<compile_context>
chip_gen: v7x
topology: tpu7x:2x2x1
jax: 0.10.0
libtpu: 0.0.40
codegen_flags: <defaults>
</compile_context>

<pallas_src>
import functools

import jax
import jax.numpy as jnp
from jax import lax
from jax.experimental import pallas as pl
from jax.experimental.pallas import tpu as pltpu

EPS = 1e-5
MM_DTYPE = jnp.bfloat16              # MXU-native matmul / activation dtype
VMEM_LIMIT = 48 * 1024 * 1024        # explicit scoped-VMEM limit
VMEM_BUDGET = 40 * 1024 * 1024       # tile-picking budget (v7x-safe headroom)


def _round_up(x, m):
    return ((x + m - 1) // m) * m


def _pick_m_tile(M):
    """M tile: multiple of 16, <=512, and (when possible) >=2 tiles so the
    leading 'parallel' grid axis shards across both v7x TensorCores."""
    m_al = _round_up(M, 16)
    if m_al <= 16:
        return 16
    tm = _round_up(max(m_al // 2, 16), 16)
    return min(tm, 512)


def _pick_k_tile(K_pad, tm, Cn):
    """Largest K tile (multiple of 128, dividing K_pad) that keeps the
    double-buffered cols block + resident weight + f32 out under budget.
    Prefer tk == K_pad so the K grid axis (and accumulator RMW) disappears."""
    fixed = (2 * K_pad * Cn * 2      # resident weight (counted x2, conservative)
             + 2 * tm * Cn * 4       # f32 output block
             + 2 * 8 * Cn * 4        # stats block
             + (2 << 20))            # slack
    per_k = 2 * tm * 2               # bytes per K column of double-buffered bf16 cols
    avail = max(VMEM_BUDGET - fixed, per_k * 128)
    tk_cap = max(128, (avail // per_k) // 128 * 128)
    if tk_cap >= K_pad:
        return K_pad
    best = 128
    t = 128
    while t <= min(K_pad, tk_cap):
        if K_pad % t == 0:
            best = t
        t += 128
    return best


# ---------------------------------------------------------------------------
# Kernel 1: tiled im2col matmul.  The weight block is VMEM-resident (constant
# block index); the f32 output block is resident across the K axis and is
# accumulated into directly.  At the last K step, per-M-tile per-channel
# sum / sumsq partials are emitted for the global BatchNorm statistics.
# grid = (MT, KT): MT "parallel" (megacore), KT "arbitrary" (reduction).
# ---------------------------------------------------------------------------
def _conv_mm_kernel(x_ref, w_ref, y_ref, st_ref, *, tk, n_k):
    if n_k == 1:
        y_ref[...] = jnp.dot(x_ref[...], w_ref[...],
                             preferred_element_type=jnp.float32)
    else:
        ki = pl.program_id(1)

        @pl.when(ki == 0)
        def _():
            y_ref[...] = jnp.zeros_like(y_ref)

        k0 = pl.multiple_of(ki * tk, 128)
        y_ref[...] += jnp.dot(x_ref[...], w_ref[pl.ds(k0, tk), :],
                              preferred_element_type=jnp.float32)

    def _stats():
        y = y_ref[...]                                     # (tm, Cn) f32, resident
        s = jnp.sum(y, axis=0, keepdims=True)              # (1, Cn)
        ss = jnp.sum(y * y, axis=0, keepdims=True)         # (1, Cn)
        row = lax.broadcasted_iota(jnp.int32, st_ref.shape, 0)
        st_ref[...] = (jnp.where(row == 0, s, 0.0) +
                       jnp.where(row == 1, ss, 0.0))       # rows 0/1 = sum/sumsq

    if n_k == 1:
        _stats()
    else:
        pl.when(pl.program_id(1) == n_k - 1)(_stats)


def _conv_matmul(cols, wk, *, tm, tk):
    M_pad, K_pad = cols.shape
    Cn = wk.shape[1]
    MT = M_pad // tm
    KT = K_pad // tk

    kern = functools.partial(_conv_mm_kernel, tk=tk, n_k=KT)
    y, stats = pl.pallas_call(
        kern,
        out_shape=(jax.ShapeDtypeStruct((M_pad, Cn), jnp.float32),
                   jax.ShapeDtypeStruct((MT * 8, Cn), jnp.float32)),
        grid_spec=pltpu.PrefetchScalarGridSpec(
            num_scalar_prefetch=0,
            grid=(MT, KT),
            in_specs=[
                pl.BlockSpec((tm, tk), lambda mi, ki: (mi, ki)),
                # Weight: constant block index -> copied once, VMEM-resident.
                pl.BlockSpec((K_pad, Cn), lambda mi, ki: (0, 0)),
            ],
            out_specs=(pl.BlockSpec((tm, Cn), lambda mi, ki: (mi, 0)),
                       pl.BlockSpec((8, Cn), lambda mi, ki: (mi, 0))),
        ),
        compiler_params=pltpu.CompilerParams(
            dimension_semantics=("parallel", "arbitrary"),
            vmem_limit_bytes=VMEM_LIMIT),
    )(cols, wk)
    return y, stats


# ---------------------------------------------------------------------------
# Kernel 2: tiled, lane-dense BatchNorm(scale/shift) + ReLU apply.
# Output dtype is bf16 for inner layers (feeds the next bf16 matmul), f32 last.
# ---------------------------------------------------------------------------
def _bn_relu_kernel(y_ref, sc_ref, sh_ref, o_ref):
    o_ref[...] = jnp.maximum(y_ref[...] * sc_ref[...] + sh_ref[...],
                             0.0).astype(o_ref.dtype)


def _bn_relu_apply(y, scale, shift, *, tm, out_dtype):
    M_pad, Cn = y.shape
    MT = M_pad // tm
    return pl.pallas_call(
        _bn_relu_kernel,
        out_shape=jax.ShapeDtypeStruct((M_pad, Cn), out_dtype),
        grid_spec=pltpu.PrefetchScalarGridSpec(
            num_scalar_prefetch=0,
            grid=(MT,),
            in_specs=[pl.BlockSpec((tm, Cn), lambda mi: (mi, 0)),
                      pl.BlockSpec((1, Cn), lambda mi: (0, 0)),
                      pl.BlockSpec((1, Cn), lambda mi: (0, 0))],
            out_specs=pl.BlockSpec((tm, Cn), lambda mi: (mi, 0)),
        ),
        compiler_params=pltpu.CompilerParams(
            dimension_semantics=("parallel",),
            vmem_limit_bytes=VMEM_LIMIT),
    )(y, scale, shift)


# ---------------------------------------------------------------------------
# im2col for a 3x3 / stride 1 / pad 1 conv: (N,H,W,C) -> (N*H*W, 9*C).
# Built directly in MM_DTYPE (layout glue done once per layer in the wrapper).
# ---------------------------------------------------------------------------
def _im2col_3x3(x):
    N, H, W, C = x.shape
    xp = jnp.pad(x, ((0, 0), (1, 1), (1, 1), (0, 0)))
    taps = [xp[:, dy:dy + H, dx:dx + W, :] for dy in range(3) for dx in range(3)]
    cols = jnp.concatenate(taps, axis=-1)                  # (N, H, W, 9*C)
    return cols.reshape(N * H * W, 9 * C)


# ---------------------------------------------------------------------------
# One fused layer: conv3x3(no bias, over channel-concat of `inputs`) + BN + ReLU
# ---------------------------------------------------------------------------
def conv3x3_bn_relu(inputs, w, gamma, beta, out_dtype=jnp.float32):
    """inputs: list of NHWC tensors (concatenated along channels),
    w: (3,3,Cin_total,Cout) HWIO.  Returns NHWC in `out_dtype`."""
    N, H, W, _ = inputs[0].shape
    M = N * H * W
    Cout = w.shape[-1]
    Cn = _round_up(Cout, 128)

    tm = _pick_m_tile(M)
    M_pad = _round_up(M, tm)

    cins = [t.shape[-1] for t in inputs]
    assert sum(cins) == w.shape[2], (cins, w.shape)

    # Fused torch.cat: per-input bf16 im2col slabs and weight slices are
    # concatenated along K -> one matmul, no HBM concat of feature maps and
    # no chained pallas_calls through an (M, Cout) intermediate.
    slabs, wslices = [], []
    off = 0
    for xin, ci in zip(inputs, cins):
        slabs.append(_im2col_3x3(xin.astype(MM_DTYPE)))            # (M, 9*ci) bf16
        wslices.append(w[:, :, off:off + ci, :].reshape(9 * ci, Cout))
        off += ci
    cols = slabs[0] if len(slabs) == 1 else jnp.concatenate(slabs, axis=1)
    wk = wslices[0] if len(wslices) == 1 else jnp.concatenate(wslices, axis=0)

    K = cols.shape[1]
    K_pad = _round_up(K, 128)
    tk = _pick_k_tile(K_pad, tm, Cn)
    cols = jnp.pad(cols, ((0, M_pad - M), (0, K_pad - K)))          # bf16 already
    wk = jnp.pad(wk, ((0, K_pad - K), (0, Cn - Cout))).astype(MM_DTYPE)

    y, stats = _conv_matmul(cols, wk, tm=tm, tk=tk)

    # Finalize *global* per-channel batch statistics from the per-M-tile
    # sum / sumsq partials (tiny reduction + rsqrt on C-length vectors).
    st = stats.reshape(-1, 8, Cn)
    s_tot = jnp.sum(st[:, 0, :], axis=0)
    ss_tot = jnp.sum(st[:, 1, :], axis=0)
    mean = s_tot / M                                         # true M (padded rows are 0)
    var = jnp.maximum(ss_tot / M - mean * mean, 0.0)         # biased var (train-mode BN)
    gamma_p = jnp.pad(gamma.astype(jnp.float32), (0, Cn - Cout))
    beta_p = jnp.pad(beta.astype(jnp.float32), (0, Cn - Cout))
    scale = gamma_p * lax.rsqrt(var + EPS)
    shift = beta_p - mean * scale

    out = _bn_relu_apply(y, scale.reshape(1, Cn), shift.reshape(1, Cn),
                         tm=tm, out_dtype=out_dtype)
    return out[:M, :Cout].reshape(N, H, W, Cout)


# ---------------------------------------------------------------------------
# Parameters (PyTorch defaults: conv kaiming-uniform-ish, bias=False,
# BN gamma=1 / beta=0) and the DecoderBlock forward.
# ---------------------------------------------------------------------------
def _init_conv3x3(key, cin, cout):
    bound = 1.0 / jnp.sqrt(jnp.asarray(cin * 9, jnp.float32))
    return jax.random.uniform(key, (3, 3, cin, cout), jnp.float32, -bound, bound)


def init_decoder_block_params(key, in_channels=512, out_channels=256):
    mid = out_channels // 2
    k1, k2, k3 = jax.random.split(key, 3)
    return {
        "w1": _init_conv3x3(k1, in_channels, mid),
        "g1": jnp.ones((mid,), jnp.float32), "b1": jnp.zeros((mid,), jnp.float32),
        "w2": _init_conv3x3(k2, mid, mid),
        "g2": jnp.ones((mid,), jnp.float32), "b2": jnp.zeros((mid,), jnp.float32),
        "w3": _init_conv3x3(k3, mid, out_channels),
        "g3": jnp.ones((out_channels,), jnp.float32),
        "b3": jnp.zeros((out_channels,), jnp.float32),
    }


def decoder_block_forward(params, xs):
    """xs: list/tuple of NCHW tensors (as in `torch.cat(x, 1)`); returns NCHW f32."""
    if not isinstance(xs, (list, tuple)):
        xs = [xs]
    xs_nhwc = [jnp.transpose(x, (0, 2, 3, 1)) for x in xs]
    # Inner activations stay in bf16 (their only consumer is the next bf16 matmul).
    h = conv3x3_bn_relu(xs_nhwc, params["w1"], params["g1"], params["b1"],
                        out_dtype=MM_DTYPE)
    h = conv3x3_bn_relu([h], params["w2"], params["g2"], params["b2"],
                        out_dtype=MM_DTYPE)
    h = conv3x3_bn_relu([h], params["w3"], params["g3"], params["b3"],
                        out_dtype=jnp.float32)
    return jnp.transpose(h, (0, 3, 1, 2))


if __name__ == "__main__":
    key = jax.random.PRNGKey(0)
    kp, ka, kb = jax.random.split(key, 3)
    in_channels, out_channels = 512, 256
    params = init_decoder_block_params(kp, in_channels, out_channels)
    # DecoderBlock forward concatenates a list of inputs along channels:
    xa = jax.random.normal(ka, (2, 256, 16, 16), jnp.float32)   # NCHW
    xb = jax.random.normal(kb, (2, 256, 16, 16), jnp.float32)   # NCHW

    fwd = jax.jit(lambda p, a, b: decoder_block_forward(p, [a, b]))
    out = jax.block_until_ready(fwd(params, xa, xb))
    assert out.shape == (2, out_channels, 16, 16), out.shape
    assert bool(jnp.all(jnp.isfinite(out)))
    print("KERNEL_OK")
</pallas_src>

<mosaic_0001>
module attributes {stable_mosaic.version = 11 : i64} {
  func.func @_conv_mm_kernel(%arg0: i32, %arg1: i32, %arg2: memref<256x4608xbf16, #tpu.memory_space<vmem>>, %arg3: memref<4608x128xbf16, #tpu.memory_space<vmem>>, %arg4: memref<256x128xf32, #tpu.memory_space<vmem>>, %arg5: memref<8x128xf32, #tpu.memory_space<vmem>>) attributes {dimension_semantics = [#tpu.dimension_semantics<parallel>, #tpu.dimension_semantics<arbitrary>], iteration_bounds = array<i64: 2, 1>, scalar_prefetch = 0 : i64, scratch_operands = 0 : i64, tpu.core_type = #tpu.core_type<tc>, window_params = [{transform_indices = @transform_0, window_bounds = array<i64: 256, 4608>}, {pipeline_mode = #tpu.pipeline_mode<synchronous>, transform_indices = @transform_1, window_bounds = array<i64: 4608, 128>}, {transform_indices = @transform_2, window_bounds = array<i64: 256, 128>}, {transform_indices = @transform_3, window_bounds = array<i64: 8, 128>}]} {
    %c0 = arith.constant 0 : index
    %c0_0 = arith.constant 0 : index
    %0 = vector.load %arg2[%c0, %c0_0] : memref<256x4608xbf16, #tpu.memory_space<vmem>>, vector<256x4608xbf16>
    %c0_1 = arith.constant 0 : index
    %c0_2 = arith.constant 0 : index
    %1 = vector.load %arg3[%c0_1, %c0_2] : memref<4608x128xbf16, #tpu.memory_space<vmem>>, vector<4608x128xbf16>
    %cst = arith.constant dense<0.000000e+00> : vector<256x128xf32>
    %2 = tpu.matmul %0, %1, %cst {dimension_numbers = #tpu.dot_dimension_numbers<[1], [0], [0], [1], [0, 0, 1, 1], [], []>} : vector<256x4608xbf16>, vector<4608x128xbf16>, vector<256x128xf32> -> vector<256x128xf32>
    %c0_3 = arith.constant 0 : index
    %c0_4 = arith.constant 0 : index
    %3 = vector.load %arg4[%c0_3, %c0_4] : memref<256x128xf32, #tpu.memory_space<vmem>>, vector<256x128xf32>
    tpu.vector_store %arg4[%c0_3, %c0_4], %2 {strides = array<i32>} : memref<256x128xf32, #tpu.memory_space<vmem>>, vector<256x128xf32>,
    %c0_5 = arith.constant 0 : index
    %c0_6 = arith.constant 0 : index
    %4 = vector.load %arg4[%c0_5, %c0_6] : memref<256x128xf32, #tpu.memory_space<vmem>>, vector<256x128xf32>
    %cst_7 = arith.constant dense<0.000000e+00> : vector<128xf32>
    %5 = vector.multi_reduction <add>, %4, %cst_7 [0] : vector<256x128xf32> to vector<128xf32>
    %6 = vector.shape_cast %5 : vector<128xf32> to vector<1x128xf32>
    %7 = arith.mulf %4, %4 : vector<256x128xf32>
    %cst_8 = arith.constant dense<0.000000e+00> : vector<128xf32>
    %8 = vector.multi_reduction <add>, %7, %cst_8 [0] : vector<256x128xf32> to vector<128xf32>
    %9 = vector.shape_cast %8 : vector<128xf32> to vector<1x128xf32>
    %10 = tpu.iota {dimensions = array<i32: 0>} : vector<8x128xi32>
    %c0_i32 = arith.constant 0 : i32
    %11 = vector.broadcast %c0_i32 : i32 to vector<8x128xi32>
    %12 = arith.cmpi eq, %10, %11 : vector<8x128xi32>
    %cst_9 = arith.constant 0.000000e+00 : f32
    %13 = vector.shape_cast %6 : vector<1x128xf32> to vector<1x128xf32>
    %14 = vector.broadcast %13 : vector<1x128xf32> to vector<8x128xf32>
    %15 = vector.broadcast %cst_9 : f32 to vector<8x128xf32>
    %16 = arith.select %12, %14, %15 : vector<8x128xi1>, vector<8x128xf32>
    %c1_i32 = arith.constant 1 : i32
    %17 = vector.broadcast %c1_i32 : i32 to vector<8x128xi32>
    %18 = arith.cmpi eq, %10, %17 : vector<8x128xi32>
    %cst_10 = arith.constant 0.000000e+00 : f32
    %19 = vector.shape_cast %9 : vector<1x128xf32> to vector<1x128xf32>
    %20 = vector.broadcast %19 : vector<1x128xf32> to vector<8x128xf32>
    %21 = vector.broadcast %cst_10 : f32 to vector<8x128xf32>
    %22 = arith.select %18, %20, %21 : vector<8x128xi1>, vector<8x128xf32>
    %23 = arith.addf %16, %22 : vector<8x128xf32>
    %c0_11 = arith.constant 0 : index
    %c0_12 = arith.constant 0 : index
    %24 = vector.load %arg5[%c0_11, %c0_12] : memref<8x128xf32, #tpu.memory_space<vmem>>, vector<8x128xf32>
    tpu.vector_store %arg5[%c0_11, %c0_12], %23 {strides = array<i32>} : memref<8x128xf32, #tpu.memory_space<vmem>>, vector<8x128xf32>,
    return
  }
  func.func @transform_0(%arg0: i32, %arg1: i32) -> (i32, i32) {
    %c0_i32 = arith.constant 0 : i32
    return %arg0, %arg1 : i32, i32
  }
  func.func @transform_1(%arg0: i32, %arg1: i32) -> (i32, i32) {
    %c0_i32 = arith.constant 0 : i32
    %c0_i32_0 = arith.constant 0 : i32
    %c0_i32_1 = arith.constant 0 : i32
    return %c0_i32, %c0_i32_0 : i32, i32
  }
  func.func @transform_2(%arg0: i32, %arg1: i32) -> (i32, i32) {
    %c0_i32 = arith.constant 0 : i32
    %c0_i32_0 = arith.constant 0 : i32
    return %arg0, %c0_i32 : i32, i32
  }
  func.func @transform_3(%arg0: i32, %arg1: i32) -> (i32, i32) {
    %c0_i32 = arith.constant 0 : i32
    %c0_i32_0 = arith.constant 0 : i32
    return %arg0, %c0_i32 : i32, i32
  }
}

module attributes {stable_mosaic.version = 11 : i64} {
  func.func @_bn_relu_kernel(%arg0: i32, %arg1: memref<256x128xf32, #tpu.memory_space<vmem>>, %arg2: memref<1x128xf32, #tpu.memory_space<vmem>>, %arg3: memref<1x128xf32, #tpu.memory_space<vmem>>, %arg4: memref<256x128xbf16, #tpu.memory_space<vmem>>) attributes {dimension_semantics = [#tpu.dimension_semantics<parallel>], iteration_bounds = array<i64: 2>, scalar_prefetch = 0 : i64, scratch_operands = 0 : i64, tpu.core_type = #tpu.core_type<tc>, window_params = [{transform_indices = @transform_0, window_bounds = array<i64: 256, 128>}, {pipeline_mode = #tpu.pipeline_mode<synchronous>, transform_indices = @transform_1, window_bounds = array<i64: 1, 128>}, {pipeline_mode = #tpu.pipeline_mode<synchronous>, transform_indices = @transform_2, window_bounds = array<i64: 1, 128>}, {transform_indices = @transform_3, window_bounds = array<i64: 256, 128>}]} {
    %c0 = arith.constant 0 : index
    %c0_0 = arith.constant 0 : index
    %0 = vector.load %arg1[%c0, %c0_0] : memref<256x128xf32, #tpu.memory_space<vmem>>, vector<256x128xf32>
    %c0_1 = arith.constant 0 : index
    %c0_2 = arith.constant 0 : index
    %1 = vector.load %arg2[%c0_1, %c0_2] : memref<1x128xf32, #tpu.memory_space<vmem>>, vector<1x128xf32>
    %2 = vector.broadcast %1 : vector<1x128xf32> to vector<256x128xf32>
    %3 = arith.mulf %0, %2 : vector<256x128xf32>
    %c0_3 = arith.constant 0 : index
    %c0_4 = arith.constant 0 : index
    %4 = vector.load %arg3[%c0_3, %c0_4] : memref<1x128xf32, #tpu.memory_space<vmem>>, vector<1x128xf32>
    %5 = vector.broadcast %4 : vector<1x128xf32> to vector<256x128xf32>
    %6 = arith.addf %3, %5 : vector<256x128xf32>
    %cst = arith.constant 0.000000e+00 : f32
    %7 = vector.broadcast %cst : f32 to vector<256x128xf32>
    %8 = arith.maximumf %6, %7 : vector<256x128xf32>
    %9 = arith.truncf %8 : vector<256x128xf32> to vector<256x128xbf16>
    %c0_5 = arith.constant 0 : index
    %c0_6 = arith.constant 0 : index
    %10 = vector.load %arg4[%c0_5, %c0_6] : memref<256x128xbf16, #tpu.memory_space<vmem>>, vector<256x128xbf16>
    tpu.vector_store %arg4[%c0_5, %c0_6], %9 {strides = array<i32>} : memref<256x128xbf16, #tpu.memory_space<vmem>>, vector<256x128xbf16>,
    return
  }
  func.func @transform_0(%arg0: i32) -> (i32, i32) {
    %c0_i32 = arith.constant 0 : i32
    %c0_i32_0 = arith.constant 0 : i32
    return %arg0, %c0_i32 : i32, i32
  }
  func.func @transform_1(%arg0: i32) -> (i32, i32) {
    %c0_i32 = arith.constant 0 : i32
    %c0_i32_0 = arith.constant 0 : i32
    %c0_i32_1 = arith.constant 0 : i32
    return %c0_i32, %c0_i32_0 : i32, i32
  }
  func.func @transform_2(%arg0: i32) -> (i32, i32) {
    %c0_i32 = arith.constant 0 : i32
    %c0_i32_0 = arith.constant 0 : i32
    %c0_i32_1 = arith.constant 0 : i32
    return %c0_i32, %c0_i32_0 : i32, i32
  }
  func.func @transform_3(%arg0: i32) -> (i32, i32) {
    %c0_i32 = arith.constant 0 : i32
    %c0_i32_0 = arith.constant 0 : i32
    return %arg0, %c0_i32 : i32, i32
  }
}

module attributes {stable_mosaic.version = 11 : i64} {
  func.func @_conv_mm_kernel(%arg0: i32, %arg1: i32, %arg2: memref<256x1152xbf16, #tpu.memory_space<vmem>>, %arg3: memref<1152x128xbf16, #tpu.memory_space<vmem>>, %arg4: memref<256x128xf32, #tpu.memory_space<vmem>>, %arg5: memref<8x128xf32, #tpu.memory_space<vmem>>) attributes {dimension_semantics = [#tpu.dimension_semantics<parallel>, #tpu.dimension_semantics<arbitrary>], iteration_bounds = array<i64: 2, 1>, scalar_prefetch = 0 : i64, scratch_operands = 0 : i64, tpu.core_type = #tpu.core_type<tc>, window_params = [{transform_indices = @transform_0, window_bounds = array<i64: 256, 1152>}, {pipeline_mode = #tpu.pipeline_mode<synchronous>, transform_indices = @transform_1, window_bounds = array<i64: 1152, 128>}, {transform_indices = @transform_2, window_bounds = array<i64: 256, 128>}, {transform_indices = @transform_3, window_bounds = array<i64: 8, 128>}]} {
    %c0 = arith.constant 0 : index
    %c0_0 = arith.constant 0 : index
    %0 = vector.load %arg2[%c0, %c0_0] : memref<256x1152xbf16, #tpu.memory_space<vmem>>, vector<256x1152xbf16>
    %c0_1 = arith.constant 0 : index
    %c0_2 = arith.constant 0 : index
    %1 = vector.load %arg3[%c0_1, %c0_2] : memref<1152x128xbf16, #tpu.memory_space<vmem>>, vector<1152x128xbf16>
    %cst = arith.constant dense<0.000000e+00> : vector<256x128xf32>
    %2 = tpu.matmul %0, %1, %cst {dimension_numbers = #tpu.dot_dimension_numbers<[1], [0], [0], [1], [0, 0, 1, 1], [], []>} : vector<256x1152xbf16>, vector<1152x128xbf16>, vector<256x128xf32> -> vector<256x128xf32>
    %c0_3 = arith.constant 0 : index
    %c0_4 = arith.constant 0 : index
    %3 = vector.load %arg4[%c0_3, %c0_4] : memref<256x128xf32, #tpu.memory_space<vmem>>, vector<256x128xf32>
    tpu.vector_store %arg4[%c0_3, %c0_4], %2 {strides = array<i32>} : memref<256x128xf32, #tpu.memory_space<vmem>>, vector<256x128xf32>,
    %c0_5 = arith.constant 0 : index
    %c0_6 = arith.constant 0 : index
    %4 = vector.load %arg4[%c0_5, %c0_6] : memref<256x128xf32, #tpu.memory_space<vmem>>, vector<256x128xf32>
    %cst_7 = arith.constant dense<0.000000e+00> : vector<128xf32>
    %5 = vector.multi_reduction <add>, %4, %cst_7 [0] : vector<256x128xf32> to vector<128xf32>
    %6 = vector.shape_cast %5 : vector<128xf32> to vector<1x128xf32>
    %7 = arith.mulf %4, %4 : vector<256x128xf32>
    %cst_8 = arith.constant dense<0.000000e+00> : vector<128xf32>
    %8 = vector.multi_reduction <add>, %7, %cst_8 [0] : vector<256x128xf32> to vector<128xf32>
    %9 = vector.shape_cast %8 : vector<128xf32> to vector<1x128xf32>
    %10 = tpu.iota {dimensions = array<i32: 0>} : vector<8x128xi32>
    %c0_i32 = arith.constant 0 : i32
    %11 = vector.broadcast %c0_i32 : i32 to vector<8x128xi32>
    %12 = arith.cmpi eq, %10, %11 : vector<8x128xi32>
    %cst_9 = arith.constant 0.000000e+00 : f32
    %13 = vector.shape_cast %6 : vector<1x128xf32> to vector<1x128xf32>
    %14 = vector.broadcast %13 : vector<1x128xf32> to vector<8x128xf32>
    %15 = vector.broadcast %cst_9 : f32 to vector<8x128xf32>
    %16 = arith.select %12, %14, %15 : vector<8x128xi1>, vector<8x128xf32>
    %c1_i32 = arith.constant 1 : i32
    %17 = vector.broadcast %c1_i32 : i32 to vector<8x128xi32>
    %18 = arith.cmpi eq, %10, %17 : vector<8x128xi32>
    %cst_10 = arith.constant 0.000000e+00 : f32
    %19 = vector.shape_cast %9 : vector<1x128xf32> to vector<1x128xf32>
    %20 = vector.broadcast %19 : vector<1x128xf32> to vector<8x128xf32>
    %21 = vector.broadcast %cst_10 : f32 to vector<8x128xf32>
    %22 = arith.select %18, %20, %21 : vector<8x128xi1>, vector<8x128xf32>
    %23 = arith.addf %16, %22 : vector<8x128xf32>
    %c0_11 = arith.constant 0 : index
    %c0_12 = arith.constant 0 : index
    %24 = vector.load %arg5[%c0_11, %c0_12] : memref<8x128xf32, #tpu.memory_space<vmem>>, vector<8x128xf32>
    tpu.vector_store %arg5[%c0_11, %c0_12], %23 {strides = array<i32>} : memref<8x128xf32, #tpu.memory_space<vmem>>, vector<8x128xf32>,
    return
  }
  func.func @transform_0(%arg0: i32, %arg1: i32) -> (i32, i32) {
    %c0_i32 = arith.constant 0 : i32
    return %arg0, %arg1 : i32, i32
  }
  func.func @transform_1(%arg0: i32, %arg1: i32) -> (i32, i32) {
    %c0_i32 = arith.constant 0 : i32
    %c0_i32_0 = arith.constant 0 : i32
    %c0_i32_1 = arith.constant 0 : i32
    return %c0_i32, %c0_i32_0 : i32, i32
  }
  func.func @transform_2(%arg0: i32, %arg1: i32) -> (i32, i32) {
    %c0_i32 = arith.constant 0 : i32
    %c0_i32_0 = arith.constant 0 : i32
    return %arg0, %c0_i32 : i32, i32
  }
  func.func @transform_3(%arg0: i32, %arg1: i32) -> (i32, i32) {
    %c0_i32 = arith.constant 0 : i32
    %c0_i32_0 = arith.constant 0 : i32
    return %arg0, %c0_i32 : i32, i32
  }
}

module attributes {stable_mosaic.version = 11 : i64} {
  func.func @_conv_mm_kernel(%arg0: i32, %arg1: i32, %arg2: memref<256x1152xbf16, #tpu.memory_space<vmem>>, %arg3: memref<1152x256xbf16, #tpu.memory_space<vmem>>, %arg4: memref<256x256xf32, #tpu.memory_space<vmem>>, %arg5: memref<8x256xf32, #tpu.memory_space<vmem>>) attributes {dimension_semantics = [#tpu.dimension_semantics<parallel>, #tpu.dimension_semantics<arbitrary>], iteration_bounds = array<i64: 2, 1>, scalar_prefetch = 0 : i64, scratch_operands = 0 : i64, tpu.core_type = #tpu.core_type<tc>, window_params = [{transform_indices = @transform_0, window_bounds = array<i64: 256, 1152>}, {pipeline_mode = #tpu.pipeline_mode<synchronous>, transform_indices = @transform_1, window_bounds = array<i64: 1152, 256>}, {transform_indices = @transform_2, window_bounds = array<i64: 256, 256>}, {transform_indices = @transform_3, window_bounds = array<i64: 8, 256>}]} {
    %c0 = arith.constant 0 : index
    %c0_0 = arith.constant 0 : index
    %0 = vector.load %arg2[%c0, %c0_0] : memref<256x1152xbf16, #tpu.memory_space<vmem>>, vector<256x1152xbf16>
    %c0_1 = arith.constant 0 : index
    %c0_2 = arith.constant 0 : index
    %1 = vector.load %arg3[%c0_1, %c0_2] : memref<1152x256xbf16, #tpu.memory_space<vmem>>, vector<1152x256xbf16>
    %cst = arith.constant dense<0.000000e+00> : vector<256x256xf32>
    %2 = tpu.matmul %0, %1, %cst {dimension_numbers = #tpu.dot_dimension_numbers<[1], [0], [0], [1], [0, 0, 1, 1], [], []>} : vector<256x1152xbf16>, vector<1152x256xbf16>, vector<256x256xf32> -> vector<256x256xf32>
    %c0_3 = arith.constant 0 : index
    %c0_4 = arith.constant 0 : index
    %3 = vector.load %arg4[%c0_3, %c0_4] : memref<256x256xf32, #tpu.memory_space<vmem>>, vector<256x256xf32>
    tpu.vector_store %arg4[%c0_3, %c0_4], %2 {strides = array<i32>} : memref<256x256xf32, #tpu.memory_space<vmem>>, vector<256x256xf32>,
    %c0_5 = arith.constant 0 : index
    %c0_6 = arith.constant 0 : index
    %4 = vector.load %arg4[%c0_5, %c0_6] : memref<256x256xf32, #tpu.memory_space<vmem>>, vector<256x256xf32>
    %cst_7 = arith.constant dense<0.000000e+00> : vector<256xf32>
    %5 = vector.multi_reduction <add>, %4, %cst_7 [0] : vector<256x256xf32> to vector<256xf32>
    %6 = vector.shape_cast %5 : vector<256xf32> to vector<1x256xf32>
    %7 = arith.mulf %4, %4 : vector<256x256xf32>
    %cst_8 = arith.constant dense<0.000000e+00> : vector<256xf32>
    %8 = vector.multi_reduction <add>, %7, %cst_8 [0] : vector<256x256xf32> to vector<256xf32>
    %9 = vector.shape_cast %8 : vector<256xf32> to vector<1x256xf32>
    %10 = tpu.iota {dimensions = array<i32: 0>} : vector<8x256xi32>
    %c0_i32 = arith.constant 0 : i32
    %11 = vector.broadcast %c0_i32 : i32 to vector<8x256xi32>
    %12 = arith.cmpi eq, %10, %11 : vector<8x256xi32>
    %cst_9 = arith.constant 0.000000e+00 : f32
    %13 = vector.shape_cast %6 : vector<1x256xf32> to vector<1x256xf32>
    %14 = vector.broadcast %13 : vector<1x256xf32> to vector<8x256xf32>
    %15 = vector.broadcast %cst_9 : f32 to vector<8x256xf32>
    %16 = arith.select %12, %14, %15 : vector<8x256xi1>, vector<8x256xf32>
    %c1_i32 = arith.constant 1 : i32
    %17 = vector.broadcast %c1_i32 : i32 to vector<8x256xi32>
    %18 = arith.cmpi eq, %10, %17 : vector<8x256xi32>
    %cst_10 = arith.constant 0.000000e+00 : f32
    %19 = vector.shape_cast %9 : vector<1x256xf32> to vector<1x256xf32>
    %20 = vector.broadcast %19 : vector<1x256xf32> to vector<8x256xf32>
    %21 = vector.broadcast %cst_10 : f32 to vector<8x256xf32>
    %22 = arith.select %18, %20, %21 : vector<8x256xi1>, vector<8x256xf32>
    %23 = arith.addf %16, %22 : vector<8x256xf32>
    %c0_11 = arith.constant 0 : index
    %c0_12 = arith.constant 0 : index
    %24 = vector.load %arg5[%c0_11, %c0_12] : memref<8x256xf32, #tpu.memory_space<vmem>>, vector<8x256xf32>
    tpu.vector_store %arg5[%c0_11, %c0_12], %23 {strides = array<i32>} : memref<8x256xf32, #tpu.memory_space<vmem>>, vector<8x256xf32>,
    return
  }
  func.func @transform_0(%arg0: i32, %arg1: i32) -> (i32, i32) {
    %c0_i32 = arith.constant 0 : i32
    return %arg0, %arg1 : i32, i32
  }
  func.func @transform_1(%arg0: i32, %arg1: i32) -> (i32, i32) {
    %c0_i32 = arith.constant 0 : i32
    %c0_i32_0 = arith.constant 0 : i32
    %c0_i32_1 = arith.constant 0 : i32
    return %c0_i32, %c0_i32_0 : i32, i32
  }
  func.func @transform_2(%arg0: i32, %arg1: i32) -> (i32, i32) {
    %c0_i32 = arith.constant 0 : i32
    %c0_i32_0 = arith.constant 0 : i32
    return %arg0, %c0_i32 : i32, i32
  }
  func.func @transform_3(%arg0: i32, %arg1: i32) -> (i32, i32) {
    %c0_i32 = arith.constant 0 : i32
    %c0_i32_0 = arith.constant 0 : i32
    return %arg0, %c0_i32 : i32, i32
  }
}

module attributes {stable_mosaic.version = 11 : i64} {
  func.func @_bn_relu_kernel(%arg0: i32, %arg1: memref<256x256xf32, #tpu.memory_space<vmem>>, %arg2: memref<1x256xf32, #tpu.memory_space<vmem>>, %arg3: memref<1x256xf32, #tpu.memory_space<vmem>>, %arg4: memref<256x256xf32, #tpu.memory_space<vmem>>) attributes {dimension_semantics = [#tpu.dimension_semantics<parallel>], iteration_bounds = array<i64: 2>, scalar_prefetch = 0 : i64, scratch_operands = 0 : i64, tpu.core_type = #tpu.core_type<tc>, window_params = [{transform_indices = @transform_0, window_bounds = array<i64: 256, 256>}, {pipeline_mode = #tpu.pipeline_mode<synchronous>, transform_indices = @transform_1, window_bounds = array<i64: 1, 256>}, {pipeline_mode = #tpu.pipeline_mode<synchronous>, transform_indices = @transform_2, window_bounds = array<i64: 1, 256>}, {transform_indices = @transform_3, window_bounds = array<i64: 256, 256>}]} {
    %c0 = arith.constant 0 : index
    %c0_0 = arith.constant 0 : index
    %0 = vector.load %arg1[%c0, %c0_0] : memref<256x256xf32, #tpu.memory_space<vmem>>, vector<256x256xf32>
    %c0_1 = arith.constant 0 : index
    %c0_2 = arith.constant 0 : index
    %1 = vector.load %arg2[%c0_1, %c0_2] : memref<1x256xf32, #tpu.memory_space<vmem>>, vector<1x256xf32>
    %2 = vector.broadcast %1 : vector<1x256xf32> to vector<256x256xf32>
    %3 = arith.mulf %0, %2 : vector<256x256xf32>
    %c0_3 = arith.constant 0 : index
    %c0_4 = arith.constant 0 : index
    %4 = vector.load %arg3[%c0_3, %c0_4] : memref<1x256xf32, #tpu.memory_space<vmem>>, vector<1x256xf32>
    %5 = vector.broadcast %4 : vector<1x256xf32> to vector<256x256xf32>
    %6 = arith.addf %3, %5 : vector<256x256xf32>
    %cst = arith.constant 0.000000e+00 : f32
    %7 = vector.broadcast %cst : f32 to vector<256x256xf32>
    %8 = arith.maximumf %6, %7 : vector<256x256xf32>
    %c0_5 = arith.constant 0 : index
    %c0_6 = arith.constant 0 : index
    %9 = vector.load %arg4[%c0_5, %c0_6] : memref<256x256xf32, #tpu.memory_space<vmem>>, vector<256x256xf32>
    tpu.vector_store %arg4[%c0_5, %c0_6], %8 {strides = array<i32>} : memref<256x256xf32, #tpu.memory_space<vmem>>, vector<256x256xf32>,
    return
  }
  func.func @transform_0(%arg0: i32) -> (i32, i32) {
    %c0_i32 = arith.constant 0 : i32
    %c0_i32_0 = arith.constant 0 : i32
    return %arg0, %c0_i32 : i32, i32
  }
  func.func @transform_1(%arg0: i32) -> (i32, i32) {
    %c0_i32 = arith.constant 0 : i32
    %c0_i32_0 = arith.constant 0 : i32
    %c0_i32_1 = arith.constant 0 : i32
    return %c0_i32, %c0_i32_0 : i32, i32
  }
  func.func @transform_2(%arg0: i32) -> (i32, i32) {
    %c0_i32 = arith.constant 0 : i32
    %c0_i32_0 = arith.constant 0 : i32
    %c0_i32_1 = arith.constant 0 : i32
    return %c0_i32, %c0_i32_0 : i32, i32
  }
  func.func @transform_3(%arg0: i32) -> (i32, i32) {
    %c0_i32 = arith.constant 0 : i32
    %c0_i32_0 = arith.constant 0 : i32
    return %arg0, %c0_i32 : i32, i32
  }
}

</mosaic_0001>

<bundles_post_ra>
// kernel: _lambda_.7
= control target key start
LH: loop header
LB: loop body
LE: loop exit
PB: predicated region body
PF: predicated region fallthrough
CT: control target
= control target key end

     0   :  { %s740_s12 = smov 0   ;;  %s887_s0 = inlined_call_operand.vmem [shape: f32[512,128], index: 0, kind: input, shape index: {}]   ;;  %s888_s1 = inlined_call_operand.vmem [shape: f32[1,128], index: 1, kind: input, shape index: {}]   ;;  %s889_s2 = inlined_call_operand.vmem [shape: f32[1,128], index: 2, kind: input, shape index: {}]   ;;  %s890_s3 = inlined_call_operand.vmem [shape: bf16[512,128], index: 3, kind: output, shape index: {}]  }
   0x1 LB: > { %s532_s13 = sadd.s32 4294967295, %s718_s12   ;;  %p536_p0 = scmp.ge.s32.totalorder %s718_s12, 1  ;;  %s718_s12 = sphi %s740_s12, %s13_s12  }
   0x2   : > { %p138_p1 = scmp.lt.s32.totalorder %s718_s12, 3 }
   0x4   : > { %p139_p2 = pnand %p536_p0, %p138_p1 }
   0x5   : > { %s537_s14 = sshll.u32 (!%p139_p2), %s532_s13, 5  ;;  %v754_v0 = vld [vmem:[%s888_s1] ss:$0 sm:$0xff] (!%p139_p2) }
   0x6   : > { %142 = sbr.rel (%p139_p2) target bundleno = 51 (0x33), region = 32  ;;  %p163_p3 = scmp.lt.s32.totalorder (!%p139_p2), %s537_s14, 63  ;;  %v764_v1 = vld [vmem:[%s889_s2] ss:$0 sm:$0xff] (!%p139_p2) }
   0xd   : > { %s892_s14 = smov (!%p163_p3, %s537_s14), 63 }
   0xe   : > { %s538_s15 = sshll.u32 %s892_s14, 3  ;;  %s540_s23 = sshll.u32 %s892_s14, 2 }
   0xf   : > { %s759_s20 = scalar_lea.vmem %s887_s0, %s538_s15  ;;  %s796_s26 = scalar_lea.vmem %s890_s3, %s540_s23 }
  0x10   : > { %v174_v2 = vld [vmem:[%s759_s20] sm:$0xff]  ;;  %v175_v3 = vld [vmem:[%s759_s20 + $0x8] sm:$0xff]  ;;  %v176_v4 = vld [vmem:[%s759_s20 + $0x10] sm:$0xff] }
  0x11   : > { %v213_v5 = vmul.f32 %v754_v0, %v174_v2  ;;  %v214_v6 = vmul.f32 %v754_v0, %v175_v3  ;;  %v177_v7 = vld [vmem:[%s759_s20 + $0x18] sm:$0xff]  ;;  %v215_v8 = vmul.f32 %v754_v0, %v176_v4  ;;  %v178_v9 = vld [vmem:[%s759_s20 + $0x20] sm:$0xff]  ;;  %v179_v10 = vld [vmem:[%s759_s20 + $0x28] sm:$0xff] }
  0x12   : > { %v216_v11 = vmul.f32 %v754_v0, %v177_v7  ;;  %v217_v12 = vmul.f32 %v754_v0, %v178_v9  ;;  %v218_v13 = vmul.f32 %v754_v0, %v179_v10  ;;  %v180_v14 = vld [vmem:[%s759_s20 + $0x30] sm:$0xff]  ;;  %v181_v15 = vld [vmem:[%s759_s20 + $0x38] sm:$0xff]  ;;  %v182_v24 = vld [vmem:[%s759_s20 + $0x40] sm:$0xff] }
  0x13   : > { %v252_v16 = vadd.f32 %v764_v1, %v213_v5  ;;  %v253_v17 = vadd.f32 %v764_v1, %v214_v6  ;;  %v254_v18 = vadd.f32 %v764_v1, %v215_v8  ;;  %v219_v19 = vmul.f32 %v754_v0, %v180_v14  ;;  %v183_v25 = vld [vmem:[%s759_s20 + $0x48] sm:$0xff]  ;;  %v184_v30 = vld [vmem:[%s759_s20 + $0x50] sm:$0xff]  ;;  %v185_v35 = vld [vmem:[%s759_s20 + $0x58] sm:$0xff] }
  0x14   : > { %v255_v20 = vadd.f32 %v764_v1, %v216_v11  ;;  %v256_v21 = vadd.f32 %v764_v1, %v217_v12  ;;  %v257_v22 = vadd.f32 %v764_v1, %v218_v13  ;;  %v220_v23 = vmul.f32 %v754_v0, %v181_v15  ;;  %v186_v36 = vld [vmem:[%s759_s20 + $0x60] sm:$0xff]  ;;  %v187_v41 = vld [vmem:[%s759_s20 + $0x68] sm:$0xff]  ;;  %v188_v42 = vld [vmem:[%s759_s20 + $0x70] sm:$0xff] }
  0x15   : > { %v284_v26 = vmax.f32 %v252_v16, 0.0  ;;  %v285_v27 = vmax.f32 %v253_v17, 0.0  ;;  %v286_v28 = vmax.f32 %v254_v18, 0.0  ;;  %v258_v29 = vadd.f32 %v764_v1, %v219_v19  ;;  %v189_v51 = vld [vmem:[%s759_s20 + $0x78] sm:$0xff]  ;;  %v190_v56 = vld [vmem:[%s759_s20 + $0x80] sm:$0xff]  ;;  %v191_v61 = vld [vmem:[%s759_s20 + $0x88] sm:$0xff] }
  0x16   : > { %v287_v31 = vmax.f32 %v255_v20, 0.0  ;;  %v288_v32 = vmax.f32 %v256_v21, 0.0  ;;  %v289_v33 = vmax.f32 %v257_v22, 0.0  ;;  %v259_v34 = vadd.f32 %v764_v1, %v220_v23  ;;  %v192_v4 = vld [vmem:[%s759_s20 + $0x90] sm:$0xff]  ;;  %v193_v5 = vld [vmem:[%s759_s20 + $0x98] sm:$0xff]  ;;  %v194_v10 = vld [vmem:[%s759_s20 + $0xa0] sm:$0xff] }
  0x17   : > { %v612_v37 = vpack.c.bf16 %v285_v27, %v284_v26  ;;  %v290_v38 = vmax.f32 %v258_v29, 0.0  ;;  %v221_v39 = vmul.f32 %v754_v0, %v182_v24  ;;  %v222_v40 = vmul.f32 %v754_v0, %v183_v25  ;;  %v195_v15 = vld [vmem:[%s759_s20 + $0xa8] sm:$0xff]  ;;  %v196_v20 = vld [vmem:[%s759_s20 + $0xb0] sm:$0xff]  ;;  %v197_v25 = vld [vmem:[%s759_s20 + $0xb8] sm:$0xff] }
  0x18   : > { %v617_v43 = vpack.c.bf16 %v287_v31, %v286_v28  ;;  %v622_v44 = vpack.c.bf16 %v289_v33, %v288_v32  ;;  %v291_v45 = vmax.f32 %v259_v34, 0.0  ;;  %v223_v46 = vmul.f32 %v754_v0, %v184_v30  ;;  %v198_v30 = vld [vmem:[%s759_s20 + $0xc0] sm:$0xff] }
  0x19   : > { %613 = vst [vmem:[%s796_s26] sm:$0xff] %v612_v37   ;;  %v260_v47 = vadd.f32 %v764_v1, %v221_v39  ;;  %v261_v48 = vadd.f32 %v764_v1, %v222_v40  ;;  %v224_v49 = vmul.f32 %v754_v0, %v185_v35  ;;  %v225_v50 = vmul.f32 %v754_v0, %v186_v36  ;;  %v199_v35 = vld [vmem:[%s759_s20 + $0xc8] sm:$0xff]  ;;  %v200_v40 = vld [vmem:[%s759_s20 + $0xd0] sm:$0xff] }
  0x1a   : > { %689 = vst [vmem:[%s796_s26 + $0x8] sm:$0xff] %v617_v43   ;;  %690 = vst [vmem:[%s796_s26 + $0x10] sm:$0xff] %v622_v44   ;;  %v627_v52 = vpack.c.bf16 %v291_v45, %v290_v38  ;;  %v262_v53 = vadd.f32 %v764_v1, %v223_v46  ;;  %v226_v54 = vmul.f32 %v754_v0, %v187_v41  ;;  %v201_v41 = vld [vmem:[%s759_s20 + $0xd8] sm:$0xff]  ;;  %v202_v46 = vld [vmem:[%s759_s20 + $0xe0] sm:$0xff] }
  0x1b   : > { %v227_v55 = vmul.f32 %v754_v0, %v188_v42  ;;  %v292_v57 = vmax.f32 %v260_v47, 0.0  ;;  %v293_v58 = vmax.f32 %v261_v48, 0.0  ;;  %v263_v59 = vadd.f32 %v764_v1, %v224_v49 }
  0x1c   : > { %v264_v60 = vadd.f32 %v764_v1, %v225_v50  ;;  %691 = vst [vmem:[%s796_s26 + $0x18] sm:$0xff] %v627_v52   ;;  %v294_v62 = vmax.f32 %v262_v53, 0.0  ;;  %v265_v63 = vadd.f32 %v764_v1, %v226_v54  ;;  %v228_v2 = vmul.f32 %v754_v0, %v189_v51  ;;  %v203_v51 = vld [vmem:[%s759_s20 + $0xe8] sm:$0xff] }
  0x1d   : > { %v266_v3 = vadd.f32 %v764_v1, %v227_v55  ;;  %v632_v6 = vpack.c.bf16 %v293_v58, %v292_v57  ;;  %v295_v7 = vmax.f32 %v263_v59, 0.0  ;;  %v229_v9 = vmul.f32 %v754_v0, %v190_v56  ;;  %v204_v56 = vld [vmem:[%s759_s20 + $0xf0] sm:$0xff] }
  0x1e   : > { %v296_v8 = vmax.f32 %v264_v60, 0.0  ;;  %v297_v11 = vmax.f32 %v265_v63, 0.0  ;;  %v267_v12 = vadd.f32 %v764_v1, %v228_v2  ;;  %v230_v14 = vmul.f32 %v754_v0, %v191_v61  ;;  %v205_v61 = vld [vmem:[%s759_s20 + $0xf8] sm:$0xff] }
  0x1f   : > { %v298_v13 = vmax.f32 %v266_v3, 0.0  ;;  %692 = vst [vmem:[%s796_s26 + $0x20] sm:$0xff] %v632_v6   ;;  %v637_v16 = vpack.c.bf16 %v295_v7, %v294_v62  ;;  %v268_v17 = vadd.f32 %v764_v1, %v229_v9  ;;  %v231_v18 = vmul.f32 %v754_v0, %v192_v4 }
  0x20   : > { %v232_v19 = vmul.f32 %v754_v0, %v193_v5  ;;  %v642_v21 = vpack.c.bf16 %v297_v11, %v296_v8  ;;  %v299_v22 = vmax.f32 %v267_v12, 0.0  ;;  %v269_v23 = vadd.f32 %v764_v1, %v230_v14 }
  0x21   : > { %v233_v24 = vmul.f32 %v754_v0, %v194_v10  ;;  %693 = vst [vmem:[%s796_s26 + $0x28] sm:$0xff] %v637_v16   ;;  %v300_v26 = vmax.f32 %v268_v17, 0.0  ;;  %v270_v27 = vadd.f32 %v764_v1, %v231_v18  ;;  %v234_v29 = vmul.f32 %v754_v0, %v195_v15 }
  0x22   : > { %v271_v28 = vadd.f32 %v764_v1, %v232_v19  ;;  %694 = vst [vmem:[%s796_s26 + $0x30] sm:$0xff] %v642_v21   ;;  %v647_v31 = vpack.c.bf16 %v299_v22, %v298_v13  ;;  %v301_v32 = vmax.f32 %v269_v23, 0.0  ;;  %v235_v34 = vmul.f32 %v754_v0, %v196_v20 }
  0x23   : > { %v272_v33 = vadd.f32 %v764_v1, %v233_v24  ;;  %v302_v36 = vmax.f32 %v270_v27, 0.0  ;;  %v273_v38 = vadd.f32 %v764_v1, %v234_v29  ;;  %v236_v39 = vmul.f32 %v754_v0, %v197_v25 }
  0x24   : > { %v303_v37 = vmax.f32 %v271_v28, 0.0  ;;  %695 = vst [vmem:[%s796_s26 + $0x38] sm:$0xff] %v647_v31   ;;  %v652_v42 = vpack.c.bf16 %v301_v32, %v300_v26  ;;  %v274_v44 = vadd.f32 %v764_v1, %v235_v34  ;;  %v237_v45 = vmul.f32 %v754_v0, %v198_v30 }
  0x25   : > { %v304_v43 = vmax.f32 %v272_v33, 0.0  ;;  %v305_v48 = vmax.f32 %v273_v38, 0.0  ;;  %v275_v49 = vadd.f32 %v764_v1, %v236_v39  ;;  %v238_v50 = vmul.f32 %v754_v0, %v199_v35 }
  0x26   : > { %v657_v47 = vpack.c.bf16 %v303_v37, %v302_v36  ;;  %696 = vst [vmem:[%s796_s26 + $0x40] sm:$0xff] %v652_v42   ;;  %v306_v52 = vmax.f32 %v274_v44, 0.0  ;;  %v276_v53 = vadd.f32 %v764_v1, %v237_v45  ;;  %v239_v54 = vmul.f32 %v754_v0, %v200_v40 }
  0x27   : > { %v240_v55 = vmul.f32 %v754_v0, %v201_v41  ;;  %v662_v57 = vpack.c.bf16 %v305_v48, %v304_v43  ;;  %v307_v58 = vmax.f32 %v275_v49, 0.0  ;;  %v277_v59 = vadd.f32 %v764_v1, %v238_v50 }
  0x28   : > { %697 = vst [vmem:[%s796_s26 + $0x48] sm:$0xff] %v657_v47   ;;  %v241_v60 = vmul.f32 %v754_v0, %v202_v46  ;;  %v308_v62 = vmax.f32 %v276_v53, 0.0  ;;  %v278_v63 = vadd.f32 %v764_v1, %v239_v54  ;;  %v242_v3 = vmul.f32 %v754_v0, %v203_v51 }
  0x29   : > { %v279_v2 = vadd.f32 %v764_v1, %v240_v55  ;;  %698 = vst [vmem:[%s796_s26 + $0x50] sm:$0xff] %v662_v57   ;;  %v667_v4 = vpack.c.bf16 %v307_v58, %v306_v52  ;;  %v309_v5 = vmax.f32 %v277_v59, 0.0  ;;  %v243_v7 = vmul.f32 %v754_v0, %v204_v56 }
  0x2a   : > { %v280_v6 = vadd.f32 %v764_v1, %v241_v60  ;;  %v310_v8 = vmax.f32 %v278_v63, 0.0  ;;  %v281_v10 = vadd.f32 %v764_v1, %v242_v3  ;;  %v244_v11 = vmul.f32 %v754_v0, %v205_v61 }
  0x2b   : > { %v311_v9 = vmax.f32 %v279_v2, 0.0  ;;  %699 = vst [vmem:[%s796_s26 + $0x58] sm:$0xff] %v667_v4   ;;  %v672_v12 = vpack.c.bf16 %v309_v5, %v308_v62  ;;  %v282_v14 = vadd.f32 %v764_v1, %v243_v7 }
  0x2c   : > { %v312_v13 = vmax.f32 %v280_v6, 0.0  ;;  %v313_v16 = vmax.f32 %v281_v10, 0.0  ;;  %v283_v17 = vadd.f32 %v764_v1, %v244_v11 }
  0x2d   : > { %v677_v15 = vpack.c.bf16 %v311_v9, %v310_v8  ;;  %700 = vst [vmem:[%s796_s26 + $0x60] sm:$0xff] %v672_v12   ;;  %v314_v18 = vmax.f32 %v282_v14, 0.0 }
  0x2e   : > { %v682_v19 = vpack.c.bf16 %v313_v16, %v312_v13  ;;  %v315_v20 = vmax.f32 %v283_v17, 0.0 }
  0x2f   : > { %701 = vst [vmem:[%s796_s26 + $0x68] sm:$0xff] %v677_v15  }
  0x30   : > { %702 = vst [vmem:[%s796_s26 + $0x70] sm:$0xff] %v682_v19   ;;  %v687_v21 = vpack.c.bf16 %v315_v20, %v314_v18 }
  0x32   : > { %703 = vst [vmem:[%s796_s26 + $0x78] sm:$0xff] %v687_v21  }
  0x33 PF: > { %s13_s12 = sadd.s32 1, %s718_s12  }
  0x34   : > { %p10_p4 = scmp.ge.s32.totalorder %s13_s12, 4  }
  0x36   :  { %12 = sbr.rel (!%p10_p4) target bundleno = 1 (0x1), region = 62 }

// kernel: _lambda_.8
= control target key start
LH: loop header
LB: loop body
LE: loop exit
PB: predicated region body
PF: predicated region fallthrough
CT: control target
= control target key end

     0   :  { %s3887_s12 = smov 0   ;;  %s3889_s13 = smov 0   ;;  %s4676_s0 = inlined_call_operand.vmem [shape: bf16[512,1152], index: 0, kind: input, shape index: {}]   ;;  %s4677_s1 = inlined_call_operand.vmem [shape: bf16[1152,128], index: 1, kind: input, shape index: {}]   ;;  %s4678_s2 = inlined_call_operand.vmem [shape: f32[512,128], index: 2, kind: output, shape index: {0}]   ;;  %s4679_s3 = inlined_call_operand.vmem [shape: f32[16,128], index: 3, kind: output, shape index: {1}]  }
   0x1   :  { %s3891_s14 = smov 0  }
   0x2 LB: > { %s26_s15 = sadd.s32 1, %s3861_s13  ;;  %p2778_p0 = scmp.ge.s32.totalorder %s3865_s14, 1  ;;  %s3865_s14 = sphi %s3891_s14, %s14_s14   ;;  %s3861_s13 = sphi %s3889_s13, %s4681_s13   ;;  %s3857_s12 = sphi %s3887_s12, %s4680_s12  }
   0x3   : > { %p28_p1 = scmp.ge.s32.totalorder %s26_s15, 2  ;;  %p161_p2 = scmp.lt.s32.totalorder %s3865_s14, 3 }
   0x5   : > { %s4683_s15 = smov (%p28_p1, %s26_s15), 0  ;;  %p162_p3 = pnand %p2778_p0, %p161_p2 }
   0x6   : > { %v3563_v0 = vld [vmem:[%s4677_s1 + $0x40] sm:$0xff] (!%p162_p3)   ;;  %s2779_s18 = sshll.u32 (!%p162_p3), %s3857_s12, 5  ;;  %v3565_v2 = vld [vmem:[%s4677_s1 + $0x48] sm:$0xff] (!%p162_p3)   ;;  %v3567_v4 = vld [vmem:[%s4677_s1 + $0x50] sm:$0xff] (!%p162_p3)   ;;  %p212_p5 = scmp.lt.s32.totalorder (!%p162_p3), %s3857_s12, 1 }
   0x7   : > { %165 = sbr.rel (%p162_p3) target bundleno = 561 (0x231), region = 28  ;;  %v3564_v1 = vld [vmem:[%s4677_s1] sm:$0xff] (!%p162_p3)   ;;  %3002 = vmatprep.subr.bf16.mxu0 (!%p162_p3), %v3563_v0  ;;  %3522 = vmatprep.subr.bf16.mxu1 (!%p162_p3), %v3563_v0  ;;  %p196_p4 = scmp.lt.s32.totalorder (!%p162_p3), %s2779_s18, 63  ;;  %v3566_v3 = vld [vmem:[%s4677_s1 + $0x8] sm:$0xff] (!%p162_p3)   ;;  %v3568_v5 = vld [vmem:[%s4677_s1 + $0x10] sm:$0xff] (!%p162_p3)  }
   0x8   : > { %3003 = vmatpush3.bf16.msra.mxu0 (!%p162_p3), %v3564_v1  ;;  %3530 = vmatpush3.bf16.msra.mxu1 (!%p162_p3), %v3564_v1  ;;  %v3569_v6 = vld [vmem:[%s4677_s1 + $0x58] sm:$0xff] (!%p162_p3)   ;;  %v3571_v8 = vld [vmem:[%s4677_s1 + $0x60] sm:$0xff] (!%p162_p3)   ;;  %v3573_v10 = vld [vmem:[%s4677_s1 + $0x68] sm:$0xff] (!%p162_p3)  }
   0x9   : > { %3004 = vmatprep.subr.bf16.mxu0 (!%p162_p3), %v3565_v2  ;;  %3523 = vmatprep.subr.bf16.mxu1 (!%p162_p3), %v3565_v2  ;;  %v3570_v7 = vld [vmem:[%s4677_s1 + $0x18] sm:$0xff] (!%p162_p3)   ;;  %v3572_v9 = vld [vmem:[%s4677_s1 + $0x20] sm:$0xff] (!%p162_p3)   ;;  %v3574_v13 = vld [vmem:[%s4677_s1 + $0x28] sm:$0xff] (!%p162_p3)  }
   0xa   : > { %v3575_v14 = vld [vmem:[%s4677_s1 + $0x70] sm:$0xff] (!%p162_p3)   ;;  %v3577_v16 = vld [vmem:[%s4677_s1 + $0x78] sm:$0xff] (!%p162_p3)   ;;  %v3585_v18 = vld [vmem:[%s4677_s1 + $0xc0] sm:$0xff] (!%p162_p3)  }
   0xb   : > { %v3576_v15 = vld [vmem:[%s4677_s1 + $0x30] sm:$0xff] (!%p162_p3)   ;;  %v3578_v17 = vld [vmem:[%s4677_s1 + $0x38] sm:$0xff] (!%p162_p3)   ;;  %v3586_v21 = vld [vmem:[%s4677_s1 + $0x140] sm:$0xff] (!%p162_p3)  }
   0xc   : > { %3005 = vmatpush3.bf16.msra.mxu0 (!%p162_p3), %v3566_v3  ;;  %3531 = vmatpush3.bf16.msra.mxu1 (!%p162_p3), %v3566_v3  ;;  %v3587_v22 = vld [vmem:[%s4677_s1 + $0x80] sm:$0xff] (!%p162_p3)   ;;  %v3589_v24 = vld [vmem:[%s4677_s1 + $0xc8] sm:$0xff] (!%p162_p3)   ;;  %v3597_v32 = vld [vmem:[%s4677_s1 + $0xd0] sm:$0xff] (!%p162_p3)  }
   0xd   : > { %3006 = vmatprep.subr.bf16.mxu0 (!%p162_p3), %v3567_v4  ;;  %3524 = vmatprep.subr.bf16.mxu1 (!%p162_p3), %v3567_v4  ;;  %v3588_v23 = vld [vmem:[%s4677_s1 + $0x100] sm:$0xff] (!%p162_p3)   ;;  %v3600_v27 = vld [vmem:[%s4677_s1 + $0x148] sm:$0xff] (!%p162_p3)   ;;  %v3598_v33 = vld [vmem:[%s4677_s1 + $0x90] sm:$0xff] (!%p162_p3)  }
   0xe   : > { %s4685_s18 = smov (!%p196_p4, %s2779_s18), 63  ;;  %v3590_v28 = vld [vmem:[%s4677_s1 + $0x88] sm:$0xff]   ;;  %v3599_v34 = vld [vmem:[%s4677_s1 + $0xd8] sm:$0xff]   ;;  %v3609_v38 = vld [vmem:[%s4677_s1 + $0xe0] sm:$0xff]   ;;  %s4687_s12 = smov (!%p212_p5, %s3857_s12), 1 }
   0xf   : > { %s3538_s4 = smul.u32 36, %s4685_s18  ;;  %v3602_v29 = vld [vmem:[%s4677_s1 + $0x108] sm:$0xff]   ;;  %v3601_v37 = vld [vmem:[%s4677_s1 + $0x98] sm:$0xff]   ;;  %v3620_v41 = vld [vmem:[%s4677_s1 + $0x150] sm:$0xff]  }
  0x10   : > { %3007 = vmatpush3.bf16.msra.mxu0 %v3568_v5  ;;  %3532 = vmatpush3.bf16.msra.mxu1 %v3568_v5  ;;  %v3610_v42 = vld [vmem:[%s4677_s1 + $0xa0] sm:$0xff]   ;;  %v3611_v43 = vld [vmem:[%s4677_s1 + $0xe8] sm:$0xff]   ;;  %v3622_v44 = vld [vmem:[%s4677_s1 + $0x110] sm:$0xff]  }
  0x11   : > { %3008 = vmatprep.subr.bf16.mxu0 %v3569_v6  ;;  %3525 = vmatprep.subr.bf16.mxu1 %v3569_v6  ;;  %s3941_s11 = scalar_lea.vmem %s4676_s0, %s3538_s4  ;;  %v3612_v47 = vld [vmem:[%s4677_s1 + $0xa8] sm:$0xff]   ;;  %v3619_v50 = vld [vmem:[%s4677_s1 + $0xf0] sm:$0xff]   ;;  %v3623_v53 = vld [vmem:[%s4677_s1 + $0xf8] sm:$0xff]  }
  0x12   : > { %v3581_v11 = vld [vmem:[%s3941_s11 + $0x4] ss:$36 sps:$4 sm:$0xff]   ;;  %v3591_v25 = vld [vmem:[%s3941_s11 + $0x4c] ss:$36 sps:$4 sm:$0xff]   ;;  %v3603_v35 = vld [vmem:[%s3941_s11 + $0x94] ss:$36 sps:$4 sm:$0xff]  }
  0x13   : > { %v3584_v12 = vld [vmem:[%s3941_s11 + $0x364] ss:$36 sps:$4 sm:$0xff]   ;;  %1721 = vmatprep.mubr.bf16.mxu0 %v3581_v11  ;;  %v3593_v26 = vld [vmem:[%s3941_s11 + $0x3ac] ss:$36 sps:$4 sm:$0xff]   ;;  %v3605_v36 = vld [vmem:[%s3941_s11 + $0x3f4] ss:$36 sps:$4 sm:$0xff]  }
  0x14   : > { %3009 = vmatpush3.bf16.msra.mxu0 %v3570_v7  ;;  %3533 = vmatpush3.bf16.msra.mxu1 %v3570_v7  ;;  %v3579_v19 = vld [vmem:[%s3941_s11] ss:$36 sps:$4 sm:$0xff]   ;;  %v3595_v30 = vld [vmem:[%s3941_s11 + $0x48] ss:$36 sps:$4 sm:$0xff]   ;;  %v3607_v39 = vld [vmem:[%s3941_s11 + $0x90] ss:$36 sps:$4 sm:$0xff]  }
  0x15   : > { %3010 = vmatprep.subr.bf16.mxu0 %v3571_v8  ;;  %3526 = vmatprep.subr.bf16.mxu1 %v3571_v8  ;;  %v3582_v20 = vld [vmem:[%s3941_s11 + $0x360] ss:$36 sps:$4 sm:$0xff]   ;;  %v3596_v31 = vld [vmem:[%s3941_s11 + $0x3a8] ss:$36 sps:$4 sm:$0xff]   ;;  %v3608_v40 = vld [vmem:[%s3941_s11 + $0x3f0] ss:$36 sps:$4 sm:$0xff]  }
  0x16   : > { %1817 = vmatprep.mubr.bf16.mxu1 %v3584_v12  ;;  %v3613_v45 = vld [vmem:[%s3941_s11 + $0xdc] ss:$36 sps:$4 sm:$0xff]   ;;  %v3621_v51 = vld [vmem:[%s4677_s1 + $0xb0] sm:$0xff]   ;;  %v3625_v52 = vld [vmem:[%s3941_s11 + $0x124] ss:$36 sps:$4 sm:$0xff]  }
  0x17   : > { %v3615_v46 = vld [vmem:[%s3941_s11 + $0x43c] ss:$36 sps:$4 sm:$0xff]   ;;  %v3629_v56 = vld [vmem:[%s3941_s11 + $0xc] ss:$36 sps:$4 sm:$0xff]   ;;  %v3637_v0 = vld [vmem:[%s3941_s11 + $0x54] ss:$36 sps:$4 sm:$0xff]  }
  0x18   : > { %3011 = vmatpush3.bf16.msra.mxu0 %v3572_v9  ;;  %3534 = vmatpush3.bf16.msra.mxu1 %v3572_v9  ;;  %v3617_v48 = vld [vmem:[%s3941_s11 + $0xd8] ss:$36 sps:$4 sm:$0xff]   ;;  %v3627_v58 = vld [vmem:[%s3941_s11 + $0x8] ss:$36 sps:$4 sm:$0xff]   ;;  %v3630_v59 = vld [vmem:[%s3941_s11 + $0x120] ss:$36 sps:$4 sm:$0xff]  }
  0x19   : > { %3012 = vmatprep.subr.bf16.mxu0 %v3573_v10  ;;  %3527 = vmatprep.subr.bf16.mxu1 %v3573_v10  ;;  %v3618_v49 = vld [vmem:[%s3941_s11 + $0x438] ss:$36 sps:$4 sm:$0xff]   ;;  %v3631_v60 = vld [vmem:[%s4677_s1 + $0x1c0] sm:$0xff]   ;;  %v3635_v62 = vld [vmem:[%s3941_s11 + $0x16c] ss:$36 sps:$4 sm:$0xff]  }
  0x1a   : > { %v3633_v54 = vld [vmem:[%s4677_s1 + $0x158] sm:$0xff]   ;;  %v3632_v61 = vld [vmem:[%s4677_s1 + $0x180] sm:$0xff]   ;;  %v3648_v2 = vld [vmem:[%s4677_s1 + $0x1c8] sm:$0xff]  }
  0x1b   : > { %v3634_v55 = vld [vmem:[%s4677_s1 + $0x118] sm:$0xff]   ;;  %v3647_v63 = vld [vmem:[%s4677_s1 + $0x160] sm:$0xff]   ;;  %v3650_v3 = vld [vmem:[%s4677_s1 + $0x188] sm:$0xff]  }
  0x1c   : > { %3013 = vmatpush3.bf16.msra.mxu0 %v3574_v13  ;;  %3535 = vmatpush3.bf16.msra.mxu1 %v3574_v13  ;;  %v3624_v57 = vld [vmem:[%s4677_s1 + $0xb8] sm:$0xff]   ;;  %v3649_v1 = vld [vmem:[%s4677_s1 + $0x120] sm:$0xff]   ;;  %v3639_v4 = vld [vmem:[%s3941_s11 + $0x168] ss:$36 sps:$4 sm:$0xff]  }
  0x1d   : > { %3014 = vmatprep.subr.bf16.mxu0 %v3575_v14  ;;  %3528 = vmatprep.subr.bf16.mxu1 %v3575_v14  ;;  %v3657_v5 = vld [vmem:[%s4677_s1 + $0x168] sm:$0xff]   ;;  %v3640_v7 = vld [vmem:[%s3941_s11 + $0x50] ss:$36 sps:$4 sm:$0xff]   ;;  %v3643_v9 = vld [vmem:[%s3941_s11 + $0x9c] ss:$36 sps:$4 sm:$0xff]  }
  0x1e   : > { %v3658_v6 = vld [vmem:[%s4677_s1 + $0x128] sm:$0xff]   ;;  %v3641_v8 = vld [vmem:[%s3941_s11 + $0x1b4] ss:$36 sps:$4 sm:$0xff]   ;;  %v3651_v14 = vld [vmem:[%s3941_s11 + $0x1fc] ss:$36 sps:$4 sm:$0xff]  }
  0x1f   : > { %v3665_v10 = vld [vmem:[%s4677_s1 + $0x1d0] sm:$0xff]   ;;  %v3646_v13 = vld [vmem:[%s3941_s11 + $0x98] ss:$36 sps:$4 sm:$0xff]  }
  0x20   : > { %3015 = vmatpush3.bf16.msra.mxu0 %v3576_v15  ;;  %3536 = vmatpush3.bf16.msra.mxu1 %v3576_v15  ;;  %v3666_v11 = vld [vmem:[%s4677_s1 + $0x190] sm:$0xff]  }
  0x21   : > { %3016 = vmatprep.subr.bf16.mxu0 %v3577_v16  ;;  %3529 = vmatprep.subr.bf16.mxu1 %v3577_v16  ;;  %v3645_v12 = vld [vmem:[%s3941_s11 + $0x1b0] ss:$36 sps:$4 sm:$0xff]  }
  0x22   : > { %v3673_v15 = vld [vmem:[%s4677_s1 + $0x170] sm:$0xff]  }
  0x23   : > { %v3674_v16 = vld [vmem:[%s4677_s1 + $0x130] sm:$0xff]  }
  0x24   : > { %3017 = vmatpush3.bf16.msra.mxu0 %v3578_v17  ;;  %3537 = vmatpush3.bf16.msra.mxu1 %v3578_v17  ;;  %v3653_v17 = vld [vmem:[%s3941_s11 + $0xe4] ss:$36 sps:$4 sm:$0xff]  }
  0x25   : > { %3114 = vmatprep.subr.bf16.mxu1 %v3585_v18  ;;  %3226 = vmatprep.subr.bf16.mxu0 %v3586_v21  ;;  %v3681_v18 = vld [vmem:[%s4677_s1 + $0x1d8] sm:$0xff]  }
  0x26   : > { %v3683_v21 = vld [vmem:[%s4677_s1 + $0x178] sm:$0xff]  }
  0x27   : > { %1722 = vmatmul.mubr.bf16.vlgmr.msra.gmra.mrb[0].mxu0 %v3579_v19  ;;  %1818 = vmatmul.mubr.bf16.vlgmr.msra.gmra.mrb[0].mxu1 %v3582_v20  ;;  %v3682_v19 = vld [vmem:[%s4677_s1 + $0x198] sm:$0xff]  }
  0x28   : > { %3115 = vmatpush3.bf16.msra.mxu1 %v3587_v22  ;;  %3227 = vmatpush3.bf16.msra.mxu0 %v3588_v23  ;;  %v3655_v20 = vld [vmem:[%s3941_s11 + $0x1f8] ss:$36 sps:$4 sm:$0xff]   ;;  %v3656_v23 = vld [vmem:[%s3941_s11 + $0xe0] ss:$36 sps:$4 sm:$0xff]  }
  0x29   : > { %3116 = vmatprep.subr.bf16.mxu1 %v3589_v24  ;;  %1729 = vmatprep.mubr.bf16.mxu0 %v3591_v25  ;;  %v3684_v22 = vld [vmem:[%s4677_s1 + $0x138] sm:$0xff]   ;;  %v3659_v24 = vld [vmem:[%s3941_s11 + $0x244] ss:$36 sps:$4 sm:$0xff]   ;;  %v3661_v25 = vld [vmem:[%s3941_s11 + $0x12c] ss:$36 sps:$4 sm:$0xff]  }
  0x2a   : > { %1825 = vmatprep.mubr.bf16.mxu1 %v3593_v26  ;;  %3228 = vmatprep.subr.bf16.mxu0 %v3600_v27  ;;  %v3697_v26 = vld [vmem:[%s4677_s1 + $0x1e0] sm:$0xff]  }
  0x2b   : > { %v3663_v27 = vld [vmem:[%s3941_s11 + $0x240] ss:$36 sps:$4 sm:$0xff]  }
  0x2c   : > { %3117 = vmatpush3.bf16.msra.mxu1 %v3590_v28  ;;  %3229 = vmatpush3.bf16.msra.mxu0 %v3602_v29  ;;  %v3698_v28 = vld [vmem:[%s4677_s1 + $0x200] sm:$0xff]  }
  0x2d   : > { %3118 = vmatprep.subr.bf16.mxu1 %v3597_v32  ;;  %3230 = vmatprep.subr.bf16.mxu0 %v3620_v41  ;;  %v3699_v29 = vld [vmem:[%s4677_s1 + $0x1a0] sm:$0xff]   ;;  %v3669_v32 = vld [vmem:[%s3941_s11 + $0x174] ss:$36 sps:$4 sm:$0xff]  }
  0x2e   : > { %v3727_v41 = vld [vmem:[%s4677_s1 + $0x1f0] sm:$0xff]  }
  0x2f   : > { %1730 = vmatmul.mubr.bf16.gmra.mrb[4].mxu0 %v3595_v30  ;;  %1826 = vmatmul.mubr.bf16.gmra.mrb[4].mxu1 %v3596_v31  ;;  %v3664_v30 = vld [vmem:[%s3941_s11 + $0x128] ss:$36 sps:$4 sm:$0xff]  }
  0x30   : > { %3119 = vmatpush3.bf16.msra.mxu1 %v3598_v33  ;;  %1737 = vmatprep.mubr.bf16.mxu0 %v3603_v35  ;;  %v3667_v31 = vld [vmem:[%s3941_s11 + $0x28c] ss:$36 sps:$4 sm:$0xff]  }
  0x31   : > { %3120 = vmatprep.subr.bf16.mxu1 %v3599_v34  ;;  %1833 = vmatprep.mubr.bf16.mxu1 %v3605_v36  ;;  %v3712_v33 = vld [vmem:[%s4677_s1 + $0x1e8] sm:$0xff]   ;;  %v3672_v35 = vld [vmem:[%s3941_s11 + $0x170] ss:$36 sps:$4 sm:$0xff]  }
  0x32   : > { %3231 = vmatpush3.bf16.msra.mxu0 %v3622_v44  ;;  %v3671_v34 = vld [vmem:[%s3941_s11 + $0x288] ss:$36 sps:$4 sm:$0xff]  }
  0x33   : > { %3232 = vmatprep.subr.bf16.mxu0 %v3633_v54  ;;  %v3714_v36 = vld [vmem:[%s4677_s1 + $0x1a8] sm:$0xff]   ;;  %v3702_v54 = vld [vmem:[%s3941_s11 + $0x5c] ss:$36 sps:$4 sm:$0xff]  }
  0x34   : > { %3121 = vmatpush3.bf16.msra.mxu1 %v3601_v37  ;;  %v3675_v37 = vld [vmem:[%s3941_s11 + $0x2d4] ss:$36 sps:$4 sm:$0xff]   ;;  %v3687_v44 = vld [vmem:[%s3941_s11 + $0x204] ss:$36 sps:$4 sm:$0xff]  }
  0x35   : > { %3122 = vmatprep.subr.bf16.mxu1 %v3609_v38  ;;  %v3677_v38 = vld [vmem:[%s3941_s11 + $0x1bc] ss:$36 sps:$4 sm:$0xff]  }
  0x36   : > { %3233 = vmatpush3.bf16.msra.mxu0 %v3634_v55  ;;  %v3713_v55 = vld [vmem:[%s4677_s1 + $0x208] sm:$0xff]  }
  0x37   : > { %1738 = vmatmul.mubr.bf16.gmra.mrb[8].mxu0 %v3607_v39  ;;  %1834 = vmatmul.mubr.bf16.gmra.mrb[8].mxu1 %v3608_v40  ;;  %v3679_v39 = vld [vmem:[%s3941_s11 + $0x2d0] ss:$36 sps:$4 sm:$0xff]   ;;  %v3680_v40 = vld [vmem:[%s3941_s11 + $0x1b8] ss:$36 sps:$4 sm:$0xff]  }
  0x38   : > { %3123 = vmatpush3.bf16.msra.mxu1 %v3610_v42  ;;  %1745 = vmatprep.mubr.bf16.mxu0 %v3613_v45  ;;  %v3685_v42 = vld [vmem:[%s3941_s11 + $0x31c] ss:$36 sps:$4 sm:$0xff]  }
  0x39   : > { %3124 = vmatprep.subr.bf16.mxu1 %v3611_v43  ;;  %1841 = vmatprep.mubr.bf16.mxu1 %v3615_v46  ;;  %v3729_v43 = vld [vmem:[%s4677_s1 + $0x1b0] sm:$0xff]   ;;  %v3689_v45 = vld [vmem:[%s3941_s11 + $0x318] ss:$36 sps:$4 sm:$0xff]   ;;  %v3690_v46 = vld [vmem:[%s3941_s11 + $0x200] ss:$36 sps:$4 sm:$0xff]  }
  0x3a   : > { %3234 = vmatprep.subr.bf16.mxu0 %v3647_v63  ;;  %v3710_v63 = vld [vmem:[%s3941_s11 + $0x2d8] ss:$36 sps:$4 sm:$0xff]  }
  0x3b   : > { %3235 = vmatpush3.bf16.msra.mxu0 %v3649_v1  ;;  %v3715_v1 = vld [vmem:[%s3941_s11 + $0x324] ss:$36 sps:$4 sm:$0xff]  }
  0x3c   : > { %3125 = vmatpush3.bf16.msra.mxu1 %v3612_v47  ;;  %3236 = vmatprep.subr.bf16.mxu0 %v3657_v5  ;;  %v3742_v47 = vld [vmem:[%s4677_s1 + $0x1f8] sm:$0xff]   ;;  %v3720_v5 = vld [vmem:[%s3941_s11 + $0xe8] ss:$36 sps:$4 sm:$0xff]  }
  0x3d   : > { %3126 = vmatprep.subr.bf16.mxu1 %v3619_v50  ;;  %v3695_v50 = vld [vmem:[%s3941_s11 + $0x14] ss:$36 sps:$4 sm:$0xff]  }
  0x3f   : > { %1746 = vmatmul.mubr.bf16.gmra.mrb[12].mxu0 %v3617_v48  ;;  %1842 = vmatmul.mubr.bf16.gmra.mrb[12].mxu1 %v3618_v49  ;;  %v3691_v48 = vld [vmem:[%s3941_s11 + $0x24c] ss:$36 sps:$4 sm:$0xff]   ;;  %v3744_v49 = vld [vmem:[%s4677_s1 + $0x1b8] sm:$0xff]  }
  0x40   : > { %3127 = vmatpush3.bf16.msra.mxu1 %v3621_v51  ;;  %1753 = vmatprep.mubr.bf16.mxu0 %v3625_v52  ;;  %v3693_v51 = vld [vmem:[%s3941_s11 + $0x10] ss:$36 sps:$4 sm:$0xff]   ;;  %v3696_v52 = vld [vmem:[%s3941_s11 + $0x248] ss:$36 sps:$4 sm:$0xff]  }
  0x41   : > { %3128 = vmatprep.subr.bf16.mxu1 %v3623_v53  ;;  %1882 = vmatprep.mubr.bf16.mxu1 %v3629_v56  ;;  %v3700_v53 = vld [vmem:[%s3941_s11 + $0x294] ss:$36 sps:$4 sm:$0xff]  }
  0x42   : > { %3237 = vmatpush3.bf16.msra.mxu0 %v3658_v6  ;;  %v3728_v56 = vld [vmem:[%s4677_s1 + $0x210] sm:$0xff]  }
  0x43   : > { %3238 = vmatprep.subr.bf16.mxu0 %v3673_v15  ;;  %v3783_v6 = vld [vmem:[%s4677_s1 + $0x230] sm:$0xff]   ;;  %v3735_v15 = vld [vmem:[%s3941_s11 + $0x178] ss:$36 sps:$4 sm:$0xff]  }
  0x44   : > { %3129 = vmatpush3.bf16.msra.mxu1 %v3624_v57  ;;  %v3704_v57 = vld [vmem:[%s3941_s11 + $0x290] ss:$36 sps:$4 sm:$0xff]  }
  0x45   : > { %3338 = vmatprep.subr.bf16.mxu1 %v3631_v60  ;;  %v3708_v60 = vld [vmem:[%s3941_s11 + $0xa4] ss:$36 sps:$4 sm:$0xff]  }
  0x46   : > { %3239 = vmatpush3.bf16.msra.mxu0 %v3674_v16  ;;  %v3736_v16 = vld [vmem:[%s3941_s11 + $0x3fc] ss:$36 sps:$4 sm:$0xff]  }
  0x47   : > { %1754 = vmatmul.mubr.bf16.gmra.mrb[16].mxu0 %v3630_v59  ;;  %1883 = vmatmul.mubr.bf16.vlgmr.msra.gmra.mrb[16].mxu1 %v3627_v58  ;;  %v3705_v58 = vld [vmem:[%s3941_s11 + $0x58] ss:$36 sps:$4 sm:$0xff]  }
  0x48   : > { %3339 = vmatpush3.bf16.msra.mxu1 %v3632_v61  ;;  %1761 = vmatprep.mubr.bf16.mxu0 %v3635_v62  ;;  %v3706_v59 = vld [vmem:[%s3941_s11 + $0x2dc] ss:$36 sps:$4 sm:$0xff]  }
  0x49   : > { %1890 = vmatprep.mubr.bf16.mxu1 %v3637_v0  ;;  %3340 = vmatprep.subr.bf16.mxu1 %v3648_v2  ;;  %v3743_v61 = vld [vmem:[%s4677_s1 + $0x218] sm:$0xff]   ;;  %v3757_v62 = vld [vmem:[%s4677_s1 + $0x220] sm:$0xff]   ;;  %v3717_v2 = vld [vmem:[%s3941_s11 + $0xec] ss:$36 sps:$4 sm:$0xff]  }
  0x4a   : > { %3240 = vmatprep.subr.bf16.mxu0 %v3683_v21  ;;  %v3711_v0 = vld [vmem:[%s3941_s11 + $0xa0] ss:$36 sps:$4 sm:$0xff]   ;;  %v3747_v21 = vld [vmem:[%s3941_s11 + $0x20c] ss:$36 sps:$4 sm:$0xff]  }
  0x4b   : > { %3241 = vmatpush3.bf16.msra.mxu0 %v3684_v22  ;;  %v3749_v22 = vld [vmem:[%s3941_s11 + $0x440] ss:$36 sps:$4 sm:$0xff]  }
  0x4c   : > { %3341 = vmatpush3.bf16.msra.mxu1 %v3650_v3  ;;  %3474 = vmatprep.subr.bf16.mxu0 %v3698_v28  ;;  %v3770_v3 = vld [vmem:[%s4677_s1 + $0x228] sm:$0xff]  }
  0x4d   : > { %3342 = vmatprep.subr.bf16.mxu1 %v3665_v10  ;;  %v3725_v10 = vld [vmem:[%s3941_s11 + $0x368] ss:$36 sps:$4 sm:$0xff]  }
  0x4f   : > { %1762 = vmatmul.mubr.bf16.gmra.mrb[20].mxu0 %v3639_v4  ;;  %1891 = vmatmul.mubr.bf16.gmra.mrb[20].mxu1 %v3640_v7  ;;  %v3719_v4 = vld [vmem:[%s3941_s11 + $0x320] ss:$36 sps:$4 sm:$0xff]   ;;  %v3721_v7 = vld [vmem:[%s3941_s11 + $0x36c] ss:$36 sps:$4 sm:$0xff]  }
  0x50   : > { %1769 = vmatprep.mubr.bf16.mxu0 %v3641_v8  ;;  %1898 = vmatprep.mubr.bf16.mxu1 %v3643_v9  ;;  %v3723_v8 = vld [vmem:[%s3941_s11 + $0x134] ss:$36 sps:$4 sm:$0xff]  }
  0x51   : > { %3343 = vmatpush3.bf16.msra.mxu1 %v3666_v11  ;;  %v3796_v9 = vld [vmem:[%s4677_s1 + $0x238] sm:$0xff]   ;;  %v3726_v11 = vld [vmem:[%s3941_s11 + $0x130] ss:$36 sps:$4 sm:$0xff]  }
  0x52   : > { %3344 = vmatprep.subr.bf16.mxu1 %v3681_v18  ;;  %v3740_v18 = vld [vmem:[%s3941_s11 + $0x3f8] ss:$36 sps:$4 sm:$0xff]  }
  0x55   : > { %3345 = vmatpush3.bf16.msra.mxu1 %v3682_v19  ;;  %v3741_v19 = vld [vmem:[%s3941_s11 + $0x1c0] ss:$36 sps:$4 sm:$0xff]  }
  0x56   : > { %3346 = vmatprep.subr.bf16.mxu1 %v3697_v26  ;;  %v3753_v26 = vld [vmem:[%s3941_s11 + $0x18] ss:$36 sps:$4 sm:$0xff]  }
  0x57   : > { %1770 = vmatmul.mubr.bf16.gmra.mrb[24].mxu0 %v3645_v12  ;;  %1899 = vmatmul.mubr.bf16.gmra.mrb[24].mxu1 %v3646_v13  ;;  %v3730_v12 = vld [vmem:[%s3941_s11 + $0x3b4] ss:$36 sps:$4 sm:$0xff]   ;;  %v3732_v13 = vld [vmem:[%s3941_s11 + $0x17c] ss:$36 sps:$4 sm:$0xff]  }
  0x58   : > { %1777 = vmatprep.mubr.bf16.mxu0 %v3651_v14  ;;  %1906 = vmatprep.mubr.bf16.mxu1 %v3653_v17  ;;  %v3734_v14 = vld [vmem:[%s3941_s11 + $0x3b0] ss:$36 sps:$4 sm:$0xff]   ;;  %v3738_v17 = vld [vmem:[%s3941_s11 + $0x1c4] ss:$36 sps:$4 sm:$0xff]  }
  0x59   : > { %3347 = vmatpush3.bf16.msra.mxu1 %v3699_v29  ;;  %v3760_v29 = vld [vmem:[%s3941_s11 + $0x64] ss:$36 sps:$4 sm:$0xff]  }
  0x5a   : > { %3348 = vmatprep.subr.bf16.mxu1 %v3712_v33  ;;  %v3766_v33 = vld [vmem:[%s3941_s11 + $0xac] ss:$36 sps:$4 sm:$0xff]  }
  0x5d   : > { %3349 = vmatpush3.bf16.msra.mxu1 %v3714_v36  ;;  %v3771_v36 = vld [vmem:[%s3941_s11 + $0x32c] ss:$36 sps:$4 sm:$0xff]  }
  0x5e   : > { %3350 = vmatprep.subr.bf16.mxu1 %v3727_v41  ;;  %v3779_v41 = vld [vmem:[%s3941_s11 + $0x13c] ss:$36 sps:$4 sm:$0xff]  }
  0x5f   : > { %1778 = vmatmul.mubr.bf16.gmra.mrb[28].mxu0 %v3655_v20  ;;  %1907 = vmatmul.mubr.bf16.gmra.mrb[28].mxu1 %v3656_v23  ;;  %v3745_v20 = vld [vmem:[%s3941_s11 + $0x444] ss:$36 sps:$4 sm:$0xff]  }
  0x60   : > { %1785 = vmatprep.mubr.bf16.mxu0 %v3659_v24  ;;  %1914 = vmatprep.mubr.bf16.mxu1 %v3661_v25  ;;  %v3750_v23 = vld [vmem:[%s3941_s11 + $0x208] ss:$36 sps:$4 sm:$0xff]   ;;  %v3751_v24 = vld [vmem:[%s3941_s11 + $0x254] ss:$36 sps:$4 sm:$0xff]   ;;  %v3755_v25 = vld [vmem:[%s3941_s11 + $0x1c] ss:$36 sps:$4 sm:$0xff]  }
  0x61   : > { %3351 = vmatpush3.bf16.msra.mxu1 %v3729_v43  ;;  %v3782_v43 = vld [vmem:[%s3941_s11 + $0x138] ss:$36 sps:$4 sm:$0xff]  }
  0x62   : > { %3352 = vmatprep.subr.bf16.mxu1 %v3742_v47  ;;  %v3789_v47 = vld [vmem:[%s3941_s11 + $0x180] ss:$36 sps:$4 sm:$0xff]  }
  0x65   : > { %3353 = vmatpush3.bf16.msra.mxu1 %v3744_v49  ;;  %v3792_v49 = vld [vmem:[%s3941_s11 + $0x1cc] ss:$36 sps:$4 sm:$0xff]  }
  0x67   : > { %1786 = vmatmul.mubr.bf16.gmra.mrb[32].mxu0 %v3663_v27  ;;  %1915 = vmatmul.mubr.bf16.gmra.mrb[32].mxu1 %v3664_v30  ;;  %v3756_v27 = vld [vmem:[%s3941_s11 + $0x250] ss:$36 sps:$4 sm:$0xff]   ;;  %v3762_v30 = vld [vmem:[%s3941_s11 + $0x298] ss:$36 sps:$4 sm:$0xff]  }
  0x68   : > { %1793 = vmatprep.mubr.bf16.mxu0 %v3667_v31  ;;  %1922 = vmatprep.mubr.bf16.mxu1 %v3669_v32  ;;  %v3763_v31 = vld [vmem:[%s3941_s11 + $0x60] ss:$36 sps:$4 sm:$0xff]  }
  0x69   : > { %v3764_v32 = vld [vmem:[%s3941_s11 + $0x2e4] ss:$36 sps:$4 sm:$0xff]  }
  0x6f   : > { %1794 = vmatmul.mubr.bf16.gmra.mrb[36].mxu0 %v3671_v34  ;;  %1923 = vmatmul.mubr.bf16.gmra.mrb[36].mxu1 %v3672_v35  ;;  %v3768_v34 = vld [vmem:[%s3941_s11 + $0x2e0] ss:$36 sps:$4 sm:$0xff]   ;;  %v3769_v35 = vld [vmem:[%s3941_s11 + $0xa8] ss:$36 sps:$4 sm:$0xff]  }
  0x70   : > { %1801 = vmatprep.mubr.bf16.mxu0 %v3675_v37  ;;  %1930 = vmatprep.mubr.bf16.mxu1 %v3677_v38  ;;  %v3773_v37 = vld [vmem:[%s3941_s11 + $0xf4] ss:$36 sps:$4 sm:$0xff]   ;;  %v3775_v38 = vld [vmem:[%s3941_s11 + $0x328] ss:$36 sps:$4 sm:$0xff]  }
  0x77   : > { %1802 = vmatmul.mubr.bf16.gmra.mrb[40].mxu0 %v3679_v39  ;;  %1931 = vmatmul.mubr.bf16.gmra.mrb[40].mxu1 %v3680_v40  ;;  %v3776_v39 = vld [vmem:[%s3941_s11 + $0xf0] ss:$36 sps:$4 sm:$0xff]  }
  0x78   : > { %1809 = vmatprep.mubr.bf16.mxu0 %v3685_v42  ;;  %1938 = vmatprep.mubr.bf16.mxu1 %v3687_v44  ;;  %v3777_v40 = vld [vmem:[%s3941_s11 + $0x374] ss:$36 sps:$4 sm:$0xff]   ;;  %v3784_v44 = vld [vmem:[%s3941_s11 + $0x3bc] ss:$36 sps:$4 sm:$0xff]  }
  0x79   : > { %v3781_v42 = vld [vmem:[%s3941_s11 + $0x370] ss:$36 sps:$4 sm:$0xff]  }
  0x7f   : > { %1810 = vmatmul.mubr.bf16.gmra.mrb[44].mxu0 %v3689_v45  ;;  %1939 = vmatmul.mubr.bf16.gmra.mrb[44].mxu1 %v3690_v46  ;;  %v3786_v45 = vld [vmem:[%s3941_s11 + $0x184] ss:$36 sps:$4 sm:$0xff]   ;;  %v3788_v46 = vld [vmem:[%s3941_s11 + $0x3b8] ss:$36 sps:$4 sm:$0xff]  }
  0x80   : > { %1946 = vmatprep.mubr.bf16.mxu1 %v3691_v48  ;;  %2043 = vmatprep.mubr.bf16.mxu0 %v3695_v50  ;;  %v3790_v48 = vld [vmem:[%s3941_s11 + $0x404] ss:$36 sps:$4 sm:$0xff]  }
  0x81   : > { %v3794_v50 = vld [vmem:[%s3941_s11 + $0x400] ss:$36 sps:$4 sm:$0xff]  }
  0x87   : > { %1947 = vmatmul.mubr.bf16.gmra.mrb[48].mxu1 %v3696_v52  ;;  %2044 = vmatmul.mubr.bf16.vlgmr.msra.gmra.mrb[48].mxu0 %v3693_v51  ;;  %v3795_v51 = vld [vmem:[%s3941_s11 + $0x1c8] ss:$36 sps:$4 sm:$0xff]  }
  0x88   : > { %3475 = vmatpush3.bf16.msra.mxu0 %v3698_v28  ;;  %1954 = vmatprep.mubr.bf16.mxu1 %v3700_v53  ;;  %v3758_v28 = vld [vmem:[%s3941_s11 + $0x29c] ss:$36 sps:$4 sm:$0xff]   ;;  %v3797_v52 = vld [vmem:[%s3941_s11 + $0x44c] ss:$36 sps:$4 sm:$0xff]   ;;  %v3799_v53 = vld [vmem:[%s3941_s11 + $0x214] ss:$36 sps:$4 sm:$0xff]  }
  0x89   : > { %2051 = vmatprep.mubr.bf16.mxu0 %v3702_v54  ;;  %3476 = vmatprep.subr.bf16.mxu0 %v3713_v55 }
  0x8c   : > { %3477 = vmatpush3.bf16.msra.mxu0 %v3713_v55 }
  0x8d   : > { %3478 = vmatprep.subr.bf16.mxu0 %v3728_v56 }
  0x8f   : > { %1955 = vmatmul.mubr.bf16.gmra.mrb[52].mxu1 %v3704_v57  ;;  %2052 = vmatmul.mubr.bf16.gmra.mrb[52].mxu0 %v3705_v58  ;;  %v3801_v58 = vld [vmem:[%s3941_s11 + $0x448] ss:$36 sps:$4 sm:$0xff]  }
  0x90   : > { %1962 = vmatprep.mubr.bf16.mxu1 %v3706_v59  ;;  %2059 = vmatprep.mubr.bf16.mxu0 %v3708_v60  ;;  %v3802_v59 = vld [vmem:[%s3941_s11 + $0x210] ss:$36 sps:$4 sm:$0xff]  }
  0x91   : > { %3479 = vmatpush3.bf16.msra.mxu0 %v3728_v56 }
  0x92   : > { %3480 = vmatprep.subr.bf16.mxu0 %v3743_v61 }
  0x95   : > { %3481 = vmatpush3.bf16.msra.mxu0 %v3743_v61 }
  0x96   : > { %3482 = vmatprep.subr.bf16.mxu0 %v3757_v62 }
  0x97   : > { %1963 = vmatmul.mubr.bf16.gmra.mrb[56].mxu1 %v3710_v63  ;;  %2060 = vmatmul.mubr.bf16.gmra.mrb[56].mxu0 %v3711_v0  ;;  %v3803_v0 = vld [vmem:[%s3941_s11 + $0x25c] ss:$36 sps:$4 sm:$0xff]  }
  0x98   : > { %1970 = vmatprep.mubr.bf16.mxu1 %v3715_v1  ;;  %2067 = vmatprep.mubr.bf16.mxu0 %v3717_v2  ;;  %v3805_v1 = vld [vmem:[%s3941_s11 + $0x20] ss:$36 sps:$4 sm:$0xff]  }
  0x99   : > { %3483 = vmatpush3.bf16.msra.mxu0 %v3757_v62 }
  0x9a   : > { %3484 = vmatprep.subr.bf16.mxu0 %v3770_v3 }
  0x9d   : > { %3485 = vmatpush3.bf16.msra.mxu0 %v3770_v3 }
  0x9e   : > { %3486 = vmatprep.subr.bf16.mxu0 %v3783_v6 }
  0x9f   : > { %1971 = vmatmul.mubr.bf16.gmra.mrb[60].mxu1 %v3719_v4  ;;  %2068 = vmatmul.mubr.bf16.gmra.mrb[60].mxu0 %v3720_v5 }
  0xa0   : > { %1978 = vmatprep.mubr.bf16.mxu1 %v3721_v7  ;;  %2075 = vmatprep.mubr.bf16.mxu0 %v3723_v8 }
  0xa1   : > { %3487 = vmatpush3.bf16.msra.mxu0 %v3783_v6 }
  0xa2   : > { %3488 = vmatprep.subr.bf16.mxu0 %v3796_v9 }
  0xa5   : > { %3489 = vmatpush3.bf16.msra.mxu0 %v3796_v9 }
  0xa7   : > { %1979 = vmatmul.mubr.bf16.gmra.mrb[64].mxu1 %v3725_v10  ;;  %2076 = vmatmul.mubr.bf16.gmra.mrb[64].mxu0 %v3726_v11  ;;  %v3806_v10 = vld [vmem:[%s3941_s11 + $0x258] ss:$36 sps:$4 sm:$0xff]   ;;  %v3807_v11 = vld [vmem:[%s3941_s11 + $0x68] ss:$36 sps:$4 sm:$0xff]  }
  0xa8   : > { %1986 = vmatprep.mubr.bf16.mxu1 %v3730_v12  ;;  %2083 = vmatprep.mubr.bf16.mxu0 %v3732_v13 }
  0xaf   : > { %1987 = vmatmul.mubr.bf16.gmra.mrb[68].mxu1 %v3734_v14  ;;  %2084 = vmatmul.mubr.bf16.gmra.mrb[68].mxu0 %v3735_v15 }
  0xb0   : > { %1994 = vmatprep.mubr.bf16.mxu1 %v3736_v16  ;;  %2091 = vmatprep.mubr.bf16.mxu0 %v3738_v17  ;;  %v3808_v16 = vld [vmem:[%s3941_s11 + $0x2a4] ss:$36 sps:$4 sm:$0xff]   ;;  %v3810_v17 = vld [vmem:[%s3941_s11 + $0xb0] ss:$36 sps:$4 sm:$0xff]  }
  0xb7   : > { %1995 = vmatmul.mubr.bf16.gmra.mrb[72].mxu1 %v3740_v18  ;;  %2092 = vmatmul.mubr.bf16.gmra.mrb[72].mxu0 %v3741_v19 }
  0xb8   : > { %2002 = vmatprep.mubr.bf16.mxu1 %v3745_v20  ;;  %2099 = vmatprep.mubr.bf16.mxu0 %v3747_v21 }
  0xbf   : > { %2003 = vmatmul.mubr.bf16.gmra.mrb[76].mxu1 %v3749_v22  ;;  %2100 = vmatmul.mubr.bf16.gmra.mrb[76].mxu0 %v3750_v23 }
  0xc0   : > { %2107 = vmatprep.mubr.bf16.mxu0 %v3751_v24  ;;  %2204 = vmatprep.mubr.bf16.mxu1 %v3755_v25 }
  0xc7   : > { %2108 = vmatmul.mubr.bf16.gmra.mrb[80].mxu0 %v3756_v27  ;;  %2205 = vmatmul.mubr.bf16.vlgmr.msra.gmra.mrb[80].mxu1 %v3753_v26  ;;  %v3811_v26 = vld [vmem:[%s3941_s11 + $0x2a0] ss:$36 sps:$4 sm:$0xff]   ;;  %v3812_v27 = vld [vmem:[%s3941_s11 + $0xf8] ss:$36 sps:$4 sm:$0xff]  }
  0xc8   : > { %2115 = vmatprep.mubr.bf16.mxu0 %v3758_v28  ;;  %2212 = vmatprep.mubr.bf16.mxu1 %v3760_v29 }
  0xcf   : > { %2116 = vmatmul.mubr.bf16.gmra.mrb[84].mxu0 %v3762_v30  ;;  %2213 = vmatmul.mubr.bf16.gmra.mrb[84].mxu1 %v3763_v31 }
  0xd0   : > { %2123 = vmatprep.mubr.bf16.mxu0 %v3764_v32  ;;  %2220 = vmatprep.mubr.bf16.mxu1 %v3766_v33  ;;  %v3813_v32 = vld [vmem:[%s3941_s11 + $0x2ec] ss:$36 sps:$4 sm:$0xff]   ;;  %v3815_v33 = vld [vmem:[%s3941_s11 + $0x140] ss:$36 sps:$4 sm:$0xff]  }
  0xd7   : > { %2124 = vmatmul.mubr.bf16.gmra.mrb[88].mxu0 %v3768_v34  ;;  %2221 = vmatmul.mubr.bf16.gmra.mrb[88].mxu1 %v3769_v35 }
  0xd8   : > { %2131 = vmatprep.mubr.bf16.mxu0 %v3771_v36  ;;  %2228 = vmatprep.mubr.bf16.mxu1 %v3773_v37 }
  0xdf   : > { %2132 = vmatmul.mubr.bf16.gmra.mrb[92].mxu0 %v3775_v38  ;;  %2229 = vmatmul.mubr.bf16.gmra.mrb[92].mxu1 %v3776_v39 }
  0xe0   : > { %2139 = vmatprep.mubr.bf16.mxu0 %v3777_v40  ;;  %2236 = vmatprep.mubr.bf16.mxu1 %v3779_v41 }
  0xe7   : > { %2140 = vmatmul.mubr.bf16.gmra.mrb[96].mxu0 %v3781_v42  ;;  %2237 = vmatmul.mubr.bf16.gmra.mrb[96].mxu1 %v3782_v43  ;;  %v3816_v42 = vld [vmem:[%s3941_s11 + $0x2e8] ss:$36 sps:$4 sm:$0xff]  }
  0xe8   : > { %2147 = vmatprep.mubr.bf16.mxu0 %v3784_v44  ;;  %2244 = vmatprep.mubr.bf16.mxu1 %v3786_v45  ;;  %v3817_v43 = vld [vmem:[%s3941_s11 + $0x188] ss:$36 sps:$4 sm:$0xff]  }
  0xef   : > { %2148 = vmatmul.mubr.bf16.gmra.mrb[100].mxu0 %v3788_v46  ;;  %2245 = vmatmul.mubr.bf16.gmra.mrb[100].mxu1 %v3789_v47 }
  0xf0   : > { %2155 = vmatprep.mubr.bf16.mxu0 %v3790_v48  ;;  %2252 = vmatprep.mubr.bf16.mxu1 %v3792_v49  ;;  %v3818_v48 = vld [vmem:[%s3941_s11 + $0x334] ss:$36 sps:$4 sm:$0xff]  }
  0xf1   : > { %v3820_v49 = vld [vmem:[%s3941_s11 + $0x1d0] ss:$36 sps:$4 sm:$0xff]  }
  0xf7   : > { %2156 = vmatmul.mubr.bf16.gmra.mrb[104].mxu0 %v3794_v50  ;;  %2253 = vmatmul.mubr.bf16.gmra.mrb[104].mxu1 %v3795_v51 }
  0xf8   : > { %2163 = vmatprep.mubr.bf16.mxu0 %v3797_v52  ;;  %2260 = vmatprep.mubr.bf16.mxu1 %v3799_v53 }
  0xfa   : > { %v3018_v54 = vpop.f32.mrb[0].mxu0  ;;  %v3090_v55 = vpop.f32.mrb[0].mxu1 }
  0xfb   : > { %v3019_v56 = vpop.f32.mrb[1].mxu0  ;;  %v3091_v57 = vpop.f32.mrb[1].mxu1 }
  0xfc   : > { %v4244_v60 = vadd.f32 %v3019_v56, %v3018_v54  ;;  %v4246_v61 = vadd.f32 %v3091_v57, %v3090_v55  ;;  %v3021_v62 = vpop.f32.mrb[2].mxu0  ;;  %v3093_v63 = vpop.f32.mrb[2].mxu1 }
  0xfd   : > { %v3022_v2 = vpop.f32.mrb[3].mxu0  ;;  %v3094_v3 = vpop.f32.mrb[3].mxu1 }
  0xfe   : > { %v4250_v4 = vadd.f32 %v3022_v2, %v3021_v62  ;;  %v4252_v5 = vadd.f32 %v3094_v3, %v3093_v63  ;;  %v3823_v2 = vld [vmem:[%s3941_s11 + $0x37c] ss:$36 sps:$4 sm:$0xff]  }
  0xff   : > { %2164 = vmatmul.mubr.bf16.gmra.mrb[108].mxu0 %v3801_v58  ;;  %2261 = vmatmul.mubr.bf16.gmra.mrb[108].mxu1 %v3802_v59  ;;  %v3821_v58 = vld [vmem:[%s3941_s11 + $0x330] ss:$36 sps:$4 sm:$0xff]   ;;  %v3822_v59 = vld [vmem:[%s3941_s11 + $0x218] ss:$36 sps:$4 sm:$0xff]   ;;  %v3825_v3 = vld [vmem:[%s3941_s11 + $0x260] ss:$36 sps:$4 sm:$0xff]  }
 0x100   : > { %2268 = vmatprep.mubr.bf16.mxu1 %v3803_v0  ;;  %3490 = vmatprep.mubr.bf16.mxu0 %v3805_v1 }
 0x102   : > { %v3024_v6 = vpop.f32.mrb[4].mxu0  ;;  %v3096_v7 = vpop.f32.mrb[4].mxu1 }
 0x103   : > { %v3025_v8 = vpop.f32.mrb[5].mxu0  ;;  %v3097_v9 = vpop.f32.mrb[5].mxu1 }
 0x104   : > { %v4256_v12 = vadd.f32 %v3025_v8, %v3024_v6  ;;  %v4258_v13 = vadd.f32 %v3097_v9, %v3096_v7  ;;  %v3027_v14 = vpop.f32.mrb[6].mxu0  ;;  %v3099_v15 = vpop.f32.mrb[6].mxu1 }
 0x105   : > { %v3028_v18 = vpop.f32.mrb[7].mxu0  ;;  %v3100_v19 = vpop.f32.mrb[7].mxu1 }
 0x106   : > { %v4262_v20 = vadd.f32 %v3028_v18, %v3027_v14  ;;  %v4264_v21 = vadd.f32 %v3100_v19, %v3099_v15  ;;  %v3826_v18 = vld [vmem:[%s3941_s11 + $0x378] ss:$36 sps:$4 sm:$0xff]   ;;  %v3827_v19 = vld [vmem:[%s3941_s11 + $0x2a8] ss:$36 sps:$4 sm:$0xff]  }
 0x107   : > { %2269 = vmatmul.mubr.bf16.gmra.mrb[112].mxu1 %v3806_v10  ;;  %3491 = vmatmul.mubr.bf16.vlgmr.msra.gmra.mrb[112].mxu0 %v3807_v11 }
 0x108   : > { %2276 = vmatprep.mubr.bf16.mxu1 %v3808_v16  ;;  %3494 = vmatprep.mubr.bf16.mxu0 %v3810_v17 }
 0x10a   : > { %v3030_v22 = vpop.f32.mrb[8].mxu0  ;;  %v3102_v23 = vpop.f32.mrb[8].mxu1 }
 0x10b   : > { %v3031_v24 = vpop.f32.mrb[9].mxu0  ;;  %v3103_v25 = vpop.f32.mrb[9].mxu1 }
 0x10c   : > { %v4268_v28 = vadd.f32 %v3031_v24, %v3030_v22  ;;  %v4270_v29 = vadd.f32 %v3103_v25, %v3102_v23  ;;  %v3033_v30 = vpop.f32.mrb[10].mxu0  ;;  %v3105_v31 = vpop.f32.mrb[10].mxu1  ;;  %v3828_v25 = vld [vmem:[%s3941_s11 + $0x3c4] ss:$36 sps:$4 sm:$0xff]  }
 0x10d   : > { %v3034_v34 = vpop.f32.mrb[11].mxu0  ;;  %v3106_v35 = vpop.f32.mrb[11].mxu1 }
 0x10e   : > { %v4274_v36 = vadd.f32 %v3034_v34, %v3033_v30  ;;  %v4276_v37 = vadd.f32 %v3106_v35, %v3105_v31 }
 0x10f   : > { %2277 = vmatmul.mubr.bf16.gmra.mrb[116].mxu1 %v3811_v26  ;;  %3495 = vmatmul.mubr.bf16.gmra.mrb[116].mxu0 %v3812_v27  ;;  %v3830_v26 = vld [vmem:[%s3941_s11 + $0x2f0] ss:$36 sps:$4 sm:$0xff]  }
 0x110   : > { %2284 = vmatprep.mubr.bf16.mxu1 %v3813_v32  ;;  %3498 = vmatprep.mubr.bf16.mxu0 %v3815_v33 }
 0x112   : > { %v3036_v38 = vpop.f32.mrb[12].mxu0  ;;  %v3108_v39 = vpop.f32.mrb[12].mxu1 }
 0x113   : > { %v3037_v40 = vpop.f32.mrb[13].mxu0  ;;  %v3109_v41 = vpop.f32.mrb[13].mxu1 }
 0x114   : > { %v4280_v44 = vadd.f32 %v3037_v40, %v3036_v38  ;;  %v4282_v45 = vadd.f32 %v3109_v41, %v3108_v39  ;;  %v3039_v46 = vpop.f32.mrb[14].mxu0  ;;  %v3111_v47 = vpop.f32.mrb[14].mxu1  ;;  %v3831_v40 = vld [vmem:[%s3941_s11 + $0x3c0] ss:$36 sps:$4 sm:$0xff]   ;;  %v3832_v41 = vld [vmem:[%s3941_s11 + $0x338] ss:$36 sps:$4 sm:$0xff]  }
 0x115   : > { %v3040_v50 = vpop.f32.mrb[15].mxu0  ;;  %v3112_v51 = vpop.f32.mrb[15].mxu1 }
 0x116   : > { %v4286_v52 = vadd.f32 %v3040_v50, %v3039_v46  ;;  %v4288_v53 = vadd.f32 %v3112_v51, %v3111_v47  ;;  %v3833_v47 = vld [vmem:[%s3941_s11 + $0x40c] ss:$36 sps:$4 sm:$0xff]  }
 0x117   : > { %2285 = vmatmul.mubr.bf16.gmra.mrb[120].mxu1 %v3816_v42  ;;  %3499 = vmatmul.mubr.bf16.gmra.mrb[120].mxu0 %v3817_v43 }
 0x118   : > { %2292 = vmatprep.mubr.bf16.mxu1 %v3818_v48  ;;  %3502 = vmatprep.mubr.bf16.mxu0 %v3820_v49  ;;  %v3835_v48 = vld [vmem:[%s3941_s11 + $0x380] ss:$36 sps:$4 sm:$0xff]  }
 0x11a   : > { %v3042_v54 = vpop.f32.mrb[16].mxu0  ;;  %v3130_v55 = vpop.f32.mrb[16].mxu1 }
 0x11b   : > { %v3043_v56 = vpop.f32.mrb[17].mxu0  ;;  %v3131_v57 = vpop.f32.mrb[17].mxu1 }
 0x11c   : > { %v4292_v62 = vadd.f32 %v3043_v56, %v3042_v54  ;;  %v3132_v63 = vadd.f32 %v3131_v57, %v3130_v55  ;;  %v3045_v0 = vpop.f32.mrb[18].mxu0  ;;  %v3133_v1 = vpop.f32.mrb[18].mxu1 }
 0x11d   : > { %v3046_v6 = vpop.f32.mrb[19].mxu0  ;;  %v3134_v7 = vpop.f32.mrb[19].mxu1 }
 0x11e   : > { %v4297_v8 = vadd.f32 %v3132_v63, %v4244_v60  ;;  %v4299_v9 = vadd.f32 %v3046_v6, %v3045_v0  ;;  %v3135_v10 = vadd.f32 %v3134_v7, %v3133_v1  ;;  %v3836_v63 = vld [vmem:[%s3941_s11 + $0x408] ss:$36 sps:$4 sm:$0xff]   ;;  %v3838_v6 = vld [vmem:[%s3941_s11 + $0x454] ss:$36 sps:$4 sm:$0xff]  }
 0x11f   : > { %2293 = vmatmul.mubr.bf16.gmra.mrb[124].mxu1 %v3821_v58  ;;  %3503 = vmatmul.mubr.bf16.gmra.mrb[124].mxu0 %v3822_v59  ;;  %v3837_v0 = vld [vmem:[%s3941_s11 + $0x3c8] ss:$36 sps:$4 sm:$0xff]   ;;  %v3840_v7 = vld [vmem:[%s3941_s11 + $0x410] ss:$36 sps:$4 sm:$0xff]  }
 0x120   : > { %v4302_v11 = vadd.f32 %v3135_v10, %v4250_v4  ;;  %2300 = vmatprep.mubr.bf16.mxu1 %v3823_v2  ;;  %3506 = vmatprep.mubr.bf16.mxu0 %v3825_v3 }
 0x122   : > { %v3048_v14 = vpop.f32.mrb[20].mxu0  ;;  %v3136_v15 = vpop.f32.mrb[20].mxu1 }
 0x123   : > { %v3049_v16 = vpop.f32.mrb[21].mxu0  ;;  %v3137_v17 = vpop.f32.mrb[21].mxu1 }
 0x124   : > { %v4306_v60 = vadd.f32 %v3049_v16, %v3048_v14  ;;  %v3138_v22 = vadd.f32 %v3137_v17, %v3136_v15  ;;  %v3051_v23 = vpop.f32.mrb[22].mxu0  ;;  %v3139_v24 = vpop.f32.mrb[22].mxu1 }
 0x125   : > { %v3052_v27 = vpop.f32.mrb[23].mxu0  ;;  %v3140_v4 = vpop.f32.mrb[23].mxu1 }
 0x126   : > { %v4311_v30 = vadd.f32 %v3138_v22, %v4256_v12  ;;  %v4313_v31 = vadd.f32 %v3052_v27, %v3051_v23  ;;  %v3141_v32 = vadd.f32 %v3140_v4, %v3139_v24  ;;  %v3841_v24 = vld [vmem:[%s3941_s11 + $0x450] ss:$36 sps:$4 sm:$0xff]  }
 0x127   : > { %2301 = vmatmul.mubr.bf16.gmra.mrb[128].mxu1 %v3826_v18  ;;  %3507 = vmatmul.mubr.bf16.gmra.mrb[128].mxu0 %v3827_v19 }
 0x128   : > { %v4316_v33 = vadd.f32 %v3141_v32, %v4262_v20  ;;  %2308 = vmatprep.mubr.bf16.mxu1 %v3828_v25  ;;  %3510 = vmatprep.mubr.bf16.mxu0 %v3830_v26  ;;  %v3842_v25 = vld [vmem:[%s3941_s11 + $0x458] ss:$36 sps:$4 sm:$0xff]   ;;  %s2782_s11 = sshll.u32 %s4685_s18, 3  ;;  %s2783_s18 = sshll.u32 %s4687_s12, 3 }
 0x129   : > { %s4578_s19 = scalar_lea.vmem %s4678_s2, %s2782_s11  ;;  %s215_s22 = scalar_lea.vmem %s4679_s3, %s2783_s18 }
 0x12a   : > { %v3054_v34 = vpop.f32.mrb[24].mxu0  ;;  %v3142_v35 = vpop.f32.mrb[24].mxu1 }
 0x12b   : > { %v3055_v38 = vpop.f32.mrb[25].mxu0  ;;  %v3143_v39 = vpop.f32.mrb[25].mxu1 }
 0x12c   : > { %v4320_v12 = vadd.f32 %v3055_v38, %v3054_v34  ;;  %v3144_v42 = vadd.f32 %v3143_v39, %v3142_v35  ;;  %v3057_v43 = vpop.f32.mrb[26].mxu0  ;;  %v3145_v46 = vpop.f32.mrb[26].mxu1 }
 0x12d   : > { %v3058_v49 = vpop.f32.mrb[27].mxu0  ;;  %v3146_v20 = vpop.f32.mrb[27].mxu1 }
 0x12e   : > { %v4325_v50 = vadd.f32 %v3144_v42, %v4268_v28  ;;  %v4327_v51 = vadd.f32 %v3058_v49, %v3057_v43  ;;  %v3147_v54 = vadd.f32 %v3146_v20, %v3145_v46 }
 0x12f   : > { %2309 = vmatmul.mubr.bf16.gmra.mrb[132].mxu1 %v3831_v40  ;;  %3511 = vmatmul.mubr.bf16.gmra.mrb[132].mxu0 %v3832_v41 }
 0x130   : > { %v4330_v55 = vadd.f32 %v3147_v54, %v4274_v36  ;;  %2316 = vmatprep.mubr.bf16.mxu1 %v3833_v47  ;;  %3514 = vmatprep.mubr.bf16.mxu0 %v3835_v48 }
 0x132   : > { %v3060_v56 = vpop.f32.mrb[28].mxu0  ;;  %v3148_v57 = vpop.f32.mrb[28].mxu1 }
 0x133   : > { %v3061_v58 = vpop.f32.mrb[29].mxu0  ;;  %v3149_v59 = vpop.f32.mrb[29].mxu1 }
 0x134   : > { %v4334_v28 = vadd.f32 %v3061_v58, %v3060_v56  ;;  %v3150_v1 = vadd.f32 %v3149_v59, %v3148_v57  ;;  %v3063_v2 = vpop.f32.mrb[30].mxu0  ;;  %v3151_v3 = vpop.f32.mrb[30].mxu1 }
 0x135   : > { %v3064_v10 = vpop.f32.mrb[31].mxu0  ;;  %v3152_v36 = vpop.f32.mrb[31].mxu1 }
 0x136   : > { %v4339_v14 = vadd.f32 %v3150_v1, %v4280_v44  ;;  %v4341_v15 = vadd.f32 %v3064_v10, %v3063_v2  ;;  %v3153_v16 = vadd.f32 %v3152_v36, %v3151_v3 }
 0x137   : > { %2317 = vmatmul.mubr.bf16.gmra.mrb[136].mxu1 %v3836_v63  ;;  %3515 = vmatmul.mubr.bf16.gmra.mrb[136].mxu0 %v3837_v0 }
 0x138   : > { %v4344_v17 = vadd.f32 %v3153_v16, %v4286_v52  ;;  %2324 = vmatprep.mubr.bf16.mxu1 %v3838_v6  ;;  %3518 = vmatprep.mubr.bf16.mxu0 %v3840_v7 }
 0x13a   : > { %v3066_v18 = vpop.f32.mrb[32].mxu0  ;;  %v3154_v19 = vpop.f32.mrb[32].mxu1 }
 0x13b   : > { %v3067_v22 = vpop.f32.mrb[33].mxu0  ;;  %v3155_v23 = vpop.f32.mrb[33].mxu1 }
 0x13c   : > { %v4348_v26 = vadd.f32 %v3067_v22, %v3066_v18  ;;  %v3156_v44 = vadd.f32 %v3155_v23, %v3154_v19  ;;  %v3069_v27 = vpop.f32.mrb[34].mxu0  ;;  %v3157_v4 = vpop.f32.mrb[34].mxu1 }
 0x13d   : > { %v3070_v32 = vpop.f32.mrb[35].mxu0  ;;  %v3158_v34 = vpop.f32.mrb[35].mxu1 }
 0x13e   : > { %v4351_v35 = vadd.f32 %v3156_v44, %v4292_v62  ;;  %v3071_v52 = vadd.f32 %v3070_v32, %v3069_v27  ;;  %v3159_v38 = vadd.f32 %v3158_v34, %v3157_v4 }
 0x13f   : > { %2325 = vmatmul.mubr.bf16.gmra.mrb[140].mxu1 %v3841_v24  ;;  %3519 = vmatmul.mubr.bf16.gmra.mrb[140].mxu0 %v3842_v25 }
 0x140   : > { %v4354_v39 = vadd.f32 %v3159_v38, %v4299_v9 }
 0x142   : > { %v3072_v40 = vpop.f32.mrb[36].mxu0  ;;  %v3160_v41 = vpop.f32.mrb[36].mxu1 }
 0x143   : > { %v3073_v42 = vpop.f32.mrb[37].mxu0  ;;  %v3161_v43 = vpop.f32.mrb[37].mxu1 }
 0x144   : > { %v4356_v46 = vadd.f32 %v3073_v42, %v3072_v40  ;;  %v3162_v47 = vadd.f32 %v3161_v43, %v3160_v41  ;;  %v3075_v48 = vpop.f32.mrb[38].mxu0  ;;  %v3163_v49 = vpop.f32.mrb[38].mxu1 }
 0x145   : > { %v3076_v20 = vpop.f32.mrb[39].mxu0  ;;  %v3164_v54 = vpop.f32.mrb[39].mxu1 }
 0x146   : > { %v4359_v62 = vadd.f32 %v3162_v47, %v4306_v60  ;;  %v3077_v56 = vadd.f32 %v3076_v20, %v3075_v48  ;;  %v3165_v57 = vadd.f32 %v3164_v54, %v3163_v49 }
 0x148   : > { %v4362_v58 = vadd.f32 %v3165_v57, %v4313_v31 }
 0x14a   : > { %v3078_v9 = vpop.f32.mrb[40].mxu0  ;;  %v3166_v59 = vpop.f32.mrb[40].mxu1 }
 0x14b   : > { %v3079_v63 = vpop.f32.mrb[41].mxu0  ;;  %v3167_v0 = vpop.f32.mrb[41].mxu1 }
 0x14c   : > { %v4364_v1 = vadd.f32 %v3079_v63, %v3078_v9  ;;  %v3168_v2 = vadd.f32 %v3167_v0, %v3166_v59  ;;  %v3081_v3 = vpop.f32.mrb[42].mxu0  ;;  %v3169_v6 = vpop.f32.mrb[42].mxu1 }
 0x14d   : > { %v3082_v7 = vpop.f32.mrb[43].mxu0  ;;  %v3170_v10 = vpop.f32.mrb[43].mxu1 }
 0x14e   : > { %v4367_v36 = vadd.f32 %v3168_v2, %v4320_v12  ;;  %v4369_v60 = vadd.f32 %v3082_v7, %v3081_v3  ;;  %v3171_v16 = vadd.f32 %v3170_v10, %v3169_v6 }
 0x150   : > { %v4372_v31 = vadd.f32 %v3171_v16, %v4327_v51 }
 0x152   : > { %v3084_v18 = vpop.f32.mrb[44].mxu0  ;;  %v3172_v19 = vpop.f32.mrb[44].mxu1 }
 0x153   : > { %v3085_v22 = vpop.f32.mrb[45].mxu0  ;;  %v3173_v23 = vpop.f32.mrb[45].mxu1 }
 0x154   : > { %v4374_v24 = vadd.f32 %v3085_v22, %v3084_v18  ;;  %v3174_v25 = vadd.f32 %v3173_v23, %v3172_v19  ;;  %v3087_v44 = vpop.f32.mrb[46].mxu0  ;;  %v3175_v27 = vpop.f32.mrb[46].mxu1 }
 0x155   : > { %v3088_v4 = vpop.f32.mrb[47].mxu0  ;;  %v3176_v32 = vpop.f32.mrb[47].mxu1 }
 0x156   : > { %v4377_v12 = vadd.f32 %v3174_v25, %v4334_v28  ;;  %v4379_v34 = vadd.f32 %v3088_v4, %v3087_v44  ;;  %v3177_v38 = vadd.f32 %v3176_v32, %v3175_v27 }
 0x158   : > { %v4382_v51 = vadd.f32 %v3177_v38, %v4341_v15 }
 0x15a   : > { %v3178_v40 = vpop.f32.mrb[48].mxu1  ;;  %v3242_v41 = vpop.f32.mrb[48].mxu0 }
 0x15b   : > { %v3179_v42 = vpop.f32.mrb[49].mxu1  ;;  %v3243_v43 = vpop.f32.mrb[49].mxu0 }
 0x15c   : > { %v3180_v47 = vadd.f32 %v3179_v42, %v3178_v40  ;;  %v3244_v48 = vadd.f32 %v3243_v43, %v3242_v41  ;;  %v3181_v49 = vpop.f32.mrb[50].mxu1  ;;  %v3245_v20 = vpop.f32.mrb[50].mxu0 }
 0x15d   : > { %v3182_v54 = vpop.f32.mrb[51].mxu1  ;;  %v3246_v57 = vpop.f32.mrb[51].mxu0 }
 0x15e   : > { %v4385_v9 = vadd.f32 %v3180_v47, %v4348_v26  ;;  %v4388_v28 = vadd.f32 %v3244_v48, %v4297_v8  ;;  %v3183_v59 = vadd.f32 %v3182_v54, %v3181_v49  ;;  %v3247_v63 = vadd.f32 %v3246_v57, %v3245_v20 }
 0x160   : > { %v4390_v15 = vadd.f32 %v3183_v59, %v3071_v52  ;;  %v4393_v0 = vadd.f32 %v3247_v63, %v4302_v11 }
 0x162   : > { %v3184_v2 = vpop.f32.mrb[52].mxu1  ;;  %v3248_v3 = vpop.f32.mrb[52].mxu0 }
 0x163   : > { %v3185_v6 = vpop.f32.mrb[53].mxu1  ;;  %v3249_v7 = vpop.f32.mrb[53].mxu0 }
 0x164   : > { %v3186_v10 = vadd.f32 %v3185_v6, %v3184_v2  ;;  %v3250_v16 = vadd.f32 %v3249_v7, %v3248_v3  ;;  %v3187_v18 = vpop.f32.mrb[54].mxu1  ;;  %v3251_v19 = vpop.f32.mrb[54].mxu0 }
 0x165   : > { %v3188_v26 = vpop.f32.mrb[55].mxu1  ;;  %v3252_v22 = vpop.f32.mrb[55].mxu0 }
 0x166   : > { %v4396_v8 = vadd.f32 %v3186_v10, %v4356_v46  ;;  %v4399_v23 = vadd.f32 %v3250_v16, %v4311_v30  ;;  %v3189_v52 = vadd.f32 %v3188_v26, %v3187_v18  ;;  %v3253_v25 = vadd.f32 %v3252_v22, %v3251_v19 }
 0x168   : > { %v4401_v11 = vadd.f32 %v3189_v52, %v3077_v56  ;;  %v4404_v44 = vadd.f32 %v3253_v25, %v4316_v33 }
 0x16a   : > { %v3190_v27 = vpop.f32.mrb[56].mxu1  ;;  %v3254_v4 = vpop.f32.mrb[56].mxu0 }
 0x16b   : > { %v3191_v32 = vpop.f32.mrb[57].mxu1  ;;  %v3255_v38 = vpop.f32.mrb[57].mxu0 }
 0x16c   : > { %v3192_v40 = vadd.f32 %v3191_v32, %v3190_v27  ;;  %v3256_v41 = vadd.f32 %v3255_v38, %v3254_v4  ;;  %v3193_v42 = vpop.f32.mrb[58].mxu1  ;;  %v3257_v43 = vpop.f32.mrb[58].mxu0 }
 0x16d   : > { %v3194_v46 = vpop.f32.mrb[59].mxu1  ;;  %v3258_v47 = vpop.f32.mrb[59].mxu0 }
 0x16e   : > { %v4407_v30 = vadd.f32 %v3192_v40, %v4364_v1  ;;  %v4410_v48 = vadd.f32 %v3256_v41, %v4325_v50  ;;  %v3195_v56 = vadd.f32 %v3194_v46, %v3193_v42  ;;  %v3259_v49 = vadd.f32 %v3258_v47, %v3257_v43 }
 0x170   : > { %v4413_v33 = vadd.f32 %v3195_v56, %v4369_v60  ;;  %v4416_v20 = vadd.f32 %v3259_v49, %v4330_v55 }
 0x172   : > { %v3196_v54 = vpop.f32.mrb[60].mxu1  ;;  %v3260_v57 = vpop.f32.mrb[60].mxu0 }
 0x173   : > { %v3197_v59 = vpop.f32.mrb[61].mxu1  ;;  %v3261_v63 = vpop.f32.mrb[61].mxu0 }
 0x174   : > { %v3198_v2 = vadd.f32 %v3197_v59, %v3196_v54  ;;  %v3262_v3 = vadd.f32 %v3261_v63, %v3260_v57  ;;  %v3199_v6 = vpop.f32.mrb[62].mxu1  ;;  %v3263_v1 = vpop.f32.mrb[62].mxu0 }
 0x175   : > { %v3200_v7 = vpop.f32.mrb[63].mxu1  ;;  %v3264_v10 = vpop.f32.mrb[63].mxu0 }
 0x176   : > { %v4419_v50 = vadd.f32 %v3198_v2, %v4374_v24  ;;  %v4422_v16 = vadd.f32 %v3262_v3, %v4339_v14  ;;  %v3201_v60 = vadd.f32 %v3200_v7, %v3199_v6  ;;  %v3265_v18 = vadd.f32 %v3264_v10, %v3263_v1 }
 0x178   : > { %v4425_v55 = vadd.f32 %v3201_v60, %v4379_v34  ;;  %v4428_v19 = vadd.f32 %v3265_v18, %v4344_v17 }
 0x17a   : > { %v3202_v26 = vpop.f32.mrb[64].mxu1  ;;  %v3266_v22 = vpop.f32.mrb[64].mxu0 }
 0x17b   : > { %v3203_v52 = vpop.f32.mrb[65].mxu1  ;;  %v3267_v25 = vpop.f32.mrb[65].mxu0 }
 0x17c   : > { %v3204_v27 = vadd.f32 %v3203_v52, %v3202_v26  ;;  %v3268_v4 = vadd.f32 %v3267_v25, %v3266_v22  ;;  %v3205_v32 = vpop.f32.mrb[66].mxu1  ;;  %v3269_v24 = vpop.f32.mrb[66].mxu0 }
 0x17d   : > { %v3206_v38 = vpop.f32.mrb[67].mxu1  ;;  %v3270_v40 = vpop.f32.mrb[67].mxu0 }
 0x17e   : > { %v4431_v14 = vadd.f32 %v3204_v27, %v4246_v61  ;;  %v4434_v41 = vadd.f32 %v3268_v4, %v4351_v35  ;;  %v3207_v34 = vadd.f32 %v3206_v38, %v3205_v32  ;;  %v3271_v42 = vadd.f32 %v3270_v40, %v3269_v24 }
 0x180   : > { %v4437_v17 = vadd.f32 %v3207_v34, %v4252_v5  ;;  %v4440_v43 = vadd.f32 %v3271_v42, %v4354_v39 }
 0x182   : > { %v3208_v46 = vpop.f32.mrb[68].mxu1  ;;  %v3272_v47 = vpop.f32.mrb[68].mxu0 }
 0x183   : > { %v3209_v56 = vpop.f32.mrb[69].mxu1  ;;  %v3273_v49 = vpop.f32.mrb[69].mxu0 }
 0x184   : > { %v3210_v54 = vadd.f32 %v3209_v56, %v3208_v46  ;;  %v3274_v57 = vadd.f32 %v3273_v49, %v3272_v47  ;;  %v3211_v59 = vpop.f32.mrb[70].mxu1  ;;  %v3275_v61 = vpop.f32.mrb[70].mxu0 }
 0x185   : > { %v3212_v63 = vpop.f32.mrb[71].mxu1  ;;  %v3276_v2 = vpop.f32.mrb[71].mxu0 }
 0x186   : > { %v4443_v35 = vadd.f32 %v3210_v54, %v4258_v13  ;;  %v4446_v3 = vadd.f32 %v3274_v57, %v4359_v62  ;;  %v3213_v5 = vadd.f32 %v3212_v63, %v3211_v59  ;;  %v3277_v6 = vadd.f32 %v3276_v2, %v3275_v61 }
 0x188   : > { %v4449_v39 = vadd.f32 %v3213_v5, %v4264_v21  ;;  %v4452_v1 = vadd.f32 %v3277_v6, %v4362_v58 }
 0x18a   : > { %v3214_v7 = vpop.f32.mrb[72].mxu1  ;;  %v3278_v10 = vpop.f32.mrb[72].mxu0 }
 0x18b   : > { %v3215_v60 = vpop.f32.mrb[73].mxu1  ;;  %v3279_v18 = vpop.f32.mrb[73].mxu0 }
 0x18c   : > { %v3216_v26 = vadd.f32 %v3215_v60, %v3214_v7  ;;  %v3280_v22 = vadd.f32 %v3279_v18, %v3278_v10  ;;  %v3217_v52 = vpop.f32.mrb[74].mxu1  ;;  %v3281_v13 = vpop.f32.mrb[74].mxu0 }
 0x18d   : > { %v3218_v25 = vpop.f32.mrb[75].mxu1  ;;  %v3282_v27 = vpop.f32.mrb[75].mxu0 }
 0x18e   : > { %v4455_v62 = vadd.f32 %v3216_v26, %v4270_v29  ;;  %v4458_v4 = vadd.f32 %v3280_v22, %v4367_v36  ;;  %v3219_v21 = vadd.f32 %v3218_v25, %v3217_v52  ;;  %v3283_v32 = vadd.f32 %v3282_v27, %v3281_v13 }
 0x190   : > { %v4461_v58 = vadd.f32 %v3219_v21, %v4276_v37  ;;  %v4464_v24 = vadd.f32 %v3283_v32, %v4372_v31 }
 0x192   : > { %v3220_v38 = vpop.f32.mrb[76].mxu1  ;;  %v3284_v40 = vpop.f32.mrb[76].mxu0 }
 0x193   : > { %v3221_v34 = vpop.f32.mrb[77].mxu1  ;;  %v3285_v42 = vpop.f32.mrb[77].mxu0 }
 0x194   : > { %v3222_v46 = vadd.f32 %v3221_v34, %v3220_v38  ;;  %v3286_v47 = vadd.f32 %v3285_v42, %v3284_v40  ;;  %v3223_v56 = vpop.f32.mrb[78].mxu1  ;;  %v3287_v29 = vpop.f32.mrb[78].mxu0 }
 0x195   : > { %v3224_v49 = vpop.f32.mrb[79].mxu1  ;;  %v3288_v54 = vpop.f32.mrb[79].mxu0 }
 0x196   : > { %v4467_v36 = vadd.f32 %v3222_v46, %v4282_v45  ;;  %v4470_v57 = vadd.f32 %v3286_v47, %v4377_v12  ;;  %v3225_v37 = vadd.f32 %v3224_v49, %v3223_v56  ;;  %v3289_v59 = vadd.f32 %v3288_v54, %v3287_v29 }
 0x198   : > { %v4473_v31 = vadd.f32 %v3225_v37, %v4288_v53  ;;  %v4476_v61 = vadd.f32 %v3289_v59, %v4382_v51 }
 0x19a   : > { %v3290_v63 = vpop.f32.mrb[80].mxu0  ;;  %v3354_v2 = vpop.f32.mrb[80].mxu1 }
 0x19b   : > { %v3291_v5 = vpop.f32.mrb[81].mxu0  ;;  %v3355_v6 = vpop.f32.mrb[81].mxu1 }
 0x19c   : > { %v3292_v7 = vadd.f32 %v3291_v5, %v3290_v63  ;;  %v3356_v10 = vadd.f32 %v3355_v6, %v3354_v2  ;;  %v3293_v60 = vpop.f32.mrb[82].mxu0  ;;  %v3357_v45 = vpop.f32.mrb[82].mxu1 }
 0x19d   : > { %v3294_v18 = vpop.f32.mrb[83].mxu0  ;;  %v3358_v26 = vpop.f32.mrb[83].mxu1 }
 0x19e   : > { %v4479_v12 = vadd.f32 %v3292_v7, %v4385_v9  ;;  %v3295_v22 = vadd.f32 %v3294_v18, %v3293_v60  ;;  %v3359_v52 = vadd.f32 %v3358_v26, %v3357_v45  ;;  %v4482_v53 = vadd.f32 %v3356_v10, %v4388_v28 }
 0x1a0   : > { %v4485_v51 = vadd.f32 %v3295_v22, %v4390_v15  ;;  %v4488_v13 = vadd.f32 %v3359_v52, %v4393_v0 }
 0x1a2   : > { %v3296_v25 = vpop.f32.mrb[84].mxu0  ;;  %v3360_v27 = vpop.f32.mrb[84].mxu1 }
 0x1a3   : > { %v3297_v21 = vpop.f32.mrb[85].mxu0  ;;  %v3361_v32 = vpop.f32.mrb[85].mxu1 }
 0x1a4   : > { %v3298_v38 = vadd.f32 %v3297_v21, %v3296_v25  ;;  %v3362_v40 = vadd.f32 %v3361_v32, %v3360_v27  ;;  %v3299_v34 = vpop.f32.mrb[86].mxu0  ;;  %v3363_v9 = vpop.f32.mrb[86].mxu1 }
 0x1a5   : > { %v3300_v42 = vpop.f32.mrb[87].mxu0  ;;  %v3364_v46 = vpop.f32.mrb[87].mxu1 }
 0x1a6   : > { %v4491_v47 = vadd.f32 %v3298_v38, %v4396_v8  ;;  %v3301_v28 = vadd.f32 %v3300_v42, %v3299_v34  ;;  %v3365_v56 = vadd.f32 %v3364_v46, %v3363_v9  ;;  %v4494_v15 = vadd.f32 %v3362_v40, %v4399_v23 }
 0x1a8   : > { %v4497_v0 = vadd.f32 %v3301_v28, %v4401_v11  ;;  %v4500_v29 = vadd.f32 %v3365_v56, %v4404_v44 }
 0x1aa   : > { %v3302_v49 = vpop.f32.mrb[88].mxu0  ;;  %v3366_v54 = vpop.f32.mrb[88].mxu1 }
 0x1ab   : > { %v3303_v37 = vpop.f32.mrb[89].mxu0  ;;  %v3367_v59 = vpop.f32.mrb[89].mxu1 }
 0x1ac   : > { %v3304_v63 = vadd.f32 %v3303_v37, %v3302_v49  ;;  %v3368_v2 = vadd.f32 %v3367_v59, %v3366_v54  ;;  %v3305_v5 = vpop.f32.mrb[90].mxu0  ;;  %v3369_v8 = vpop.f32.mrb[90].mxu1 }
 0x1ad   : > { %v3306_v6 = vpop.f32.mrb[91].mxu0  ;;  %v3370_v7 = vpop.f32.mrb[91].mxu1 }
 0x1ae   : > { %v4503_v10 = vadd.f32 %v3304_v63, %v4407_v30  ;;  %v3307_v23 = vadd.f32 %v3306_v6, %v3305_v5  ;;  %v3371_v60 = vadd.f32 %v3370_v7, %v3369_v8  ;;  %v4506_v11 = vadd.f32 %v3368_v2, %v4410_v48 }
 0x1b0   : > { %v4509_v44 = vadd.f32 %v3307_v23, %v4413_v33  ;;  %v4512_v45 = vadd.f32 %v3371_v60, %v4416_v20 }
 0x1b2   : > { %v3308_v18 = vpop.f32.mrb[92].mxu0  ;;  %v3372_v26 = vpop.f32.mrb[92].mxu1 }
 0x1b3   : > { %v3309_v22 = vpop.f32.mrb[93].mxu0  ;;  %v3373_v52 = vpop.f32.mrb[93].mxu1 }
 0x1b4   : > { %v3310_v25 = vadd.f32 %v3309_v22, %v3308_v18  ;;  %v3374_v27 = vadd.f32 %v3373_v52, %v3372_v26  ;;  %v3311_v21 = vpop.f32.mrb[94].mxu0  ;;  %v3375_v30 = vpop.f32.mrb[94].mxu1 }
 0x1b5   : > { %v3312_v32 = vpop.f32.mrb[95].mxu0  ;;  %v3376_v38 = vpop.f32.mrb[95].mxu1 }
 0x1b6   : > { %v4515_v40 = vadd.f32 %v3310_v25, %v4419_v50  ;;  %v3313_v48 = vadd.f32 %v3312_v32, %v3311_v21  ;;  %v3377_v34 = vadd.f32 %v3376_v38, %v3375_v30  ;;  %v4518_v33 = vadd.f32 %v3374_v27, %v4422_v16 }
 0x1b8   : > { %v4521_v20 = vadd.f32 %v3313_v48, %v4425_v55  ;;  %v4524_v9 = vadd.f32 %v3377_v34, %v4428_v19 }
 0x1ba   : > { %v3314_v42 = vpop.f32.mrb[96].mxu0  ;;  %v3378_v46 = vpop.f32.mrb[96].mxu1 }
 0x1bb   : > { %v3315_v28 = vpop.f32.mrb[97].mxu0  ;;  %v3379_v56 = vpop.f32.mrb[97].mxu1 }
 0x1bc   : > { %v3316_v49 = vadd.f32 %v3315_v28, %v3314_v42  ;;  %v3380_v54 = vadd.f32 %v3379_v56, %v3378_v46  ;;  %v3317_v37 = vpop.f32.mrb[98].mxu0  ;;  %v3381_v50 = vpop.f32.mrb[98].mxu1 }
 0x1bd   : > { %v3318_v59 = vpop.f32.mrb[99].mxu0  ;;  %v3382_v63 = vpop.f32.mrb[99].mxu1 }
 0x1be   : > { %v4527_v2 = vadd.f32 %v3316_v49, %v4431_v14  ;;  %v3319_v16 = vadd.f32 %v3318_v59, %v3317_v37  ;;  %v3383_v5 = vadd.f32 %v3382_v63, %v3381_v50  ;;  %v4530_v55 = vadd.f32 %v3380_v54, %v4434_v41 }
 0x1c0   : > { %v4533_v19 = vadd.f32 %v3319_v16, %v4437_v17  ;;  %v4536_v8 = vadd.f32 %v3383_v5, %v4440_v43 }
 0x1c2   : > { %v3320_v6 = vpop.f32.mrb[100].mxu0  ;;  %v3384_v7 = vpop.f32.mrb[100].mxu1 }
 0x1c3   : > { %v3321_v23 = vpop.f32.mrb[101].mxu0  ;;  %v3385_v60 = vpop.f32.mrb[101].mxu1 }
 0x1c4   : > { %v3322_v18 = vadd.f32 %v3321_v23, %v3320_v6  ;;  %v3386_v26 = vadd.f32 %v3385_v60, %v3384_v7  ;;  %v3323_v22 = vpop.f32.mrb[102].mxu0  ;;  %v3387_v14 = vpop.f32.mrb[102].mxu1 }
 0x1c5   : > { %v3324_v52 = vpop.f32.mrb[103].mxu0  ;;  %v3388_v25 = vpop.f32.mrb[103].mxu1 }
 0x1c6   : > { %v4539_v27 = vadd.f32 %v3322_v18, %v4443_v35  ;;  %v3325_v41 = vadd.f32 %v3324_v52, %v3323_v22  ;;  %v3389_v21 = vadd.f32 %v3388_v25, %v3387_v14  ;;  %v4542_v17 = vadd.f32 %v3386_v26, %v4446_v3 }
 0x1c8   : > { %v4545_v43 = vadd.f32 %v3325_v41, %v4449_v39  ;;  %v4548_v30 = vadd.f32 %v3389_v21, %v4452_v1 }
 0x1ca   : > { %v3326_v32 = vpop.f32.mrb[104].mxu0  ;;  %v3390_v38 = vpop.f32.mrb[104].mxu1 }
 0x1cb   : > { %v3327_v48 = vpop.f32.mrb[105].mxu0  ;;  %v3391_v34 = vpop.f32.mrb[105].mxu1 }
 0x1cc   : > { %v3328_v42 = vadd.f32 %v3327_v48, %v3326_v32  ;;  %v3392_v46 = vadd.f32 %v3391_v34, %v3390_v38  ;;  %v3329_v28 = vpop.f32.mrb[106].mxu0  ;;  %v3393_v35 = vpop.f32.mrb[106].mxu1 }
 0x1cd   : > { %v3330_v56 = vpop.f32.mrb[107].mxu0  ;;  %v3394_v49 = vpop.f32.mrb[107].mxu1 }
 0x1ce   : > { %v4551_v54 = vadd.f32 %v3328_v42, %v4455_v62  ;;  %v3331_v3 = vadd.f32 %v3330_v56, %v3329_v28  ;;  %v3395_v37 = vadd.f32 %v3394_v49, %v3393_v35  ;;  %v4554_v39 = vadd.f32 %v3392_v46, %v4458_v4 }
 0x1d0   : > { %v4557_v1 = vadd.f32 %v3331_v3, %v4461_v58  ;;  %v4560_v50 = vadd.f32 %v3395_v37, %v4464_v24 }
 0x1d2   : > { %v3332_v59 = vpop.f32.mrb[108].mxu0  ;;  %v3396_v63 = vpop.f32.mrb[108].mxu1 }
 0x1d3   : > { %v3333_v16 = vpop.f32.mrb[109].mxu0  ;;  %v3397_v5 = vpop.f32.mrb[109].mxu1 }
 0x1d4   : > { %v3334_v6 = vadd.f32 %v3333_v16, %v3332_v59  ;;  %v3398_v7 = vadd.f32 %v3397_v5, %v3396_v63  ;;  %v3335_v62 = vpop.f32.mrb[110].mxu0  ;;  %v3399_v23 = vpop.f32.mrb[110].mxu1 }
 0x1d5   : > { %v3336_v60 = vpop.f32.mrb[111].mxu0  ;;  %v3400_v18 = vpop.f32.mrb[111].mxu1 }
 0x1d6   : > { %v4563_v4 = vadd.f32 %v3334_v6, %v4467_v36  ;;  %v3337_v26 = vadd.f32 %v3336_v60, %v3335_v62  ;;  %v3401_v58 = vadd.f32 %v3400_v18, %v3399_v23  ;;  %v4566_v22 = vadd.f32 %v3398_v7, %v4470_v57 }
 0x1d8   : > { %v4570_v24 = vadd.f32 %v3337_v26, %v4473_v31  ;;  %v4573_v14 = vadd.f32 %v3401_v58, %v4476_v61 }
 0x1da   : > { %v3402_v52 = vpop.f32.mrb[112].mxu1  ;;  %v3492_v36 = vpop.f32.mrb[112].mxu0 }
 0x1db   : > { %v2376_v57 = vadd.f32 %v3492_v36, %v4494_v15  ;;  %v3403_v25 = vpop.f32.mrb[113].mxu1  ;;  %v2367_v41 = vpop.f32.mrb[113].mxu0 }
 0x1dc   : > { %v3404_v31 = vadd.f32 %v3403_v25, %v3402_v52  ;;  %v2368_v21 = vadd.f32 %v2367_v41, %v4482_v53  ;;  %v3405_v61 = vpop.f32.mrb[114].mxu1  ;;  %v3493_v32 = vpop.f32.mrb[114].mxu0 }
 0x1dd   : > { %2496 = vst [vmem:[%s4578_s19 + $0x10] sm:$0xff] %v2376_v57  ;;  %v2379_v38 = vadd.f32 %v3493_v32, %v4500_v29  ;;  %v3406_v48 = vpop.f32.mrb[115].mxu1  ;;  %v2370_v34 = vpop.f32.mrb[115].mxu0  ;;  %v2597_v49 = vmul.f32 %v2376_v57, %v2376_v57 }
 0x1de   : > { %2494 = vst [vmem:[%s4578_s19] sm:$0xff] %v2368_v21  ;;  %v3407_v42 = vadd.f32 %v3406_v48, %v3405_v61  ;;  %v2371_v46 = vadd.f32 %v2370_v34, %v4488_v13  ;;  %v4587_v28 = vadd.f32 %v3404_v31, %v4479_v12  ;;  %v2595_v15 = vmul.f32 %v2368_v21, %v2368_v21 }
 0x1df   : > { %2497 = vst [vmem:[%s4578_s19 + $0x18] sm:$0xff] %v2379_v38  ;;  %v2598_v63 = vmul.f32 %v2379_v38, %v2379_v38 }
 0x1e0   : > { %2495 = vst [vmem:[%s4578_s19 + $0x8] sm:$0xff] %v2371_v46  ;;  %v2558_v35 = vadd.f32 %v2371_v46, %v2368_v21  ;;  %v2596_v56 = vmul.f32 %v2371_v46, %v2371_v46  ;;  %v4592_v53 = vadd.f32 %v3407_v42, %v4485_v51 }
 0x1e2   : > { %v2559_v29 = vadd.f32 %v2558_v35, %v2376_v57  ;;  %v2627_v3 = vadd.f32 %v2596_v56, %v2595_v15  ;;  %v3408_v37 = vpop.f32.mrb[116].mxu1  ;;  %v3496_v59 = vpop.f32.mrb[116].mxu0 }
 0x1e3   : > { %v2392_v13 = vadd.f32 %v3496_v59, %v4518_v33  ;;  %v3409_v12 = vpop.f32.mrb[117].mxu1  ;;  %v2383_v16 = vpop.f32.mrb[117].mxu0 }
 0x1e4   : > { %v2628_v5 = vadd.f32 %v2627_v3, %v2597_v49  ;;  %v3410_v6 = vadd.f32 %v3409_v12, %v3408_v37  ;;  %v2384_v7 = vadd.f32 %v2383_v16, %v4506_v11  ;;  %v2560_v62 = vadd.f32 %v2559_v29, %v2379_v38  ;;  %v3411_v51 = vpop.f32.mrb[118].mxu1  ;;  %v3497_v23 = vpop.f32.mrb[118].mxu0 }
 0x1e5   : > { %2500 = vst [vmem:[%s4578_s19 + $0x30] sm:$0xff] %v2392_v13  ;;  %v2395_v60 = vadd.f32 %v3497_v23, %v4524_v9  ;;  %v3412_v18 = vpop.f32.mrb[119].mxu1  ;;  %v2386_v26 = vpop.f32.mrb[119].mxu0  ;;  %v2601_v32 = vmul.f32 %v2392_v13, %v2392_v13 }
 0x1e6   : > { %2498 = vst [vmem:[%s4578_s19 + $0x20] sm:$0xff] %v2384_v7  ;;  %v2561_v58 = vadd.f32 %v2560_v62, %v2384_v7  ;;  %v2599_v52 = vmul.f32 %v2384_v7, %v2384_v7  ;;  %v2629_v33 = vadd.f32 %v2628_v5, %v2598_v63  ;;  %v3413_v36 = vadd.f32 %v3412_v18, %v3411_v51 }
 0x1e7   : > { %2501 = vst [vmem:[%s4578_s19 + $0x38] sm:$0xff] %v2395_v60  ;;  %v2387_v57 = vadd.f32 %v2386_v26, %v4512_v45  ;;  %v4602_v25 = vadd.f32 %v3410_v6, %v4491_v47  ;;  %v2602_v35 = vmul.f32 %v2395_v60, %v2395_v60 }
 0x1e8   : > { %v2630_v11 = vadd.f32 %v2629_v33, %v2599_v52  ;;  %v4605_v41 = vadd.f32 %v3413_v36, %v4497_v0 }
 0x1e9   : > { %2499 = vst [vmem:[%s4578_s19 + $0x28] sm:$0xff] %v2387_v57  ;;  %v2562_v31 = vadd.f32 %v2561_v58, %v2387_v57  ;;  %v2600_v9 = vmul.f32 %v2387_v57, %v2387_v57 }
 0x1ea   : > { %v3414_v21 = vpop.f32.mrb[120].mxu1  ;;  %v3500_v61 = vpop.f32.mrb[120].mxu0 }
 0x1eb   : > { %v2563_v38 = vadd.f32 %v2562_v31, %v2392_v13  ;;  %v2631_v48 = vadd.f32 %v2630_v11, %v2600_v9  ;;  %v2408_v34 = vadd.f32 %v3500_v61, %v4542_v17  ;;  %v3415_v45 = vpop.f32.mrb[121].mxu1  ;;  %v2399_v42 = vpop.f32.mrb[121].mxu0 }
 0x1ec   : > { %v3416_v47 = vadd.f32 %v3415_v45, %v3414_v21  ;;  %v2400_v46 = vadd.f32 %v2399_v42, %v4530_v55  ;;  %v3417_v15 = vpop.f32.mrb[122].mxu1  ;;  %v3501_v0 = vpop.f32.mrb[122].mxu0 }
 0x1ed   : > { %v2632_v56 = vadd.f32 %v2631_v48, %v2601_v32  ;;  %2504 = vst [vmem:[%s4578_s19 + $0x50] sm:$0xff] %v2408_v34  ;;  %v2564_v49 = vadd.f32 %v2563_v38, %v2395_v60  ;;  %v2411_v29 = vadd.f32 %v3501_v0, %v4548_v30  ;;  %v3418_v3 = vpop.f32.mrb[123].mxu1  ;;  %v2402_v37 = vpop.f32.mrb[123].mxu0  ;;  %v2605_v51 = vmul.f32 %v2408_v34, %v2408_v34 }
 0x1ee   : > { %2502 = vst [vmem:[%s4578_s19 + $0x40] sm:$0xff] %v2400_v46  ;;  %v2603_v59 = vmul.f32 %v2400_v46, %v2400_v46  ;;  %v3419_v17 = vadd.f32 %v3418_v3, %v3417_v15  ;;  %v2403_v63 = vadd.f32 %v2402_v37, %v4536_v8  ;;  %v4615_v13 = vadd.f32 %v3416_v47, %v4503_v10 }
 0x1ef   : > { %v2565_v55 = vadd.f32 %v2564_v49, %v2400_v46  ;;  %v2633_v12 = vadd.f32 %v2632_v56, %v2602_v35  ;;  %2505 = vst [vmem:[%s4578_s19 + $0x58] sm:$0xff] %v2411_v29  ;;  %v2606_v33 = vmul.f32 %v2411_v29, %v2411_v29 }
 0x1f0   : > { %2503 = vst [vmem:[%s4578_s19 + $0x48] sm:$0xff] %v2403_v63  ;;  %v2604_v16 = vmul.f32 %v2403_v63, %v2403_v63  ;;  %v4620_v5 = vadd.f32 %v3419_v17, %v4509_v44 }
 0x1f1   : > { %v2634_v6 = vadd.f32 %v2633_v12, %v2603_v59  ;;  %v2566_v30 = vadd.f32 %v2565_v55, %v2403_v63 }
 0x1f2   : > { %v3420_v7 = vpop.f32.mrb[124].mxu1  ;;  %v3504_v62 = vpop.f32.mrb[124].mxu0 }
 0x1f3   : > { %v2567_v23 = vadd.f32 %v2566_v30, %v2408_v34  ;;  %v2635_v8 = vadd.f32 %v2634_v6, %v2604_v16  ;;  %v2424_v10 = vadd.f32 %v3504_v62, %v4566_v22  ;;  %v3421_v60 = vpop.f32.mrb[125].mxu1  ;;  %v2415_v18 = vpop.f32.mrb[125].mxu0 }
 0x1f4   : > { %v3422_v26 = vadd.f32 %v3421_v60, %v3420_v7  ;;  %v2416_v58 = vadd.f32 %v2415_v18, %v4554_v39  ;;  %v3423_v52 = vpop.f32.mrb[126].mxu1  ;;  %v3505_v44 = vpop.f32.mrb[126].mxu0 }
 0x1f5   : > { %v2636_v36 = vadd.f32 %v2635_v8, %v2605_v51  ;;  %2508 = vst [vmem:[%s4578_s19 + $0x70] sm:$0xff] %v2424_v10  ;;  %v2568_v57 = vadd.f32 %v2567_v23, %v2411_v29  ;;  %v2427_v11 = vadd.f32 %v3505_v44, %v4573_v14  ;;  %v3424_v31 = vpop.f32.mrb[127].mxu1  ;;  %v2418_v9 = vpop.f32.mrb[127].mxu0  ;;  %v2609_v46 = vmul.f32 %v2424_v10, %v2424_v10 }
 0x1f6   : > { %2506 = vst [vmem:[%s4578_s19 + $0x60] sm:$0xff] %v2416_v58  ;;  %v2607_v21 = vmul.f32 %v2416_v58, %v2416_v58  ;;  %v3425_v22 = vadd.f32 %v3424_v31, %v3423_v52  ;;  %v2419_v61 = vadd.f32 %v2418_v9, %v4560_v50  ;;  %v2295_v32 = vadd.f32 %v3422_v26, %v4515_v40 }
 0x1f7   : > { %v2569_v39 = vadd.f32 %v2568_v57, %v2416_v58  ;;  %v2637_v38 = vadd.f32 %v2636_v36, %v2606_v33  ;;  %2509 = vst [vmem:[%s4578_s19 + $0x78] sm:$0xff] %v2427_v11 }
 0x1f8   : > { %2507 = vst [vmem:[%s4578_s19 + $0x68] sm:$0xff] %v2419_v61  ;;  %v2608_v48 = vmul.f32 %v2419_v61, %v2419_v61  ;;  %v2298_v34 = vadd.f32 %v3425_v22, %v4521_v20  ;;  %v2610_v20 = vmul.f32 %v2427_v11, %v2427_v11 }
 0x1f9   : > { %v2638_v45 = vadd.f32 %v2637_v38, %v2607_v21  ;;  %v2570_v42 = vadd.f32 %v2569_v39, %v2419_v61 }
 0x1fa   : > { %v3426_v14 = vpop.f32.mrb[128].mxu1  ;;  %v3508_v47 = vpop.f32.mrb[128].mxu0 }
 0x1fb   : > { %v2571_v15 = vadd.f32 %v2570_v42, %v2424_v10  ;;  %v2639_v0 = vadd.f32 %v2638_v45, %v2608_v48  ;;  %v2440_v50 = vadd.f32 %v3508_v47, %v4602_v25  ;;  %v3427_v35 = vpop.f32.mrb[129].mxu1  ;;  %v2431_v40 = vpop.f32.mrb[129].mxu0 }
 0x1fc   : > { %v3428_v56 = vadd.f32 %v3427_v35, %v3426_v14  ;;  %v2432_v49 = vadd.f32 %v2431_v40, %v4587_v28  ;;  %v3429_v29 = vpop.f32.mrb[130].mxu1  ;;  %v3509_v3 = vpop.f32.mrb[130].mxu0 }
 0x1fd   : > { %v2640_v37 = vadd.f32 %v2639_v0, %v2609_v46  ;;  %2512 = vst [vmem:[%s4578_s19 + $0x90] sm:$0xff] %v2440_v50  ;;  %v2572_v59 = vadd.f32 %v2571_v15, %v2427_v11  ;;  %v2443_v17 = vadd.f32 %v3509_v3, %v4605_v41  ;;  %v3430_v63 = vpop.f32.mrb[131].mxu1  ;;  %v2434_v55 = vpop.f32.mrb[131].mxu0  ;;  %v2613_v10 = vmul.f32 %v2440_v50, %v2440_v50 }
 0x1fe   : > { %2510 = vst [vmem:[%s4578_s19 + $0x80] sm:$0xff] %v2432_v49  ;;  %v2611_v12 = vmul.f32 %v2432_v49, %v2432_v49  ;;  %v3431_v25 = vadd.f32 %v3430_v63, %v3429_v29  ;;  %v2435_v16 = vadd.f32 %v2434_v55, %v4592_v53  ;;  %v2303_v6 = vadd.f32 %v3428_v56, %v4527_v2 }
 0x1ff   : > { %v2573_v28 = vadd.f32 %v2572_v59, %v2432_v49  ;;  %v2641_v30 = vadd.f32 %v2640_v37, %v2610_v20  ;;  %2513 = vst [vmem:[%s4578_s19 + $0x98] sm:$0xff] %v2443_v17 }
 0x200   : > { %2511 = vst [vmem:[%s4578_s19 + $0x88] sm:$0xff] %v2435_v16  ;;  %v2612_v7 = vmul.f32 %v2435_v16, %v2435_v16  ;;  %v2306_v62 = vadd.f32 %v3431_v25, %v4533_v19  ;;  %v2614_v19 = vmul.f32 %v2443_v17, %v2443_v17 }
 0x201   : > { %v2642_v51 = vadd.f32 %v2641_v30, %v2611_v12  ;;  %v2574_v23 = vadd.f32 %v2573_v28, %v2435_v16 }
 0x202   : > { %v3432_v41 = vpop.f32.mrb[132].mxu1  ;;  %v3512_v8 = vpop.f32.mrb[132].mxu0 }
 0x203   : > { %v2575_v60 = vadd.f32 %v2574_v23, %v2440_v50  ;;  %v2643_v18 = vadd.f32 %v2642_v51, %v2612_v7  ;;  %v2456_v26 = vadd.f32 %v3512_v8, %v2295_v32  ;;  %v3433_v53 = vpop.f32.mrb[133].mxu1  ;;  %v2447_v58 = vpop.f32.mrb[133].mxu0 }
 0x204   : > { %v3434_v2 = vadd.f32 %v3433_v53, %v3432_v41  ;;  %v2448_v52 = vadd.f32 %v2447_v58, %v4615_v13  ;;  %v3435_v44 = vpop.f32.mrb[134].mxu1  ;;  %v3513_v33 = vpop.f32.mrb[134].mxu0 }
 0x205   : > { %v2644_v36 = vadd.f32 %v2643_v18, %v2613_v10  ;;  %2516 = vst [vmem:[%s4578_s19 + $0xb0] sm:$0xff] %v2456_v26  ;;  %v2576_v57 = vadd.f32 %v2575_v60, %v2443_v17  ;;  %v2459_v11 = vadd.f32 %v3513_v33, %v2298_v34  ;;  %v3436_v31 = vpop.f32.mrb[135].mxu1  ;;  %v2450_v9 = vpop.f32.mrb[135].mxu0  ;;  %v2617_v47 = vmul.f32 %v2456_v26, %v2456_v26 }
 0x206   : > { %2514 = vst [vmem:[%s4578_s19 + $0xa0] sm:$0xff] %v2448_v52  ;;  %v2615_v21 = vmul.f32 %v2448_v52, %v2448_v52  ;;  %v3437_v22 = vadd.f32 %v3436_v31, %v3435_v44  ;;  %v2451_v61 = vadd.f32 %v2450_v9, %v4620_v5  ;;  %v2311_v32 = vadd.f32 %v3434_v2, %v4539_v27 }
 0x207   : > { %v2577_v39 = vadd.f32 %v2576_v57, %v2448_v52  ;;  %v2645_v13 = vadd.f32 %v2644_v36, %v2614_v19  ;;  %2517 = vst [vmem:[%s4578_s19 + $0xb8] sm:$0xff] %v2459_v11  ;;  %v2618_v49 = vmul.f32 %v2459_v11, %v2459_v11 }
 0x208   : > { %2515 = vst [vmem:[%s4578_s19 + $0xa8] sm:$0xff] %v2451_v61  ;;  %v2616_v38 = vmul.f32 %v2451_v61, %v2451_v61  ;;  %v2314_v48 = vadd.f32 %v3437_v22, %v4545_v43 }
 0x209   : > { %v2646_v45 = vadd.f32 %v2645_v13, %v2615_v21  ;;  %v2578_v42 = vadd.f32 %v2577_v39, %v2451_v61 }
 0x20a   : > { %v3438_v34 = vpop.f32.mrb[136].mxu1  ;;  %v3516_v14 = vpop.f32.mrb[136].mxu0 }
 0x20b   : > { %v2579_v46 = vadd.f32 %v2578_v42, %v2456_v26  ;;  %v2647_v15 = vadd.f32 %v2646_v45, %v2616_v38  ;;  %v2472_v0 = vadd.f32 %v3516_v14, %v2311_v32  ;;  %v3439_v5 = vpop.f32.mrb[137].mxu1  ;;  %v2463_v50 = vpop.f32.mrb[137].mxu0 }
 0x20c   : > { %v3440_v27 = vadd.f32 %v3439_v5, %v3438_v34  ;;  %v2464_v35 = vadd.f32 %v2463_v50, %v2303_v6  ;;  %v3441_v40 = vpop.f32.mrb[138].mxu1  ;;  %v3517_v56 = vpop.f32.mrb[138].mxu0 }
 0x20d   : > { %v2648_v43 = vadd.f32 %v2647_v15, %v2617_v47  ;;  %2520 = vst [vmem:[%s4578_s19 + $0xd0] sm:$0xff] %v2472_v0  ;;  %v2580_v29 = vadd.f32 %v2579_v46, %v2459_v11  ;;  %v2475_v3 = vadd.f32 %v3517_v56, %v2314_v48  ;;  %v3442_v20 = vpop.f32.mrb[139].mxu1  ;;  %v2466_v37 = vpop.f32.mrb[139].mxu0  ;;  %v2621_v23 = vmul.f32 %v2472_v0, %v2472_v0 }
 0x20e   : > { %2518 = vst [vmem:[%s4578_s19 + $0xc0] sm:$0xff] %v2464_v35  ;;  %v2619_v59 = vmul.f32 %v2464_v35, %v2464_v35  ;;  %v3443_v17 = vadd.f32 %v3442_v20, %v3441_v40  ;;  %v2467_v63 = vadd.f32 %v2466_v37, %v2306_v62  ;;  %v2319_v55 = vadd.f32 %v3440_v27, %v4551_v54 }
 0x20f   : > { %v2581_v12 = vadd.f32 %v2580_v29, %v2464_v35  ;;  %v2649_v25 = vadd.f32 %v2648_v43, %v2618_v49  ;;  %2521 = vst [vmem:[%s4578_s19 + $0xd8] sm:$0xff] %v2475_v3  ;;  %v2622_v53 = vmul.f32 %v2475_v3, %v2475_v3 }
 0x210   : > { %2519 = vst [vmem:[%s4578_s19 + $0xc8] sm:$0xff] %v2467_v63  ;;  %v2620_v16 = vmul.f32 %v2467_v63, %v2467_v63  ;;  %v2322_v6 = vadd.f32 %v3443_v17, %v4557_v1 }
 0x211   : > { %v2650_v28 = vadd.f32 %v2649_v25, %v2619_v59  ;;  %v2582_v30 = vadd.f32 %v2581_v12, %v2467_v63 }
 0x212   : > { %v3444_v7 = vpop.f32.mrb[140].mxu1  ;;  %v3520_v51 = vpop.f32.mrb[140].mxu0 }
 0x213   : > { %v2583_v41 = vadd.f32 %v2582_v30, %v2472_v0  ;;  %v2651_v8 = vadd.f32 %v2650_v28, %v2620_v16  ;;  %v3445_v10 = vpop.f32.mrb[141].mxu1  ;;  %v2479_v60 = vpop.f32.mrb[141].mxu0 }
 0x214   : > { %v3446_v62 = vadd.f32 %v3445_v10, %v3444_v7  ;;  %v2480_v18 = vadd.f32 %v2479_v60, %v2319_v55  ;;  %v3447_v54 = vpop.f32.mrb[142].mxu1  ;;  %v3521_v26 = vpop.f32.mrb[142].mxu0 }
 0x215   : > { %v2652_v58 = vadd.f32 %v2651_v8, %v2621_v23  ;;  %v2584_v2 = vadd.f32 %v2583_v41, %v2475_v3  ;;  %v3448_v1 = vpop.f32.mrb[143].mxu1  ;;  %v2482_v52 = vpop.f32.mrb[143].mxu0 }
 0x216   : > { %v2327_v44 = vadd.f32 %v3446_v62, %v4563_v4  ;;  %2522 = vst [vmem:[%s4578_s19 + $0xe0] sm:$0xff] %v2480_v18  ;;  %v2623_v33 = vmul.f32 %v2480_v18, %v2480_v18  ;;  %v3449_v19 = vadd.f32 %v3448_v1, %v3447_v54  ;;  %v2483_v36 = vadd.f32 %v2482_v52, %v2322_v6 }
 0x217   : > { %v2585_v57 = vadd.f32 %v2584_v2, %v2480_v18  ;;  %v2653_v11 = vadd.f32 %v2652_v58, %v2622_v53 }
 0x218   : > { %v2488_v31 = vadd.f32 %v3520_v51, %v2327_v44  ;;  %v2330_v9 = vadd.f32 %v3449_v19, %v4570_v24  ;;  %2523 = vst [vmem:[%s4578_s19 + $0xe8] sm:$0xff] %v2483_v36  ;;  %v2624_v21 = vmul.f32 %v2483_v36, %v2483_v36  ;;  %v2664_v24 = vlaneseq }
 0x219   : > { %v2654_v22 = vadd.f32 %v2653_v11, %v2623_v33  ;;  %v2586_v61 = vadd.f32 %v2585_v57, %v2483_v36 }
 0x21a   : > { %2524 = vst [vmem:[%s4578_s19 + $0xf0] sm:$0xff] %v2488_v31  ;;  %v2491_v32 = vadd.f32 %v3521_v26, %v2330_v9  ;;  %v2625_v39 = vmul.f32 %v2488_v31, %v2488_v31  ;;  %v2665_v50 = vshrl.u32 %v2664_v24, 7 }
 0x21b   : > { %v2587_v13 = vadd.f32 %v2586_v61, %v2488_v31  ;;  %v2655_v4 = vadd.f32 %v2654_v22, %v2624_v21 }
 0x21c   : > { %2525 = vst [vmem:[%s4578_s19 + $0xf8] sm:$0xff] %v2491_v32  ;;  %v2626_v38 = vmul.f32 %v2491_v32, %v2491_v32  ;;  %vm2666_vm0 = vcmp.eq.s32.totalorder %v2665_v50, 0  ;;  %vm2668_vm1 = vcmp.eq.s32.totalorder %v2665_v50, 1 }
 0x21d   : > { %v2588_v48 = vadd.f32 %v2587_v13, %v2491_v32  ;;  %v2656_v45 = vadd.f32 %v2655_v4, %v2625_v39 }
 0x21f   : > { %v2589_v42 = vrot.slane %v2588_v48, 4  ;;  %v2657_v34 = vadd.f32 %v2656_v45, %v2626_v38 }
 0x221   : > { %v2590_v14 = vadd.f32 %v2589_v42, %v2588_v48  ;;  %v2658_v47 = vrot.slane %v2657_v34, 4 }
 0x223   : > { %v2591_v46 = vrot.slane %v2590_v14, 2  ;;  %v2659_v15 = vadd.f32 %v2658_v47, %v2657_v34 }
 0x225   : > { %v2592_v0 = vadd.f32 %v2591_v46, %v2590_v14  ;;  %v2660_v5 = vrot.slane %v2659_v15, 2 }
 0x227   : > { %v2593_v27 = vrot.slane %v2592_v0, 1  ;;  %v2661_v35 = vadd.f32 %v2660_v5, %v2659_v15 }
 0x229   : > { %v2594_v40 = vadd.f32 %v2593_v27, %v2592_v0  ;;  %v2662_v56 = vrot.slane %v2661_v35, 1 }
 0x22b   : > { %v2663_v49 = vadd.f32 %v2662_v56, %v2661_v35  ;;  %v2667_v43 = vsel %vm2666_vm0, %v2594_v40, 0.0 }
 0x22d   : > { %v2669_v29 = vsel %vm2668_vm1, %v2663_v49, 0.0 }
 0x22e   : > { %v2670_v3 = vadd.f32 %v2669_v29, %v2667_v43 }
 0x230   : > { %2671 = vst [vmem:[%s215_s22] sm:$0xff] %v2670_v3 }
 0x231 PF: > { %s14_s14 = sadd.s32 1, %s3865_s14   ;;  %s4680_s12 = smov %s3861_s13 }
 0x232   : > { %p11_p6 = scmp.ge.s32.totalorder %s14_s14, 4   ;;  %s4681_s13 = smov %s4683_s15 }
 0x234   :  { %13 = sbr.rel (!%p11_p6) target bundleno = 2 (0x2), region = 70 }

// kernel: _lambda_.11
= control target key start
LH: loop header
LB: loop body
LE: loop exit
PB: predicated region body
PF: predicated region fallthrough
CT: control target
= control target key end

     0   :  { %8 = vsyncpa [#allocation3], 0  ;;  %s1125_s0 = inlined_call_operand.vmem [shape: f32[512,256], index: 0, kind: input, shape index: {}]   ;;  %s1126_s1 = inlined_call_operand.vmem [shape: f32[1,256], index: 1, kind: input, shape index: {}]   ;;  %s1127_s2 = inlined_call_operand.vmem [shape: f32[1,256], index: 2, kind: input, shape index: {}]   ;;  %s1128_s3 = inlined_call_operand.hbm [shape: f32[512,256], index: 3, kind: output, shape index: {}]  }
   0x1   :  { %10 = vsyncpa [#allocation3 + $0x1], 0  ;;  %s741_s12 = smov 0   ;;  %s743_s13 = smov 0  }
   0x2   :  { %s745_s14 = smov 0   ;;  %s747_s15 = smov 0  }
   0x3 LB: > { %s762_s16 = sadd.s32 4294967295, %s716_s15   ;;  %s596_s17 = sadd.s32 4294967294, %s716_s15   ;;  %s716_s15 = sphi %s747_s15, %s1134_s15   ;;  %s712_s14 = sphi %s745_s14, %s1133_s14   ;;  %s708_s13 = sphi %s743_s13, %s1132_s13   ;;  %s704_s12 = sphi %s741_s12, %s1131_s12  }
   0x4   : > { %s766_s18 = sadd.s32 1, %s716_s15   ;;  %s91_s19 = sadd.s32 1, %s712_s14 }
   0x5   : > { %s88_s20 = ssub.s32 %s716_s15, %s766_s18  ;;  %p101_p0 = scmp.ne.s32.totalorder %s712_s14, %s708_s13 }
   0x6   : > { %p89_p1 = scmp.eq.s32.totalorder %s88_s20, 0  ;;  %p102_p2 = scmp.eq.s32.totalorder %s762_s16, 1 }
   0x7   : > { %p107_p3 = scmp.ne.s32.totalorder %s708_s13, %s704_s12  ;;  %p108_p4 = scmp.eq.s32.totalorder %s596_s17, 1 }
   0x8   : > { %s777_s21 = scalar_select %p89_p1, %s712_s14, %s91_s19  }
   0x9   : > { %p779_p5 = por %p102_p2, %p101_p0  ;;  %p783_p6 = por %p108_p4, %p107_p3 }
   0xa   : > { %p599_p7 = scmp.ge.s32.totalorder %s716_s15, 1  ;;  %p142_p8 = scmp.lt.s32.totalorder %s716_s15, 3 }
   0xc   : > { %p143_p9 = pnand %p599_p7, %p142_p8 }
   0xd   : > { %s601_s24 = sshll.u32 (!%p143_p9), %s762_s16, 5  ;;  %v241_v0 = vlaneseq (!%p143_p9)  ;;  %v239_v2 = vld [vmem:[%s1126_s1] sm:$0x3] (!%p143_p9)  ;;  %s164_s29 = sand.u32 (!%p143_p9), 1, %s708_s13  }
   0xe   : > { %146 = sbr.rel (%p143_p9) target bundleno = 92 (0x5c), region = 32  ;;  %p168_p10 = scmp.lt.s32.totalorder (!%p143_p9), %s601_s24, 63  ;;  %v315_v3 = vld [vmem:[%s1127_s2] sm:$0x3] (!%p143_p9) }
   0xf   : > { %v242_v1 = vshrl.u32 (!%p143_p9), %v241_v0, 7  ;;  %s815_s7 = sshll.u32 (!%p143_p9), %s164_s29, 9  ;;  %s612_s9 = sshll.u32 (!%p143_p9), %s762_s16, 13 }
  0x10   : > { %s846_s8 = scalar_lea.vmem (!%p143_p9), [#allocation2], %s815_s7  ;;  %s1073_s17 = scalar_lea.hbm (!%p143_p9), %s1128_s3, %s612_s9 }
  0x11   : > { %v243_v4 = vsub.s32 (!%p143_p9), 0, %v242_v1  ;;  %v247_v5 = vsub.s32 (!%p143_p9), 1, %v242_v1  ;;  %s534_s10 = sshll.u32 (!%p143_p9), %s846_s8, 4  ;;  %s1084_s19 = scalar_lea.sflag (!%p143_p9), [#allocation3], %s164_s29  ;;  %s1075_s10 = int_to_ptr.vmem [resolvable:$true] %s534_s10 }
  0x12   : > { %s654_s20 = scalar_lea.vmem (!%p143_p9), %s1075_s10, 8192 }
  0x13   : > { %v802_v6 = vrot.slane (!%p143_p9), %v239_v2, %v243_v4  ;;  %v804_v7 = vrot.slane (!%p143_p9), %v315_v3, %v243_v4  ;;  %v806_v8 = vrot.slane (!%p143_p9), %v239_v2, %v247_v5  ;;  %v808_v9 = vrot.slane (!%p143_p9), %v315_v3, %v247_v5  ;;  %p655_p11 = scmp.ne.s32.totalorder (!%p143_p9), %s1075_s10, %s654_s20 }
  0x15   : > { %s1136_s24 = smov (!%p168_p10, %s601_s24), 63  ;;  %p656_p12 = pnand %p655_p11, %p779_p5 }
  0x16   : > { %s610_s30 = sshll.u32 %s1136_s24, 4  ;;  %s718_s24 = smov [#allocation2]  }
  0x17   : > { %s800_s6 = scalar_lea.vmem %s1125_s0, %s610_s30  ;;  %p657_p13 = pneg %p656_p12 }
  0x18   : > { %v175_v10 = vld [vmem:[%s800_s6] sm:$0xff]  ;;  %v176_v11 = vld [vmem:[%s800_s6 + $0x8] sm:$0xff]  ;;  %v177_v12 = vld [vmem:[%s800_s6 + $0x10] sm:$0xff]  ;;  %s658_s25 = sshll.u32 %s718_s24, 4  ;;  %s659_s25 = int_to_ptr.vmem [resolvable:$false] %s658_s25 }
  0x19   : > { %v251_v13 = vmul.f32 %v802_v6, %v175_v10  ;;  %v252_v14 = vmul.f32 %v806_v8, %v176_v11  ;;  %v253_v15 = vmul.f32 %v802_v6, %v177_v12  ;;  %v178_v16 = vld [vmem:[%s800_s6 + $0x18] sm:$0xff]  ;;  %v179_v17 = vld [vmem:[%s800_s6 + $0x20] sm:$0xff]  ;;  %v180_v18 = vld [vmem:[%s800_s6 + $0x28] sm:$0xff]  ;;  %s660_s26 = scalar_lea.vmem %s659_s25, 16384  ;;  %p661_p0 = scmp.lt.s32.totalorder %s1075_s10, %s659_s25 }
  0x1a   : > { %v254_v19 = vmul.f32 %v806_v8, %v178_v16  ;;  %v255_v20 = vmul.f32 %v802_v6, %v179_v17  ;;  %v256_v21 = vmul.f32 %v806_v8, %v180_v18  ;;  %v181_v22 = vld [vmem:[%s800_s6 + $0x30] sm:$0xff]  ;;  %v182_v23 = vld [vmem:[%s800_s6 + $0x38] sm:$0xff]  ;;  %v183_v32 = vld [vmem:[%s800_s6 + $0x40] sm:$0xff]  ;;  %p662_p1 = scmp.lt.s32.totalorder %s660_s26, %s654_s20 }
  0x1b   : > { %v327_v24 = vadd.f32 %v804_v7, %v251_v13  ;;  %v328_v25 = vadd.f32 %v808_v9, %v252_v14  ;;  %v329_v26 = vadd.f32 %v804_v7, %v253_v15  ;;  %v257_v27 = vmul.f32 %v802_v6, %v181_v22  ;;  %v184_v33 = vld [vmem:[%s800_s6 + $0x48] sm:$0xff]  ;;  %v185_v34 = vld [vmem:[%s800_s6 + $0x50] sm:$0xff]  ;;  %v186_v39 = vld [vmem:[%s800_s6 + $0x58] sm:$0xff] }
  0x1c   : > { %v330_v28 = vadd.f32 %v808_v9, %v254_v19  ;;  %v331_v29 = vadd.f32 %v804_v7, %v255_v20  ;;  %v332_v30 = vadd.f32 %v808_v9, %v256_v21  ;;  %v258_v31 = vmul.f32 %v806_v8, %v182_v23  ;;  %v187_v40 = vld [vmem:[%s800_s6 + $0x60] sm:$0xff]  ;;  %v188_v41 = vld [vmem:[%s800_s6 + $0x68] sm:$0xff]  ;;  %v189_v46 = vld [vmem:[%s800_s6 + $0x70] sm:$0xff]  ;;  %p663_p2 = por %p662_p1, %p661_p0 }
  0x1d   : > { %v391_v35 = vmax.f32 %v327_v24, 0.0  ;;  %v392_v36 = vmax.f32 %v328_v25, 0.0  ;;  %v393_v37 = vmax.f32 %v329_v26, 0.0  ;;  %v333_v38 = vadd.f32 %v804_v7, %v257_v27  ;;  %v190_v51 = vld [vmem:[%s800_s6 + $0x78] sm:$0xff]  ;;  %v191_v0 = vld [vmem:[%s800_s6 + $0x80] sm:$0xff]  ;;  %v192_v1 = vld [vmem:[%s800_s6 + $0x88] sm:$0xff] }
  0x1e   : > { %v394_v42 = vmax.f32 %v330_v28, 0.0  ;;  %v395_v43 = vmax.f32 %v331_v29, 0.0  ;;  %v396_v44 = vmax.f32 %v332_v30, 0.0  ;;  %v334_v45 = vadd.f32 %v808_v9, %v258_v31  ;;  %v193_v2 = vld [vmem:[%s800_s6 + $0x90] sm:$0xff]  ;;  %v194_v11 = vld [vmem:[%s800_s6 + $0x98] sm:$0xff]  ;;  %v195_v12 = vld [vmem:[%s800_s6 + $0xa0] sm:$0xff]  ;;  %p664_p3 = pnand %p663_p2, %p657_p13 }
  0x1f   : > { %455 = vst [vmem:[%s846_s8] sm:$0xff] %v391_v35  ;;  %456 = vst [vmem:[%s846_s8 + $0x8] sm:$0xff] %v392_v36  ;;  %v397_v47 = vmax.f32 %v333_v38, 0.0  ;;  %v259_v48 = vmul.f32 %v802_v6, %v183_v32  ;;  %v260_v49 = vmul.f32 %v806_v8, %v184_v33  ;;  %v261_v50 = vmul.f32 %v802_v6, %v185_v34  ;;  %v196_v13 = vld [vmem:[%s800_s6 + $0xa8] sm:$0xff]  ;;  %v197_v18 = vld [vmem:[%s800_s6 + $0xb0] sm:$0xff] }
  0x20   : > { %457 = vst [vmem:[%s846_s8 + $0x10] sm:$0xff] %v393_v37  ;;  %458 = vst [vmem:[%s846_s8 + $0x18] sm:$0xff] %v394_v42  ;;  %v398_v52 = vmax.f32 %v334_v45, 0.0  ;;  %v262_v53 = vmul.f32 %v806_v8, %v186_v39  ;;  %v263_v54 = vmul.f32 %v802_v6, %v187_v40  ;;  %v264_v55 = vmul.f32 %v806_v8, %v188_v41  ;;  %v198_v23 = vld [vmem:[%s800_s6 + $0xb8] sm:$0xff]  ;;  %v199_v36 = vld [vmem:[%s800_s6 + $0xc0] sm:$0xff] }
  0x21   : > { %459 = vst [vmem:[%s846_s8 + $0x20] sm:$0xff] %v395_v43  ;;  %460 = vst [vmem:[%s846_s8 + $0x28] sm:$0xff] %v396_v44  ;;  %v335_v56 = vadd.f32 %v804_v7, %v259_v48  ;;  %v336_v57 = vadd.f32 %v808_v9, %v260_v49  ;;  %v337_v58 = vadd.f32 %v804_v7, %v261_v50  ;;  %v200_v37 = vld [vmem:[%s800_s6 + $0xc8] sm:$0xff]  ;;  %v201_v38 = vld [vmem:[%s800_s6 + $0xd0] sm:$0xff] }
  0x22   : > { %461 = vst [vmem:[%s846_s8 + $0x30] sm:$0xff] %v397_v47  ;;  %v265_v59 = vmul.f32 %v802_v6, %v189_v46  ;;  %462 = vst [vmem:[%s846_s8 + $0x38] sm:$0xff] %v398_v52  ;;  %v338_v60 = vadd.f32 %v808_v9, %v262_v53  ;;  %v339_v61 = vadd.f32 %v804_v7, %v263_v54  ;;  %v202_v43 = vld [vmem:[%s800_s6 + $0xd8] sm:$0xff]  ;;  %v203_v44 = vld [vmem:[%s800_s6 + $0xe0] sm:$0xff] }
  0x23   : > { %v340_v62 = vadd.f32 %v808_v9, %v264_v55  ;;  %v266_v63 = vmul.f32 %v806_v8, %v190_v51  ;;  %v399_v3 = vmax.f32 %v335_v56, 0.0  ;;  %v400_v4 = vmax.f32 %v336_v57, 0.0  ;;  %v204_v45 = vld [vmem:[%s800_s6 + $0xe8] sm:$0xff]  ;;  %v205_v50 = vld [vmem:[%s800_s6 + $0xf0] sm:$0xff]  ;;  %v206_v55 = vld [vmem:[%s800_s6 + $0xf8] sm:$0xff] }
  0x24   : > { %v401_v5 = vmax.f32 %v337_v58, 0.0  ;;  %v341_v10 = vadd.f32 %v804_v7, %v265_v59  ;;  %v402_v14 = vmax.f32 %v338_v60, 0.0  ;;  %v403_v15 = vmax.f32 %v339_v61, 0.0 }
  0x25   : > { %v404_v16 = vmax.f32 %v340_v62, 0.0  ;;  %v342_v17 = vadd.f32 %v808_v9, %v266_v63  ;;  %463 = vst [vmem:[%s846_s8 + $0x40] sm:$0xff] %v399_v3  ;;  %464 = vst [vmem:[%s846_s8 + $0x48] sm:$0xff] %v400_v4  ;;  %v267_v20 = vmul.f32 %v802_v6, %v191_v0  ;;  %v268_v21 = vmul.f32 %v806_v8, %v192_v1  ;;  %v207_v4 = vld [vmem:[%s800_s6 + $0x100] sm:$0xff] }
  0x26   : > { %465 = vst [vmem:[%s846_s8 + $0x50] sm:$0xff] %v401_v5  ;;  %v405_v19 = vmax.f32 %v341_v10, 0.0  ;;  %v269_v22 = vmul.f32 %v802_v6, %v193_v2  ;;  %466 = vst [vmem:[%s846_s8 + $0x58] sm:$0xff] %v402_v14  ;;  %v270_v25 = vmul.f32 %v806_v8, %v194_v11  ;;  %v271_v26 = vmul.f32 %v802_v6, %v195_v12  ;;  %v208_v5 = vld [vmem:[%s800_s6 + $0x108] sm:$0xff]  ;;  %v209_v10 = vld [vmem:[%s800_s6 + $0x110] sm:$0xff] }
  0x27   : > { %467 = vst [vmem:[%s846_s8 + $0x60] sm:$0xff] %v403_v15  ;;  %468 = vst [vmem:[%s846_s8 + $0x68] sm:$0xff] %v404_v16  ;;  %v406_v24 = vmax.f32 %v342_v17, 0.0  ;;  %v272_v27 = vmul.f32 %v806_v8, %v196_v13  ;;  %v343_v28 = vadd.f32 %v804_v7, %v267_v20  ;;  %v344_v29 = vadd.f32 %v808_v9, %v268_v21  ;;  %v210_v15 = vld [vmem:[%s800_s6 + $0x118] sm:$0xff]  ;;  %v211_v16 = vld [vmem:[%s800_s6 + $0x120] sm:$0xff] }
  0x28   : > { %469 = vst [vmem:[%s846_s8 + $0x70] sm:$0xff] %v405_v19  ;;  %v345_v30 = vadd.f32 %v804_v7, %v269_v22  ;;  %v273_v31 = vmul.f32 %v802_v6, %v197_v18  ;;  %v346_v32 = vadd.f32 %v808_v9, %v270_v25  ;;  %v347_v33 = vadd.f32 %v804_v7, %v271_v26  ;;  %v212_v17 = vld [vmem:[%s800_s6 + $0x128] sm:$0xff]  ;;  %v213_v22 = vld [vmem:[%s800_s6 + $0x130] sm:$0xff] }
  0x29   : > { %470 = vst [vmem:[%s846_s8 + $0x78] sm:$0xff] %v406_v24  ;;  %v348_v34 = vadd.f32 %v808_v9, %v272_v27  ;;  %v274_v35 = vmul.f32 %v806_v8, %v198_v23  ;;  %v407_v39 = vmax.f32 %v343_v28, 0.0  ;;  %v408_v40 = vmax.f32 %v344_v29, 0.0  ;;  %v214_v27 = vld [vmem:[%s800_s6 + $0x138] sm:$0xff] }
  0x2a   : > { %v409_v41 = vmax.f32 %v345_v30, 0.0  ;;  %v349_v42 = vadd.f32 %v804_v7, %v273_v31  ;;  %v410_v46 = vmax.f32 %v346_v32, 0.0  ;;  %v411_v47 = vmax.f32 %v347_v33, 0.0 }
  0x2b   : > { %v412_v48 = vmax.f32 %v348_v34, 0.0  ;;  %v350_v49 = vadd.f32 %v808_v9, %v274_v35  ;;  %471 = vst [vmem:[%s846_s8 + $0x80] sm:$0xff] %v407_v39  ;;  %472 = vst [vmem:[%s846_s8 + $0x88] sm:$0xff] %v408_v40  ;;  %v275_v52 = vmul.f32 %v802_v6, %v199_v36  ;;  %v276_v53 = vmul.f32 %v806_v8, %v200_v37  ;;  %v215_v40 = vld [vmem:[%s800_s6 + $0x140] sm:$0xff] }
  0x2c   : > { %473 = vst [vmem:[%s846_s8 + $0x90] sm:$0xff] %v409_v41  ;;  %v413_v51 = vmax.f32 %v349_v42, 0.0  ;;  %v277_v54 = vmul.f32 %v802_v6, %v201_v38  ;;  %474 = vst [vmem:[%s846_s8 + $0x98] sm:$0xff] %v410_v46  ;;  %v278_v57 = vmul.f32 %v806_v8, %v202_v43  ;;  %v279_v58 = vmul.f32 %v802_v6, %v203_v44  ;;  %v216_v41 = vld [vmem:[%s800_s6 + $0x148] sm:$0xff]  ;;  %v217_v42 = vld [vmem:[%s800_s6 + $0x150] sm:$0xff] }
  0x2d   : > { %475 = vst [vmem:[%s846_s8 + $0xa0] sm:$0xff] %v411_v47  ;;  %476 = vst [vmem:[%s846_s8 + $0xa8] sm:$0xff] %v412_v48  ;;  %v414_v56 = vmax.f32 %v350_v49, 0.0  ;;  %v280_v59 = vmul.f32 %v806_v8, %v204_v45  ;;  %v351_v60 = vadd.f32 %v804_v7, %v275_v52  ;;  %v352_v61 = vadd.f32 %v808_v9, %v276_v53  ;;  %v218_v47 = vld [vmem:[%s800_s6 + $0x158] sm:$0xff]  ;;  %v219_v48 = vld [vmem:[%s800_s6 + $0x160] sm:$0xff] }
  0x2e   : > { %477 = vst [vmem:[%s846_s8 + $0xb0] sm:$0xff] %v413_v51  ;;  %v353_v62 = vadd.f32 %v804_v7, %v277_v54  ;;  %v281_v63 = vmul.f32 %v802_v6, %v205_v50  ;;  %v354_v0 = vadd.f32 %v808_v9, %v278_v57  ;;  %v355_v1 = vadd.f32 %v804_v7, %v279_v58  ;;  %v220_v49 = vld [vmem:[%s800_s6 + $0x168] sm:$0xff]  ;;  %v221_v54 = vld [vmem:[%s800_s6 + $0x170] sm:$0xff] }
  0x2f   : > { %478 = vst [vmem:[%s846_s8 + $0xb8] sm:$0xff] %v414_v56  ;;  %v356_v2 = vadd.f32 %v808_v9, %v280_v59  ;;  %v282_v3 = vmul.f32 %v806_v8, %v206_v55  ;;  %v415_v11 = vmax.f32 %v351_v60, 0.0  ;;  %v416_v12 = vmax.f32 %v352_v61, 0.0  ;;  %v222_v59 = vld [vmem:[%s800_s6 + $0x178] sm:$0xff] }
  0x30   : > { %v417_v13 = vmax.f32 %v353_v62, 0.0  ;;  %v357_v14 = vadd.f32 %v804_v7, %v281_v63  ;;  %v418_v18 = vmax.f32 %v354_v0, 0.0  ;;  %v419_v19 = vmax.f32 %v355_v1, 0.0 }
  0x31   : > { %v420_v20 = vmax.f32 %v356_v2, 0.0  ;;  %v358_v21 = vadd.f32 %v808_v9, %v282_v3  ;;  %479 = vst [vmem:[%s846_s8 + $0xc0] sm:$0xff] %v415_v11  ;;  %480 = vst [vmem:[%s846_s8 + $0xc8] sm:$0xff] %v416_v12  ;;  %v283_v24 = vmul.f32 %v802_v6, %v207_v4  ;;  %v284_v25 = vmul.f32 %v806_v8, %v208_v5  ;;  %v223_v12 = vld [vmem:[%s800_s6 + $0x180] sm:$0xff] }
  0x32   : > { %481 = vst [vmem:[%s846_s8 + $0xd0] sm:$0xff] %v417_v13  ;;  %v421_v23 = vmax.f32 %v357_v14, 0.0  ;;  %v285_v26 = vmul.f32 %v802_v6, %v209_v10  ;;  %482 = vst [vmem:[%s846_s8 + $0xd8] sm:$0xff] %v418_v18  ;;  %v286_v29 = vmul.f32 %v806_v8, %v210_v15  ;;  %v287_v30 = vmul.f32 %v802_v6, %v211_v16  ;;  %v224_v13 = vld [vmem:[%s800_s6 + $0x188] sm:$0xff]  ;;  %v225_v14 = vld [vmem:[%s800_s6 + $0x190] sm:$0xff] }
  0x33   : > { %483 = vst [vmem:[%s846_s8 + $0xe0] sm:$0xff] %v419_v19  ;;  %484 = vst [vmem:[%s846_s8 + $0xe8] sm:$0xff] %v420_v20  ;;  %v422_v28 = vmax.f32 %v358_v21, 0.0  ;;  %v288_v31 = vmul.f32 %v806_v8, %v212_v17  ;;  %v359_v32 = vadd.f32 %v804_v7, %v283_v24  ;;  %v360_v33 = vadd.f32 %v808_v9, %v284_v25  ;;  %v226_v19 = vld [vmem:[%s800_s6 + $0x198] sm:$0xff]  ;;  %v227_v20 = vld [vmem:[%s800_s6 + $0x1a0] sm:$0xff] }
  0x34   : > { %485 = vst [vmem:[%s846_s8 + $0xf0] sm:$0xff] %v421_v23  ;;  %v361_v34 = vadd.f32 %v804_v7, %v285_v26  ;;  %v289_v35 = vmul.f32 %v802_v6, %v213_v22  ;;  %v362_v36 = vadd.f32 %v808_v9, %v286_v29  ;;  %v363_v37 = vadd.f32 %v804_v7, %v287_v30  ;;  %v228_v21 = vld [vmem:[%s800_s6 + $0x1a8] sm:$0xff]  ;;  %v229_v26 = vld [vmem:[%s800_s6 + $0x1b0] sm:$0xff] }
  0x35   : > { %486 = vst [vmem:[%s846_s8 + $0xf8] sm:$0xff] %v422_v28  ;;  %v364_v38 = vadd.f32 %v808_v9, %v288_v31  ;;  %v290_v39 = vmul.f32 %v806_v8, %v214_v27  ;;  %v423_v43 = vmax.f32 %v359_v32, 0.0  ;;  %v424_v44 = vmax.f32 %v360_v33, 0.0  ;;  %v230_v31 = vld [vmem:[%s800_s6 + $0x1b8] sm:$0xff] }
  0x36   : > { %v425_v45 = vmax.f32 %v361_v34, 0.0  ;;  %v365_v46 = vadd.f32 %v804_v7, %v289_v35  ;;  %v426_v50 = vmax.f32 %v362_v36, 0.0  ;;  %v427_v51 = vmax.f32 %v363_v37, 0.0 }
  0x37   : > { %v428_v52 = vmax.f32 %v364_v38, 0.0  ;;  %v366_v53 = vadd.f32 %v808_v9, %v290_v39  ;;  %487 = vst [vmem:[%s846_s8 + $0x100] sm:$0xff] %v423_v43  ;;  %488 = vst [vmem:[%s846_s8 + $0x108] sm:$0xff] %v424_v44  ;;  %v291_v56 = vmul.f32 %v802_v6, %v215_v40  ;;  %v292_v57 = vmul.f32 %v806_v8, %v216_v41  ;;  %v231_v44 = vld [vmem:[%s800_s6 + $0x1c0] sm:$0xff] }
  0x38   : > { %489 = vst [vmem:[%s846_s8 + $0x110] sm:$0xff] %v425_v45  ;;  %v429_v55 = vmax.f32 %v365_v46, 0.0  ;;  %v293_v58 = vmul.f32 %v802_v6, %v217_v42  ;;  %490 = vst [vmem:[%s846_s8 + $0x118] sm:$0xff] %v426_v50  ;;  %v294_v61 = vmul.f32 %v806_v8, %v218_v47  ;;  %v295_v62 = vmul.f32 %v802_v6, %v219_v48  ;;  %v232_v45 = vld [vmem:[%s800_s6 + $0x1c8] sm:$0xff]  ;;  %v233_v46 = vld [vmem:[%s800_s6 + $0x1d0] sm:$0xff] }
  0x39   : > { %491 = vst [vmem:[%s846_s8 + $0x120] sm:$0xff] %v427_v51  ;;  %492 = vst [vmem:[%s846_s8 + $0x128] sm:$0xff] %v428_v52  ;;  %v430_v60 = vmax.f32 %v366_v53, 0.0  ;;  %v296_v63 = vmul.f32 %v806_v8, %v220_v49  ;;  %v367_v0 = vadd.f32 %v804_v7, %v291_v56  ;;  %v368_v1 = vadd.f32 %v808_v9, %v292_v57  ;;  %v234_v51 = vld [vmem:[%s800_s6 + $0x1d8] sm:$0xff]  ;;  %v235_v52 = vld [vmem:[%s800_s6 + $0x1e0] sm:$0xff] }
  0x3a   : > { %493 = vst [vmem:[%s846_s8 + $0x130] sm:$0xff] %v429_v55  ;;  %v369_v2 = vadd.f32 %v804_v7, %v293_v58  ;;  %v297_v3 = vmul.f32 %v802_v6, %v221_v54  ;;  %v370_v4 = vadd.f32 %v808_v9, %v294_v61  ;;  %v371_v5 = vadd.f32 %v804_v7, %v295_v62  ;;  %v236_v53 = vld [vmem:[%s800_s6 + $0x1e8] sm:$0xff]  ;;  %v237_v58 = vld [vmem:[%s800_s6 + $0x1f0] sm:$0xff] }
  0x3b   : > { %494 = vst [vmem:[%s846_s8 + $0x138] sm:$0xff] %v430_v60  ;;  %v372_v10 = vadd.f32 %v808_v9, %v296_v63  ;;  %v298_v11 = vmul.f32 %v806_v8, %v222_v59  ;;  %v431_v15 = vmax.f32 %v367_v0, 0.0  ;;  %v432_v16 = vmax.f32 %v368_v1, 0.0  ;;  %v238_v63 = vld [vmem:[%s800_s6 + $0x1f8] sm:$0xff] }
  0x3c   : > { %v433_v17 = vmax.f32 %v369_v2, 0.0  ;;  %v373_v18 = vadd.f32 %v804_v7, %v297_v3  ;;  %v434_v22 = vmax.f32 %v370_v4, 0.0  ;;  %v435_v23 = vmax.f32 %v371_v5, 0.0 }
  0x3d   : > { %v436_v24 = vmax.f32 %v372_v10, 0.0  ;;  %v374_v25 = vadd.f32 %v808_v9, %v298_v11  ;;  %495 = vst [vmem:[%s846_s8 + $0x140] sm:$0xff] %v431_v15  ;;  %496 = vst [vmem:[%s846_s8 + $0x148] sm:$0xff] %v432_v16  ;;  %v299_v28 = vmul.f32 %v802_v6, %v223_v12  ;;  %v300_v29 = vmul.f32 %v806_v8, %v224_v13 }
  0x3e   : > { %497 = vst [vmem:[%s846_s8 + $0x150] sm:$0xff] %v433_v17  ;;  %v437_v27 = vmax.f32 %v373_v18, 0.0  ;;  %v301_v30 = vmul.f32 %v802_v6, %v225_v14  ;;  %498 = vst [vmem:[%s846_s8 + $0x158] sm:$0xff] %v434_v22  ;;  %v302_v33 = vmul.f32 %v806_v8, %v226_v19  ;;  %v303_v34 = vmul.f32 %v802_v6, %v227_v20 }
  0x3f   : > { %499 = vst [vmem:[%s846_s8 + $0x160] sm:$0xff] %v435_v23  ;;  %500 = vst [vmem:[%s846_s8 + $0x168] sm:$0xff] %v436_v24  ;;  %v438_v32 = vmax.f32 %v374_v25, 0.0  ;;  %v304_v35 = vmul.f32 %v806_v8, %v228_v21  ;;  %v375_v36 = vadd.f32 %v804_v7, %v299_v28  ;;  %v376_v37 = vadd.f32 %v808_v9, %v300_v29 }
  0x40   : > { %501 = vst [vmem:[%s846_s8 + $0x170] sm:$0xff] %v437_v27  ;;  %v377_v38 = vadd.f32 %v804_v7, %v301_v30  ;;  %v305_v39 = vmul.f32 %v802_v6, %v229_v26  ;;  %v378_v40 = vadd.f32 %v808_v9, %v302_v33  ;;  %v379_v41 = vadd.f32 %v804_v7, %v303_v34 }
  0x41   : > { %502 = vst [vmem:[%s846_s8 + $0x178] sm:$0xff] %v438_v32  ;;  %v380_v42 = vadd.f32 %v808_v9, %v304_v35  ;;  %v306_v43 = vmul.f32 %v806_v8, %v230_v31  ;;  %v439_v47 = vmax.f32 %v375_v36, 0.0  ;;  %v440_v48 = vmax.f32 %v376_v37, 0.0 }
  0x42   : > { %v441_v49 = vmax.f32 %v377_v38, 0.0  ;;  %v381_v50 = vadd.f32 %v804_v7, %v305_v39  ;;  %v442_v54 = vmax.f32 %v378_v40, 0.0  ;;  %v443_v55 = vmax.f32 %v379_v41, 0.0 }
  0x43   : > { %v444_v56 = vmax.f32 %v380_v42, 0.0  ;;  %v382_v57 = vadd.f32 %v808_v9, %v306_v43  ;;  %503 = vst [vmem:[%s846_s8 + $0x180] sm:$0xff] %v439_v47  ;;  %504 = vst [vmem:[%s846_s8 + $0x188] sm:$0xff] %v440_v48  ;;  %v307_v60 = vmul.f32 %v802_v6, %v231_v44  ;;  %v308_v61 = vmul.f32 %v806_v8, %v232_v45 }
  0x44   : > { %505 = vst [vmem:[%s846_s8 + $0x190] sm:$0xff] %v441_v49  ;;  %v445_v59 = vmax.f32 %v381_v50, 0.0  ;;  %v309_v62 = vmul.f32 %v802_v6, %v233_v46  ;;  %506 = vst [vmem:[%s846_s8 + $0x198] sm:$0xff] %v442_v54  ;;  %v310_v1 = vmul.f32 %v806_v8, %v234_v51  ;;  %v311_v2 = vmul.f32 %v802_v6, %v235_v52 }
  0x45   : > { %507 = vst [vmem:[%s846_s8 + $0x1a0] sm:$0xff] %v443_v55  ;;  %508 = vst [vmem:[%s846_s8 + $0x1a8] sm:$0xff] %v444_v56  ;;  %v446_v0 = vmax.f32 %v382_v57, 0.0  ;;  %v312_v3 = vmul.f32 %v806_v8, %v236_v53  ;;  %v383_v4 = vadd.f32 %v804_v7, %v307_v60  ;;  %v384_v5 = vadd.f32 %v808_v9, %v308_v61 }
  0x46   : > { %509 = vst [vmem:[%s846_s8 + $0x1b0] sm:$0xff] %v445_v59  ;;  %v385_v10 = vadd.f32 %v804_v7, %v309_v62  ;;  %v313_v11 = vmul.f32 %v802_v6, %v237_v58  ;;  %v386_v12 = vadd.f32 %v808_v9, %v310_v1  ;;  %v387_v13 = vadd.f32 %v804_v7, %v311_v2 }
  0x47   : > { %510 = vst [vmem:[%s846_s8 + $0x1b8] sm:$0xff] %v446_v0  ;;  %v388_v14 = vadd.f32 %v808_v9, %v312_v3  ;;  %v314_v15 = vmul.f32 %v806_v8, %v238_v63  ;;  %v447_v16 = vmax.f32 %v383_v4, 0.0  ;;  %v448_v17 = vmax.f32 %v384_v5, 0.0 }
  0x48   : > { %v449_v6 = vmax.f32 %v385_v10, 0.0  ;;  %v389_v18 = vadd.f32 %v804_v7, %v313_v11  ;;  %v450_v19 = vmax.f32 %v386_v12, 0.0  ;;  %v451_v20 = vmax.f32 %v387_v13, 0.0 }
  0x49   : > { %v452_v21 = vmax.f32 %v388_v14, 0.0  ;;  %v390_v22 = vadd.f32 %v808_v9, %v314_v15  ;;  %511 = vst [vmem:[%s846_s8 + $0x1c0] sm:$0xff] %v447_v16  ;;  %512 = vst [vmem:[%s846_s8 + $0x1c8] sm:$0xff] %v448_v17 }
  0x4a   : > { %513 = vst [vmem:[%s846_s8 + $0x1d0] sm:$0xff] %v449_v6  ;;  %v453_v8 = vmax.f32 %v389_v18, 0.0  ;;  %514 = vst [vmem:[%s846_s8 + $0x1d8] sm:$0xff] %v450_v19 }
  0x4b   : > { %515 = vst [vmem:[%s846_s8 + $0x1e0] sm:$0xff] %v451_v20  ;;  %516 = vst [vmem:[%s846_s8 + $0x1e8] sm:$0xff] %v452_v21  ;;  %v454_v7 = vmax.f32 %v390_v22, 0.0 }
  0x4c   : > { %517 = vst [vmem:[%s846_s8 + $0x1f0] sm:$0xff] %v453_v8 }
  0x4d   : > { %518 = vst [vmem:[%s846_s8 + $0x1f8] sm:$0xff] %v454_v7 }
  0x4e   : > { %667 = shalt.err (!%p664_p3)
}
  0x4f   : > { %s668_s27 = scalar_lea.hbm %s1073_s17, 8192  ;;  %s672_s30 = scalar_lea.hbm %s1128_s3, 16384 }
  0x50   : > { %p669_p4 = scmp.ne.s32.totalorder %s1073_s17, %s668_s27  ;;  %p673_p9 = scmp.lt.u32.totalorder %s1073_s17, %s1128_s3 }
  0x51   : > { %p674_p10 = scmp.lt.u32.totalorder %s672_s30, %s668_s27  ;;  %p676_p12 = scmp.lt.u32.totalorder %s668_s27, %s1073_s17 }
  0x52   : > { %p670_p7 = pnand %p669_p4, %p779_p5 }
  0x53   : > { %p675_p11 = por %p674_p10, %p673_p9 }
  0x54   : > { %p671_p8 = pneg %p670_p7 }
  0x55   : > { %p677_p13 = por %p676_p12, %p675_p11 }
  0x57   : > { %p678_p0 = pnand %p677_p13, %p671_p8 }
  0x59   : > { %681 = shalt.err (!%p678_p0)
}
  0x5a   : > { %s719_s6 = smov 256   ;;  %s720_s7 = smov 16  }
  0x5b   : > { %613 = dma.vmem_to_hbm [thread:$0]  (%p779_p5), %s1075_s10, 8192, %s1073_s17, %s1084_s19, %s719_s6, %s719_s6, %s720_s7  }
  0x5c PF: > { %p619_p1 = scmp.ge.s32.totalorder %s716_s15, 2  ;;  %s549_s8 = sand.u32 1, %s704_s12  }
  0x5d   : > { %s550_s9 = scalar_lea.sflag [#allocation3], %s549_s8 }
  0x5e   : > { %p616_p2 = pnand %p619_p1, %p783_p6 }
  0x60   : > { %699 = dma.done.wait (!%p616_p2), %s550_s9, 8192  }
  0x61   : > { %701 = vsyncadd (!%p616_p2), %s550_s9, 4294959104  ;;  %p13_p3 = scmp.ge.s32.totalorder %s766_s18, 4   ;;  %s1131_s12 = smov %s708_s13 }
  0x62   : > { %s1132_s13 = smov %s712_s14  ;;  %s1133_s14 = smov %s777_s21 }
  0x63   : > { %s1134_s15 = smov %s766_s18  ;;  %15 = sbr.rel (!%p13_p3) target bundleno = 3 (0x3), region = 67 }
  0x6a   :  { %555 = vsyncpa [#allocation3], 1 }
  0x6b   :  { %557 = vsyncpa [#allocation3 + $0x1], 1 }

// kernel: _lambda_.10
= control target key start
LH: loop header
LB: loop body
LE: loop exit
PB: predicated region body
PF: predicated region fallthrough
CT: control target
= control target key end

     0   :  { %s4523_s12 = smov 0   ;;  %s4525_s13 = smov 0   ;;  %s5396_s0 = inlined_call_operand.vmem [shape: bf16[512,1152], index: 0, kind: input, shape index: {}]   ;;  %s5397_s1 = inlined_call_operand.vmem [shape: bf16[1152,256], index: 1, kind: input, shape index: {}]   ;;  %s5398_s2 = inlined_call_operand.vmem [shape: f32[512,256], index: 2, kind: output, shape index: {0}]   ;;  %s5399_s3 = inlined_call_operand.vmem [shape: f32[16,256], index: 3, kind: output, shape index: {1}]  }
   0x1   :  { %s4527_s14 = smov 0  }
   0x2 LB: > { %s26_s15 = sadd.s32 1, %s4496_s13  ;;  %p3408_p0 = scmp.ge.s32.totalorder %s4500_s14, 1  ;;  %s4500_s14 = sphi %s4527_s14, %s14_s14   ;;  %s4496_s13 = sphi %s4525_s13, %s5401_s13   ;;  %s4492_s12 = sphi %s4523_s12, %s5400_s12  }
   0x3   : > { %p28_p1 = scmp.ge.s32.totalorder %s26_s15, 2  ;;  %p161_p2 = scmp.lt.s32.totalorder %s4500_s14, 3 }
   0x5   : > { %s5403_s15 = smov (%p28_p1, %s26_s15), 0  ;;  %p162_p3 = pnand %p3408_p0, %p161_p2 }
   0x6   : > { %v4022_v0 = vld [vmem:[%s5397_s1 + $0x4] ss:$8 sps:$4 sm:$0xff] (!%p162_p3)   ;;  %v4026_v2 = vld [vmem:[%s5397_s1] ss:$8 sps:$4 sm:$0xff] (!%p162_p3)   ;;  %v4028_v4 = vld [vmem:[%s5397_s1 + $0x14] ss:$8 sps:$4 sm:$0xff] (!%p162_p3)  }
   0x7   : > { %165 = sbr.rel (%p162_p3) target bundleno = 621 (0x26d), region = 28  ;;  %v4024_v1 = vld [vmem:[%s5397_s1 + $0x204] ss:$8 sps:$4 sm:$0xff] (!%p162_p3)   ;;  %1981 = vmatprep.subr.bf16.mxu1 (!%p162_p3), %v4022_v0  ;;  %v4027_v3 = vld [vmem:[%s5397_s1 + $0x200] ss:$8 sps:$4 sm:$0xff] (!%p162_p3)   ;;  %s3409_s30 = sshll.u32 (!%p162_p3), %s4492_s12, 5 }
   0x8   : > { %2367 = vmatprep.subr.bf16.mxu0 (!%p162_p3), %v4024_v1  ;;  %1982 = vmatpush1.bf16.msra.mxu1 (!%p162_p3), %v4026_v2  ;;  %v4030_v5 = vld [vmem:[%s5397_s1 + $0x214] ss:$8 sps:$4 sm:$0xff] (!%p162_p3)   ;;  %v4032_v6 = vld [vmem:[%s5397_s1 + $0x10] ss:$8 sps:$4 sm:$0xff] (!%p162_p3)   ;;  %v4034_v8 = vld [vmem:[%s5397_s1 + $0x24] ss:$8 sps:$4 sm:$0xff] (!%p162_p3)  }
   0x9   : > { %2368 = vmatpush1.bf16.msra.mxu0 (!%p162_p3), %v4027_v3  ;;  %1983 = vmatprep.subr.bf16.mxu1 (!%p162_p3), %v4028_v4  ;;  %v4033_v7 = vld [vmem:[%s5397_s1 + $0x210] ss:$8 sps:$4 sm:$0xff] (!%p162_p3)   ;;  %v4036_v9 = vld [vmem:[%s5397_s1 + $0x224] ss:$8 sps:$4 sm:$0xff] (!%p162_p3)   ;;  %v4038_v10 = vld [vmem:[%s5397_s1 + $0x20] ss:$8 sps:$4 sm:$0xff] (!%p162_p3)  }
   0xa   : > { %2369 = vmatprep.subr.bf16.mxu0 (!%p162_p3), %v4030_v5  ;;  %v4039_v11 = vld [vmem:[%s5397_s1 + $0x220] ss:$8 sps:$4 sm:$0xff] (!%p162_p3)   ;;  %v4040_v12 = vld [vmem:[%s5397_s1 + $0x34] ss:$8 sps:$4 sm:$0xff] (!%p162_p3)   ;;  %v4044_v14 = vld [vmem:[%s5397_s1 + $0x30] ss:$8 sps:$4 sm:$0xff] (!%p162_p3)  }
   0xb   : > { %v4042_v13 = vld [vmem:[%s5397_s1 + $0x234] ss:$8 sps:$4 sm:$0xff] (!%p162_p3)   ;;  %v4045_v15 = vld [vmem:[%s5397_s1 + $0x230] ss:$8 sps:$4 sm:$0xff] (!%p162_p3)   ;;  %v4046_v16 = vld [vmem:[%s5397_s1 + $0x44] ss:$8 sps:$4 sm:$0xff] (!%p162_p3)  }
   0xc   : > { %1984 = vmatpush1.bf16.msra.mxu1 (!%p162_p3), %v4032_v6  ;;  %v4048_v17 = vld [vmem:[%s5397_s1 + $0x244] ss:$8 sps:$4 sm:$0xff] (!%p162_p3)   ;;  %v4050_v18 = vld [vmem:[%s5397_s1 + $0x40] ss:$8 sps:$4 sm:$0xff] (!%p162_p3)   ;;  %v4052_v20 = vld [vmem:[%s5397_s1 + $0x54] ss:$8 sps:$4 sm:$0xff] (!%p162_p3)  }
   0xd   : > { %2370 = vmatpush1.bf16.msra.mxu0 (!%p162_p3), %v4033_v7  ;;  %1985 = vmatprep.subr.bf16.mxu1 (!%p162_p3), %v4034_v8  ;;  %v4051_v19 = vld [vmem:[%s5397_s1 + $0x240] ss:$8 sps:$4 sm:$0xff] (!%p162_p3)   ;;  %v4054_v21 = vld [vmem:[%s5397_s1 + $0x254] ss:$8 sps:$4 sm:$0xff] (!%p162_p3)   ;;  %v4056_v22 = vld [vmem:[%s5397_s1 + $0x50] ss:$8 sps:$4 sm:$0xff] (!%p162_p3)  }
   0xe   : > { %2371 = vmatprep.subr.bf16.mxu0 %v4036_v9  ;;  %v4057_v23 = vld [vmem:[%s5397_s1 + $0x250] ss:$8 sps:$4 sm:$0xff]   ;;  %v4058_v24 = vld [vmem:[%s5397_s1 + $0x64] ss:$8 sps:$4 sm:$0xff]   ;;  %v4062_v26 = vld [vmem:[%s5397_s1 + $0x60] ss:$8 sps:$4 sm:$0xff]  }
   0xf   : > { %v4060_v25 = vld [vmem:[%s5397_s1 + $0x264] ss:$8 sps:$4 sm:$0xff]   ;;  %v4063_v27 = vld [vmem:[%s5397_s1 + $0x260] ss:$8 sps:$4 sm:$0xff]   ;;  %v4064_v28 = vld [vmem:[%s5397_s1 + $0x74] ss:$8 sps:$4 sm:$0xff]  }
  0x10   : > { %1986 = vmatpush1.bf16.msra.mxu1 %v4038_v10  ;;  %v4066_v29 = vld [vmem:[%s5397_s1 + $0x274] ss:$8 sps:$4 sm:$0xff]   ;;  %v4068_v30 = vld [vmem:[%s5397_s1 + $0x70] ss:$8 sps:$4 sm:$0xff]   ;;  %v4070_v32 = vld [vmem:[%s5397_s1 + $0x84] ss:$8 sps:$4 sm:$0xff]  }
  0x11   : > { %2372 = vmatpush1.bf16.msra.mxu0 %v4039_v11  ;;  %1987 = vmatprep.subr.bf16.mxu1 %v4040_v12  ;;  %v4069_v31 = vld [vmem:[%s5397_s1 + $0x270] ss:$8 sps:$4 sm:$0xff]   ;;  %p198_p4 = scmp.lt.s32.totalorder %s3409_s30, 63  ;;  %v4072_v33 = vld [vmem:[%s5397_s1 + $0x284] ss:$8 sps:$4 sm:$0xff]   ;;  %p215_p5 = scmp.lt.s32.totalorder %s4492_s12, 1 }
  0x12   : > { %2373 = vmatprep.subr.bf16.mxu0 %v4042_v13  ;;  %v4074_v34 = vld [vmem:[%s5397_s1 + $0x80] ss:$8 sps:$4 sm:$0xff]   ;;  %v4076_v36 = vld [vmem:[%s5397_s1 + $0x94] ss:$8 sps:$4 sm:$0xff]   ;;  %v4080_v38 = vld [vmem:[%s5397_s1 + $0x90] ss:$8 sps:$4 sm:$0xff]  }
  0x13   : > { %v4075_v35 = vld [vmem:[%s5397_s1 + $0x280] ss:$8 sps:$4 sm:$0xff]   ;;  %s5405_s30 = smov (!%p198_p4, %s3409_s30), 63  ;;  %v4078_v37 = vld [vmem:[%s5397_s1 + $0x294] ss:$8 sps:$4 sm:$0xff]   ;;  %s5407_s12 = smov (!%p215_p5, %s4492_s12), 1 }
  0x14   : > { %1988 = vmatpush1.bf16.msra.mxu1 %v4044_v14  ;;  %v4081_v39 = vld [vmem:[%s5397_s1 + $0x290] ss:$8 sps:$4 sm:$0xff]   ;;  %v4082_v40 = vld [vmem:[%s5397_s1 + $0xa4] ss:$8 sps:$4 sm:$0xff]   ;;  %s3996_s4 = smul.u32 36, %s5405_s30 }
  0x15   : > { %2374 = vmatpush1.bf16.msra.mxu0 %v4045_v15  ;;  %1989 = vmatprep.subr.bf16.mxu1 %v4046_v16  ;;  %v4084_v41 = vld [vmem:[%s5397_s1 + $0x2a4] ss:$8 sps:$4 sm:$0xff]   ;;  %v4086_v42 = vld [vmem:[%s5397_s1 + $0xa0] ss:$8 sps:$4 sm:$0xff]   ;;  %v4088_v44 = vld [vmem:[%s5397_s1 + $0xb4] ss:$8 sps:$4 sm:$0xff]  }
  0x16   : > { %2375 = vmatprep.subr.bf16.mxu0 %v4048_v17  ;;  %v4087_v43 = vld [vmem:[%s5397_s1 + $0x2a0] ss:$8 sps:$4 sm:$0xff]   ;;  %s4685_s19 = scalar_lea.vmem %s5396_s0, %s3996_s4  ;;  %v4090_v45 = vld [vmem:[%s5397_s1 + $0x2b4] ss:$8 sps:$4 sm:$0xff]   ;;  %v4092_v46 = vld [vmem:[%s5397_s1 + $0xb0] ss:$8 sps:$4 sm:$0xff]  }
  0x17   : > { %v4093_v47 = vld [vmem:[%s5397_s1 + $0x2b0] ss:$8 sps:$4 sm:$0xff]   ;;  %v4094_v48 = vld [vmem:[%s5397_s1 + $0xc4] ss:$8 sps:$4 sm:$0xff]   ;;  %v4098_v52 = vld [vmem:[%s5397_s1 + $0xc0] ss:$8 sps:$4 sm:$0xff]  }
  0x18   : > { %1990 = vmatpush1.bf16.msra.mxu1 %v4050_v18  ;;  %v4120_v49 = vld [vmem:[%s4685_s19 + $0x4] ss:$36 sps:$4 sm:$0xff]   ;;  %v4123_v51 = vld [vmem:[%s4685_s19 + $0x14] ss:$36 sps:$4 sm:$0xff]   ;;  %v4133_v9 = vld [vmem:[%s4685_s19 + $0x4c] ss:$36 sps:$4 sm:$0xff]  }
  0x19   : > { %2376 = vmatpush1.bf16.msra.mxu0 %v4051_v19  ;;  %1991 = vmatprep.subr.bf16.mxu1 %v4052_v20  ;;  %v4096_v50 = vld [vmem:[%s5397_s1 + $0x2c4] ss:$8 sps:$4 sm:$0xff]   ;;  %v4099_v53 = vld [vmem:[%s5397_s1 + $0x2c0] ss:$8 sps:$4 sm:$0xff]   ;;  %v4100_v54 = vld [vmem:[%s5397_s1 + $0xd4] ss:$8 sps:$4 sm:$0xff]  }
  0x1a   : > { %2377 = vmatprep.subr.bf16.mxu0 %v4054_v21  ;;  %2013 = vmatprep.mubr.bf16.mxu1 %v4120_v49  ;;  %v4102_v55 = vld [vmem:[%s5397_s1 + $0x2d4] ss:$8 sps:$4 sm:$0xff]   ;;  %v4104_v56 = vld [vmem:[%s5397_s1 + $0xd0] ss:$8 sps:$4 sm:$0xff]   ;;  %v4106_v58 = vld [vmem:[%s5397_s1 + $0xe4] ss:$8 sps:$4 sm:$0xff]  }
  0x1b   : > { %2399 = vmatprep.mubr.bf16.mxu0 %v4123_v51  ;;  %v4105_v57 = vld [vmem:[%s5397_s1 + $0x2d0] ss:$8 sps:$4 sm:$0xff]   ;;  %v4108_v59 = vld [vmem:[%s5397_s1 + $0x2e4] ss:$8 sps:$4 sm:$0xff]   ;;  %v4110_v60 = vld [vmem:[%s5397_s1 + $0xe0] ss:$8 sps:$4 sm:$0xff]  }
  0x1c   : > { %1992 = vmatpush1.bf16.msra.mxu1 %v4056_v22  ;;  %v4111_v61 = vld [vmem:[%s5397_s1 + $0x2e0] ss:$8 sps:$4 sm:$0xff]   ;;  %v4112_v62 = vld [vmem:[%s5397_s1 + $0xf4] ss:$8 sps:$4 sm:$0xff]   ;;  %v4116_v0 = vld [vmem:[%s5397_s1 + $0xf0] ss:$8 sps:$4 sm:$0xff]  }
  0x1d   : > { %2378 = vmatpush1.bf16.msra.mxu0 %v4057_v23  ;;  %1993 = vmatprep.subr.bf16.mxu1 %v4058_v24  ;;  %v4114_v63 = vld [vmem:[%s5397_s1 + $0x2f4] ss:$8 sps:$4 sm:$0xff]   ;;  %v4117_v1 = vld [vmem:[%s5397_s1 + $0x2f0] ss:$8 sps:$4 sm:$0xff]   ;;  %v4126_v2 = vld [vmem:[%s5397_s1 + $0x104] ss:$8 sps:$4 sm:$0xff]  }
  0x1e   : > { %2379 = vmatprep.subr.bf16.mxu0 %v4060_v25  ;;  %v4129_v3 = vld [vmem:[%s5397_s1 + $0x304] ss:$8 sps:$4 sm:$0xff]   ;;  %v4121_v5 = vld [vmem:[%s4685_s19 + $0x10] ss:$36 sps:$4 sm:$0xff]   ;;  %v4124_v6 = vld [vmem:[%s5397_s1 + $0x100] ss:$8 sps:$4 sm:$0xff]  }
  0x1f   : > { %v4118_v4 = vld [vmem:[%s4685_s19] ss:$36 sps:$4 sm:$0xff]   ;;  %v4132_v8 = vld [vmem:[%s5397_s1 + $0x314] ss:$8 sps:$4 sm:$0xff]   ;;  %v4130_v12 = vld [vmem:[%s5397_s1 + $0x310] ss:$8 sps:$4 sm:$0xff]  }
  0x20   : > { %1994 = vmatpush1.bf16.msra.mxu1 %v4062_v26  ;;  %v4127_v7 = vld [vmem:[%s5397_s1 + $0x300] ss:$8 sps:$4 sm:$0xff]   ;;  %v4140_v11 = vld [vmem:[%s5397_s1 + $0x114] ss:$8 sps:$4 sm:$0xff]   ;;  %v4138_v13 = vld [vmem:[%s5397_s1 + $0x110] ss:$8 sps:$4 sm:$0xff]  }
  0x21   : > { %2380 = vmatpush1.bf16.msra.mxu0 %v4063_v27  ;;  %1995 = vmatprep.subr.bf16.mxu1 %v4064_v28  ;;  %v4135_v10 = vld [vmem:[%s4685_s19 + $0x5c] ss:$36 sps:$4 sm:$0xff]   ;;  %v4144_v14 = vld [vmem:[%s5397_s1 + $0x324] ss:$8 sps:$4 sm:$0xff]   ;;  %v4148_v20 = vld [vmem:[%s4685_s19 + $0x94] ss:$36 sps:$4 sm:$0xff]  }
  0x22   : > { %2381 = vmatprep.subr.bf16.mxu0 %v4066_v29  ;;  %v4155_v15 = vld [vmem:[%s5397_s1 + $0x124] ss:$8 sps:$4 sm:$0xff]   ;;  %v4141_v17 = vld [vmem:[%s4685_s19 + $0x58] ss:$36 sps:$4 sm:$0xff]   ;;  %v4142_v18 = vld [vmem:[%s5397_s1 + $0x320] ss:$8 sps:$4 sm:$0xff]  }
  0x23   : > { %v4137_v16 = vld [vmem:[%s4685_s19 + $0x48] ss:$36 sps:$4 sm:$0xff]   ;;  %v4147_v19 = vld [vmem:[%s5397_s1 + $0x334] ss:$8 sps:$4 sm:$0xff]   ;;  %v4145_v24 = vld [vmem:[%s5397_s1 + $0x330] ss:$8 sps:$4 sm:$0xff]  }
  0x24   : > { %1996 = vmatpush1.bf16.msra.mxu1 %v4068_v30  ;;  %v4150_v21 = vld [vmem:[%s4685_s19 + $0xa4] ss:$36 sps:$4 sm:$0xff]   ;;  %v4170_v23 = vld [vmem:[%s5397_s1 + $0x134] ss:$8 sps:$4 sm:$0xff]   ;;  %v4168_v27 = vld [vmem:[%s5397_s1 + $0x130] ss:$8 sps:$4 sm:$0xff]  }
  0x25   : > { %2382 = vmatpush1.bf16.msra.mxu0 %v4069_v31  ;;  %1997 = vmatprep.subr.bf16.mxu1 %v4070_v32  ;;  %v4153_v22 = vld [vmem:[%s5397_s1 + $0x120] ss:$8 sps:$4 sm:$0xff]   ;;  %v4152_v25 = vld [vmem:[%s4685_s19 + $0x90] ss:$36 sps:$4 sm:$0xff]   ;;  %v4159_v26 = vld [vmem:[%s5397_s1 + $0x344] ss:$8 sps:$4 sm:$0xff]  }
  0x26   : > { %2383 = vmatprep.subr.bf16.mxu0 %v4072_v33  ;;  %v4156_v28 = vld [vmem:[%s4685_s19 + $0xa0] ss:$36 sps:$4 sm:$0xff]   ;;  %v4162_v30 = vld [vmem:[%s5397_s1 + $0x354] ss:$8 sps:$4 sm:$0xff]   ;;  %v4165_v32 = vld [vmem:[%s4685_s19 + $0xec] ss:$36 sps:$4 sm:$0xff]  }
  0x27   : > { %v4157_v29 = vld [vmem:[%s5397_s1 + $0x340] ss:$8 sps:$4 sm:$0xff]   ;;  %v4185_v33 = vld [vmem:[%s5397_s1 + $0x144] ss:$8 sps:$4 sm:$0xff]   ;;  %v4186_v49 = vld [vmem:[%s4685_s19 + $0x130] ss:$36 sps:$4 sm:$0xff]  }
  0x28   : > { %1998 = vmatpush1.bf16.msra.mxu1 %v4074_v34  ;;  %v4163_v31 = vld [vmem:[%s4685_s19 + $0xdc] ss:$36 sps:$4 sm:$0xff]  }
  0x29   : > { %2384 = vmatpush1.bf16.msra.mxu0 %v4075_v35  ;;  %1999 = vmatprep.subr.bf16.mxu1 %v4076_v36  ;;  %v4183_v34 = vld [vmem:[%s5397_s1 + $0x140] ss:$8 sps:$4 sm:$0xff]   ;;  %v4160_v35 = vld [vmem:[%s5397_s1 + $0x350] ss:$8 sps:$4 sm:$0xff]   ;;  %v4200_v36 = vld [vmem:[%s5397_s1 + $0x154] ss:$8 sps:$4 sm:$0xff]  }
  0x2a   : > { %2385 = vmatprep.subr.bf16.mxu0 %v4078_v37  ;;  %v4174_v37 = vld [vmem:[%s5397_s1 + $0x364] ss:$8 sps:$4 sm:$0xff]   ;;  %v4187_v51 = vld [vmem:[%s5397_s1 + $0x380] ss:$8 sps:$4 sm:$0xff]  }
  0x2c   : > { %2000 = vmatpush1.bf16.msra.mxu1 %v4080_v38  ;;  %v4167_v38 = vld [vmem:[%s4685_s19 + $0xd8] ss:$36 sps:$4 sm:$0xff]  }
  0x2d   : > { %2386 = vmatpush1.bf16.msra.mxu0 %v4081_v39  ;;  %2001 = vmatprep.subr.bf16.mxu1 %v4082_v40  ;;  %v4171_v39 = vld [vmem:[%s4685_s19 + $0xe8] ss:$36 sps:$4 sm:$0xff]  }
  0x2e   : > { %2387 = vmatprep.subr.bf16.mxu0 %v4084_v41  ;;  %v4172_v40 = vld [vmem:[%s5397_s1 + $0x360] ss:$8 sps:$4 sm:$0xff]   ;;  %v4177_v41 = vld [vmem:[%s5397_s1 + $0x374] ss:$8 sps:$4 sm:$0xff]  }
  0x30   : > { %2002 = vmatpush1.bf16.msra.mxu1 %v4086_v42  ;;  %v4178_v42 = vld [vmem:[%s4685_s19 + $0x124] ss:$36 sps:$4 sm:$0xff]  }
  0x31   : > { %2388 = vmatpush1.bf16.msra.mxu0 %v4087_v43  ;;  %2003 = vmatprep.subr.bf16.mxu1 %v4088_v44  ;;  %v4180_v43 = vld [vmem:[%s4685_s19 + $0x134] ss:$36 sps:$4 sm:$0xff]  }
  0x32   : > { %2389 = vmatprep.subr.bf16.mxu0 %v4090_v45  ;;  %v4198_v44 = vld [vmem:[%s5397_s1 + $0x150] ss:$8 sps:$4 sm:$0xff]   ;;  %v4215_v45 = vld [vmem:[%s5397_s1 + $0x164] ss:$8 sps:$4 sm:$0xff]  }
  0x34   : > { %2004 = vmatpush1.bf16.msra.mxu1 %v4092_v46  ;;  %v4175_v46 = vld [vmem:[%s5397_s1 + $0x370] ss:$8 sps:$4 sm:$0xff]  }
  0x35   : > { %2390 = vmatpush1.bf16.msra.mxu0 %v4093_v47  ;;  %2005 = vmatprep.subr.bf16.mxu1 %v4094_v48  ;;  %v4182_v47 = vld [vmem:[%s4685_s19 + $0x120] ss:$36 sps:$4 sm:$0xff]  }
  0x36   : > { %2391 = vmatprep.subr.bf16.mxu0 %v4096_v50  ;;  %v4189_v48 = vld [vmem:[%s5397_s1 + $0x384] ss:$8 sps:$4 sm:$0xff]   ;;  %v4213_v50 = vld [vmem:[%s5397_s1 + $0x160] ss:$8 sps:$4 sm:$0xff]  }
  0x38   : > { %2006 = vmatpush1.bf16.msra.mxu1 %v4098_v52  ;;  %v4192_v52 = vld [vmem:[%s5397_s1 + $0x394] ss:$8 sps:$4 sm:$0xff]  }
  0x39   : > { %2392 = vmatpush1.bf16.msra.mxu0 %v4099_v53  ;;  %2007 = vmatprep.subr.bf16.mxu1 %v4100_v54  ;;  %v4193_v53 = vld [vmem:[%s4685_s19 + $0x16c] ss:$36 sps:$4 sm:$0xff]   ;;  %v4195_v54 = vld [vmem:[%s4685_s19 + $0x17c] ss:$36 sps:$4 sm:$0xff]  }
  0x3a   : > { %2393 = vmatprep.subr.bf16.mxu0 %v4102_v55  ;;  %v4230_v55 = vld [vmem:[%s5397_s1 + $0x174] ss:$8 sps:$4 sm:$0xff]  }
  0x3c   : > { %2008 = vmatpush1.bf16.msra.mxu1 %v4104_v56  ;;  %v4190_v56 = vld [vmem:[%s5397_s1 + $0x390] ss:$8 sps:$4 sm:$0xff]  }
  0x3d   : > { %2394 = vmatpush1.bf16.msra.mxu0 %v4105_v57  ;;  %2009 = vmatprep.subr.bf16.mxu1 %v4106_v58  ;;  %v4228_v57 = vld [vmem:[%s5397_s1 + $0x170] ss:$8 sps:$4 sm:$0xff]   ;;  %v4246_v58 = vld [vmem:[%s5397_s1 + $0x184] ss:$8 sps:$4 sm:$0xff]  }
  0x3e   : > { %2395 = vmatprep.subr.bf16.mxu0 %v4108_v59  ;;  %v4204_v59 = vld [vmem:[%s5397_s1 + $0x3a4] ss:$8 sps:$4 sm:$0xff]  }
  0x40   : > { %2010 = vmatpush1.bf16.msra.mxu1 %v4110_v60  ;;  %v4197_v60 = vld [vmem:[%s4685_s19 + $0x168] ss:$36 sps:$4 sm:$0xff]  }
  0x41   : > { %2396 = vmatpush1.bf16.msra.mxu0 %v4111_v61  ;;  %2011 = vmatprep.subr.bf16.mxu1 %v4112_v62  ;;  %v4201_v61 = vld [vmem:[%s4685_s19 + $0x178] ss:$36 sps:$4 sm:$0xff]   ;;  %v4202_v62 = vld [vmem:[%s5397_s1 + $0x3a0] ss:$8 sps:$4 sm:$0xff]  }
  0x42   : > { %2397 = vmatprep.subr.bf16.mxu0 %v4114_v63  ;;  %v4207_v63 = vld [vmem:[%s5397_s1 + $0x3b4] ss:$8 sps:$4 sm:$0xff]  }
  0x44   : > { %2012 = vmatpush1.bf16.msra.mxu1 %v4116_v0  ;;  %v4208_v0 = vld [vmem:[%s4685_s19 + $0x1b4] ss:$36 sps:$4 sm:$0xff]  }
  0x45   : > { %2398 = vmatpush1.bf16.msra.mxu0 %v4117_v1  ;;  %2174 = vmatprep.subr.bf16.mxu1 %v4126_v2  ;;  %v4210_v1 = vld [vmem:[%s4685_s19 + $0x1c4] ss:$36 sps:$4 sm:$0xff]  }
  0x46   : > { %2560 = vmatprep.subr.bf16.mxu0 %v4129_v3  ;;  %v4244_v2 = vld [vmem:[%s5397_s1 + $0x180] ss:$8 sps:$4 sm:$0xff]   ;;  %v4257_v3 = vld [vmem:[%s5397_s1 + $0x194] ss:$8 sps:$4 sm:$0xff]  }
  0x47   : > { %2014 = vmatmul.mubr.bf16.vlgmr.msra.gmra.mrb[0].mxu1 %v4118_v4  ;;  %v4205_v4 = vld [vmem:[%s5397_s1 + $0x3b0] ss:$8 sps:$4 sm:$0xff]  }
  0x48   : > { %2400 = vmatmul.mubr.bf16.vlgmr.msra.gmra.mrb[0].mxu0 %v4121_v5  ;;  %2175 = vmatpush1.bf16.msra.mxu1 %v4124_v6  ;;  %v4212_v5 = vld [vmem:[%s4685_s19 + $0x1b0] ss:$36 sps:$4 sm:$0xff]   ;;  %v4219_v6 = vld [vmem:[%s5397_s1 + $0x3c4] ss:$8 sps:$4 sm:$0xff]  }
  0x49   : > { %2561 = vmatpush1.bf16.msra.mxu0 %v4127_v7  ;;  %2023 = vmatprep.mubr.bf16.mxu1 %v4133_v9  ;;  %v4216_v7 = vld [vmem:[%s4685_s19 + $0x1c0] ss:$36 sps:$4 sm:$0xff]  }
  0x4a   : > { %2562 = vmatprep.subr.bf16.mxu0 %v4132_v8  ;;  %2409 = vmatprep.mubr.bf16.mxu0 %v4135_v10  ;;  %v4255_v8 = vld [vmem:[%s5397_s1 + $0x190] ss:$8 sps:$4 sm:$0xff]   ;;  %v4217_v9 = vld [vmem:[%s5397_s1 + $0x3c0] ss:$8 sps:$4 sm:$0xff]   ;;  %v4222_v10 = vld [vmem:[%s5397_s1 + $0x3d4] ss:$8 sps:$4 sm:$0xff]  }
  0x4b   : > { %2176 = vmatprep.subr.bf16.mxu1 %v4140_v11  ;;  %v4223_v11 = vld [vmem:[%s4685_s19 + $0x1fc] ss:$36 sps:$4 sm:$0xff]  }
  0x4c   : > { %2177 = vmatpush1.bf16.msra.mxu1 %v4138_v13  ;;  %v4266_v13 = vld [vmem:[%s5397_s1 + $0x1a4] ss:$8 sps:$4 sm:$0xff]  }
  0x4d   : > { %2563 = vmatpush1.bf16.msra.mxu0 %v4130_v12  ;;  %2178 = vmatprep.subr.bf16.mxu1 %v4155_v15  ;;  %v4225_v12 = vld [vmem:[%s4685_s19 + $0x20c] ss:$36 sps:$4 sm:$0xff]  }
  0x4e   : > { %2564 = vmatprep.subr.bf16.mxu0 %v4144_v14  ;;  %v4264_v14 = vld [vmem:[%s5397_s1 + $0x1a0] ss:$8 sps:$4 sm:$0xff]   ;;  %v4220_v15 = vld [vmem:[%s5397_s1 + $0x3d0] ss:$8 sps:$4 sm:$0xff]  }
  0x4f   : > { %2024 = vmatmul.mubr.bf16.gmra.mrb[4].mxu1 %v4137_v16  ;;  %v4278_v16 = vld [vmem:[%s5397_s1 + $0x1b4] ss:$8 sps:$4 sm:$0xff]  }
  0x50   : > { %2410 = vmatmul.mubr.bf16.gmra.mrb[4].mxu0 %v4141_v17  ;;  %2033 = vmatprep.mubr.bf16.mxu1 %v4148_v20  ;;  %v4234_v17 = vld [vmem:[%s5397_s1 + $0x3e4] ss:$8 sps:$4 sm:$0xff]   ;;  %v4232_v20 = vld [vmem:[%s5397_s1 + $0x3e0] ss:$8 sps:$4 sm:$0xff]  }
  0x51   : > { %2565 = vmatpush1.bf16.msra.mxu0 %v4142_v18  ;;  %2419 = vmatprep.mubr.bf16.mxu0 %v4150_v21  ;;  %v4227_v18 = vld [vmem:[%s4685_s19 + $0x1f8] ss:$36 sps:$4 sm:$0xff]  }
  0x52   : > { %2566 = vmatprep.subr.bf16.mxu0 %v4147_v19  ;;  %2179 = vmatpush1.bf16.msra.mxu1 %v4153_v22  ;;  %v4231_v19 = vld [vmem:[%s4685_s19 + $0x208] ss:$36 sps:$4 sm:$0xff]   ;;  %v4237_v21 = vld [vmem:[%s5397_s1 + $0x3f4] ss:$8 sps:$4 sm:$0xff]  }
  0x53   : > { %2180 = vmatprep.subr.bf16.mxu1 %v4170_v23  ;;  %v4238_v22 = vld [vmem:[%s4685_s19 + $0x244] ss:$36 sps:$4 sm:$0xff]   ;;  %v4242_v23 = vld [vmem:[%s4685_s19 + $0x1c] ss:$36 sps:$4 sm:$0xff]  }
  0x55   : > { %2567 = vmatpush1.bf16.msra.mxu0 %v4145_v24  ;;  %v4276_v24 = vld [vmem:[%s5397_s1 + $0x1b0] ss:$8 sps:$4 sm:$0xff]  }
  0x56   : > { %2568 = vmatprep.subr.bf16.mxu0 %v4159_v26  ;;  %2181 = vmatpush1.bf16.msra.mxu1 %v4168_v27  ;;  %v4235_v26 = vld [vmem:[%s5397_s1 + $0x3f0] ss:$8 sps:$4 sm:$0xff]  }
  0x57   : > { %2034 = vmatmul.mubr.bf16.gmra.mrb[8].mxu1 %v4152_v25  ;;  %2182 = vmatprep.subr.bf16.mxu1 %v4185_v33  ;;  %v4287_v25 = vld [vmem:[%s5397_s1 + $0x1c4] ss:$8 sps:$4 sm:$0xff]   ;;  %v4240_v27 = vld [vmem:[%s4685_s19 + $0x18] ss:$36 sps:$4 sm:$0xff]  }
  0x58   : > { %2420 = vmatmul.mubr.bf16.gmra.mrb[8].mxu0 %v4156_v28  ;;  %2043 = vmatprep.mubr.bf16.mxu1 %v4163_v31  ;;  %v4249_v28 = vld [vmem:[%s5397_s1 + $0x404] ss:$8 sps:$4 sm:$0xff]   ;;  %v4247_v31 = vld [vmem:[%s5397_s1 + $0x400] ss:$8 sps:$4 sm:$0xff]  }
  0x59   : > { %2569 = vmatpush1.bf16.msra.mxu0 %v4157_v29  ;;  %2429 = vmatprep.mubr.bf16.mxu0 %v4165_v32  ;;  %v4285_v29 = vld [vmem:[%s5397_s1 + $0x1c0] ss:$8 sps:$4 sm:$0xff]   ;;  %v4250_v32 = vld [vmem:[%s4685_s19 + $0x28c] ss:$36 sps:$4 sm:$0xff]  }
  0x5a   : > { %2570 = vmatprep.subr.bf16.mxu0 %v4162_v30  ;;  %2183 = vmatpush1.bf16.msra.mxu1 %v4183_v34  ;;  %v4243_v30 = vld [vmem:[%s4685_s19 + $0x240] ss:$36 sps:$4 sm:$0xff]   ;;  %v4270_v34 = vld [vmem:[%s5397_s1 + $0x414] ss:$8 sps:$4 sm:$0xff]  }
  0x5b   : > { %2184 = vmatprep.subr.bf16.mxu1 %v4200_v36  ;;  %v4252_v33 = vld [vmem:[%s4685_s19 + $0x64] ss:$36 sps:$4 sm:$0xff]   ;;  %v4297_v36 = vld [vmem:[%s5397_s1 + $0x1d0] ss:$8 sps:$4 sm:$0xff]  }
  0x5d   : > { %2571 = vmatpush1.bf16.msra.mxu0 %v4160_v35  ;;  %v4299_v35 = vld [vmem:[%s5397_s1 + $0x1d4] ss:$8 sps:$4 sm:$0xff]  }
  0x5e   : > { %2572 = vmatprep.subr.bf16.mxu0 %v4174_v37  ;;  %2185 = vmatpush1.bf16.msra.mxu1 %v4198_v44  ;;  %v4268_v37 = vld [vmem:[%s5397_s1 + $0x410] ss:$8 sps:$4 sm:$0xff]   ;;  %v4289_v44 = vld [vmem:[%s5397_s1 + $0x420] ss:$8 sps:$4 sm:$0xff]  }
  0x5f   : > { %2044 = vmatmul.mubr.bf16.gmra.mrb[12].mxu1 %v4167_v38  ;;  %2186 = vmatprep.subr.bf16.mxu1 %v4215_v45  ;;  %v4308_v38 = vld [vmem:[%s5397_s1 + $0x1e4] ss:$8 sps:$4 sm:$0xff]   ;;  %v4306_v45 = vld [vmem:[%s5397_s1 + $0x1e0] ss:$8 sps:$4 sm:$0xff]  }
  0x60   : > { %2430 = vmatmul.mubr.bf16.gmra.mrb[12].mxu0 %v4171_v39  ;;  %2053 = vmatprep.mubr.bf16.mxu1 %v4178_v42  ;;  %v4254_v39 = vld [vmem:[%s4685_s19 + $0x288] ss:$36 sps:$4 sm:$0xff]   ;;  %v4259_v42 = vld [vmem:[%s4685_s19 + $0x2d4] ss:$36 sps:$4 sm:$0xff]  }
  0x61   : > { %2573 = vmatpush1.bf16.msra.mxu0 %v4172_v40  ;;  %2439 = vmatprep.mubr.bf16.mxu0 %v4180_v43  ;;  %v4291_v40 = vld [vmem:[%s5397_s1 + $0x424] ss:$8 sps:$4 sm:$0xff]  }
  0x62   : > { %2574 = vmatprep.subr.bf16.mxu0 %v4177_v41  ;;  %2187 = vmatpush1.bf16.msra.mxu1 %v4213_v50  ;;  %v4258_v41 = vld [vmem:[%s4685_s19 + $0x60] ss:$36 sps:$4 sm:$0xff]   ;;  %v4261_v43 = vld [vmem:[%s4685_s19 + $0xac] ss:$36 sps:$4 sm:$0xff]  }
  0x63   : > { %2188 = vmatprep.subr.bf16.mxu1 %v4230_v55  ;;  %v4263_v50 = vld [vmem:[%s4685_s19 + $0x2d0] ss:$36 sps:$4 sm:$0xff]   ;;  %v4328_v55 = vld [vmem:[%s5397_s1 + $0x440] ss:$8 sps:$4 sm:$0xff]  }
  0x65   : > { %2575 = vmatpush1.bf16.msra.mxu0 %v4175_v46  ;;  %v4312_v46 = vld [vmem:[%s5397_s1 + $0x434] ss:$8 sps:$4 sm:$0xff]  }
  0x66   : > { %2576 = vmatprep.subr.bf16.mxu0 %v4189_v48  ;;  %2189 = vmatpush1.bf16.msra.mxu1 %v4228_v57  ;;  %v4310_v48 = vld [vmem:[%s5397_s1 + $0x430] ss:$8 sps:$4 sm:$0xff]   ;;  %v4345_v57 = vld [vmem:[%s5397_s1 + $0x454] ss:$8 sps:$4 sm:$0xff]  }
  0x67   : > { %2054 = vmatmul.mubr.bf16.gmra.mrb[16].mxu1 %v4182_v47  ;;  %2190 = vmatprep.subr.bf16.mxu1 %v4246_v58  ;;  %v4320_v47 = vld [vmem:[%s5397_s1 + $0x1f4] ss:$8 sps:$4 sm:$0xff]   ;;  %v4343_v58 = vld [vmem:[%s5397_s1 + $0x450] ss:$8 sps:$4 sm:$0xff]  }
  0x68   : > { %2440 = vmatmul.mubr.bf16.gmra.mrb[16].mxu0 %v4186_v49  ;;  %2063 = vmatprep.mubr.bf16.mxu1 %v4193_v53  ;;  %v4318_v49 = vld [vmem:[%s5397_s1 + $0x1f0] ss:$8 sps:$4 sm:$0xff]   ;;  %v4271_v53 = vld [vmem:[%s4685_s19 + $0x31c] ss:$36 sps:$4 sm:$0xff]  }
  0x69   : > { %2577 = vmatpush1.bf16.msra.mxu0 %v4187_v51  ;;  %2449 = vmatprep.mubr.bf16.mxu0 %v4195_v54  ;;  %v4330_v51 = vld [vmem:[%s5397_s1 + $0x444] ss:$8 sps:$4 sm:$0xff]   ;;  %v4273_v54 = vld [vmem:[%s4685_s19 + $0xf4] ss:$36 sps:$4 sm:$0xff]  }
  0x6a   : > { %2578 = vmatprep.subr.bf16.mxu0 %v4192_v52  ;;  %2191 = vmatpush1.bf16.msra.mxu1 %v4244_v2  ;;  %v4267_v52 = vld [vmem:[%s4685_s19 + $0xa8] ss:$36 sps:$4 sm:$0xff]   ;;  %v4375_v2 = vld [vmem:[%s5397_s1 + $0x474] ss:$8 sps:$4 sm:$0xff]  }
  0x6b   : > { %2192 = vmatprep.subr.bf16.mxu1 %v4257_v3  ;;  %v4284_v3 = vld [vmem:[%s4685_s19 + $0x360] ss:$36 sps:$4 sm:$0xff]  }
  0x6d   : > { %2579 = vmatpush1.bf16.msra.mxu0 %v4190_v56  ;;  %v4446_v56 = vld [vmem:[%s5397_s1 + $0x204] ss:$8 sps:$4 sm:$0xff]  }
  0x6e   : > { %2580 = vmatprep.subr.bf16.mxu0 %v4204_v59  ;;  %2193 = vmatpush1.bf16.msra.mxu1 %v4255_v8  ;;  %v4275_v59 = vld [vmem:[%s4685_s19 + $0x318] ss:$36 sps:$4 sm:$0xff]   ;;  %v4300_v8 = vld [vmem:[%s4685_s19 + $0x180] ss:$36 sps:$4 sm:$0xff]  }
  0x6f   : > { %2064 = vmatmul.mubr.bf16.gmra.mrb[20].mxu1 %v4197_v60  ;;  %2194 = vmatprep.subr.bf16.mxu1 %v4266_v13  ;;  %v4360_v60 = vld [vmem:[%s5397_s1 + $0x464] ss:$8 sps:$4 sm:$0xff]   ;;  %v4313_v13 = vld [vmem:[%s4685_s19 + $0x43c] ss:$36 sps:$4 sm:$0xff]  }
  0x70   : > { %2450 = vmatmul.mubr.bf16.gmra.mrb[20].mxu0 %v4201_v61  ;;  %2073 = vmatprep.mubr.bf16.mxu1 %v4208_v0  ;;  %v4279_v61 = vld [vmem:[%s4685_s19 + $0xf0] ss:$36 sps:$4 sm:$0xff]   ;;  %v4358_v0 = vld [vmem:[%s5397_s1 + $0x460] ss:$8 sps:$4 sm:$0xff]  }
  0x71   : > { %2581 = vmatpush1.bf16.msra.mxu0 %v4202_v62  ;;  %2459 = vmatprep.mubr.bf16.mxu0 %v4210_v1  ;;  %v4280_v62 = vld [vmem:[%s4685_s19 + $0x364] ss:$36 sps:$4 sm:$0xff]   ;;  %v4373_v1 = vld [vmem:[%s5397_s1 + $0x470] ss:$8 sps:$4 sm:$0xff]  }
  0x72   : > { %2582 = vmatprep.subr.bf16.mxu0 %v4207_v63  ;;  %2195 = vmatpush1.bf16.msra.mxu1 %v4264_v14  ;;  %v4282_v63 = vld [vmem:[%s4685_s19 + $0x13c] ss:$36 sps:$4 sm:$0xff]   ;;  %v4315_v14 = vld [vmem:[%s4685_s19 + $0x214] ss:$36 sps:$4 sm:$0xff]  }
  0x73   : > { %2196 = vmatprep.subr.bf16.mxu1 %v4278_v16  ;;  %v4321_v16 = vld [vmem:[%s4685_s19 + $0x210] ss:$36 sps:$4 sm:$0xff]  }
  0x75   : > { %2583 = vmatpush1.bf16.msra.mxu0 %v4205_v4  ;;  %v4288_v4 = vld [vmem:[%s4685_s19 + $0x138] ss:$36 sps:$4 sm:$0xff]  }
  0x76   : > { %2584 = vmatprep.subr.bf16.mxu0 %v4219_v6  ;;  %2197 = vmatpush1.bf16.msra.mxu1 %v4276_v24  ;;  %v4294_v6 = vld [vmem:[%s4685_s19 + $0x184] ss:$36 sps:$4 sm:$0xff]   ;;  %v4448_v24 = vld [vmem:[%s5397_s1 + $0x214] ss:$8 sps:$4 sm:$0xff]  }
  0x77   : > { %2074 = vmatmul.mubr.bf16.gmra.mrb[24].mxu1 %v4212_v5  ;;  %2198 = vmatprep.subr.bf16.mxu1 %v4287_v25  ;;  %v4292_v5 = vld [vmem:[%s4685_s19 + $0x3ac] ss:$36 sps:$4 sm:$0xff]  }
  0x78   : > { %2460 = vmatmul.mubr.bf16.gmra.mrb[24].mxu0 %v4216_v7  ;;  %2083 = vmatprep.mubr.bf16.mxu1 %v4223_v11  ;;  %v4296_v7 = vld [vmem:[%s4685_s19 + $0x3a8] ss:$36 sps:$4 sm:$0xff]   ;;  %v4305_v11 = vld [vmem:[%s4685_s19 + $0x3f0] ss:$36 sps:$4 sm:$0xff]  }
  0x79   : > { %2585 = vmatpush1.bf16.msra.mxu0 %v4217_v9  ;;  %2469 = vmatprep.mubr.bf16.mxu0 %v4225_v12  ;;  %v4301_v9 = vld [vmem:[%s4685_s19 + $0x3f4] ss:$36 sps:$4 sm:$0xff]   ;;  %v4309_v12 = vld [vmem:[%s4685_s19 + $0x1c8] ss:$36 sps:$4 sm:$0xff]  }
  0x7a   : > { %2586 = vmatprep.subr.bf16.mxu0 %v4222_v10  ;;  %2199 = vmatpush1.bf16.msra.mxu1 %v4285_v29  ;;  %v4303_v10 = vld [vmem:[%s4685_s19 + $0x1cc] ss:$36 sps:$4 sm:$0xff]  }
  0x7b   : > { %2200 = vmatprep.subr.bf16.mxu1 %v4299_v35  ;;  %v4335_v25 = vld [vmem:[%s4685_s19 + $0x50] ss:$36 sps:$4 sm:$0xff]   ;;  %v4346_v35 = vld [vmem:[%s4685_s19 + $0xe4] ss:$36 sps:$4 sm:$0xff]  }
  0x7c   : > { %v4339_v29 = vld [vmem:[%s4685_s19 + $0x2ec] ss:$36 sps:$4 sm:$0xff]  }
  0x7d   : > { %2587 = vmatpush1.bf16.msra.mxu0 %v4220_v15  ;;  %v4317_v15 = vld [vmem:[%s4685_s19 + $0x438] ss:$36 sps:$4 sm:$0xff]  }
  0x7e   : > { %2588 = vmatprep.subr.bf16.mxu0 %v4234_v17  ;;  %2201 = vmatpush1.bf16.msra.mxu1 %v4297_v36  ;;  %v4324_v17 = vld [vmem:[%s4685_s19 + $0xc] ss:$36 sps:$4 sm:$0xff]   ;;  %v4348_v36 = vld [vmem:[%s4685_s19 + $0x334] ss:$36 sps:$4 sm:$0xff]  }
  0x7f   : > { %2084 = vmatmul.mubr.bf16.gmra.mrb[28].mxu1 %v4227_v18  ;;  %2202 = vmatprep.subr.bf16.mxu1 %v4308_v38  ;;  %v4325_v18 = vld [vmem:[%s4685_s19 + $0x25c] ss:$36 sps:$4 sm:$0xff]   ;;  %v4454_v38 = vld [vmem:[%s5397_s1 + $0x244] ss:$8 sps:$4 sm:$0xff]  }
  0x80   : > { %2470 = vmatmul.mubr.bf16.gmra.mrb[28].mxu0 %v4231_v19  ;;  %2093 = vmatprep.mubr.bf16.mxu1 %v4238_v22  ;;  %v4322_v19 = vld [vmem:[%s4685_s19 + $0x8] ss:$36 sps:$4 sm:$0xff]  }
  0x81   : > { %2589 = vmatpush1.bf16.msra.mxu0 %v4232_v20  ;;  %2592 = vmatprep.mubr.bf16.mxu0 %v4242_v23  ;;  %v4327_v20 = vld [vmem:[%s4685_s19 + $0x258] ss:$36 sps:$4 sm:$0xff]   ;;  %v4333_v22 = vld [vmem:[%s4685_s19 + $0x2a4] ss:$36 sps:$4 sm:$0xff]  }
  0x82   : > { %2590 = vmatprep.subr.bf16.mxu0 %v4237_v21  ;;  %2203 = vmatpush1.bf16.msra.mxu1 %v4306_v45  ;;  %v4331_v21 = vld [vmem:[%s4685_s19 + $0x54] ss:$36 sps:$4 sm:$0xff]   ;;  %v4447_v23 = vld [vmem:[%s5397_s1 + $0x200] ss:$8 sps:$4 sm:$0xff]  }
  0x83   : > { %2204 = vmatprep.subr.bf16.mxu1 %v4320_v47  ;;  %v4457_v45 = vld [vmem:[%s5397_s1 + $0x250] ss:$8 sps:$4 sm:$0xff]   ;;  %v4459_v47 = vld [vmem:[%s5397_s1 + $0x260] ss:$8 sps:$4 sm:$0xff]  }
  0x85   : > { %2591 = vmatpush1.bf16.msra.mxu0 %v4235_v26  ;;  %v4336_v26 = vld [vmem:[%s4685_s19 + $0x2a0] ss:$36 sps:$4 sm:$0xff]  }
  0x86   : > { %2753 = vmatprep.subr.bf16.mxu0 %v4249_v28  ;;  %2205 = vmatpush1.bf16.msra.mxu1 %v4318_v49  ;;  %v4337_v28 = vld [vmem:[%s4685_s19 + $0x9c] ss:$36 sps:$4 sm:$0xff]   ;;  %v4356_v49 = vld [vmem:[%s4685_s19 + $0x128] ss:$36 sps:$4 sm:$0xff]  }
  0x87   : > { %2094 = vmatmul.mubr.bf16.gmra.mrb[32].mxu1 %v4243_v30  ;;  %3708 = vmatprep.subr.bf16.mxu1 %v4446_v56  ;;  %v4450_v30 = vld [vmem:[%s5397_s1 + $0x224] ss:$8 sps:$4 sm:$0xff]   ;;  %v4464_v56 = vld [vmem:[%s5397_s1 + $0x294] ss:$8 sps:$4 sm:$0xff]  }
  0x88   : > { %2593 = vmatmul.mubr.bf16.vlgmr.msra.gmra.mrb[0].mxu0 %v4240_v27  ;;  %2103 = vmatprep.mubr.bf16.mxu1 %v4250_v32  ;;  %v4449_v27 = vld [vmem:[%s5397_s1 + $0x210] ss:$8 sps:$4 sm:$0xff]   ;;  %v4452_v32 = vld [vmem:[%s5397_s1 + $0x234] ss:$8 sps:$4 sm:$0xff]  }
  0x89   : > { %2754 = vmatpush1.bf16.msra.mxu0 %v4247_v31  ;;  %2602 = vmatprep.mubr.bf16.mxu0 %v4252_v33  ;;  %v4451_v31 = vld [vmem:[%s5397_s1 + $0x220] ss:$8 sps:$4 sm:$0xff]   ;;  %v4341_v33 = vld [vmem:[%s4685_s19 + $0x98] ss:$36 sps:$4 sm:$0xff]  }
  0x8a   : > { %2755 = vmatprep.subr.bf16.mxu0 %v4270_v34  ;;  %v4342_v34 = vld [vmem:[%s4685_s19 + $0x2e8] ss:$36 sps:$4 sm:$0xff]  }
  0x8d   : > { %2756 = vmatpush1.bf16.msra.mxu0 %v4268_v37  ;;  %v4453_v37 = vld [vmem:[%s5397_s1 + $0x230] ss:$8 sps:$4 sm:$0xff]  }
  0x8e   : > { %2757 = vmatprep.subr.bf16.mxu0 %v4291_v40  ;;  %v4456_v40 = vld [vmem:[%s5397_s1 + $0x254] ss:$8 sps:$4 sm:$0xff]  }
  0x8f   : > { %2104 = vmatmul.mubr.bf16.gmra.mrb[36].mxu1 %v4254_v39  ;;  %v4455_v39 = vld [vmem:[%s5397_s1 + $0x240] ss:$8 sps:$4 sm:$0xff]  }
  0x90   : > { %2603 = vmatmul.mubr.bf16.gmra.mrb[4].mxu0 %v4258_v41  ;;  %2113 = vmatprep.mubr.bf16.mxu1 %v4259_v42  ;;  %v4350_v41 = vld [vmem:[%s4685_s19 + $0xe0] ss:$36 sps:$4 sm:$0xff]   ;;  %v4351_v42 = vld [vmem:[%s4685_s19 + $0x330] ss:$36 sps:$4 sm:$0xff]  }
  0x91   : > { %2612 = vmatprep.mubr.bf16.mxu0 %v4261_v43  ;;  %2758 = vmatpush1.bf16.msra.mxu0 %v4289_v44  ;;  %v4352_v43 = vld [vmem:[%s4685_s19 + $0x12c] ss:$36 sps:$4 sm:$0xff]   ;;  %v4354_v44 = vld [vmem:[%s4685_s19 + $0x37c] ss:$36 sps:$4 sm:$0xff]  }
  0x92   : > { %2759 = vmatprep.subr.bf16.mxu0 %v4312_v46  ;;  %v4458_v46 = vld [vmem:[%s5397_s1 + $0x264] ss:$8 sps:$4 sm:$0xff]  }
  0x95   : > { %2760 = vmatpush1.bf16.msra.mxu0 %v4310_v48  ;;  %v4460_v48 = vld [vmem:[%s5397_s1 + $0x274] ss:$8 sps:$4 sm:$0xff]  }
  0x96   : > { %2761 = vmatprep.subr.bf16.mxu0 %v4330_v51  ;;  %v4361_v51 = vld [vmem:[%s4685_s19 + $0x174] ss:$36 sps:$4 sm:$0xff]  }
  0x97   : > { %2114 = vmatmul.mubr.bf16.gmra.mrb[40].mxu1 %v4263_v50  ;;  %v4357_v50 = vld [vmem:[%s4685_s19 + $0x378] ss:$36 sps:$4 sm:$0xff]  }
  0x98   : > { %2613 = vmatmul.mubr.bf16.gmra.mrb[8].mxu0 %v4267_v52  ;;  %2123 = vmatprep.mubr.bf16.mxu1 %v4271_v53  ;;  %v4363_v52 = vld [vmem:[%s4685_s19 + $0x3c4] ss:$36 sps:$4 sm:$0xff]   ;;  %v4461_v53 = vld [vmem:[%s5397_s1 + $0x270] ss:$8 sps:$4 sm:$0xff]  }
  0x99   : > { %2622 = vmatprep.mubr.bf16.mxu0 %v4273_v54  ;;  %2762 = vmatpush1.bf16.msra.mxu0 %v4328_v55  ;;  %v4462_v54 = vld [vmem:[%s5397_s1 + $0x284] ss:$8 sps:$4 sm:$0xff]   ;;  %v4463_v55 = vld [vmem:[%s5397_s1 + $0x280] ss:$8 sps:$4 sm:$0xff]  }
  0x9a   : > { %2763 = vmatprep.subr.bf16.mxu0 %v4345_v57  ;;  %v4365_v57 = vld [vmem:[%s4685_s19 + $0x170] ss:$36 sps:$4 sm:$0xff]  }
  0x9d   : > { %2764 = vmatpush1.bf16.msra.mxu0 %v4343_v58  ;;  %v4366_v58 = vld [vmem:[%s4685_s19 + $0x3c0] ss:$36 sps:$4 sm:$0xff]  }
  0x9e   : > { %2765 = vmatprep.subr.bf16.mxu0 %v4360_v60  ;;  %v4369_v60 = vld [vmem:[%s4685_s19 + $0x40c] ss:$36 sps:$4 sm:$0xff]  }
  0x9f   : > { %2124 = vmatmul.mubr.bf16.gmra.mrb[44].mxu1 %v4275_v59  ;;  %v4367_v59 = vld [vmem:[%s4685_s19 + $0x1bc] ss:$36 sps:$4 sm:$0xff]  }
  0xa0   : > { %2623 = vmatmul.mubr.bf16.gmra.mrb[12].mxu0 %v4279_v61  ;;  %2133 = vmatprep.mubr.bf16.mxu1 %v4280_v62  ;;  %v4465_v61 = vld [vmem:[%s5397_s1 + $0x290] ss:$8 sps:$4 sm:$0xff]   ;;  %v4466_v62 = vld [vmem:[%s5397_s1 + $0x2a4] ss:$8 sps:$4 sm:$0xff]  }
  0xa1   : > { %2632 = vmatprep.mubr.bf16.mxu0 %v4282_v63  ;;  %2766 = vmatpush1.bf16.msra.mxu0 %v4358_v0  ;;  %v4467_v63 = vld [vmem:[%s5397_s1 + $0x2a0] ss:$8 sps:$4 sm:$0xff]   ;;  %v4468_v0 = vld [vmem:[%s5397_s1 + $0x2b4] ss:$8 sps:$4 sm:$0xff]  }
  0xa2   : > { %2767 = vmatprep.subr.bf16.mxu0 %v4375_v2  ;;  %v4372_v2 = vld [vmem:[%s4685_s19 + $0x408] ss:$36 sps:$4 sm:$0xff]  }
  0xa5   : > { %2768 = vmatpush1.bf16.msra.mxu0 %v4373_v1  ;;  %v4371_v1 = vld [vmem:[%s4685_s19 + $0x1b8] ss:$36 sps:$4 sm:$0xff]  }
  0xa7   : > { %2134 = vmatmul.mubr.bf16.gmra.mrb[48].mxu1 %v4284_v3  ;;  %v4376_v3 = vld [vmem:[%s4685_s19 + $0x204] ss:$36 sps:$4 sm:$0xff]  }
  0xa8   : > { %2633 = vmatmul.mubr.bf16.gmra.mrb[16].mxu0 %v4288_v4  ;;  %2143 = vmatprep.mubr.bf16.mxu1 %v4292_v5  ;;  %v4378_v4 = vld [vmem:[%s4685_s19 + $0x454] ss:$36 sps:$4 sm:$0xff]  }
  0xa9   : > { %2642 = vmatprep.mubr.bf16.mxu0 %v4294_v6  ;;  %v4469_v5 = vld [vmem:[%s5397_s1 + $0x2b0] ss:$8 sps:$4 sm:$0xff]   ;;  %v4470_v6 = vld [vmem:[%s5397_s1 + $0x2c4] ss:$8 sps:$4 sm:$0xff]  }
  0xaf   : > { %2144 = vmatmul.mubr.bf16.gmra.mrb[52].mxu1 %v4296_v7  ;;  %v4471_v7 = vld [vmem:[%s5397_s1 + $0x2c0] ss:$8 sps:$4 sm:$0xff]  }
  0xb0   : > { %2643 = vmatmul.mubr.bf16.gmra.mrb[20].mxu0 %v4300_v8  ;;  %2153 = vmatprep.mubr.bf16.mxu1 %v4301_v9  ;;  %v4472_v8 = vld [vmem:[%s5397_s1 + $0x2d4] ss:$8 sps:$4 sm:$0xff]   ;;  %v4380_v9 = vld [vmem:[%s4685_s19 + $0x200] ss:$36 sps:$4 sm:$0xff]  }
  0xb1   : > { %2652 = vmatprep.mubr.bf16.mxu0 %v4303_v10  ;;  %v4381_v10 = vld [vmem:[%s4685_s19 + $0x450] ss:$36 sps:$4 sm:$0xff]  }
  0xb7   : > { %2154 = vmatmul.mubr.bf16.gmra.mrb[56].mxu1 %v4305_v11  ;;  %v4382_v11 = vld [vmem:[%s4685_s19 + $0x24c] ss:$36 sps:$4 sm:$0xff]  }
  0xb8   : > { %2653 = vmatmul.mubr.bf16.gmra.mrb[24].mxu0 %v4309_v12  ;;  %2163 = vmatprep.mubr.bf16.mxu1 %v4313_v13  ;;  %v4473_v12 = vld [vmem:[%s5397_s1 + $0x2d0] ss:$8 sps:$4 sm:$0xff]   ;;  %v4474_v13 = vld [vmem:[%s5397_s1 + $0x2e4] ss:$8 sps:$4 sm:$0xff]  }
  0xb9   : > { %2662 = vmatprep.mubr.bf16.mxu0 %v4315_v14  ;;  %v4502_v14 = vmov 0  }
  0xbf   : > { %2164 = vmatmul.mubr.bf16.gmra.mrb[60].mxu1 %v4317_v15  ;;  %v4475_v15 = vld [vmem:[%s5397_s1 + $0x2e0] ss:$8 sps:$4 sm:$0xff]  }
  0xc0   : > { %2663 = vmatmul.mubr.bf16.gmra.mrb[28].mxu0 %v4321_v16  ;;  %2206 = vmatprep.mubr.bf16.mxu1 %v4324_v17  ;;  %v4476_v16 = vld [vmem:[%s5397_s1 + $0x2f4] ss:$8 sps:$4 sm:$0xff]   ;;  %v4384_v17 = vld [vmem:[%s4685_s19 + $0x248] ss:$36 sps:$4 sm:$0xff]  }
  0xc1   : > { %2672 = vmatprep.mubr.bf16.mxu0 %v4325_v18  ;;  %v4385_v18 = vld [vmem:[%s4685_s19 + $0x20] ss:$36 sps:$4 sm:$0xff]  }
  0xc7   : > { %2207 = vmatmul.mubr.bf16.vlgmr.msra.gmra.mrb[0].mxu1 %v4322_v19  ;;  %v4386_v19 = vld [vmem:[%s4685_s19 + $0x294] ss:$36 sps:$4 sm:$0xff]  }
  0xc8   : > { %2673 = vmatmul.mubr.bf16.gmra.mrb[32].mxu0 %v4327_v20  ;;  %3724 = vmatpush1.bf16.msra.mxu1 %v4447_v23  ;;  %v4477_v20 = vld [vmem:[%s5397_s1 + $0x2f0] ss:$8 sps:$4 sm:$0xff]   ;;  %v4390_v23 = vld [vmem:[%s4685_s19 + $0x2dc] ss:$36 sps:$4 sm:$0xff]  }
  0xc9   : > { %2216 = vmatprep.mubr.bf16.mxu1 %v4331_v21  ;;  %2682 = vmatprep.mubr.bf16.mxu0 %v4333_v22  ;;  %v4388_v21 = vld [vmem:[%s4685_s19 + $0x290] ss:$36 sps:$4 sm:$0xff]   ;;  %v4389_v22 = vld [vmem:[%s4685_s19 + $0x68] ss:$36 sps:$4 sm:$0xff]  }
  0xca   : > { %3709 = vmatprep.subr.bf16.mxu1 %v4448_v24  ;;  %v4392_v24 = vld [vmem:[%s4685_s19 + $0x2d8] ss:$36 sps:$4 sm:$0xff]  }
  0xcc   : > { %3725 = vmatpush1.bf16.msra.mxu1 %v4449_v27  ;;  %v4396_v27 = vld [vmem:[%s4685_s19 + $0x320] ss:$36 sps:$4 sm:$0xff]  }
  0xcd   : > { %3710 = vmatprep.subr.bf16.mxu1 %v4450_v30  ;;  %v4400_v30 = vld [vmem:[%s4685_s19 + $0x368] ss:$36 sps:$4 sm:$0xff]  }
  0xcf   : > { %2217 = vmatmul.mubr.bf16.gmra.mrb[4].mxu1 %v4335_v25  ;;  %v4393_v25 = vld [vmem:[%s4685_s19 + $0xb0] ss:$36 sps:$4 sm:$0xff]  }
  0xd0   : > { %2683 = vmatmul.mubr.bf16.gmra.mrb[36].mxu0 %v4336_v26  ;;  %2226 = vmatprep.mubr.bf16.mxu1 %v4337_v28  ;;  %v4394_v26 = vld [vmem:[%s4685_s19 + $0x324] ss:$36 sps:$4 sm:$0xff]   ;;  %v4397_v28 = vld [vmem:[%s4685_s19 + $0xf8] ss:$36 sps:$4 sm:$0xff]  }
  0xd1   : > { %2692 = vmatprep.mubr.bf16.mxu0 %v4339_v29  ;;  %3726 = vmatpush1.bf16.msra.mxu1 %v4451_v31  ;;  %v4398_v29 = vld [vmem:[%s4685_s19 + $0x36c] ss:$36 sps:$4 sm:$0xff]   ;;  %v4401_v31 = vld [vmem:[%s4685_s19 + $0x140] ss:$36 sps:$4 sm:$0xff]  }
  0xd2   : > { %3711 = vmatprep.subr.bf16.mxu1 %v4452_v32  ;;  %v4402_v32 = vld [vmem:[%s4685_s19 + $0x3b4] ss:$36 sps:$4 sm:$0xff]  }
  0xd5   : > { %3727 = vmatpush1.bf16.msra.mxu1 %v4453_v37  ;;  %v4409_v37 = vld [vmem:[%s4685_s19 + $0x1d0] ss:$36 sps:$4 sm:$0xff]  }
  0xd6   : > { %3712 = vmatprep.subr.bf16.mxu1 %v4454_v38  ;;  %v4410_v38 = vld [vmem:[%s4685_s19 + $0x444] ss:$36 sps:$4 sm:$0xff]  }
  0xd7   : > { %2227 = vmatmul.mubr.bf16.gmra.mrb[8].mxu1 %v4341_v33  ;;  %v4404_v33 = vld [vmem:[%s4685_s19 + $0x3b0] ss:$36 sps:$4 sm:$0xff]  }
  0xd8   : > { %2693 = vmatmul.mubr.bf16.gmra.mrb[40].mxu0 %v4342_v34  ;;  %2236 = vmatprep.mubr.bf16.mxu1 %v4346_v35  ;;  %v4405_v34 = vld [vmem:[%s4685_s19 + $0x188] ss:$36 sps:$4 sm:$0xff]   ;;  %v4406_v35 = vld [vmem:[%s4685_s19 + $0x3fc] ss:$36 sps:$4 sm:$0xff]  }
  0xd9   : > { %2702 = vmatprep.mubr.bf16.mxu0 %v4348_v36  ;;  %3728 = vmatpush1.bf16.msra.mxu1 %v4455_v39  ;;  %v4408_v36 = vld [vmem:[%s4685_s19 + $0x3f8] ss:$36 sps:$4 sm:$0xff]   ;;  %v4412_v39 = vld [vmem:[%s4685_s19 + $0x440] ss:$36 sps:$4 sm:$0xff]  }
  0xda   : > { %3713 = vmatprep.subr.bf16.mxu1 %v4456_v40  ;;  %v4413_v40 = vld [vmem:[%s4685_s19 + $0x218] ss:$36 sps:$4 sm:$0xff]  }
  0xdd   : > { %3729 = vmatpush1.bf16.msra.mxu1 %v4457_v45  ;;  %v4420_v45 = vld [vmem:[%s4685_s19 + $0x298] ss:$36 sps:$4 sm:$0xff]  }
  0xde   : > { %3714 = vmatprep.subr.bf16.mxu1 %v4458_v46  ;;  %v4421_v46 = vld [vmem:[%s4685_s19 + $0x2a8] ss:$36 sps:$4 sm:$0xff]  }
  0xdf   : > { %2237 = vmatmul.mubr.bf16.gmra.mrb[12].mxu1 %v4350_v41  ;;  %v4416_v41 = vld [vmem:[%s4685_s19 + $0x254] ss:$36 sps:$4 sm:$0xff]  }
  0xe0   : > { %2703 = vmatmul.mubr.bf16.gmra.mrb[44].mxu0 %v4351_v42  ;;  %2246 = vmatprep.mubr.bf16.mxu1 %v4352_v43  ;;  %v4414_v42 = vld [vmem:[%s4685_s19 + $0x250] ss:$36 sps:$4 sm:$0xff]   ;;  %v4417_v43 = vld [vmem:[%s4685_s19 + $0x260] ss:$36 sps:$4 sm:$0xff]  }
  0xe1   : > { %2712 = vmatprep.mubr.bf16.mxu0 %v4354_v44  ;;  %3730 = vmatpush1.bf16.msra.mxu1 %v4459_v47  ;;  %v4418_v44 = vld [vmem:[%s4685_s19 + $0x29c] ss:$36 sps:$4 sm:$0xff]   ;;  %v4422_v47 = vld [vmem:[%s4685_s19 + $0x2e4] ss:$36 sps:$4 sm:$0xff]  }
  0xe2   : > { %3715 = vmatprep.subr.bf16.mxu1 %v4460_v48  ;;  %v4424_v48 = vld [vmem:[%s4685_s19 + $0x2e0] ss:$36 sps:$4 sm:$0xff]  }
  0xe5   : > { %3731 = vmatpush1.bf16.msra.mxu1 %v4461_v53  ;;  %v4430_v53 = vld [vmem:[%s4685_s19 + $0x374] ss:$36 sps:$4 sm:$0xff]  }
  0xe6   : > { %3716 = vmatprep.subr.bf16.mxu1 %v4462_v54  ;;  %v4432_v54 = vld [vmem:[%s4685_s19 + $0x370] ss:$36 sps:$4 sm:$0xff]  }
  0xe7   : > { %2247 = vmatmul.mubr.bf16.gmra.mrb[16].mxu1 %v4356_v49  ;;  %v4425_v49 = vld [vmem:[%s4685_s19 + $0x2f0] ss:$36 sps:$4 sm:$0xff]  }
  0xe8   : > { %2713 = vmatmul.mubr.bf16.gmra.mrb[48].mxu0 %v4357_v50  ;;  %2256 = vmatprep.mubr.bf16.mxu1 %v4361_v51  ;;  %v4426_v50 = vld [vmem:[%s4685_s19 + $0x32c] ss:$36 sps:$4 sm:$0xff]  }
  0xe9   : > { %2722 = vmatprep.mubr.bf16.mxu0 %v4363_v52  ;;  %3732 = vmatpush1.bf16.msra.mxu1 %v4463_v55  ;;  %v4428_v51 = vld [vmem:[%s4685_s19 + $0x328] ss:$36 sps:$4 sm:$0xff]   ;;  %v4429_v52 = vld [vmem:[%s4685_s19 + $0x338] ss:$36 sps:$4 sm:$0xff]   ;;  %v4433_v55 = vld [vmem:[%s4685_s19 + $0x380] ss:$36 sps:$4 sm:$0xff]  }
  0xea   : > { %3717 = vmatprep.subr.bf16.mxu1 %v4464_v56  ;;  %v4434_v56 = vld [vmem:[%s4685_s19 + $0x3bc] ss:$36 sps:$4 sm:$0xff]  }
  0xed   : > { %3733 = vmatpush1.bf16.msra.mxu1 %v4465_v61  ;;  %v4441_v61 = vld [vmem:[%s4685_s19 + $0x410] ss:$36 sps:$4 sm:$0xff]  }
  0xee   : > { %3718 = vmatprep.subr.bf16.mxu1 %v4466_v62  ;;  %v4442_v62 = vld [vmem:[%s4685_s19 + $0x44c] ss:$36 sps:$4 sm:$0xff]  }
  0xef   : > { %2257 = vmatmul.mubr.bf16.gmra.mrb[20].mxu1 %v4365_v57  ;;  %v4436_v57 = vld [vmem:[%s4685_s19 + $0x3b8] ss:$36 sps:$4 sm:$0xff]  }
  0xf0   : > { %2723 = vmatmul.mubr.bf16.gmra.mrb[52].mxu0 %v4366_v58  ;;  %2266 = vmatprep.mubr.bf16.mxu1 %v4367_v59  ;;  %v4437_v58 = vld [vmem:[%s4685_s19 + $0x3c8] ss:$36 sps:$4 sm:$0xff]  }
  0xf1   : > { %2732 = vmatprep.mubr.bf16.mxu0 %v4369_v60  ;;  %3734 = vmatpush1.bf16.msra.mxu1 %v4467_v63  ;;  %v4438_v59 = vld [vmem:[%s4685_s19 + $0x404] ss:$36 sps:$4 sm:$0xff]  }
  0xf2   : > { %3719 = vmatprep.subr.bf16.mxu1 %v4468_v0  ;;  %v4440_v60 = vld [vmem:[%s4685_s19 + $0x400] ss:$36 sps:$4 sm:$0xff]   ;;  %v4444_v63 = vld [vmem:[%s4685_s19 + $0x448] ss:$36 sps:$4 sm:$0xff]   ;;  %v4445_v0 = vld [vmem:[%s4685_s19 + $0x458] ss:$36 sps:$4 sm:$0xff]  }
  0xf3   : > { %s3706_s19 = sshll.u32 %s5405_s30, 4  ;;  %s3707_s30 = sshll.u32 %s5407_s12, 4 }
  0xf4   : > { %s5292_s6 = scalar_lea.vmem %s5398_s2, %s3706_s19  ;;  %s219_s9 = scalar_lea.vmem %s5399_s3, %s3707_s30 }
  0xf5   : > { %3735 = vmatpush1.bf16.msra.mxu1 %v4469_v5 }
  0xf6   : > { %3720 = vmatprep.subr.bf16.mxu1 %v4470_v6 }
  0xf7   : > { %2267 = vmatmul.mubr.bf16.gmra.mrb[24].mxu1 %v4371_v1 }
  0xf8   : > { %2733 = vmatmul.mubr.bf16.gmra.mrb[56].mxu0 %v4372_v2  ;;  %2276 = vmatprep.mubr.bf16.mxu1 %v4376_v3 }
  0xf9   : > { %2742 = vmatprep.mubr.bf16.mxu0 %v4378_v4  ;;  %3736 = vmatpush1.bf16.msra.mxu1 %v4471_v7 }
  0xfa   : > { %3721 = vmatprep.subr.bf16.mxu1 %v4472_v8 }
  0xfd   : > { %3737 = vmatpush1.bf16.msra.mxu1 %v4473_v12 }
  0xfe   : > { %3722 = vmatprep.subr.bf16.mxu1 %v4474_v13 }
  0xff   : > { %2277 = vmatmul.mubr.bf16.gmra.mrb[28].mxu1 %v4380_v9 }
 0x100   : > { %2743 = vmatmul.mubr.bf16.gmra.mrb[60].mxu0 %v4381_v10  ;;  %2286 = vmatprep.mubr.bf16.mxu1 %v4382_v11 }
 0x101   : > { %2785 = vmatprep.mubr.bf16.mxu0 %v4502_v14  ;;  %3738 = vmatpush1.bf16.msra.mxu1 %v4475_v15 }
 0x102   : > { %3723 = vmatprep.subr.bf16.mxu1 %v4476_v16 }
 0x105   : > { %3739 = vmatpush1.bf16.msra.mxu1 %v4477_v20 }
 0x107   : > { %2287 = vmatmul.mubr.bf16.gmra.mrb[32].mxu1 %v4384_v17 }
 0x108   : > { %2786 = vmatmul.mubr.bf16.vlgmr.msra.gmra.mrb[0].mxu0 %v4385_v18  ;;  %2296 = vmatprep.mubr.bf16.mxu1 %v4386_v19 }
 0x109   : > { %2795 = vmatprep.mubr.bf16.mxu0 %v4502_v14 }
 0x10f   : > { %2297 = vmatmul.mubr.bf16.gmra.mrb[36].mxu1 %v4388_v21 }
 0x110   : > { %2796 = vmatmul.mubr.bf16.gmra.mrb[4].mxu0 %v4389_v22  ;;  %2306 = vmatprep.mubr.bf16.mxu1 %v4390_v23 }
 0x111   : > { %2805 = vmatprep.mubr.bf16.mxu0 %v4502_v14 }
 0x117   : > { %2307 = vmatmul.mubr.bf16.gmra.mrb[40].mxu1 %v4392_v24 }
 0x118   : > { %2806 = vmatmul.mubr.bf16.gmra.mrb[8].mxu0 %v4393_v25  ;;  %2316 = vmatprep.mubr.bf16.mxu1 %v4394_v26 }
 0x119   : > { %2815 = vmatprep.mubr.bf16.mxu0 %v4502_v14 }
 0x11f   : > { %2317 = vmatmul.mubr.bf16.gmra.mrb[44].mxu1 %v4396_v27 }
 0x120   : > { %2816 = vmatmul.mubr.bf16.gmra.mrb[12].mxu0 %v4397_v28  ;;  %2326 = vmatprep.mubr.bf16.mxu1 %v4398_v29 }
 0x121   : > { %2825 = vmatprep.mubr.bf16.mxu0 %v4502_v14 }
 0x127   : > { %2327 = vmatmul.mubr.bf16.gmra.mrb[48].mxu1 %v4400_v30 }
 0x128   : > { %2826 = vmatmul.mubr.bf16.gmra.mrb[16].mxu0 %v4401_v31  ;;  %2336 = vmatprep.mubr.bf16.mxu1 %v4402_v32 }
 0x129   : > { %2835 = vmatprep.mubr.bf16.mxu0 %v4502_v14 }
 0x12f   : > { %2337 = vmatmul.mubr.bf16.gmra.mrb[52].mxu1 %v4404_v33 }
 0x130   : > { %2836 = vmatmul.mubr.bf16.gmra.mrb[20].mxu0 %v4405_v34  ;;  %2346 = vmatprep.mubr.bf16.mxu1 %v4406_v35 }
 0x131   : > { %2845 = vmatprep.mubr.bf16.mxu0 %v4502_v14 }
 0x137   : > { %2347 = vmatmul.mubr.bf16.gmra.mrb[56].mxu1 %v4408_v36 }
 0x138   : > { %2846 = vmatmul.mubr.bf16.gmra.mrb[24].mxu0 %v4409_v37  ;;  %2356 = vmatprep.mubr.bf16.mxu1 %v4410_v38 }
 0x139   : > { %2855 = vmatprep.mubr.bf16.mxu0 %v4502_v14 }
 0x13f   : > { %2357 = vmatmul.mubr.bf16.gmra.mrb[60].mxu1 %v4412_v39 }
 0x140   : > { %2856 = vmatmul.mubr.bf16.gmra.mrb[28].mxu0 %v4413_v40  ;;  %2479 = vmatprep.mubr.bf16.mxu1 %v4416_v41 }
 0x141   : > { %2865 = vmatprep.mubr.bf16.mxu0 %v4502_v14 }
 0x147   : > { %2480 = vmatmul.mubr.bf16.vlgmr.msra.gmra.mrb[32].mxu1 %v4414_v42 }
 0x148   : > { %2866 = vmatmul.mubr.bf16.gmra.mrb[32].mxu0 %v4417_v43  ;;  %2489 = vmatprep.mubr.bf16.mxu1 %v4418_v44 }
 0x149   : > { %2875 = vmatprep.mubr.bf16.mxu0 %v4502_v14 }
 0x14f   : > { %2490 = vmatmul.mubr.bf16.gmra.mrb[36].mxu1 %v4420_v45 }
 0x150   : > { %2876 = vmatmul.mubr.bf16.gmra.mrb[36].mxu0 %v4421_v46  ;;  %2499 = vmatprep.mubr.bf16.mxu1 %v4422_v47 }
 0x151   : > { %2885 = vmatprep.mubr.bf16.mxu0 %v4502_v14 }
 0x157   : > { %2500 = vmatmul.mubr.bf16.gmra.mrb[40].mxu1 %v4424_v48 }
 0x158   : > { %2886 = vmatmul.mubr.bf16.gmra.mrb[40].mxu0 %v4425_v49  ;;  %2509 = vmatprep.mubr.bf16.mxu1 %v4426_v50 }
 0x159   : > { %2895 = vmatprep.mubr.bf16.mxu0 %v4502_v14 }
 0x15f   : > { %2510 = vmatmul.mubr.bf16.gmra.mrb[44].mxu1 %v4428_v51 }
 0x160   : > { %2896 = vmatmul.mubr.bf16.gmra.mrb[44].mxu0 %v4429_v52  ;;  %2519 = vmatprep.mubr.bf16.mxu1 %v4430_v53 }
 0x161   : > { %2905 = vmatprep.mubr.bf16.mxu0 %v4502_v14 }
 0x167   : > { %2520 = vmatmul.mubr.bf16.gmra.mrb[48].mxu1 %v4432_v54 }
 0x168   : > { %2906 = vmatmul.mubr.bf16.gmra.mrb[48].mxu0 %v4433_v55  ;;  %2529 = vmatprep.mubr.bf16.mxu1 %v4434_v56 }
 0x169   : > { %2915 = vmatprep.mubr.bf16.mxu0 %v4502_v14 }
 0x16f   : > { %2530 = vmatmul.mubr.bf16.gmra.mrb[52].mxu1 %v4436_v57 }
 0x170   : > { %2916 = vmatmul.mubr.bf16.gmra.mrb[52].mxu0 %v4437_v58  ;;  %2539 = vmatprep.mubr.bf16.mxu1 %v4438_v59 }
 0x171   : > { %2925 = vmatprep.mubr.bf16.mxu0 %v4502_v14 }
 0x177   : > { %2540 = vmatmul.mubr.bf16.gmra.mrb[56].mxu1 %v4440_v60 }
 0x178   : > { %2926 = vmatmul.mubr.bf16.gmra.mrb[56].mxu0 %v4441_v61  ;;  %2549 = vmatprep.mubr.bf16.mxu1 %v4442_v62 }
 0x179   : > { %2935 = vmatprep.mubr.bf16.mxu0 %v4502_v14 }
 0x17f   : > { %2550 = vmatmul.mubr.bf16.gmra.mrb[60].mxu1 %v4444_v63 }
 0x180   : > { %2936 = vmatmul.mubr.bf16.gmra.mrb[60].mxu0 %v4445_v0 }
 0x19a   : > { %v2208_v1 = vpop.f32.mrb[0].mxu1 }
 0x19b   : > { %v2210_v2 = vpop.f32.mrb[1].mxu1 }
 0x19c   : > { %v2212_v3 = vpop.f32.mrb[2].mxu1 }
 0x19d   : > { %v2214_v4 = vpop.f32.mrb[3].mxu1 }
 0x1a2   : > { %v2218_v5 = vpop.f32.mrb[4].mxu1 }
 0x1a3   : > { %v2220_v6 = vpop.f32.mrb[5].mxu1 }
 0x1a4   : > { %v2222_v7 = vpop.f32.mrb[6].mxu1 }
 0x1a5   : > { %v2224_v8 = vpop.f32.mrb[7].mxu1 }
 0x1aa   : > { %v5240_v9 = vpop.f32.mrb[8].mxu1 }
 0x1ab   : > { %v5242_v10 = vpop.f32.mrb[9].mxu1 }
 0x1ac   : > { %v5244_v11 = vpop.f32.mrb[10].mxu1 }
 0x1ad   : > { %v5246_v12 = vpop.f32.mrb[11].mxu1 }
 0x1b2   : > { %v5248_v13 = vpop.f32.mrb[12].mxu1 }
 0x1b3   : > { %v5250_v14 = vpop.f32.mrb[13].mxu1 }
 0x1b4   : > { %v5252_v15 = vpop.f32.mrb[14].mxu1 }
 0x1b5   : > { %v5254_v16 = vpop.f32.mrb[15].mxu1 }
 0x1ba   : > { %v5256_v17 = vpop.f32.mrb[16].mxu1 }
 0x1bb   : > { %v5258_v18 = vpop.f32.mrb[17].mxu1 }
 0x1bc   : > { %v5260_v19 = vpop.f32.mrb[18].mxu1 }
 0x1bd   : > { %v5262_v20 = vpop.f32.mrb[19].mxu1 }
 0x1c2   : > { %v5264_v21 = vpop.f32.mrb[20].mxu1 }
 0x1c3   : > { %v5266_v22 = vpop.f32.mrb[21].mxu1 }
 0x1c4   : > { %v5268_v23 = vpop.f32.mrb[22].mxu1 }
 0x1c5   : > { %v5270_v24 = vpop.f32.mrb[23].mxu1 }
 0x1ca   : > { %v5272_v25 = vpop.f32.mrb[24].mxu1 }
 0x1cb   : > { %v5274_v26 = vpop.f32.mrb[25].mxu1 }
 0x1cc   : > { %v5276_v27 = vpop.f32.mrb[26].mxu1 }
 0x1cd   : > { %v5278_v28 = vpop.f32.mrb[27].mxu1 }
 0x1d2   : > { %v5280_v29 = vpop.f32.mrb[28].mxu1 }
 0x1d3   : > { %v5282_v30 = vpop.f32.mrb[29].mxu1 }
 0x1d4   : > { %v5284_v31 = vpop.f32.mrb[30].mxu1 }
 0x1d5   : > { %v5286_v32 = vpop.f32.mrb[31].mxu1 }
 0x1db   : > { %v2787_v33 = vpop.f32.mrb[0].mxu0 }
 0x1dc   : > { %v3740_v34 = vadd.f32 %v2787_v33, %v2208_v1  ;;  %v2789_v35 = vpop.f32.mrb[1].mxu0 }
 0x1dd   : > { %v3741_v36 = vadd.f32 %v2789_v35, %v2210_v2  ;;  %v2791_v37 = vpop.f32.mrb[2].mxu0 }
 0x1de   : > { %2946 = vst [vmem:[%s5292_s6] sm:$0xff] %v3740_v34  ;;  %v3742_v38 = vadd.f32 %v2791_v37, %v2212_v3  ;;  %v2793_v39 = vpop.f32.mrb[3].mxu0  ;;  %v3148_v41 = vmul.f32 %v3740_v34, %v3740_v34 }
 0x1df   : > { %2947 = vst [vmem:[%s5292_s6 + $0x8] sm:$0xff] %v3741_v36  ;;  %v3743_v40 = vadd.f32 %v2793_v39, %v2214_v4  ;;  %v3149_v44 = vmul.f32 %v3741_v36, %v3741_v36 }
 0x1e0   : > { %2948 = vst [vmem:[%s5292_s6 + $0x10] sm:$0xff] %v3742_v38  ;;  %v3074_v42 = vadd.f32 %v3742_v38, %v3740_v34  ;;  %v3150_v43 = vmul.f32 %v3742_v38, %v3742_v38 }
 0x1e1   : > { %2949 = vst [vmem:[%s5292_s6 + $0x18] sm:$0xff] %v3743_v40  ;;  %v3111_v45 = vadd.f32 %v3743_v40, %v3741_v36  ;;  %v3151_v46 = vmul.f32 %v3743_v40, %v3743_v40 }
 0x1e2   : > { %v3212_v47 = vadd.f32 %v3150_v43, %v3148_v41 }
 0x1e3   : > { %v3249_v48 = vadd.f32 %v3151_v46, %v3149_v44  ;;  %v2797_v49 = vpop.f32.mrb[4].mxu0 }
 0x1e4   : > { %v3744_v50 = vadd.f32 %v2797_v49, %v2218_v5  ;;  %v2799_v51 = vpop.f32.mrb[5].mxu0 }
 0x1e5   : > { %v3745_v52 = vadd.f32 %v2799_v51, %v2220_v6  ;;  %v2801_v53 = vpop.f32.mrb[6].mxu0 }
 0x1e6   : > { %2950 = vst [vmem:[%s5292_s6 + $0x20] sm:$0xff] %v3744_v50  ;;  %v3075_v54 = vadd.f32 %v3744_v50, %v3074_v42  ;;  %v3152_v55 = vmul.f32 %v3744_v50, %v3744_v50  ;;  %v3746_v56 = vadd.f32 %v2801_v53, %v2222_v7  ;;  %v2803_v57 = vpop.f32.mrb[7].mxu0 }
 0x1e7   : > { %2951 = vst [vmem:[%s5292_s6 + $0x28] sm:$0xff] %v3745_v52  ;;  %v3112_v58 = vadd.f32 %v3745_v52, %v3111_v45  ;;  %v3153_v59 = vmul.f32 %v3745_v52, %v3745_v52  ;;  %v3747_v60 = vadd.f32 %v2803_v57, %v2224_v8 }
 0x1e8   : > { %v3213_v61 = vadd.f32 %v3212_v47, %v3152_v55  ;;  %2952 = vst [vmem:[%s5292_s6 + $0x30] sm:$0xff] %v3746_v56  ;;  %v3076_v62 = vadd.f32 %v3746_v56, %v3075_v54  ;;  %v3154_v63 = vmul.f32 %v3746_v56, %v3746_v56 }
 0x1e9   : > { %v3250_v0 = vadd.f32 %v3249_v48, %v3153_v59  ;;  %2953 = vst [vmem:[%s5292_s6 + $0x38] sm:$0xff] %v3747_v60  ;;  %v3113_v1 = vadd.f32 %v3747_v60, %v3112_v58  ;;  %v3155_v2 = vmul.f32 %v3747_v60, %v3747_v60 }
 0x1ea   : > { %v3214_v3 = vadd.f32 %v3213_v61, %v3154_v63 }
 0x1eb   : > { %v3251_v4 = vadd.f32 %v3250_v0, %v3155_v2  ;;  %v2807_v5 = vpop.f32.mrb[8].mxu0 }
 0x1ec   : > { %v3748_v6 = vadd.f32 %v2807_v5, %v5240_v9  ;;  %v2809_v7 = vpop.f32.mrb[9].mxu0 }
 0x1ed   : > { %v3749_v33 = vadd.f32 %v2809_v7, %v5242_v10  ;;  %v2811_v8 = vpop.f32.mrb[10].mxu0 }
 0x1ee   : > { %2954 = vst [vmem:[%s5292_s6 + $0x40] sm:$0xff] %v3748_v6  ;;  %v3077_v34 = vadd.f32 %v3748_v6, %v3076_v62  ;;  %v3156_v35 = vmul.f32 %v3748_v6, %v3748_v6  ;;  %v3750_v36 = vadd.f32 %v2811_v8, %v5244_v11  ;;  %v2813_v37 = vpop.f32.mrb[11].mxu0 }
 0x1ef   : > { %2955 = vst [vmem:[%s5292_s6 + $0x48] sm:$0xff] %v3749_v33  ;;  %v3114_v38 = vadd.f32 %v3749_v33, %v3113_v1  ;;  %v3157_v39 = vmul.f32 %v3749_v33, %v3749_v33  ;;  %v3751_v40 = vadd.f32 %v2813_v37, %v5246_v12 }
 0x1f0   : > { %v3215_v41 = vadd.f32 %v3214_v3, %v3156_v35  ;;  %2956 = vst [vmem:[%s5292_s6 + $0x50] sm:$0xff] %v3750_v36  ;;  %v3078_v9 = vadd.f32 %v3750_v36, %v3077_v34  ;;  %v3158_v42 = vmul.f32 %v3750_v36, %v3750_v36 }
 0x1f1   : > { %v3252_v43 = vadd.f32 %v3251_v4, %v3157_v39  ;;  %2957 = vst [vmem:[%s5292_s6 + $0x58] sm:$0xff] %v3751_v40  ;;  %v3115_v10 = vadd.f32 %v3751_v40, %v3114_v38  ;;  %v3159_v44 = vmul.f32 %v3751_v40, %v3751_v40 }
 0x1f2   : > { %v3216_v45 = vadd.f32 %v3215_v41, %v3158_v42 }
 0x1f3   : > { %v3253_v46 = vadd.f32 %v3252_v43, %v3159_v44  ;;  %v2817_v11 = vpop.f32.mrb[12].mxu0 }
 0x1f4   : > { %v3752_v47 = vadd.f32 %v2817_v11, %v5248_v13  ;;  %v2819_v48 = vpop.f32.mrb[13].mxu0 }
 0x1f5   : > { %v3753_v49 = vadd.f32 %v2819_v48, %v5250_v14  ;;  %v2821_v12 = vpop.f32.mrb[14].mxu0 }
 0x1f6   : > { %2958 = vst [vmem:[%s5292_s6 + $0x60] sm:$0xff] %v3752_v47  ;;  %v3079_v50 = vadd.f32 %v3752_v47, %v3078_v9  ;;  %v3160_v51 = vmul.f32 %v3752_v47, %v3752_v47  ;;  %v3754_v52 = vadd.f32 %v2821_v12, %v5252_v15  ;;  %v2823_v53 = vpop.f32.mrb[15].mxu0 }
 0x1f7   : > { %2959 = vst [vmem:[%s5292_s6 + $0x68] sm:$0xff] %v3753_v49  ;;  %v3116_v54 = vadd.f32 %v3753_v49, %v3115_v10  ;;  %v3161_v55 = vmul.f32 %v3753_v49, %v3753_v49  ;;  %v3755_v56 = vadd.f32 %v2823_v53, %v5254_v16 }
 0x1f8   : > { %v3217_v57 = vadd.f32 %v3216_v45, %v3160_v51  ;;  %2960 = vst [vmem:[%s5292_s6 + $0x70] sm:$0xff] %v3754_v52  ;;  %v3080_v13 = vadd.f32 %v3754_v52, %v3079_v50  ;;  %v3162_v58 = vmul.f32 %v3754_v52, %v3754_v52 }
 0x1f9   : > { %v3254_v59 = vadd.f32 %v3253_v46, %v3161_v55  ;;  %2961 = vst [vmem:[%s5292_s6 + $0x78] sm:$0xff] %v3755_v56  ;;  %v3117_v14 = vadd.f32 %v3755_v56, %v3116_v54  ;;  %v3163_v60 = vmul.f32 %v3755_v56, %v3755_v56 }
 0x1fa   : > { %v3218_v61 = vadd.f32 %v3217_v57, %v3162_v58 }
 0x1fb   : > { %v3255_v62 = vadd.f32 %v3254_v59, %v3163_v60  ;;  %v2827_v15 = vpop.f32.mrb[16].mxu0 }
 0x1fc   : > { %v3756_v63 = vadd.f32 %v2827_v15, %v5256_v17  ;;  %v2829_v0 = vpop.f32.mrb[17].mxu0 }
 0x1fd   : > { %v3757_v1 = vadd.f32 %v2829_v0, %v5258_v18  ;;  %v2831_v16 = vpop.f32.mrb[18].mxu0 }
 0x1fe   : > { %2962 = vst [vmem:[%s5292_s6 + $0x80] sm:$0xff] %v3756_v63  ;;  %v3081_v2 = vadd.f32 %v3756_v63, %v3080_v13  ;;  %v3164_v3 = vmul.f32 %v3756_v63, %v3756_v63  ;;  %v3758_v4 = vadd.f32 %v2831_v16, %v5260_v19  ;;  %v2833_v5 = vpop.f32.mrb[19].mxu0 }
 0x1ff   : > { %2963 = vst [vmem:[%s5292_s6 + $0x88] sm:$0xff] %v3757_v1  ;;  %v3118_v6 = vadd.f32 %v3757_v1, %v3117_v14  ;;  %v3165_v7 = vmul.f32 %v3757_v1, %v3757_v1  ;;  %v3759_v33 = vadd.f32 %v2833_v5, %v5262_v20 }
 0x200   : > { %v3219_v8 = vadd.f32 %v3218_v61, %v3164_v3  ;;  %2964 = vst [vmem:[%s5292_s6 + $0x90] sm:$0xff] %v3758_v4  ;;  %v3082_v17 = vadd.f32 %v3758_v4, %v3081_v2  ;;  %v3166_v34 = vmul.f32 %v3758_v4, %v3758_v4 }
 0x201   : > { %v3256_v35 = vadd.f32 %v3255_v62, %v3165_v7  ;;  %2965 = vst [vmem:[%s5292_s6 + $0x98] sm:$0xff] %v3759_v33  ;;  %v3119_v18 = vadd.f32 %v3759_v33, %v3118_v6  ;;  %v3167_v36 = vmul.f32 %v3759_v33, %v3759_v33 }
 0x202   : > { %v3220_v37 = vadd.f32 %v3219_v8, %v3166_v34 }
 0x203   : > { %v3257_v38 = vadd.f32 %v3256_v35, %v3167_v36  ;;  %v2837_v19 = vpop.f32.mrb[20].mxu0 }
 0x204   : > { %v3760_v39 = vadd.f32 %v2837_v19, %v5264_v21  ;;  %v2839_v40 = vpop.f32.mrb[21].mxu0 }
 0x205   : > { %v3761_v41 = vadd.f32 %v2839_v40, %v5266_v22  ;;  %v2841_v20 = vpop.f32.mrb[22].mxu0 }
 0x206   : > { %2966 = vst [vmem:[%s5292_s6 + $0xa0] sm:$0xff] %v3760_v39  ;;  %v3083_v9 = vadd.f32 %v3760_v39, %v3082_v17  ;;  %v3168_v42 = vmul.f32 %v3760_v39, %v3760_v39  ;;  %v3762_v43 = vadd.f32 %v2841_v20, %v5268_v23  ;;  %v2843_v10 = vpop.f32.mrb[23].mxu0 }
 0x207   : > { %2967 = vst [vmem:[%s5292_s6 + $0xa8] sm:$0xff] %v3761_v41  ;;  %v3120_v44 = vadd.f32 %v3761_v41, %v3119_v18  ;;  %v3169_v45 = vmul.f32 %v3761_v41, %v3761_v41  ;;  %v3763_v46 = vadd.f32 %v2843_v10, %v5270_v24 }
 0x208   : > { %v3221_v11 = vadd.f32 %v3220_v37, %v3168_v42  ;;  %2968 = vst [vmem:[%s5292_s6 + $0xb0] sm:$0xff] %v3762_v43  ;;  %v3084_v21 = vadd.f32 %v3762_v43, %v3083_v9  ;;  %v3170_v47 = vmul.f32 %v3762_v43, %v3762_v43 }
 0x209   : > { %v3258_v48 = vadd.f32 %v3257_v38, %v3169_v45  ;;  %2969 = vst [vmem:[%s5292_s6 + $0xb8] sm:$0xff] %v3763_v46  ;;  %v3121_v22 = vadd.f32 %v3763_v46, %v3120_v44  ;;  %v3171_v49 = vmul.f32 %v3763_v46, %v3763_v46 }
 0x20a   : > { %v3222_v12 = vadd.f32 %v3221_v11, %v3170_v47 }
 0x20b   : > { %v3259_v50 = vadd.f32 %v3258_v48, %v3171_v49  ;;  %v2847_v23 = vpop.f32.mrb[24].mxu0 }
 0x20c   : > { %v3764_v51 = vadd.f32 %v2847_v23, %v5272_v25  ;;  %v2849_v52 = vpop.f32.mrb[25].mxu0 }
 0x20d   : > { %v3765_v53 = vadd.f32 %v2849_v52, %v5274_v26  ;;  %v2851_v24 = vpop.f32.mrb[26].mxu0 }
 0x20e   : > { %2970 = vst [vmem:[%s5292_s6 + $0xc0] sm:$0xff] %v3764_v51  ;;  %v3085_v54 = vadd.f32 %v3764_v51, %v3084_v21  ;;  %v3172_v55 = vmul.f32 %v3764_v51, %v3764_v51  ;;  %v3766_v56 = vadd.f32 %v2851_v24, %v5276_v27  ;;  %v2853_v57 = vpop.f32.mrb[27].mxu0 }
 0x20f   : > { %2971 = vst [vmem:[%s5292_s6 + $0xc8] sm:$0xff] %v3765_v53  ;;  %v3122_v13 = vadd.f32 %v3765_v53, %v3121_v22  ;;  %v3173_v58 = vmul.f32 %v3765_v53, %v3765_v53  ;;  %v3767_v59 = vadd.f32 %v2853_v57, %v5278_v28 }
 0x210   : > { %v3223_v14 = vadd.f32 %v3222_v12, %v3172_v55  ;;  %2972 = vst [vmem:[%s5292_s6 + $0xd0] sm:$0xff] %v3766_v56  ;;  %v3086_v25 = vadd.f32 %v3766_v56, %v3085_v54  ;;  %v3174_v60 = vmul.f32 %v3766_v56, %v3766_v56 }
 0x211   : > { %v3260_v61 = vadd.f32 %v3259_v50, %v3173_v58  ;;  %2973 = vst [vmem:[%s5292_s6 + $0xd8] sm:$0xff] %v3767_v59  ;;  %v3123_v26 = vadd.f32 %v3767_v59, %v3122_v13  ;;  %v3175_v62 = vmul.f32 %v3767_v59, %v3767_v59 }
 0x212   : > { %v3224_v15 = vadd.f32 %v3223_v14, %v3174_v60 }
 0x213   : > { %v3261_v63 = vadd.f32 %v3260_v61, %v3175_v62  ;;  %v2857_v27 = vpop.f32.mrb[28].mxu0 }
 0x214   : > { %v3768_v0 = vadd.f32 %v2857_v27, %v5280_v29  ;;  %v2859_v1 = vpop.f32.mrb[29].mxu0 }
 0x215   : > { %v3769_v16 = vadd.f32 %v2859_v1, %v5282_v30  ;;  %v2861_v28 = vpop.f32.mrb[30].mxu0 }
 0x216   : > { %2974 = vst [vmem:[%s5292_s6 + $0xe0] sm:$0xff] %v3768_v0  ;;  %v3087_v2 = vadd.f32 %v3768_v0, %v3086_v25  ;;  %v3176_v3 = vmul.f32 %v3768_v0, %v3768_v0  ;;  %v3770_v4 = vadd.f32 %v2861_v28, %v5284_v31  ;;  %v2863_v5 = vpop.f32.mrb[31].mxu0 }
 0x217   : > { %2975 = vst [vmem:[%s5292_s6 + $0xe8] sm:$0xff] %v3769_v16  ;;  %v3124_v6 = vadd.f32 %v3769_v16, %v3123_v26  ;;  %v3177_v7 = vmul.f32 %v3769_v16, %v3769_v16  ;;  %v3771_v33 = vadd.f32 %v2863_v5, %v5286_v32 }
 0x218   : > { %v3225_v8 = vadd.f32 %v3224_v15, %v3176_v3  ;;  %2976 = vst [vmem:[%s5292_s6 + $0xf0] sm:$0xff] %v3770_v4  ;;  %v3088_v17 = vadd.f32 %v3770_v4, %v3087_v2  ;;  %v3178_v29 = vmul.f32 %v3770_v4, %v3770_v4 }
 0x219   : > { %v3262_v34 = vadd.f32 %v3261_v63, %v3177_v7  ;;  %2977 = vst [vmem:[%s5292_s6 + $0xf8] sm:$0xff] %v3771_v33  ;;  %v3125_v30 = vadd.f32 %v3771_v33, %v3124_v6  ;;  %v3179_v35 = vmul.f32 %v3771_v33, %v3771_v33 }
 0x21a   : > { %v3226_v18 = vadd.f32 %v3225_v8, %v3178_v29  ;;  %v2481_v37 = vpop.f32.mrb[32].mxu1 }
 0x21b   : > { %v3263_v36 = vadd.f32 %v3262_v34, %v3179_v35  ;;  %v2867_v31 = vpop.f32.mrb[32].mxu0  ;;  %v2483_v19 = vpop.f32.mrb[33].mxu1 }
 0x21c   : > { %v3772_v38 = vadd.f32 %v2867_v31, %v2481_v37  ;;  %v2869_v39 = vpop.f32.mrb[33].mxu0  ;;  %v2485_v32 = vpop.f32.mrb[34].mxu1 }
 0x21d   : > { %v3773_v40 = vadd.f32 %v2869_v39, %v2483_v19  ;;  %v2871_v41 = vpop.f32.mrb[34].mxu0  ;;  %v2487_v43 = vpop.f32.mrb[35].mxu1 }
 0x21e   : > { %2978 = vst [vmem:[%s5292_s6 + $0x100] sm:$0xff] %v3772_v38  ;;  %v3089_v20 = vadd.f32 %v3772_v38, %v3088_v17  ;;  %v3180_v9 = vmul.f32 %v3772_v38, %v3772_v38  ;;  %v3774_v42 = vadd.f32 %v2871_v41, %v2485_v32  ;;  %v2873_v10 = vpop.f32.mrb[35].mxu0 }
 0x21f   : > { %2979 = vst [vmem:[%s5292_s6 + $0x108] sm:$0xff] %v3773_v40  ;;  %v3126_v44 = vadd.f32 %v3773_v40, %v3125_v30  ;;  %v3181_v45 = vmul.f32 %v3773_v40, %v3773_v40  ;;  %v3775_v46 = vadd.f32 %v2873_v10, %v2487_v43 }
 0x220   : > { %v3227_v11 = vadd.f32 %v3226_v18, %v3180_v9  ;;  %2980 = vst [vmem:[%s5292_s6 + $0x110] sm:$0xff] %v3774_v42  ;;  %v3090_v21 = vadd.f32 %v3774_v42, %v3089_v20  ;;  %v3182_v47 = vmul.f32 %v3774_v42, %v3774_v42 }
 0x221   : > { %v3264_v48 = vadd.f32 %v3263_v36, %v3181_v45  ;;  %2981 = vst [vmem:[%s5292_s6 + $0x118] sm:$0xff] %v3775_v46  ;;  %v3127_v22 = vadd.f32 %v3775_v46, %v3126_v44  ;;  %v3183_v49 = vmul.f32 %v3775_v46, %v3775_v46 }
 0x222   : > { %v3228_v12 = vadd.f32 %v3227_v11, %v3182_v47  ;;  %v2491_v23 = vpop.f32.mrb[36].mxu1 }
 0x223   : > { %v3265_v50 = vadd.f32 %v3264_v48, %v3183_v49  ;;  %v2877_v51 = vpop.f32.mrb[36].mxu0  ;;  %v2493_v53 = vpop.f32.mrb[37].mxu1 }
 0x224   : > { %v3776_v52 = vadd.f32 %v2877_v51, %v2491_v23  ;;  %v2879_v24 = vpop.f32.mrb[37].mxu0  ;;  %v2495_v55 = vpop.f32.mrb[38].mxu1 }
 0x225   : > { %v3777_v54 = vadd.f32 %v2879_v24, %v2493_v53  ;;  %v2881_v56 = vpop.f32.mrb[38].mxu0  ;;  %v2497_v59 = vpop.f32.mrb[39].mxu1 }
 0x226   : > { %2982 = vst [vmem:[%s5292_s6 + $0x120] sm:$0xff] %v3776_v52  ;;  %v3091_v57 = vadd.f32 %v3776_v52, %v3090_v21  ;;  %v3184_v13 = vmul.f32 %v3776_v52, %v3776_v52  ;;  %v3778_v58 = vadd.f32 %v2881_v56, %v2495_v55  ;;  %v2883_v14 = vpop.f32.mrb[39].mxu0 }
 0x227   : > { %2983 = vst [vmem:[%s5292_s6 + $0x128] sm:$0xff] %v3777_v54  ;;  %v3128_v25 = vadd.f32 %v3777_v54, %v3127_v22  ;;  %v3185_v60 = vmul.f32 %v3777_v54, %v3777_v54  ;;  %v3779_v61 = vadd.f32 %v2883_v14, %v2497_v59 }
 0x228   : > { %v3229_v26 = vadd.f32 %v3228_v12, %v3184_v13  ;;  %2984 = vst [vmem:[%s5292_s6 + $0x130] sm:$0xff] %v3778_v58  ;;  %v3092_v62 = vadd.f32 %v3778_v58, %v3091_v57  ;;  %v3186_v15 = vmul.f32 %v3778_v58, %v3778_v58 }
 0x229   : > { %v3266_v63 = vadd.f32 %v3265_v50, %v3185_v60  ;;  %2985 = vst [vmem:[%s5292_s6 + $0x138] sm:$0xff] %v3779_v61  ;;  %v3129_v27 = vadd.f32 %v3779_v61, %v3128_v25  ;;  %v3187_v0 = vmul.f32 %v3779_v61, %v3779_v61 }
 0x22a   : > { %v3230_v1 = vadd.f32 %v3229_v26, %v3186_v15  ;;  %v2501_v28 = vpop.f32.mrb[40].mxu1 }
 0x22b   : > { %v3267_v16 = vadd.f32 %v3266_v63, %v3187_v0  ;;  %v2887_v2 = vpop.f32.mrb[40].mxu0  ;;  %v2503_v4 = vpop.f32.mrb[41].mxu1 }
 0x22c   : > { %v3780_v3 = vadd.f32 %v2887_v2, %v2501_v28  ;;  %v2889_v5 = vpop.f32.mrb[41].mxu0  ;;  %v2505_v7 = vpop.f32.mrb[42].mxu1 }
 0x22d   : > { %v3781_v6 = vadd.f32 %v2889_v5, %v2503_v4  ;;  %v2891_v33 = vpop.f32.mrb[42].mxu0  ;;  %v2507_v34 = vpop.f32.mrb[43].mxu1 }
 0x22e   : > { %2986 = vst [vmem:[%s5292_s6 + $0x140] sm:$0xff] %v3780_v3  ;;  %v3093_v8 = vadd.f32 %v3780_v3, %v3092_v62  ;;  %v3188_v17 = vmul.f32 %v3780_v3, %v3780_v3  ;;  %v3782_v29 = vadd.f32 %v2891_v33, %v2505_v7  ;;  %v2893_v30 = vpop.f32.mrb[43].mxu0 }
 0x22f   : > { %2987 = vst [vmem:[%s5292_s6 + $0x148] sm:$0xff] %v3781_v6  ;;  %v3130_v35 = vadd.f32 %v3781_v6, %v3129_v27  ;;  %v3189_v18 = vmul.f32 %v3781_v6, %v3781_v6  ;;  %v3783_v36 = vadd.f32 %v2893_v30, %v2507_v34 }
 0x230   : > { %v3231_v37 = vadd.f32 %v3230_v1, %v3188_v17  ;;  %2988 = vst [vmem:[%s5292_s6 + $0x150] sm:$0xff] %v3782_v29  ;;  %v3094_v31 = vadd.f32 %v3782_v29, %v3093_v8  ;;  %v3190_v38 = vmul.f32 %v3782_v29, %v3782_v29 }
 0x231   : > { %v3268_v19 = vadd.f32 %v3267_v16, %v3189_v18  ;;  %2989 = vst [vmem:[%s5292_s6 + $0x158] sm:$0xff] %v3783_v36  ;;  %v3131_v39 = vadd.f32 %v3783_v36, %v3130_v35  ;;  %v3191_v40 = vmul.f32 %v3783_v36, %v3783_v36 }
 0x232   : > { %v3232_v32 = vadd.f32 %v3231_v37, %v3190_v38  ;;  %v2511_v20 = vpop.f32.mrb[44].mxu1 }
 0x233   : > { %v3269_v41 = vadd.f32 %v3268_v19, %v3191_v40  ;;  %v2897_v9 = vpop.f32.mrb[44].mxu0  ;;  %v2513_v43 = vpop.f32.mrb[45].mxu1 }
 0x234   : > { %v3784_v42 = vadd.f32 %v2897_v9, %v2511_v20  ;;  %v2899_v10 = vpop.f32.mrb[45].mxu0  ;;  %v2515_v45 = vpop.f32.mrb[46].mxu1 }
 0x235   : > { %v3785_v44 = vadd.f32 %v2899_v10, %v2513_v43  ;;  %v2901_v46 = vpop.f32.mrb[46].mxu0  ;;  %v2517_v48 = vpop.f32.mrb[47].mxu1 }
 0x236   : > { %2990 = vst [vmem:[%s5292_s6 + $0x160] sm:$0xff] %v3784_v42  ;;  %v3095_v11 = vadd.f32 %v3784_v42, %v3094_v31  ;;  %v3192_v21 = vmul.f32 %v3784_v42, %v3784_v42  ;;  %v3786_v47 = vadd.f32 %v2901_v46, %v2515_v45  ;;  %v2903_v22 = vpop.f32.mrb[47].mxu0 }
 0x237   : > { %2991 = vst [vmem:[%s5292_s6 + $0x168] sm:$0xff] %v3785_v44  ;;  %v3132_v49 = vadd.f32 %v3785_v44, %v3131_v39  ;;  %v3193_v12 = vmul.f32 %v3785_v44, %v3785_v44  ;;  %v3787_v50 = vadd.f32 %v2903_v22, %v2517_v48 }
 0x238   : > { %v3233_v23 = vadd.f32 %v3232_v32, %v3192_v21  ;;  %2992 = vst [vmem:[%s5292_s6 + $0x170] sm:$0xff] %v3786_v47  ;;  %v3096_v51 = vadd.f32 %v3786_v47, %v3095_v11  ;;  %v3194_v52 = vmul.f32 %v3786_v47, %v3786_v47 }
 0x239   : > { %v3270_v53 = vadd.f32 %v3269_v41, %v3193_v12  ;;  %2993 = vst [vmem:[%s5292_s6 + $0x178] sm:$0xff] %v3787_v50  ;;  %v3133_v24 = vadd.f32 %v3787_v50, %v3132_v49  ;;  %v3195_v54 = vmul.f32 %v3787_v50, %v3787_v50 }
 0x23a   : > { %v3234_v55 = vadd.f32 %v3233_v23, %v3194_v52  ;;  %v2521_v57 = vpop.f32.mrb[48].mxu1 }
 0x23b   : > { %v3271_v56 = vadd.f32 %v3270_v53, %v3195_v54  ;;  %v2907_v13 = vpop.f32.mrb[48].mxu0  ;;  %v2523_v59 = vpop.f32.mrb[49].mxu1 }
 0x23c   : > { %v3788_v58 = vadd.f32 %v2907_v13, %v2521_v57  ;;  %v2909_v14 = vpop.f32.mrb[49].mxu0  ;;  %v2525_v60 = vpop.f32.mrb[50].mxu1 }
 0x23d   : > { %v3789_v25 = vadd.f32 %v2909_v14, %v2523_v59  ;;  %v2911_v61 = vpop.f32.mrb[50].mxu0  ;;  %v2527_v63 = vpop.f32.mrb[51].mxu1 }
 0x23e   : > { %2994 = vst [vmem:[%s5292_s6 + $0x180] sm:$0xff] %v3788_v58  ;;  %v3097_v26 = vadd.f32 %v3788_v58, %v3096_v51  ;;  %v3196_v62 = vmul.f32 %v3788_v58, %v3788_v58  ;;  %v3790_v15 = vadd.f32 %v2911_v61, %v2525_v60  ;;  %v2913_v27 = vpop.f32.mrb[51].mxu0 }
 0x23f   : > { %2995 = vst [vmem:[%s5292_s6 + $0x188] sm:$0xff] %v3789_v25  ;;  %v3134_v0 = vadd.f32 %v3789_v25, %v3133_v24  ;;  %v3197_v1 = vmul.f32 %v3789_v25, %v3789_v25  ;;  %v3791_v16 = vadd.f32 %v2913_v27, %v2527_v63 }
 0x240   : > { %v3235_v28 = vadd.f32 %v3234_v55, %v3196_v62  ;;  %2996 = vst [vmem:[%s5292_s6 + $0x190] sm:$0xff] %v3790_v15  ;;  %v3098_v2 = vadd.f32 %v3790_v15, %v3097_v26  ;;  %v3198_v3 = vmul.f32 %v3790_v15, %v3790_v15 }
 0x241   : > { %v3272_v4 = vadd.f32 %v3271_v56, %v3197_v1  ;;  %2997 = vst [vmem:[%s5292_s6 + $0x198] sm:$0xff] %v3791_v16  ;;  %v3135_v5 = vadd.f32 %v3791_v16, %v3134_v0  ;;  %v3199_v6 = vmul.f32 %v3791_v16, %v3791_v16 }
 0x242   : > { %v3236_v7 = vadd.f32 %v3235_v28, %v3198_v3  ;;  %v2531_v8 = vpop.f32.mrb[52].mxu1 }
 0x243   : > { %v3273_v33 = vadd.f32 %v3272_v4, %v3199_v6  ;;  %v2917_v17 = vpop.f32.mrb[52].mxu0  ;;  %v2533_v34 = vpop.f32.mrb[53].mxu1 }
 0x244   : > { %v3792_v29 = vadd.f32 %v2917_v17, %v2531_v8  ;;  %v2919_v30 = vpop.f32.mrb[53].mxu0  ;;  %v2535_v18 = vpop.f32.mrb[54].mxu1 }
 0x245   : > { %v3793_v35 = vadd.f32 %v2919_v30, %v2533_v34  ;;  %v2921_v36 = vpop.f32.mrb[54].mxu0  ;;  %v2537_v19 = vpop.f32.mrb[55].mxu1 }
 0x246   : > { %2998 = vst [vmem:[%s5292_s6 + $0x1a0] sm:$0xff] %v3792_v29  ;;  %v3099_v37 = vadd.f32 %v3792_v29, %v3098_v2  ;;  %v3200_v31 = vmul.f32 %v3792_v29, %v3792_v29  ;;  %v3794_v38 = vadd.f32 %v2921_v36, %v2535_v18  ;;  %v2923_v39 = vpop.f32.mrb[55].mxu0 }
 0x247   : > { %2999 = vst [vmem:[%s5292_s6 + $0x1a8] sm:$0xff] %v3793_v35  ;;  %v3136_v40 = vadd.f32 %v3793_v35, %v3135_v5  ;;  %v3201_v32 = vmul.f32 %v3793_v35, %v3793_v35  ;;  %v3795_v41 = vadd.f32 %v2923_v39, %v2537_v19  ;;  %v3286_v39 = vlaneseq }
 0x248   : > { %v3237_v20 = vadd.f32 %v3236_v7, %v3200_v31  ;;  %3000 = vst [vmem:[%s5292_s6 + $0x1b0] sm:$0xff] %v3794_v38  ;;  %v3100_v9 = vadd.f32 %v3794_v38, %v3099_v37  ;;  %v3202_v42 = vmul.f32 %v3794_v38, %v3794_v38 }
 0x249   : > { %v3274_v43 = vadd.f32 %v3273_v33, %v3201_v32  ;;  %3001 = vst [vmem:[%s5292_s6 + $0x1b8] sm:$0xff] %v3795_v41  ;;  %v3137_v10 = vadd.f32 %v3795_v41, %v3136_v40  ;;  %v3203_v44 = vmul.f32 %v3795_v41, %v3795_v41 }
 0x24a   : > { %v3238_v45 = vadd.f32 %v3237_v20, %v3202_v42  ;;  %v2541_v11 = vpop.f32.mrb[56].mxu1 }
 0x24b   : > { %v3275_v46 = vadd.f32 %v3274_v43, %v3203_v44  ;;  %v2927_v21 = vpop.f32.mrb[56].mxu0  ;;  %v2543_v48 = vpop.f32.mrb[57].mxu1  ;;  %v3287_v44 = vshrl.u32 %v3286_v39, 7 }
 0x24c   : > { %v3796_v47 = vadd.f32 %v2927_v21, %v2541_v11  ;;  %v2929_v22 = vpop.f32.mrb[57].mxu0  ;;  %v2545_v12 = vpop.f32.mrb[58].mxu1 }
 0x24d   : > { %v3797_v49 = vadd.f32 %v2929_v22, %v2543_v48  ;;  %v2931_v50 = vpop.f32.mrb[58].mxu0  ;;  %v2547_v53 = vpop.f32.mrb[59].mxu1  ;;  %vm3288_vm0 = vcmp.eq.s32.totalorder %v3287_v44, 0  ;;  %vm3291_vm1 = vcmp.eq.s32.totalorder %v3287_v44, 1 }
 0x24e   : > { %3002 = vst [vmem:[%s5292_s6 + $0x1c0] sm:$0xff] %v3796_v47  ;;  %v3101_v23 = vadd.f32 %v3796_v47, %v3100_v9  ;;  %v3204_v51 = vmul.f32 %v3796_v47, %v3796_v47  ;;  %v3798_v52 = vadd.f32 %v2931_v50, %v2545_v12  ;;  %v2933_v24 = vpop.f32.mrb[59].mxu0 }
 0x24f   : > { %3003 = vst [vmem:[%s5292_s6 + $0x1c8] sm:$0xff] %v3797_v49  ;;  %v3138_v54 = vadd.f32 %v3797_v49, %v3137_v10  ;;  %v3205_v55 = vmul.f32 %v3797_v49, %v3797_v49  ;;  %v3799_v56 = vadd.f32 %v2933_v24, %v2547_v53 }
 0x250   : > { %v3239_v57 = vadd.f32 %v3238_v45, %v3204_v51  ;;  %3004 = vst [vmem:[%s5292_s6 + $0x1d0] sm:$0xff] %v3798_v52  ;;  %v3102_v13 = vadd.f32 %v3798_v52, %v3101_v23  ;;  %v3206_v58 = vmul.f32 %v3798_v52, %v3798_v52 }
 0x251   : > { %v3276_v59 = vadd.f32 %v3275_v46, %v3205_v55  ;;  %3005 = vst [vmem:[%s5292_s6 + $0x1d8] sm:$0xff] %v3799_v56  ;;  %v3139_v14 = vadd.f32 %v3799_v56, %v3138_v54  ;;  %v3207_v25 = vmul.f32 %v3799_v56, %v3799_v56 }
 0x252   : > { %v3240_v60 = vadd.f32 %v3239_v57, %v3206_v58  ;;  %v2551_v26 = vpop.f32.mrb[60].mxu1 }
 0x253   : > { %v3277_v61 = vadd.f32 %v3276_v59, %v3207_v25  ;;  %v2937_v62 = vpop.f32.mrb[60].mxu0  ;;  %v2553_v63 = vpop.f32.mrb[61].mxu1 }
 0x254   : > { %v3800_v15 = vadd.f32 %v2937_v62, %v2551_v26  ;;  %v2939_v27 = vpop.f32.mrb[61].mxu0  ;;  %v2555_v1 = vpop.f32.mrb[62].mxu1 }
 0x255   : > { %v3801_v0 = vadd.f32 %v2939_v27, %v2553_v63  ;;  %v2941_v16 = vpop.f32.mrb[62].mxu0  ;;  %v2557_v4 = vpop.f32.mrb[63].mxu1 }
 0x256   : > { %3006 = vst [vmem:[%s5292_s6 + $0x1e0] sm:$0xff] %v3800_v15  ;;  %v3103_v28 = vadd.f32 %v3800_v15, %v3102_v13  ;;  %v3208_v2 = vmul.f32 %v3800_v15, %v3800_v15  ;;  %v3802_v3 = vadd.f32 %v2941_v16, %v2555_v1  ;;  %v2943_v5 = vpop.f32.mrb[63].mxu0 }
 0x257   : > { %3007 = vst [vmem:[%s5292_s6 + $0x1e8] sm:$0xff] %v3801_v0  ;;  %v3140_v6 = vadd.f32 %v3801_v0, %v3139_v14  ;;  %v3209_v7 = vmul.f32 %v3801_v0, %v3801_v0  ;;  %v3803_v33 = vadd.f32 %v2943_v5, %v2557_v4 }
 0x258   : > { %v3241_v8 = vadd.f32 %v3240_v60, %v3208_v2  ;;  %3008 = vst [vmem:[%s5292_s6 + $0x1f0] sm:$0xff] %v3802_v3  ;;  %v3104_v17 = vadd.f32 %v3802_v3, %v3103_v28  ;;  %v3210_v29 = vmul.f32 %v3802_v3, %v3802_v3 }
 0x259   : > { %v3278_v34 = vadd.f32 %v3277_v61, %v3209_v7  ;;  %3009 = vst [vmem:[%s5292_s6 + $0x1f8] sm:$0xff] %v3803_v33  ;;  %v3141_v30 = vadd.f32 %v3803_v33, %v3140_v6  ;;  %v3211_v35 = vmul.f32 %v3803_v33, %v3803_v33 }
 0x25a   : > { %v3105_v18 = vrot.slane %v3104_v17, 4  ;;  %v3242_v36 = vadd.f32 %v3241_v8, %v3210_v29 }
 0x25b   : > { %v3142_v37 = vrot.slane %v3141_v30, 4  ;;  %v3279_v31 = vadd.f32 %v3278_v34, %v3211_v35 }
 0x25c   : > { %v3106_v38 = vadd.f32 %v3105_v18, %v3104_v17  ;;  %v3243_v19 = vrot.slane %v3242_v36, 4 }
 0x25d   : > { %v3143_v40 = vadd.f32 %v3142_v37, %v3141_v30  ;;  %v3280_v32 = vrot.slane %v3279_v31, 4 }
 0x25e   : > { %v3107_v41 = vrot.slane %v3106_v38, 2  ;;  %v3244_v20 = vadd.f32 %v3243_v19, %v3242_v36 }
 0x25f   : > { %v3144_v9 = vrot.slane %v3143_v40, 2  ;;  %v3281_v42 = vadd.f32 %v3280_v32, %v3279_v31 }
 0x260   : > { %v3108_v43 = vadd.f32 %v3107_v41, %v3106_v38  ;;  %v3245_v10 = vrot.slane %v3244_v20, 2 }
 0x261   : > { %v3145_v45 = vadd.f32 %v3144_v9, %v3143_v40  ;;  %v3282_v46 = vrot.slane %v3281_v42, 2 }
 0x262   : > { %v3109_v11 = vrot.slane %v3108_v43, 1  ;;  %v3246_v21 = vadd.f32 %v3245_v10, %v3244_v20 }
 0x263   : > { %v3146_v47 = vrot.slane %v3145_v45, 1  ;;  %v3283_v48 = vadd.f32 %v3282_v46, %v3281_v42 }
 0x264   : > { %v3110_v22 = vadd.f32 %v3109_v11, %v3108_v43  ;;  %v3247_v49 = vrot.slane %v3246_v21, 1 }
 0x265   : > { %v3147_v12 = vadd.f32 %v3146_v47, %v3145_v45  ;;  %v3284_v50 = vrot.slane %v3283_v48, 1 }
 0x266   : > { %v3248_v23 = vadd.f32 %v3247_v49, %v3246_v21  ;;  %v3289_v52 = vsel %vm3288_vm0, %v3110_v22, 0.0 }
 0x267   : > { %v3285_v51 = vadd.f32 %v3284_v50, %v3283_v48  ;;  %v3290_v54 = vsel %vm3288_vm0, %v3147_v12, 0.0 }
 0x268   : > { %v3292_v53 = vsel %vm3291_vm1, %v3248_v23, 0.0 }
 0x269   : > { %v3294_v24 = vadd.f32 %v3292_v53, %v3289_v52  ;;  %v3293_v55 = vsel %vm3291_vm1, %v3285_v51, 0.0 }
 0x26a   : > { %v3295_v56 = vadd.f32 %v3293_v55, %v3290_v54 }
 0x26b   : > { %3296 = vst [vmem:[%s219_s9] sm:$0xff] %v3294_v24 }
 0x26c   : > { %3297 = vst [vmem:[%s219_s9 + $0x8] sm:$0xff] %v3295_v56 }
 0x26d PF: > { %s14_s14 = sadd.s32 1, %s4500_s14   ;;  %s5400_s12 = smov %s4496_s13 }
 0x26e   : > { %p11_p6 = scmp.ge.s32.totalorder %s14_s14, 4   ;;  %s5401_s13 = smov %s5403_s15 }
 0x270   :  { %13 = sbr.rel (!%p11_p6) target bundleno = 2 (0x2), region = 70 }

// kernel: _lambda_.6
= control target key start
LH: loop header
LB: loop body
LE: loop exit
PB: predicated region body
PF: predicated region fallthrough
CT: control target
= control target key end

     0   :  { %s13268_s12 = smov 0   ;;  %s13270_s13 = smov 0   ;;  %s15557_s0 = inlined_call_operand.vmem [shape: bf16[512,4608], index: 0, kind: input, shape index: {}]   ;;  %s15558_s1 = inlined_call_operand.vmem [shape: bf16[4608,128], index: 1, kind: input, shape index: {}]   ;;  %s15559_s2 = inlined_call_operand.vmem [shape: f32[512,128], index: 2, kind: output, shape index: {0}]   ;;  %s15560_s3 = inlined_call_operand.vmem [shape: f32[16,128], index: 3, kind: output, shape index: {1}]  }
   0x1   :  { %s13272_s14 = smov 0  }
   0x2 LB: > { %s26_s15 = sadd.s32 1, %s13242_s13  ;;  %p9159_p0 = scmp.ge.s32.totalorder %s13246_s14, 1  ;;  %s13246_s14 = sphi %s13272_s14, %s14_s14   ;;  %s13242_s13 = sphi %s13270_s13, %s15562_s13   ;;  %s13238_s12 = sphi %s13268_s12, %s15561_s12  }
   0x3   : > { %p28_p1 = scmp.ge.s32.totalorder %s26_s15, 2  ;;  %p161_p2 = scmp.lt.s32.totalorder %s13246_s14, 3 }
   0x5   : > { %s15564_s15 = smov (%p28_p1, %s26_s15), 0  ;;  %p162_p3 = pnand %p9159_p0, %p161_p2 }
   0x6   : > { %v12072_v0 = vld [vmem:[%s15558_s1 + $0x40] sm:$0xff] (!%p162_p3)   ;;  %v12076_v4 = vld [vmem:[%s15558_s1 + $0x48] sm:$0xff] (!%p162_p3)   ;;  %v12080_v8 = vld [vmem:[%s15558_s1 + $0x50] sm:$0xff] (!%p162_p3)   ;;  %s9160_s23 = sshll.u32 (!%p162_p3), %s13238_s12, 5  ;;  %p212_p5 = scmp.lt.s32.totalorder (!%p162_p3), %s13238_s12, 1 }
   0x7   : > { %165 = sbr.rel (%p162_p3) target bundleno = 1425 (0x591), region = 28  ;;  %v12073_v1 = vld [vmem:[%s15558_s1 + $0xc0] sm:$0xff] (!%p162_p3)   ;;  %10031 = vmatprep.subr.bf16.mxu0 (!%p162_p3), %v12072_v0  ;;  %v12077_v5 = vld [vmem:[%s15558_s1 + $0xc8] sm:$0xff] (!%p162_p3)   ;;  %v12081_v9 = vld [vmem:[%s15558_s1 + $0xd0] sm:$0xff] (!%p162_p3)   ;;  %p196_p4 = scmp.lt.s32.totalorder (!%p162_p3), %s9160_s23, 63 }
   0x8   : > { %v12074_v2 = vld [vmem:[%s15558_s1] sm:$0xff] (!%p162_p3)   ;;  %10143 = vmatprep.subr.bf16.mxu1 (!%p162_p3), %v12073_v1  ;;  %v12078_v6 = vld [vmem:[%s15558_s1 + $0x8] sm:$0xff] (!%p162_p3)   ;;  %v12082_v10 = vld [vmem:[%s15558_s1 + $0x10] sm:$0xff] (!%p162_p3)  }
   0x9   : > { %v12075_v3 = vld [vmem:[%s15558_s1 + $0x80] sm:$0xff] (!%p162_p3)   ;;  %10032 = vmatpush3.bf16.msra.mxu0 (!%p162_p3), %v12074_v2  ;;  %v12079_v7 = vld [vmem:[%s15558_s1 + $0x88] sm:$0xff] (!%p162_p3)   ;;  %v12083_v11 = vld [vmem:[%s15558_s1 + $0x90] sm:$0xff] (!%p162_p3)  }
   0xa   : > { %10144 = vmatpush3.bf16.msra.mxu1 (!%p162_p3), %v12075_v3  ;;  %10033 = vmatprep.subr.bf16.mxu0 (!%p162_p3), %v12076_v4  ;;  %v12084_v12 = vld [vmem:[%s15558_s1 + $0x58] sm:$0xff] (!%p162_p3)   ;;  %v12088_v16 = vld [vmem:[%s15558_s1 + $0x60] sm:$0xff] (!%p162_p3)   ;;  %v12092_v20 = vld [vmem:[%s15558_s1 + $0x68] sm:$0xff] (!%p162_p3)  }
   0xb   : > { %10145 = vmatprep.subr.bf16.mxu1 (!%p162_p3), %v12077_v5  ;;  %v12085_v13 = vld [vmem:[%s15558_s1 + $0xd8] sm:$0xff] (!%p162_p3)   ;;  %v12089_v17 = vld [vmem:[%s15558_s1 + $0xe0] sm:$0xff] (!%p162_p3)   ;;  %v12093_v21 = vld [vmem:[%s15558_s1 + $0xe8] sm:$0xff] (!%p162_p3)  }
   0xc   : > { %v12086_v14 = vld [vmem:[%s15558_s1 + $0x18] sm:$0xff] (!%p162_p3)   ;;  %v12090_v18 = vld [vmem:[%s15558_s1 + $0x20] sm:$0xff] (!%p162_p3)   ;;  %v12094_v22 = vld [vmem:[%s15558_s1 + $0x28] sm:$0xff] (!%p162_p3)  }
   0xd   : > { %10034 = vmatpush3.bf16.msra.mxu0 (!%p162_p3), %v12078_v6  ;;  %v12087_v15 = vld [vmem:[%s15558_s1 + $0x98] sm:$0xff] (!%p162_p3)   ;;  %v12091_v19 = vld [vmem:[%s15558_s1 + $0xa0] sm:$0xff] (!%p162_p3)   ;;  %v12095_v23 = vld [vmem:[%s15558_s1 + $0xa8] sm:$0xff] (!%p162_p3)  }
   0xe   : > { %10146 = vmatpush3.bf16.msra.mxu1 %v12079_v7  ;;  %10035 = vmatprep.subr.bf16.mxu0 %v12080_v8  ;;  %s15566_s23 = smov (!%p196_p4, %s9160_s23), 63  ;;  %v12096_v24 = vld [vmem:[%s15558_s1 + $0x70] sm:$0xff]   ;;  %v12100_v28 = vld [vmem:[%s15558_s1 + $0x78] sm:$0xff]   ;;  %v12110_v36 = vld [vmem:[%s15558_s1 + $0x140] sm:$0xff]   ;;  %s15568_s12 = smov (!%p212_p5, %s13238_s12), 1 }
   0xf   : > { %10147 = vmatprep.subr.bf16.mxu1 %v12081_v9  ;;  %v12097_v25 = vld [vmem:[%s15558_s1 + $0xf0] sm:$0xff]   ;;  %s12047_s24 = smul.u32 144, %s15566_s23  ;;  %v12101_v29 = vld [vmem:[%s15558_s1 + $0xf8] sm:$0xff]   ;;  %v12111_v37 = vld [vmem:[%s15558_s1 + $0x100] sm:$0xff]  }
  0x10   : > { %v12098_v26 = vld [vmem:[%s15558_s1 + $0x30] sm:$0xff]   ;;  %v12102_v30 = vld [vmem:[%s15558_s1 + $0x38] sm:$0xff]   ;;  %v12112_v38 = vld [vmem:[%s15558_s1 + $0x1c0] sm:$0xff]  }
  0x11   : > { %10036 = vmatpush3.bf16.msra.mxu0 %v12082_v10  ;;  %v12099_v27 = vld [vmem:[%s15558_s1 + $0xb0] sm:$0xff]   ;;  %s13385_s8 = scalar_lea.vmem %s15557_s0, %s12047_s24  ;;  %v12103_v31 = vld [vmem:[%s15558_s1 + $0xb8] sm:$0xff]   ;;  %v12113_v39 = vld [vmem:[%s15558_s1 + $0x180] sm:$0xff]  }
  0x12   : > { %10148 = vmatpush3.bf16.msra.mxu1 %v12083_v11  ;;  %10037 = vmatprep.subr.bf16.mxu0 %v12084_v12  ;;  %v12104_v32 = vld [vmem:[%s13385_s8] ss:$144 sps:$4 sm:$0xff]   ;;  %v12106_v33 = vld [vmem:[%s13385_s8 + $0x4] ss:$144 sps:$4 sm:$0xff]   ;;  %v12107_v34 = vld [vmem:[%s13385_s8 + $0x8] ss:$144 sps:$4 sm:$0xff]  }
  0x13   : > { %10149 = vmatprep.subr.bf16.mxu1 %v12085_v13  ;;  %v12109_v35 = vld [vmem:[%s13385_s8 + $0xc] ss:$144 sps:$4 sm:$0xff]   ;;  %6009 = vmatprep.mubr.bf16.mxu0 %v12106_v33  ;;  %v12114_v40 = vld [vmem:[%s13385_s8 + $0x124] ss:$144 sps:$4 sm:$0xff]   ;;  %v12118_v42 = vld [vmem:[%s13385_s8 + $0x120] ss:$144 sps:$4 sm:$0xff]  }
  0x14   : > { %6170 = vmatprep.mubr.bf16.mxu1 %v12109_v35  ;;  %v12116_v41 = vld [vmem:[%s13385_s8 + $0x12c] ss:$144 sps:$4 sm:$0xff]   ;;  %v12119_v43 = vld [vmem:[%s13385_s8 + $0x128] ss:$144 sps:$4 sm:$0xff]   ;;  %v12120_v44 = vld [vmem:[%s13385_s8 + $0x244] ss:$144 sps:$4 sm:$0xff]  }
  0x15   : > { %10038 = vmatpush3.bf16.msra.mxu0 %v12086_v14  ;;  %v12122_v45 = vld [vmem:[%s13385_s8 + $0x24c] ss:$144 sps:$4 sm:$0xff]   ;;  %v12124_v48 = vld [vmem:[%s13385_s8 + $0x240] ss:$144 sps:$4 sm:$0xff]   ;;  %v12125_v51 = vld [vmem:[%s13385_s8 + $0x248] ss:$144 sps:$4 sm:$0xff]  }
  0x16   : > { %10150 = vmatpush3.bf16.msra.mxu1 %v12087_v15  ;;  %10039 = vmatprep.subr.bf16.mxu0 %v12088_v16  ;;  %v12126_v46 = vld [vmem:[%s15558_s1 + $0x148] sm:$0xff]   ;;  %v12130_v52 = vld [vmem:[%s13385_s8 + $0x364] ss:$144 sps:$4 sm:$0xff]   ;;  %v12134_v54 = vld [vmem:[%s13385_s8 + $0x360] ss:$144 sps:$4 sm:$0xff]  }
  0x17   : > { %10151 = vmatprep.subr.bf16.mxu1 %v12089_v17  ;;  %v12127_v47 = vld [vmem:[%s15558_s1 + $0x108] sm:$0xff]   ;;  %v12142_v55 = vld [vmem:[%s15558_s1 + $0x150] sm:$0xff]   ;;  %v12158_v1 = vld [vmem:[%s15558_s1 + $0x158] sm:$0xff]  }
  0x18   : > { %v12128_v49 = vld [vmem:[%s15558_s1 + $0x1c8] sm:$0xff]   ;;  %v12136_v57 = vld [vmem:[%s13385_s8 + $0x484] ss:$144 sps:$4 sm:$0xff]   ;;  %v12140_v62 = vld [vmem:[%s13385_s8 + $0x480] ss:$144 sps:$4 sm:$0xff]  }
  0x19   : > { %10040 = vmatpush3.bf16.msra.mxu0 %v12090_v18  ;;  %v12129_v50 = vld [vmem:[%s15558_s1 + $0x188] sm:$0xff]   ;;  %v12143_v58 = vld [vmem:[%s15558_s1 + $0x110] sm:$0xff]   ;;  %v12159_v3 = vld [vmem:[%s15558_s1 + $0x118] sm:$0xff]  }
  0x1a   : > { %10152 = vmatpush3.bf16.msra.mxu1 %v12091_v19  ;;  %10041 = vmatprep.subr.bf16.mxu0 %v12092_v20  ;;  %v12132_v53 = vld [vmem:[%s13385_s8 + $0x36c] ss:$144 sps:$4 sm:$0xff]   ;;  %v12135_v56 = vld [vmem:[%s13385_s8 + $0x368] ss:$144 sps:$4 sm:$0xff]   ;;  %v12144_v59 = vld [vmem:[%s15558_s1 + $0x1d0] sm:$0xff]  }
  0x1b   : > { %10153 = vmatprep.subr.bf16.mxu1 %v12093_v21  ;;  %v12145_v60 = vld [vmem:[%s15558_s1 + $0x190] sm:$0xff]   ;;  %v12138_v61 = vld [vmem:[%s13385_s8 + $0x48c] ss:$144 sps:$4 sm:$0xff]   ;;  %v12141_v63 = vld [vmem:[%s13385_s8 + $0x488] ss:$144 sps:$4 sm:$0xff]  }
  0x1c   : > { %v12146_v0 = vld [vmem:[%s13385_s8 + $0x5a4] ss:$144 sps:$4 sm:$0xff]   ;;  %v12148_v2 = vld [vmem:[%s13385_s8 + $0x5ac] ss:$144 sps:$4 sm:$0xff]   ;;  %v12150_v6 = vld [vmem:[%s13385_s8 + $0x5a0] ss:$144 sps:$4 sm:$0xff]  }
  0x1d   : > { %10042 = vmatpush3.bf16.msra.mxu0 %v12094_v22  ;;  %v12160_v4 = vld [vmem:[%s15558_s1 + $0x1d8] sm:$0xff]   ;;  %v12152_v8 = vld [vmem:[%s13385_s8 + $0x6c4] ss:$144 sps:$4 sm:$0xff]   ;;  %v12156_v14 = vld [vmem:[%s13385_s8 + $0x6c0] ss:$144 sps:$4 sm:$0xff]  }
  0x1e   : > { %10154 = vmatpush3.bf16.msra.mxu1 %v12095_v23  ;;  %10043 = vmatprep.subr.bf16.mxu0 %v12096_v24  ;;  %v12161_v5 = vld [vmem:[%s15558_s1 + $0x198] sm:$0xff]   ;;  %v12174_v10 = vld [vmem:[%s15558_s1 + $0x160] sm:$0xff]   ;;  %v12190_v18 = vld [vmem:[%s15558_s1 + $0x168] sm:$0xff]  }
  0x1f   : > { %10155 = vmatprep.subr.bf16.mxu1 %v12097_v25  ;;  %v12151_v7 = vld [vmem:[%s13385_s8 + $0x5a8] ss:$144 sps:$4 sm:$0xff]   ;;  %v12154_v9 = vld [vmem:[%s13385_s8 + $0x6cc] ss:$144 sps:$4 sm:$0xff]   ;;  %v12175_v11 = vld [vmem:[%s15558_s1 + $0x120] sm:$0xff]  }
  0x20   : > { %v12176_v12 = vld [vmem:[%s15558_s1 + $0x1e0] sm:$0xff]   ;;  %v12157_v15 = vld [vmem:[%s13385_s8 + $0x6c8] ss:$144 sps:$4 sm:$0xff]   ;;  %v12164_v17 = vld [vmem:[%s13385_s8 + $0x7ec] ss:$144 sps:$4 sm:$0xff]  }
  0x21   : > { %10044 = vmatpush3.bf16.msra.mxu0 %v12098_v26  ;;  %v12177_v13 = vld [vmem:[%s15558_s1 + $0x1a0] sm:$0xff]   ;;  %v12191_v19 = vld [vmem:[%s15558_s1 + $0x128] sm:$0xff]   ;;  %v12206_v26 = vld [vmem:[%s15558_s1 + $0x170] sm:$0xff]  }
  0x22   : > { %10156 = vmatpush3.bf16.msra.mxu1 %v12099_v27  ;;  %10045 = vmatprep.subr.bf16.mxu0 %v12100_v28  ;;  %v12162_v16 = vld [vmem:[%s13385_s8 + $0x7e4] ss:$144 sps:$4 sm:$0xff]   ;;  %v12192_v20 = vld [vmem:[%s15558_s1 + $0x1e8] sm:$0xff]   ;;  %v12166_v22 = vld [vmem:[%s13385_s8 + $0x7e0] ss:$144 sps:$4 sm:$0xff]  }
  0x23   : > { %10157 = vmatprep.subr.bf16.mxu1 %v12101_v29  ;;  %v12193_v21 = vld [vmem:[%s15558_s1 + $0x1a8] sm:$0xff]   ;;  %v12168_v24 = vld [vmem:[%s13385_s8 + $0x904] ss:$144 sps:$4 sm:$0xff]   ;;  %v12223_v35 = vld [vmem:[%s15558_s1 + $0x138] sm:$0xff]  }
  0x24   : > { %v12167_v23 = vld [vmem:[%s13385_s8 + $0x7e8] ss:$144 sps:$4 sm:$0xff]   ;;  %v12170_v25 = vld [vmem:[%s13385_s8 + $0x90c] ss:$144 sps:$4 sm:$0xff]   ;;  %v12207_v27 = vld [vmem:[%s15558_s1 + $0x130] sm:$0xff]  }
  0x25   : > { %10046 = vmatpush3.bf16.msra.mxu0 %v12102_v30  ;;  %v12208_v28 = vld [vmem:[%s15558_s1 + $0x1f0] sm:$0xff]   ;;  %v12180_v33 = vld [vmem:[%s13385_s8 + $0xa2c] ss:$144 sps:$4 sm:$0xff]  }
  0x26   : > { %10158 = vmatpush3.bf16.msra.mxu1 %v12103_v31  ;;  %10255 = vmatprep.subr.bf16.mxu0 %v12110_v36  ;;  %v12209_v29 = vld [vmem:[%s15558_s1 + $0x1b0] sm:$0xff]   ;;  %v12173_v31 = vld [vmem:[%s13385_s8 + $0x908] ss:$144 sps:$4 sm:$0xff]  }
  0x27   : > { %10367 = vmatprep.subr.bf16.mxu1 %v12112_v38  ;;  %v12172_v30 = vld [vmem:[%s13385_s8 + $0x900] ss:$144 sps:$4 sm:$0xff]   ;;  %v12225_v38 = vld [vmem:[%s15558_s1 + $0x1b8] sm:$0xff]  }
  0x28   : > { %6010 = vmatmul.mubr.bf16.vlgmr.msra.gmra.mrb[0].mxu0 %v12104_v32  ;;  %v12178_v32 = vld [vmem:[%s13385_s8 + $0xa24] ss:$144 sps:$4 sm:$0xff]   ;;  %v12182_v36 = vld [vmem:[%s13385_s8 + $0xa20] ss:$144 sps:$4 sm:$0xff]  }
  0x29   : > { %6171 = vmatmul.mubr.bf16.vlgmr.msra.gmra.mrb[0].mxu1 %v12107_v34  ;;  %10256 = vmatpush3.bf16.msra.mxu0 %v12111_v37  ;;  %v12222_v34 = vld [vmem:[%s15558_s1 + $0x178] sm:$0xff]  }
  0x2a   : > { %10368 = vmatpush3.bf16.msra.mxu1 %v12113_v39  ;;  %6017 = vmatprep.mubr.bf16.mxu0 %v12114_v40  ;;  %v12224_v37 = vld [vmem:[%s15558_s1 + $0x1f8] sm:$0xff]   ;;  %v12184_v40 = vld [vmem:[%s13385_s8 + $0xb44] ss:$144 sps:$4 sm:$0xff]  }
  0x2b   : > { %6178 = vmatprep.mubr.bf16.mxu1 %v12116_v41  ;;  %10257 = vmatprep.subr.bf16.mxu0 %v12126_v46  ;;  %v12183_v39 = vld [vmem:[%s13385_s8 + $0xa28] ss:$144 sps:$4 sm:$0xff]   ;;  %v12186_v41 = vld [vmem:[%s13385_s8 + $0xb4c] ss:$144 sps:$4 sm:$0xff]   ;;  %v12194_v46 = vld [vmem:[%s13385_s8 + $0xc64] ss:$144 sps:$4 sm:$0xff]  }
  0x2c   : > { %10369 = vmatprep.subr.bf16.mxu1 %v12128_v49  ;;  %v12199_v49 = vld [vmem:[%s13385_s8 + $0xc68] ss:$144 sps:$4 sm:$0xff]  }
  0x2d   : > { %10258 = vmatpush3.bf16.msra.mxu0 %v12127_v47  ;;  %v12196_v47 = vld [vmem:[%s13385_s8 + $0xc6c] ss:$144 sps:$4 sm:$0xff]  }
  0x2e   : > { %10370 = vmatpush3.bf16.msra.mxu1 %v12129_v50  ;;  %10259 = vmatprep.subr.bf16.mxu0 %v12142_v55  ;;  %v12200_v50 = vld [vmem:[%s13385_s8 + $0xd84] ss:$144 sps:$4 sm:$0xff]   ;;  %v12212_v55 = vld [vmem:[%s13385_s8 + $0xeac] ss:$144 sps:$4 sm:$0xff]  }
  0x2f   : > { %10371 = vmatprep.subr.bf16.mxu1 %v12144_v59  ;;  %v12218_v59 = vld [vmem:[%s13385_s8 + $0xfcc] ss:$144 sps:$4 sm:$0xff]  }
  0x30   : > { %6018 = vmatmul.mubr.bf16.gmra.mrb[4].mxu0 %v12118_v42  ;;  %v12188_v42 = vld [vmem:[%s13385_s8 + $0xb40] ss:$144 sps:$4 sm:$0xff]  }
  0x31   : > { %6179 = vmatmul.mubr.bf16.gmra.mrb[4].mxu1 %v12119_v43  ;;  %6025 = vmatprep.mubr.bf16.mxu0 %v12120_v44  ;;  %v12238_v43 = vld [vmem:[%s15558_s1 + $0x240] sm:$0xff]   ;;  %v12189_v44 = vld [vmem:[%s13385_s8 + $0xb48] ss:$144 sps:$4 sm:$0xff]  }
  0x32   : > { %6186 = vmatprep.mubr.bf16.mxu1 %v12122_v45  ;;  %10260 = vmatpush3.bf16.msra.mxu0 %v12143_v58  ;;  %v12240_v45 = vld [vmem:[%s15558_s1 + $0x2c0] sm:$0xff]  }
  0x33   : > { %10372 = vmatpush3.bf16.msra.mxu1 %v12145_v60  ;;  %10261 = vmatprep.subr.bf16.mxu0 %v12158_v1  ;;  %v12216_v58 = vld [vmem:[%s13385_s8 + $0xfc4] ss:$144 sps:$4 sm:$0xff]   ;;  %v12220_v60 = vld [vmem:[%s13385_s8 + $0xfc0] ss:$144 sps:$4 sm:$0xff]   ;;  %v12231_v1 = vld [vmem:[%s13385_s8 + $0x10e8] ss:$144 sps:$4 sm:$0xff]  }
  0x34   : > { %10373 = vmatprep.subr.bf16.mxu1 %v12160_v4  ;;  %v12232_v4 = vld [vmem:[%s13385_s8 + $0x10] ss:$144 sps:$4 sm:$0xff]  }
  0x36   : > { %10262 = vmatpush3.bf16.msra.mxu0 %v12159_v3  ;;  %v12237_v3 = vld [vmem:[%s13385_s8 + $0x1c] ss:$144 sps:$4 sm:$0xff]  }
  0x37   : > { %10374 = vmatpush3.bf16.msra.mxu1 %v12161_v5  ;;  %10263 = vmatprep.subr.bf16.mxu0 %v12174_v10  ;;  %v12235_v5 = vld [vmem:[%s13385_s8 + $0x18] ss:$144 sps:$4 sm:$0xff]  }
  0x38   : > { %6026 = vmatmul.mubr.bf16.gmra.mrb[8].mxu0 %v12124_v48  ;;  %10375 = vmatprep.subr.bf16.mxu1 %v12176_v12  ;;  %v12198_v48 = vld [vmem:[%s13385_s8 + $0xc60] ss:$144 sps:$4 sm:$0xff]   ;;  %v12254_v10 = vld [vmem:[%s15558_s1 + $0x248] sm:$0xff]  }
  0x39   : > { %6187 = vmatmul.mubr.bf16.gmra.mrb[8].mxu1 %v12125_v51  ;;  %6033 = vmatprep.mubr.bf16.mxu0 %v12130_v52  ;;  %v12202_v51 = vld [vmem:[%s13385_s8 + $0xd8c] ss:$144 sps:$4 sm:$0xff]   ;;  %v12204_v52 = vld [vmem:[%s13385_s8 + $0xd80] ss:$144 sps:$4 sm:$0xff]  }
  0x3a   : > { %6194 = vmatprep.mubr.bf16.mxu1 %v12132_v53  ;;  %10264 = vmatpush3.bf16.msra.mxu0 %v12175_v11  ;;  %v12205_v53 = vld [vmem:[%s13385_s8 + $0xd88] ss:$144 sps:$4 sm:$0xff]  }
  0x3b   : > { %10376 = vmatpush3.bf16.msra.mxu1 %v12177_v13  ;;  %10265 = vmatprep.subr.bf16.mxu0 %v12190_v18  ;;  %v12255_v11 = vld [vmem:[%s15558_s1 + $0x208] sm:$0xff]   ;;  %v12248_v18 = vld [vmem:[%s13385_s8 + $0x254] ss:$144 sps:$4 sm:$0xff]  }
  0x3c   : > { %10377 = vmatprep.subr.bf16.mxu1 %v12192_v20  ;;  %v12256_v12 = vld [vmem:[%s15558_s1 + $0x2c8] sm:$0xff]   ;;  %v12271_v20 = vld [vmem:[%s15558_s1 + $0x210] sm:$0xff]  }
  0x3d   : > { %v12257_v13 = vld [vmem:[%s15558_s1 + $0x288] sm:$0xff]  }
  0x3e   : > { %10266 = vmatpush3.bf16.msra.mxu0 %v12191_v19  ;;  %v12250_v19 = vld [vmem:[%s13385_s8 + $0x25c] ss:$144 sps:$4 sm:$0xff]  }
  0x3f   : > { %10378 = vmatpush3.bf16.msra.mxu1 %v12193_v21  ;;  %10267 = vmatprep.subr.bf16.mxu0 %v12206_v26  ;;  %v12273_v21 = vld [vmem:[%s15558_s1 + $0x290] sm:$0xff]   ;;  %v12289_v26 = vld [vmem:[%s15558_s1 + $0x298] sm:$0xff]  }
  0x40   : > { %6034 = vmatmul.mubr.bf16.gmra.mrb[12].mxu0 %v12134_v54  ;;  %10379 = vmatprep.subr.bf16.mxu1 %v12208_v28  ;;  %v12210_v54 = vld [vmem:[%s13385_s8 + $0xea4] ss:$144 sps:$4 sm:$0xff]  }
  0x41   : > { %6195 = vmatmul.mubr.bf16.gmra.mrb[12].mxu1 %v12135_v56  ;;  %6041 = vmatprep.mubr.bf16.mxu0 %v12136_v57  ;;  %v12214_v56 = vld [vmem:[%s13385_s8 + $0xea0] ss:$144 sps:$4 sm:$0xff]   ;;  %v12215_v57 = vld [vmem:[%s13385_s8 + $0xea8] ss:$144 sps:$4 sm:$0xff]   ;;  %v12258_v28 = vld [vmem:[%s13385_s8 + $0x374] ss:$144 sps:$4 sm:$0xff]  }
  0x42   : > { %6202 = vmatprep.mubr.bf16.mxu1 %v12138_v61  ;;  %10268 = vmatpush3.bf16.msra.mxu0 %v12207_v27  ;;  %v12221_v61 = vld [vmem:[%s13385_s8 + $0xfc8] ss:$144 sps:$4 sm:$0xff]  }
  0x43   : > { %10380 = vmatpush3.bf16.msra.mxu1 %v12209_v29  ;;  %10269 = vmatprep.subr.bf16.mxu0 %v12222_v34  ;;  %v12253_v27 = vld [vmem:[%s13385_s8 + $0x258] ss:$144 sps:$4 sm:$0xff]   ;;  %v12302_v29 = vld [vmem:[%s15558_s1 + $0x260] sm:$0xff]  }
  0x44   : > { %10381 = vmatprep.subr.bf16.mxu1 %v12224_v37  ;;  %v12318_v34 = vld [vmem:[%s15558_s1 + $0x268] sm:$0xff]  }
  0x45   : > { %v12319_v37 = vld [vmem:[%s15558_s1 + $0x228] sm:$0xff]  }
  0x46   : > { %10270 = vmatpush3.bf16.msra.mxu0 %v12223_v35  ;;  %v12320_v35 = vld [vmem:[%s15558_s1 + $0x2e8] sm:$0xff]  }
  0x47   : > { %10382 = vmatpush3.bf16.msra.mxu1 %v12225_v38  ;;  %10479 = vmatprep.subr.bf16.mxu0 %v12238_v43  ;;  %v12263_v38 = vld [vmem:[%s13385_s8 + $0x378] ss:$144 sps:$4 sm:$0xff]   ;;  %v12336_v43 = vld [vmem:[%s15558_s1 + $0x2f0] sm:$0xff]  }
  0x48   : > { %6042 = vmatmul.mubr.bf16.gmra.mrb[16].mxu0 %v12140_v62  ;;  %10591 = vmatprep.subr.bf16.mxu1 %v12240_v45  ;;  %v12226_v62 = vld [vmem:[%s13385_s8 + $0x10e4] ss:$144 sps:$4 sm:$0xff]  }
  0x49   : > { %6203 = vmatmul.mubr.bf16.gmra.mrb[16].mxu1 %v12141_v63  ;;  %6049 = vmatprep.mubr.bf16.mxu0 %v12146_v0  ;;  %v12228_v63 = vld [vmem:[%s13385_s8 + $0x10ec] ss:$144 sps:$4 sm:$0xff]   ;;  %v12230_v0 = vld [vmem:[%s13385_s8 + $0x10e0] ss:$144 sps:$4 sm:$0xff]  }
  0x4a   : > { %6210 = vmatprep.mubr.bf16.mxu1 %v12148_v2  ;;  %v12234_v2 = vld [vmem:[%s13385_s8 + $0x14] ss:$144 sps:$4 sm:$0xff]  }
  0x4b   : > { %v12337_v45 = vld [vmem:[%s15558_s1 + $0x2b0] sm:$0xff]  }
  0x50   : > { %6050 = vmatmul.mubr.bf16.gmra.mrb[20].mxu0 %v12150_v6  ;;  %v12239_v6 = vld [vmem:[%s15558_s1 + $0x200] sm:$0xff]  }
  0x51   : > { %6211 = vmatmul.mubr.bf16.gmra.mrb[20].mxu1 %v12151_v7  ;;  %6057 = vmatprep.mubr.bf16.mxu0 %v12152_v8  ;;  %v12241_v7 = vld [vmem:[%s15558_s1 + $0x280] sm:$0xff]  }
  0x52   : > { %6218 = vmatprep.mubr.bf16.mxu1 %v12154_v9  ;;  %v12242_v8 = vld [vmem:[%s13385_s8 + $0x134] ss:$144 sps:$4 sm:$0xff]   ;;  %v12244_v9 = vld [vmem:[%s13385_s8 + $0x13c] ss:$144 sps:$4 sm:$0xff]  }
  0x58   : > { %6058 = vmatmul.mubr.bf16.gmra.mrb[24].mxu0 %v12156_v14  ;;  %v12246_v14 = vld [vmem:[%s13385_s8 + $0x130] ss:$144 sps:$4 sm:$0xff]  }
  0x59   : > { %6219 = vmatmul.mubr.bf16.gmra.mrb[24].mxu1 %v12157_v15  ;;  %6065 = vmatprep.mubr.bf16.mxu0 %v12162_v16  ;;  %v12270_v15 = vld [vmem:[%s15558_s1 + $0x250] sm:$0xff]   ;;  %v12247_v16 = vld [vmem:[%s13385_s8 + $0x138] ss:$144 sps:$4 sm:$0xff]  }
  0x5a   : > { %6226 = vmatprep.mubr.bf16.mxu1 %v12164_v17  ;;  %v12272_v17 = vld [vmem:[%s15558_s1 + $0x2d0] sm:$0xff]  }
  0x60   : > { %6066 = vmatmul.mubr.bf16.gmra.mrb[28].mxu0 %v12166_v22  ;;  %v12286_v22 = vld [vmem:[%s15558_s1 + $0x258] sm:$0xff]  }
  0x61   : > { %6227 = vmatmul.mubr.bf16.gmra.mrb[28].mxu1 %v12167_v23  ;;  %6073 = vmatprep.mubr.bf16.mxu0 %v12168_v24  ;;  %v12288_v23 = vld [vmem:[%s15558_s1 + $0x2d8] sm:$0xff]   ;;  %v12252_v24 = vld [vmem:[%s13385_s8 + $0x250] ss:$144 sps:$4 sm:$0xff]  }
  0x62   : > { %6234 = vmatprep.mubr.bf16.mxu1 %v12170_v25  ;;  %v12287_v25 = vld [vmem:[%s15558_s1 + $0x218] sm:$0xff]  }
  0x68   : > { %6074 = vmatmul.mubr.bf16.gmra.mrb[32].mxu0 %v12172_v30  ;;  %v12260_v30 = vld [vmem:[%s13385_s8 + $0x37c] ss:$144 sps:$4 sm:$0xff]  }
  0x69   : > { %6235 = vmatmul.mubr.bf16.gmra.mrb[32].mxu1 %v12173_v31  ;;  %6081 = vmatprep.mubr.bf16.mxu0 %v12178_v32  ;;  %v12304_v31 = vld [vmem:[%s15558_s1 + $0x2e0] sm:$0xff]  }
  0x6a   : > { %6242 = vmatprep.mubr.bf16.mxu1 %v12180_v33  ;;  %v12303_v32 = vld [vmem:[%s15558_s1 + $0x220] sm:$0xff]  }
  0x6b   : > { %v12305_v33 = vld [vmem:[%s15558_s1 + $0x2a0] sm:$0xff]  }
  0x70   : > { %6082 = vmatmul.mubr.bf16.gmra.mrb[36].mxu0 %v12182_v36  ;;  %v12262_v36 = vld [vmem:[%s13385_s8 + $0x370] ss:$144 sps:$4 sm:$0xff]  }
  0x71   : > { %6243 = vmatmul.mubr.bf16.gmra.mrb[36].mxu1 %v12183_v39  ;;  %6089 = vmatprep.mubr.bf16.mxu0 %v12184_v40  ;;  %v12264_v39 = vld [vmem:[%s13385_s8 + $0x494] ss:$144 sps:$4 sm:$0xff]   ;;  %v12321_v40 = vld [vmem:[%s15558_s1 + $0x2a8] sm:$0xff]  }
  0x72   : > { %6250 = vmatprep.mubr.bf16.mxu1 %v12186_v41  ;;  %v12334_v41 = vld [vmem:[%s15558_s1 + $0x270] sm:$0xff]  }
  0x78   : > { %6090 = vmatmul.mubr.bf16.gmra.mrb[40].mxu0 %v12188_v42  ;;  %v12266_v42 = vld [vmem:[%s13385_s8 + $0x49c] ss:$144 sps:$4 sm:$0xff]  }
  0x79   : > { %6251 = vmatmul.mubr.bf16.gmra.mrb[40].mxu1 %v12189_v44  ;;  %6097 = vmatprep.mubr.bf16.mxu0 %v12194_v46  ;;  %v12335_v44 = vld [vmem:[%s15558_s1 + $0x230] sm:$0xff]   ;;  %v12350_v46 = vld [vmem:[%s15558_s1 + $0x278] sm:$0xff]  }
  0x7a   : > { %6258 = vmatprep.mubr.bf16.mxu1 %v12196_v47  ;;  %v12352_v47 = vld [vmem:[%s15558_s1 + $0x2f8] sm:$0xff]  }
  0x80   : > { %6098 = vmatmul.mubr.bf16.gmra.mrb[44].mxu0 %v12198_v48  ;;  %v12268_v48 = vld [vmem:[%s13385_s8 + $0x490] ss:$144 sps:$4 sm:$0xff]  }
  0x81   : > { %6259 = vmatmul.mubr.bf16.gmra.mrb[44].mxu1 %v12199_v49  ;;  %6105 = vmatprep.mubr.bf16.mxu0 %v12200_v50  ;;  %v12351_v49 = vld [vmem:[%s15558_s1 + $0x238] sm:$0xff]  }
  0x82   : > { %6266 = vmatprep.mubr.bf16.mxu1 %v12202_v51  ;;  %v12353_v50 = vld [vmem:[%s15558_s1 + $0x2b8] sm:$0xff]   ;;  %v12366_v51 = vld [vmem:[%s15558_s1 + $0x340] sm:$0xff]  }
  0x88   : > { %6106 = vmatmul.mubr.bf16.gmra.mrb[48].mxu0 %v12204_v52  ;;  %v12269_v52 = vld [vmem:[%s13385_s8 + $0x498] ss:$144 sps:$4 sm:$0xff]  }
  0x89   : > { %6267 = vmatmul.mubr.bf16.gmra.mrb[48].mxu1 %v12205_v53  ;;  %6113 = vmatprep.mubr.bf16.mxu0 %v12210_v54  ;;  %v12368_v53 = vld [vmem:[%s15558_s1 + $0x3c0] sm:$0xff]  }
  0x8a   : > { %6274 = vmatprep.mubr.bf16.mxu1 %v12212_v55  ;;  %v12274_v54 = vld [vmem:[%s13385_s8 + $0x5b4] ss:$144 sps:$4 sm:$0xff]   ;;  %v12276_v55 = vld [vmem:[%s13385_s8 + $0x5bc] ss:$144 sps:$4 sm:$0xff]  }
  0x90   : > { %6114 = vmatmul.mubr.bf16.gmra.mrb[52].mxu0 %v12214_v56  ;;  %v12278_v56 = vld [vmem:[%s13385_s8 + $0x5b0] ss:$144 sps:$4 sm:$0xff]  }
  0x91   : > { %6275 = vmatmul.mubr.bf16.gmra.mrb[52].mxu1 %v12215_v57  ;;  %6121 = vmatprep.mubr.bf16.mxu0 %v12216_v58  ;;  %v12279_v57 = vld [vmem:[%s13385_s8 + $0x5b8] ss:$144 sps:$4 sm:$0xff]   ;;  %v12280_v58 = vld [vmem:[%s13385_s8 + $0x6d4] ss:$144 sps:$4 sm:$0xff]  }
  0x92   : > { %6282 = vmatprep.mubr.bf16.mxu1 %v12218_v59  ;;  %v12282_v59 = vld [vmem:[%s13385_s8 + $0x6dc] ss:$144 sps:$4 sm:$0xff]  }
  0x98   : > { %6122 = vmatmul.mubr.bf16.gmra.mrb[56].mxu0 %v12220_v60  ;;  %v12284_v60 = vld [vmem:[%s13385_s8 + $0x6d0] ss:$144 sps:$4 sm:$0xff]  }
  0x99   : > { %6283 = vmatmul.mubr.bf16.gmra.mrb[56].mxu1 %v12221_v61  ;;  %6129 = vmatprep.mubr.bf16.mxu0 %v12226_v62  ;;  %v12285_v61 = vld [vmem:[%s13385_s8 + $0x6d8] ss:$144 sps:$4 sm:$0xff]   ;;  %v12290_v62 = vld [vmem:[%s13385_s8 + $0x7f4] ss:$144 sps:$4 sm:$0xff]  }
  0x9a   : > { %6290 = vmatprep.mubr.bf16.mxu1 %v12228_v63  ;;  %v12292_v63 = vld [vmem:[%s13385_s8 + $0x7fc] ss:$144 sps:$4 sm:$0xff]  }
  0xa0   : > { %6130 = vmatmul.mubr.bf16.gmra.mrb[60].mxu0 %v12230_v0  ;;  %v12294_v0 = vld [vmem:[%s13385_s8 + $0x7f0] ss:$144 sps:$4 sm:$0xff]  }
  0xa1   : > { %6291 = vmatmul.mubr.bf16.gmra.mrb[60].mxu1 %v12231_v1  ;;  %6331 = vmatprep.mubr.bf16.mxu0 %v12234_v2  ;;  %v12295_v1 = vld [vmem:[%s13385_s8 + $0x7f8] ss:$144 sps:$4 sm:$0xff]   ;;  %v12296_v2 = vld [vmem:[%s13385_s8 + $0x914] ss:$144 sps:$4 sm:$0xff]  }
  0xa2   : > { %6492 = vmatprep.mubr.bf16.mxu1 %v12237_v3  ;;  %v12298_v3 = vld [vmem:[%s13385_s8 + $0x91c] ss:$144 sps:$4 sm:$0xff]  }
  0xa8   : > { %6332 = vmatmul.mubr.bf16.vlgmr.msra.gmra.mrb[64].mxu0 %v12232_v4  ;;  %v12300_v4 = vld [vmem:[%s13385_s8 + $0x910] ss:$144 sps:$4 sm:$0xff]  }
  0xa9   : > { %6493 = vmatmul.mubr.bf16.vlgmr.msra.gmra.mrb[64].mxu1 %v12235_v5  ;;  %10480 = vmatpush3.bf16.msra.mxu0 %v12239_v6  ;;  %v12301_v5 = vld [vmem:[%s13385_s8 + $0x918] ss:$144 sps:$4 sm:$0xff]   ;;  %v12306_v6 = vld [vmem:[%s13385_s8 + $0xa34] ss:$144 sps:$4 sm:$0xff]  }
  0xaa   : > { %10592 = vmatpush3.bf16.msra.mxu1 %v12241_v7  ;;  %6339 = vmatprep.mubr.bf16.mxu0 %v12242_v8  ;;  %v12308_v7 = vld [vmem:[%s13385_s8 + $0xa3c] ss:$144 sps:$4 sm:$0xff]   ;;  %v12310_v8 = vld [vmem:[%s13385_s8 + $0xa30] ss:$144 sps:$4 sm:$0xff]  }
  0xab   : > { %6500 = vmatprep.mubr.bf16.mxu1 %v12244_v9  ;;  %10481 = vmatprep.subr.bf16.mxu0 %v12254_v10  ;;  %v12311_v9 = vld [vmem:[%s13385_s8 + $0xa38] ss:$144 sps:$4 sm:$0xff]   ;;  %v12312_v10 = vld [vmem:[%s13385_s8 + $0xb54] ss:$144 sps:$4 sm:$0xff]  }
  0xac   : > { %10593 = vmatprep.subr.bf16.mxu1 %v12256_v12  ;;  %v12316_v12 = vld [vmem:[%s13385_s8 + $0xb50] ss:$144 sps:$4 sm:$0xff]  }
  0xad   : > { %10482 = vmatpush3.bf16.msra.mxu0 %v12255_v11  ;;  %v12314_v11 = vld [vmem:[%s13385_s8 + $0xb5c] ss:$144 sps:$4 sm:$0xff]  }
  0xae   : > { %10594 = vmatpush3.bf16.msra.mxu1 %v12257_v13  ;;  %10483 = vmatprep.subr.bf16.mxu0 %v12270_v15  ;;  %v12317_v13 = vld [vmem:[%s13385_s8 + $0xb58] ss:$144 sps:$4 sm:$0xff]   ;;  %v12324_v15 = vld [vmem:[%s13385_s8 + $0xc7c] ss:$144 sps:$4 sm:$0xff]  }
  0xaf   : > { %10595 = vmatprep.subr.bf16.mxu1 %v12272_v17 }
  0xb0   : > { %6340 = vmatmul.mubr.bf16.gmra.mrb[68].mxu0 %v12246_v14  ;;  %v12322_v14 = vld [vmem:[%s13385_s8 + $0xc74] ss:$144 sps:$4 sm:$0xff]  }
  0xb1   : > { %6501 = vmatmul.mubr.bf16.gmra.mrb[68].mxu1 %v12247_v16  ;;  %6347 = vmatprep.mubr.bf16.mxu0 %v12248_v18  ;;  %v12326_v16 = vld [vmem:[%s13385_s8 + $0xc70] ss:$144 sps:$4 sm:$0xff]   ;;  %v12327_v18 = vld [vmem:[%s13385_s8 + $0xc78] ss:$144 sps:$4 sm:$0xff]  }
  0xb2   : > { %6508 = vmatprep.mubr.bf16.mxu1 %v12250_v19  ;;  %10484 = vmatpush3.bf16.msra.mxu0 %v12271_v20  ;;  %v12328_v19 = vld [vmem:[%s13385_s8 + $0xd94] ss:$144 sps:$4 sm:$0xff]  }
  0xb3   : > { %10596 = vmatpush3.bf16.msra.mxu1 %v12273_v21  ;;  %10485 = vmatprep.subr.bf16.mxu0 %v12286_v22 }
  0xb4   : > { %10597 = vmatprep.subr.bf16.mxu1 %v12288_v23 }
  0xb6   : > { %10486 = vmatpush3.bf16.msra.mxu0 %v12287_v25 }
  0xb7   : > { %10598 = vmatpush3.bf16.msra.mxu1 %v12289_v26  ;;  %10487 = vmatprep.subr.bf16.mxu0 %v12302_v29 }
  0xb8   : > { %6348 = vmatmul.mubr.bf16.gmra.mrb[72].mxu0 %v12252_v24  ;;  %10599 = vmatprep.subr.bf16.mxu1 %v12304_v31 }
  0xb9   : > { %6509 = vmatmul.mubr.bf16.gmra.mrb[72].mxu1 %v12253_v27  ;;  %6355 = vmatprep.mubr.bf16.mxu0 %v12258_v28  ;;  %v12330_v28 = vld [vmem:[%s13385_s8 + $0xd9c] ss:$144 sps:$4 sm:$0xff]  }
  0xba   : > { %6516 = vmatprep.mubr.bf16.mxu1 %v12260_v30  ;;  %10488 = vmatpush3.bf16.msra.mxu0 %v12303_v32 }
  0xbb   : > { %10600 = vmatpush3.bf16.msra.mxu1 %v12305_v33  ;;  %10489 = vmatprep.subr.bf16.mxu0 %v12318_v34  ;;  %v12332_v34 = vld [vmem:[%s13385_s8 + $0xd90] ss:$144 sps:$4 sm:$0xff]  }
  0xbc   : > { %10601 = vmatprep.subr.bf16.mxu1 %v12320_v35 }
  0xbe   : > { %10490 = vmatpush3.bf16.msra.mxu0 %v12319_v37  ;;  %v12338_v37 = vld [vmem:[%s13385_s8 + $0xeb4] ss:$144 sps:$4 sm:$0xff]  }
  0xbf   : > { %10602 = vmatpush3.bf16.msra.mxu1 %v12321_v40  ;;  %10491 = vmatprep.subr.bf16.mxu0 %v12334_v41 }
  0xc0   : > { %6356 = vmatmul.mubr.bf16.gmra.mrb[76].mxu0 %v12262_v36  ;;  %10603 = vmatprep.subr.bf16.mxu1 %v12336_v43  ;;  %v12333_v36 = vld [vmem:[%s13385_s8 + $0xd98] ss:$144 sps:$4 sm:$0xff]  }
  0xc1   : > { %6517 = vmatmul.mubr.bf16.gmra.mrb[76].mxu1 %v12263_v38  ;;  %6363 = vmatprep.mubr.bf16.mxu0 %v12264_v39 }
  0xc2   : > { %6524 = vmatprep.mubr.bf16.mxu1 %v12266_v42  ;;  %10492 = vmatpush3.bf16.msra.mxu0 %v12335_v44 }
  0xc3   : > { %10604 = vmatpush3.bf16.msra.mxu1 %v12337_v45  ;;  %10493 = vmatprep.subr.bf16.mxu0 %v12350_v46  ;;  %v12340_v46 = vld [vmem:[%s13385_s8 + $0xebc] ss:$144 sps:$4 sm:$0xff]  }
  0xc4   : > { %10605 = vmatprep.subr.bf16.mxu1 %v12352_v47 }
  0xc6   : > { %10494 = vmatpush3.bf16.msra.mxu0 %v12351_v49 }
  0xc7   : > { %10606 = vmatpush3.bf16.msra.mxu1 %v12353_v50  ;;  %10703 = vmatprep.subr.bf16.mxu0 %v12366_v51 }
  0xc8   : > { %6364 = vmatmul.mubr.bf16.gmra.mrb[80].mxu0 %v12268_v48  ;;  %10815 = vmatprep.subr.bf16.mxu1 %v12368_v53 }
  0xc9   : > { %6525 = vmatmul.mubr.bf16.gmra.mrb[80].mxu1 %v12269_v52  ;;  %6371 = vmatprep.mubr.bf16.mxu0 %v12274_v54  ;;  %v12342_v52 = vld [vmem:[%s13385_s8 + $0xeb0] ss:$144 sps:$4 sm:$0xff]   ;;  %v12343_v54 = vld [vmem:[%s13385_s8 + $0xeb8] ss:$144 sps:$4 sm:$0xff]  }
  0xca   : > { %6532 = vmatprep.mubr.bf16.mxu1 %v12276_v55  ;;  %v12344_v55 = vld [vmem:[%s13385_s8 + $0xfd4] ss:$144 sps:$4 sm:$0xff]  }
  0xd0   : > { %6372 = vmatmul.mubr.bf16.gmra.mrb[84].mxu0 %v12278_v56 }
  0xd1   : > { %6533 = vmatmul.mubr.bf16.gmra.mrb[84].mxu1 %v12279_v57  ;;  %6379 = vmatprep.mubr.bf16.mxu0 %v12280_v58 }
  0xd2   : > { %6540 = vmatprep.mubr.bf16.mxu1 %v12282_v59 }
  0xd8   : > { %6380 = vmatmul.mubr.bf16.gmra.mrb[88].mxu0 %v12284_v60 }
  0xd9   : > { %6541 = vmatmul.mubr.bf16.gmra.mrb[88].mxu1 %v12285_v61  ;;  %6387 = vmatprep.mubr.bf16.mxu0 %v12290_v62 }
  0xda   : > { %6548 = vmatprep.mubr.bf16.mxu1 %v12292_v63 }
  0xe0   : > { %6388 = vmatmul.mubr.bf16.gmra.mrb[92].mxu0 %v12294_v0  ;;  %v12346_v0 = vld [vmem:[%s13385_s8 + $0xfdc] ss:$144 sps:$4 sm:$0xff]  }
  0xe1   : > { %6549 = vmatmul.mubr.bf16.gmra.mrb[92].mxu1 %v12295_v1  ;;  %6395 = vmatprep.mubr.bf16.mxu0 %v12296_v2 }
  0xe2   : > { %6556 = vmatprep.mubr.bf16.mxu1 %v12298_v3 }
  0xe8   : > { %6396 = vmatmul.mubr.bf16.gmra.mrb[96].mxu0 %v12300_v4 }
  0xe9   : > { %6557 = vmatmul.mubr.bf16.gmra.mrb[96].mxu1 %v12301_v5  ;;  %6403 = vmatprep.mubr.bf16.mxu0 %v12306_v6  ;;  %v12348_v6 = vld [vmem:[%s13385_s8 + $0xfd0] ss:$144 sps:$4 sm:$0xff]  }
  0xea   : > { %6564 = vmatprep.mubr.bf16.mxu1 %v12308_v7 }
  0xf0   : > { %6404 = vmatmul.mubr.bf16.gmra.mrb[100].mxu0 %v12310_v8  ;;  %v12349_v8 = vld [vmem:[%s13385_s8 + $0xfd8] ss:$144 sps:$4 sm:$0xff]  }
  0xf1   : > { %6565 = vmatmul.mubr.bf16.gmra.mrb[100].mxu1 %v12311_v9  ;;  %6411 = vmatprep.mubr.bf16.mxu0 %v12312_v10  ;;  %v12354_v9 = vld [vmem:[%s13385_s8 + $0x10f4] ss:$144 sps:$4 sm:$0xff]  }
  0xf2   : > { %6572 = vmatprep.mubr.bf16.mxu1 %v12314_v11 }
  0xf8   : > { %6412 = vmatmul.mubr.bf16.gmra.mrb[104].mxu0 %v12316_v12 }
  0xf9   : > { %6573 = vmatmul.mubr.bf16.gmra.mrb[104].mxu1 %v12317_v13  ;;  %6419 = vmatprep.mubr.bf16.mxu0 %v12322_v14 }
  0xfa   : > { %6580 = vmatprep.mubr.bf16.mxu1 %v12324_v15 }
  0xfb   : > { %v10047_v17 = vpop.f32.mrb[0].mxu0 }
  0xfc   : > { %v10159_v20 = vpop.f32.mrb[0].mxu1  ;;  %v10048_v21 = vpop.f32.mrb[1].mxu0 }
  0xfd   : > { %v10049_v22 = vadd.f32 %v10048_v21, %v10047_v17  ;;  %v10160_v23 = vpop.f32.mrb[1].mxu1  ;;  %v10050_v24 = vpop.f32.mrb[2].mxu0 }
  0xfe   : > { %v10161_v25 = vadd.f32 %v10160_v23, %v10159_v20  ;;  %v10162_v26 = vpop.f32.mrb[2].mxu1  ;;  %v10051_v27 = vpop.f32.mrb[3].mxu0 }
  0xff   : > { %v10052_v29 = vadd.f32 %v10051_v27, %v10050_v24  ;;  %v10163_v30 = vpop.f32.mrb[3].mxu1  ;;  %v12358_v24 = vld [vmem:[%s13385_s8 + $0x10f0] ss:$144 sps:$4 sm:$0xff]   ;;  %v12362_v27 = vld [vmem:[%s13385_s8 + $0x24] ss:$144 sps:$4 sm:$0xff]  }
 0x100   : > { %v13705_v31 = vadd.f32 %v10161_v25, %v10049_v22  ;;  %v10164_v32 = vadd.f32 %v10163_v30, %v10162_v26  ;;  %6420 = vmatmul.mubr.bf16.gmra.mrb[108].mxu0 %v12326_v16  ;;  %v12359_v26 = vld [vmem:[%s13385_s8 + $0x10f8] ss:$144 sps:$4 sm:$0xff]  }
 0x101   : > { %6581 = vmatmul.mubr.bf16.gmra.mrb[108].mxu1 %v12327_v18  ;;  %6427 = vmatprep.mubr.bf16.mxu0 %v12328_v19  ;;  %v12356_v18 = vld [vmem:[%s13385_s8 + $0x10fc] ss:$144 sps:$4 sm:$0xff]  }
 0x102   : > { %v13707_v33 = vadd.f32 %v10164_v32, %v10052_v29  ;;  %6588 = vmatprep.mubr.bf16.mxu1 %v12330_v28 }
 0x103   : > { %v10053_v35 = vpop.f32.mrb[4].mxu0 }
 0x104   : > { %v10165_v38 = vpop.f32.mrb[4].mxu1  ;;  %v10054_v39 = vpop.f32.mrb[5].mxu0 }
 0x105   : > { %v10055_v40 = vadd.f32 %v10054_v39, %v10053_v35  ;;  %v10166_v41 = vpop.f32.mrb[5].mxu1  ;;  %v10056_v42 = vpop.f32.mrb[6].mxu0 }
 0x106   : > { %v10167_v43 = vadd.f32 %v10166_v41, %v10165_v38  ;;  %v10168_v44 = vpop.f32.mrb[6].mxu1  ;;  %v10057_v45 = vpop.f32.mrb[7].mxu0  ;;  %v12365_v38 = vld [vmem:[%s13385_s8 + $0x2c] ss:$144 sps:$4 sm:$0xff]  }
 0x107   : > { %v10058_v47 = vadd.f32 %v10057_v45, %v10056_v42  ;;  %v10169_v48 = vpop.f32.mrb[7].mxu1 }
 0x108   : > { %v13713_v49 = vadd.f32 %v10167_v43, %v10055_v40  ;;  %v10170_v50 = vadd.f32 %v10169_v48, %v10168_v44  ;;  %6428 = vmatmul.mubr.bf16.gmra.mrb[112].mxu0 %v12332_v34  ;;  %v12360_v44 = vld [vmem:[%s13385_s8 + $0x20] ss:$144 sps:$4 sm:$0xff]  }
 0x109   : > { %6589 = vmatmul.mubr.bf16.gmra.mrb[112].mxu1 %v12333_v36  ;;  %6435 = vmatprep.mubr.bf16.mxu0 %v12338_v37 }
 0x10a   : > { %v13715_v51 = vadd.f32 %v10170_v50, %v10058_v47  ;;  %6596 = vmatprep.mubr.bf16.mxu1 %v12340_v46  ;;  %v12363_v46 = vld [vmem:[%s13385_s8 + $0x28] ss:$144 sps:$4 sm:$0xff]   ;;  %v12367_v47 = vld [vmem:[%s15558_s1 + $0x300] sm:$0xff]  }
 0x10b   : > { %v10059_v53 = vpop.f32.mrb[8].mxu0 }
 0x10c   : > { %v10171_v56 = vpop.f32.mrb[8].mxu1  ;;  %v10060_v57 = vpop.f32.mrb[9].mxu0 }
 0x10d   : > { %v10061_v58 = vadd.f32 %v10060_v57, %v10059_v53  ;;  %v10172_v59 = vpop.f32.mrb[9].mxu1  ;;  %v10062_v60 = vpop.f32.mrb[10].mxu0 }
 0x10e   : > { %v10173_v61 = vadd.f32 %v10172_v59, %v10171_v56  ;;  %v10174_v62 = vpop.f32.mrb[10].mxu1  ;;  %v10063_v63 = vpop.f32.mrb[11].mxu0  ;;  %v12369_v59 = vld [vmem:[%s15558_s1 + $0x380] sm:$0xff]  }
 0x10f   : > { %v10064_v1 = vadd.f32 %v10063_v63, %v10062_v60  ;;  %v10175_v2 = vpop.f32.mrb[11].mxu1  ;;  %v12372_v60 = vld [vmem:[%s13385_s8 + $0x14c] ss:$144 sps:$4 sm:$0xff]  }
 0x110   : > { %v13721_v3 = vadd.f32 %v10173_v61, %v10061_v58  ;;  %v10176_v4 = vadd.f32 %v10175_v2, %v10174_v62  ;;  %6436 = vmatmul.mubr.bf16.gmra.mrb[116].mxu0 %v12342_v52  ;;  %v12370_v52 = vld [vmem:[%s13385_s8 + $0x144] ss:$144 sps:$4 sm:$0xff]   ;;  %v12382_v61 = vld [vmem:[%s15558_s1 + $0x348] sm:$0xff]  }
 0x111   : > { %6597 = vmatmul.mubr.bf16.gmra.mrb[116].mxu1 %v12343_v54  ;;  %6443 = vmatprep.mubr.bf16.mxu0 %v12344_v55 }
 0x112   : > { %v13723_v5 = vadd.f32 %v10176_v4, %v10064_v1  ;;  %6604 = vmatprep.mubr.bf16.mxu1 %v12346_v0  ;;  %v12383_v0 = vld [vmem:[%s15558_s1 + $0x308] sm:$0xff]  }
 0x113   : > { %v10065_v7 = vpop.f32.mrb[12].mxu0  ;;  %v12384_v1 = vld [vmem:[%s15558_s1 + $0x3c8] sm:$0xff]  }
 0x114   : > { %v10177_v10 = vpop.f32.mrb[12].mxu1  ;;  %v10066_v11 = vpop.f32.mrb[13].mxu0 }
 0x115   : > { %v10067_v12 = vadd.f32 %v10066_v11, %v10065_v7  ;;  %v10178_v13 = vpop.f32.mrb[13].mxu1  ;;  %v10068_v14 = vpop.f32.mrb[14].mxu0  ;;  %v12398_v7 = vld [vmem:[%s15558_s1 + $0x350] sm:$0xff]   ;;  %v12375_v11 = vld [vmem:[%s13385_s8 + $0x148] ss:$144 sps:$4 sm:$0xff]  }
 0x116   : > { %v10179_v15 = vadd.f32 %v10178_v13, %v10177_v10  ;;  %v10180_v16 = vpop.f32.mrb[14].mxu1  ;;  %v10069_v17 = vpop.f32.mrb[15].mxu0  ;;  %v12374_v10 = vld [vmem:[%s13385_s8 + $0x140] ss:$144 sps:$4 sm:$0xff]  }
 0x117   : > { %v10070_v19 = vadd.f32 %v10069_v17, %v10068_v14  ;;  %v10181_v20 = vpop.f32.mrb[15].mxu1 }
 0x118   : > { %v13729_v21 = vadd.f32 %v10179_v15, %v10067_v12  ;;  %v10182_v22 = vadd.f32 %v10181_v20, %v10180_v16  ;;  %6444 = vmatmul.mubr.bf16.gmra.mrb[120].mxu0 %v12348_v6  ;;  %v12385_v6 = vld [vmem:[%s15558_s1 + $0x388] sm:$0xff]   ;;  %v12400_v12 = vld [vmem:[%s15558_s1 + $0x3d0] sm:$0xff]  }
 0x119   : > { %6605 = vmatmul.mubr.bf16.gmra.mrb[120].mxu1 %v12349_v8  ;;  %6451 = vmatprep.mubr.bf16.mxu0 %v12354_v9  ;;  %v12376_v15 = vld [vmem:[%s13385_s8 + $0x264] ss:$144 sps:$4 sm:$0xff]  }
 0x11a   : > { %v13731_v23 = vadd.f32 %v10182_v22, %v10070_v19  ;;  %6612 = vmatprep.mubr.bf16.mxu1 %v12356_v18 }
 0x11b   : > { %v10071_v25 = vpop.f32.mrb[16].mxu0 }
 0x11c   : > { %v10183_v28 = vpop.f32.mrb[16].mxu1  ;;  %v10072_v29 = vpop.f32.mrb[17].mxu0 }
 0x11d   : > { %v10073_v30 = vadd.f32 %v10072_v29, %v10071_v25  ;;  %v10184_v32 = vpop.f32.mrb[17].mxu1  ;;  %v10074_v34 = vpop.f32.mrb[18].mxu0  ;;  %v12399_v25 = vld [vmem:[%s15558_s1 + $0x310] sm:$0xff]   ;;  %v12414_v29 = vld [vmem:[%s15558_s1 + $0x358] sm:$0xff]  }
 0x11e   : > { %v10185_v35 = vadd.f32 %v10184_v32, %v10183_v28  ;;  %v10186_v36 = vpop.f32.mrb[18].mxu1  ;;  %v10075_v37 = vpop.f32.mrb[19].mxu0 }
 0x11f   : > { %v10076_v39 = vadd.f32 %v10075_v37, %v10074_v34  ;;  %v10187_v40 = vpop.f32.mrb[19].mxu1  ;;  %v12430_v37 = vld [vmem:[%s15558_s1 + $0x360] sm:$0xff]  }
 0x120   : > { %v13737_v41 = vadd.f32 %v10185_v35, %v10073_v30  ;;  %v10188_v42 = vadd.f32 %v10187_v40, %v10186_v36  ;;  %6452 = vmatmul.mubr.bf16.gmra.mrb[124].mxu0 %v12358_v24  ;;  %v12378_v24 = vld [vmem:[%s13385_s8 + $0x26c] ss:$144 sps:$4 sm:$0xff]   ;;  %v12432_v40 = vld [vmem:[%s15558_s1 + $0x3e0] sm:$0xff]  }
 0x121   : > { %6613 = vmatmul.mubr.bf16.gmra.mrb[124].mxu1 %v12359_v26  ;;  %6653 = vmatprep.mubr.bf16.mxu0 %v12362_v27  ;;  %v12401_v26 = vld [vmem:[%s15558_s1 + $0x390] sm:$0xff]   ;;  %v12416_v30 = vld [vmem:[%s15558_s1 + $0x3d8] sm:$0xff]  }
 0x122   : > { %v13739_v43 = vadd.f32 %v10188_v42, %v10076_v39  ;;  %6814 = vmatprep.mubr.bf16.mxu1 %v12365_v38  ;;  %v12415_v35 = vld [vmem:[%s15558_s1 + $0x318] sm:$0xff]   ;;  %v12380_v39 = vld [vmem:[%s13385_s8 + $0x260] ss:$144 sps:$4 sm:$0xff]  }
 0x123   : > { %v10077_v45 = vpop.f32.mrb[20].mxu0  ;;  %v12417_v36 = vld [vmem:[%s15558_s1 + $0x398] sm:$0xff]  }
 0x124   : > { %v10189_v48 = vpop.f32.mrb[20].mxu1  ;;  %v10078_v50 = vpop.f32.mrb[21].mxu0 }
 0x125   : > { %v10079_v53 = vadd.f32 %v10078_v50, %v10077_v45  ;;  %v10190_v54 = vpop.f32.mrb[21].mxu1  ;;  %v10080_v55 = vpop.f32.mrb[22].mxu0  ;;  %v12386_v45 = vld [vmem:[%s13385_s8 + $0x384] ss:$144 sps:$4 sm:$0xff]  }
 0x126   : > { %v10191_v56 = vadd.f32 %v10190_v54, %v10189_v48  ;;  %v10192_v57 = vpop.f32.mrb[22].mxu1  ;;  %v10081_v58 = vpop.f32.mrb[23].mxu0 }
 0x127   : > { %v10082_v62 = vadd.f32 %v10081_v58, %v10080_v55  ;;  %v10193_v63 = vpop.f32.mrb[23].mxu1  ;;  %v12433_v58 = vld [vmem:[%s15558_s1 + $0x3a0] sm:$0xff]  }
 0x128   : > { %v13760_v2 = vadd.f32 %v10191_v56, %v10079_v53  ;;  %v10194_v4 = vadd.f32 %v10193_v63, %v10192_v57  ;;  %6654 = vmatmul.mubr.bf16.vlgmr.msra.gmra.mrb[128].mxu0 %v12360_v44  ;;  %v12381_v44 = vld [vmem:[%s13385_s8 + $0x268] ss:$144 sps:$4 sm:$0xff]   ;;  %v12388_v56 = vld [vmem:[%s13385_s8 + $0x38c] ss:$144 sps:$4 sm:$0xff]   ;;  %v12431_v57 = vld [vmem:[%s15558_s1 + $0x320] sm:$0xff]  }
 0x129   : > { %6815 = vmatmul.mubr.bf16.vlgmr.msra.gmra.mrb[128].mxu1 %v12363_v46  ;;  %10704 = vmatpush3.bf16.msra.mxu0 %v12367_v47 }
 0x12a   : > { %v13768_v8 = vadd.f32 %v10194_v4, %v10082_v62  ;;  %10816 = vmatpush3.bf16.msra.mxu1 %v12369_v59  ;;  %6661 = vmatprep.mubr.bf16.mxu0 %v12370_v52  ;;  %v12448_v62 = vld [vmem:[%s15558_s1 + $0x3e8] sm:$0xff]  }
 0x12b   : > { %v10083_v9 = vpop.f32.mrb[24].mxu0  ;;  %6822 = vmatprep.mubr.bf16.mxu1 %v12372_v60  ;;  %10705 = vmatprep.subr.bf16.mxu0 %v12382_v61  ;;  %v12446_v61 = vld [vmem:[%s15558_s1 + $0x368] sm:$0xff]  }
 0x12c   : > { %v10195_v13 = vpop.f32.mrb[24].mxu1  ;;  %v10084_v14 = vpop.f32.mrb[25].mxu0  ;;  %10817 = vmatprep.subr.bf16.mxu1 %v12384_v1  ;;  %v12447_v1 = vld [vmem:[%s15558_s1 + $0x328] sm:$0xff]  }
 0x12d   : > { %v10085_v16 = vadd.f32 %v10084_v14, %v10083_v9  ;;  %v10196_v17 = vpop.f32.mrb[25].mxu1  ;;  %v10086_v18 = vpop.f32.mrb[26].mxu0  ;;  %10706 = vmatpush3.bf16.msra.mxu0 %v12383_v0  ;;  %v12391_v9 = vld [vmem:[%s13385_s8 + $0x388] ss:$144 sps:$4 sm:$0xff]  }
 0x12e   : > { %v10197_v19 = vadd.f32 %v10196_v17, %v10195_v13  ;;  %v10198_v20 = vpop.f32.mrb[26].mxu1  ;;  %v10087_v22 = vpop.f32.mrb[27].mxu0  ;;  %10818 = vmatpush3.bf16.msra.mxu1 %v12385_v6  ;;  %10707 = vmatprep.subr.bf16.mxu0 %v12398_v7  ;;  %v12390_v6 = vld [vmem:[%s13385_s8 + $0x380] ss:$144 sps:$4 sm:$0xff]  }
 0x12f   : > { %v10088_v27 = vadd.f32 %v10087_v22, %v10086_v18  ;;  %v10199_v28 = vpop.f32.mrb[27].mxu1  ;;  %10819 = vmatprep.subr.bf16.mxu1 %v12400_v12  ;;  %v12462_v12 = vld [vmem:[%s15558_s1 + $0x370] sm:$0xff]  }
 0x130   : > { %v13789_v32 = vadd.f32 %v10197_v19, %v10085_v16  ;;  %v10200_v34 = vadd.f32 %v10199_v28, %v10198_v20  ;;  %6662 = vmatmul.mubr.bf16.gmra.mrb[132].mxu0 %v12374_v10  ;;  %v12392_v10 = vld [vmem:[%s13385_s8 + $0x4a4] ss:$144 sps:$4 sm:$0xff]  }
 0x131   : > { %6823 = vmatmul.mubr.bf16.gmra.mrb[132].mxu1 %v12375_v11  ;;  %6669 = vmatprep.mubr.bf16.mxu0 %v12376_v15  ;;  %v12449_v11 = vld [vmem:[%s15558_s1 + $0x3a8] sm:$0xff]   ;;  %v12464_v15 = vld [vmem:[%s15558_s1 + $0x3f0] sm:$0xff]  }
 0x132   : > { %v13800_v38 = vadd.f32 %v10200_v34, %v10088_v27  ;;  %6830 = vmatprep.mubr.bf16.mxu1 %v12378_v24  ;;  %10708 = vmatpush3.bf16.msra.mxu0 %v12399_v25  ;;  %v12394_v24 = vld [vmem:[%s13385_s8 + $0x4ac] ss:$144 sps:$4 sm:$0xff]   ;;  %v12463_v25 = vld [vmem:[%s15558_s1 + $0x330] sm:$0xff]  }
 0x133   : > { %v10089_v42 = vpop.f32.mrb[28].mxu0  ;;  %10820 = vmatpush3.bf16.msra.mxu1 %v12401_v26  ;;  %10709 = vmatprep.subr.bf16.mxu0 %v12414_v29  ;;  %v12465_v26 = vld [vmem:[%s15558_s1 + $0x3b0] sm:$0xff]   ;;  %v12478_v29 = vld [vmem:[%s15558_s1 + $0x378] sm:$0xff]  }
 0x134   : > { %v10201_v46 = vpop.f32.mrb[28].mxu1  ;;  %v10090_v47 = vpop.f32.mrb[29].mxu0  ;;  %10821 = vmatprep.subr.bf16.mxu1 %v12416_v30  ;;  %v12480_v30 = vld [vmem:[%s15558_s1 + $0x3f8] sm:$0xff]  }
 0x135   : > { %v10091_v48 = vadd.f32 %v10090_v47, %v10089_v42  ;;  %v10202_v50 = vpop.f32.mrb[29].mxu1  ;;  %v10092_v52 = vpop.f32.mrb[30].mxu0  ;;  %v12396_v42 = vld [vmem:[%s13385_s8 + $0x4a0] ss:$144 sps:$4 sm:$0xff]   ;;  %v12402_v47 = vld [vmem:[%s13385_s8 + $0x5c4] ss:$144 sps:$4 sm:$0xff]  }
 0x136   : > { %v10203_v53 = vadd.f32 %v10202_v50, %v10201_v46  ;;  %v10204_v54 = vpop.f32.mrb[30].mxu1  ;;  %v10093_v55 = vpop.f32.mrb[31].mxu0  ;;  %10710 = vmatpush3.bf16.msra.mxu0 %v12415_v35  ;;  %v12397_v46 = vld [vmem:[%s13385_s8 + $0x4a8] ss:$144 sps:$4 sm:$0xff]  }
 0x137   : > { %v10094_v59 = vadd.f32 %v10093_v55, %v10092_v52  ;;  %v10205_v60 = vpop.f32.mrb[31].mxu1  ;;  %10822 = vmatpush3.bf16.msra.mxu1 %v12417_v36  ;;  %10711 = vmatprep.subr.bf16.mxu0 %v12430_v37  ;;  %v12479_v36 = vld [vmem:[%s15558_s1 + $0x338] sm:$0xff]  }
 0x138   : > { %v13821_v63 = vadd.f32 %v10203_v53, %v10091_v48  ;;  %v10206_v0 = vadd.f32 %v10205_v60, %v10204_v54  ;;  %6670 = vmatmul.mubr.bf16.gmra.mrb[136].mxu0 %v12380_v39  ;;  %10823 = vmatprep.subr.bf16.mxu1 %v12432_v40  ;;  %v12481_v37 = vld [vmem:[%s15558_s1 + $0x3b8] sm:$0xff]   ;;  %v12494_v39 = vld [vmem:[%s15558_s1 + $0x440] sm:$0xff]  }
 0x139   : > { %6831 = vmatmul.mubr.bf16.gmra.mrb[136].mxu1 %v12381_v44  ;;  %6677 = vmatprep.mubr.bf16.mxu0 %v12386_v45  ;;  %v12496_v44 = vld [vmem:[%s15558_s1 + $0x4c0] sm:$0xff]  }
 0x13a   : > { %v13826_v4 = vadd.f32 %v10206_v0, %v10094_v59  ;;  %6838 = vmatprep.mubr.bf16.mxu1 %v12388_v56  ;;  %10712 = vmatpush3.bf16.msra.mxu0 %v12431_v57 }
 0x13b   : > { %v10095_v7 = vpop.f32.mrb[32].mxu0  ;;  %10824 = vmatpush3.bf16.msra.mxu1 %v12433_v58  ;;  %10713 = vmatprep.subr.bf16.mxu0 %v12446_v61  ;;  %v12404_v58 = vld [vmem:[%s13385_s8 + $0x5cc] ss:$144 sps:$4 sm:$0xff]  }
 0x13c   : > { %v10207_v13 = vpop.f32.mrb[32].mxu1  ;;  %v10096_v14 = vpop.f32.mrb[33].mxu0  ;;  %10825 = vmatprep.subr.bf16.mxu1 %v12448_v62 }
 0x13d   : > { %v10097_v16 = vadd.f32 %v10096_v14, %v10095_v7  ;;  %v10208_v17 = vpop.f32.mrb[33].mxu1  ;;  %v10098_v18 = vpop.f32.mrb[34].mxu0  ;;  %v12407_v7 = vld [vmem:[%s13385_s8 + $0x5c8] ss:$144 sps:$4 sm:$0xff]  }
 0x13e   : > { %v10209_v19 = vadd.f32 %v10208_v17, %v10207_v13  ;;  %v10210_v20 = vpop.f32.mrb[34].mxu1  ;;  %v10099_v22 = vpop.f32.mrb[35].mxu0  ;;  %10714 = vmatpush3.bf16.msra.mxu0 %v12447_v1 }
 0x13f   : > { %v10100_v27 = vadd.f32 %v10099_v22, %v10098_v18  ;;  %v10211_v28 = vpop.f32.mrb[35].mxu1  ;;  %10826 = vmatpush3.bf16.msra.mxu1 %v12449_v11  ;;  %10715 = vmatprep.subr.bf16.mxu0 %v12462_v12  ;;  %v12408_v11 = vld [vmem:[%s13385_s8 + $0x6e4] ss:$144 sps:$4 sm:$0xff]   ;;  %v12410_v18 = vld [vmem:[%s13385_s8 + $0x6ec] ss:$144 sps:$4 sm:$0xff]  }
 0x140   : > { %v13853_v34 = vadd.f32 %v10209_v19, %v10097_v16  ;;  %v10212_v35 = vadd.f32 %v10211_v28, %v10210_v20  ;;  %6678 = vmatmul.mubr.bf16.gmra.mrb[140].mxu0 %v12390_v6  ;;  %10827 = vmatprep.subr.bf16.mxu1 %v12464_v15  ;;  %v12406_v6 = vld [vmem:[%s13385_s8 + $0x5c0] ss:$144 sps:$4 sm:$0xff]   ;;  %v12413_v28 = vld [vmem:[%s13385_s8 + $0x6e8] ss:$144 sps:$4 sm:$0xff]  }
 0x141   : > { %6839 = vmatmul.mubr.bf16.gmra.mrb[140].mxu1 %v12391_v9  ;;  %6685 = vmatprep.mubr.bf16.mxu0 %v12392_v10 }
 0x142   : > { %v13864_v40 = vadd.f32 %v10212_v35, %v10100_v27  ;;  %6846 = vmatprep.mubr.bf16.mxu1 %v12394_v24  ;;  %10716 = vmatpush3.bf16.msra.mxu0 %v12463_v25 }
 0x143   : > { %v10101_v45 = vpop.f32.mrb[36].mxu0  ;;  %10828 = vmatpush3.bf16.msra.mxu1 %v12465_v26  ;;  %10717 = vmatprep.subr.bf16.mxu0 %v12478_v29  ;;  %v12412_v26 = vld [vmem:[%s13385_s8 + $0x6e0] ss:$144 sps:$4 sm:$0xff]   ;;  %v12418_v29 = vld [vmem:[%s13385_s8 + $0x804] ss:$144 sps:$4 sm:$0xff]  }
 0x144   : > { %v10213_v48 = vpop.f32.mrb[36].mxu1  ;;  %v10102_v50 = vpop.f32.mrb[37].mxu0  ;;  %10829 = vmatprep.subr.bf16.mxu1 %v12480_v30 }
 0x145   : > { %v10103_v52 = vadd.f32 %v10102_v50, %v10101_v45  ;;  %v10214_v53 = vpop.f32.mrb[37].mxu1  ;;  %v10104_v54 = vpop.f32.mrb[38].mxu0 }
 0x146   : > { %v10215_v55 = vadd.f32 %v10214_v53, %v10213_v48  ;;  %v10216_v56 = vpop.f32.mrb[38].mxu1  ;;  %v10105_v57 = vpop.f32.mrb[39].mxu0  ;;  %10718 = vmatpush3.bf16.msra.mxu0 %v12479_v36 }
 0x147   : > { %v10106_v59 = vadd.f32 %v10105_v57, %v10104_v54  ;;  %v10217_v60 = vpop.f32.mrb[39].mxu1  ;;  %10830 = vmatpush3.bf16.msra.mxu1 %v12481_v37  ;;  %10927 = vmatprep.subr.bf16.mxu0 %v12494_v39 }
 0x148   : > { %v13873_v61 = vadd.f32 %v10215_v55, %v10103_v52  ;;  %v10218_v62 = vadd.f32 %v10217_v60, %v10216_v56  ;;  %6686 = vmatmul.mubr.bf16.gmra.mrb[144].mxu0 %v12396_v42  ;;  %11039 = vmatprep.subr.bf16.mxu1 %v12496_v44  ;;  %v12422_v55 = vld [vmem:[%s13385_s8 + $0x800] ss:$144 sps:$4 sm:$0xff]   ;;  %v12423_v56 = vld [vmem:[%s13385_s8 + $0x808] ss:$144 sps:$4 sm:$0xff]  }
 0x149   : > { %6847 = vmatmul.mubr.bf16.gmra.mrb[144].mxu1 %v12397_v46  ;;  %6693 = vmatprep.mubr.bf16.mxu0 %v12402_v47  ;;  %v12420_v46 = vld [vmem:[%s13385_s8 + $0x80c] ss:$144 sps:$4 sm:$0xff]  }
 0x14a   : > { %v13875_v0 = vadd.f32 %v10218_v62, %v10106_v59  ;;  %6854 = vmatprep.mubr.bf16.mxu1 %v12404_v58  ;;  %v12424_v59 = vld [vmem:[%s13385_s8 + $0x924] ss:$144 sps:$4 sm:$0xff]  }
 0x14b   : > { %v10107_v1 = vpop.f32.mrb[40].mxu0 }
 0x14c   : > { %v10219_v9 = vpop.f32.mrb[40].mxu1  ;;  %v10108_v10 = vpop.f32.mrb[41].mxu0 }
 0x14d   : > { %v10109_v12 = vadd.f32 %v10108_v10, %v10107_v1  ;;  %v10220_v13 = vpop.f32.mrb[41].mxu1  ;;  %v10110_v14 = vpop.f32.mrb[42].mxu0  ;;  %v12426_v10 = vld [vmem:[%s13385_s8 + $0x92c] ss:$144 sps:$4 sm:$0xff]  }
 0x14e   : > { %v10221_v15 = vadd.f32 %v10220_v13, %v10219_v9  ;;  %v10222_v16 = vpop.f32.mrb[42].mxu1  ;;  %v10111_v17 = vpop.f32.mrb[43].mxu0 }
 0x14f   : > { %v10112_v19 = vadd.f32 %v10111_v17, %v10110_v14  ;;  %v10223_v20 = vpop.f32.mrb[43].mxu1 }
 0x150   : > { %v13881_v22 = vadd.f32 %v10221_v15, %v10109_v12  ;;  %v10224_v24 = vadd.f32 %v10223_v20, %v10222_v16  ;;  %6694 = vmatmul.mubr.bf16.gmra.mrb[148].mxu0 %v12406_v6  ;;  %v12428_v16 = vld [vmem:[%s13385_s8 + $0x920] ss:$144 sps:$4 sm:$0xff]  }
 0x151   : > { %6855 = vmatmul.mubr.bf16.gmra.mrb[148].mxu1 %v12407_v7  ;;  %6701 = vmatprep.mubr.bf16.mxu0 %v12408_v11 }
 0x152   : > { %v13883_v25 = vadd.f32 %v10224_v24, %v10112_v19  ;;  %6862 = vmatprep.mubr.bf16.mxu1 %v12410_v18  ;;  %v12429_v18 = vld [vmem:[%s13385_s8 + $0x928] ss:$144 sps:$4 sm:$0xff]   ;;  %v12434_v19 = vld [vmem:[%s13385_s8 + $0xa44] ss:$144 sps:$4 sm:$0xff]  }
 0x153   : > { %v10113_v27 = vpop.f32.mrb[44].mxu0 }
 0x154   : > { %v10225_v30 = vpop.f32.mrb[44].mxu1  ;;  %v10114_v35 = vpop.f32.mrb[45].mxu0 }
 0x155   : > { %v10115_v36 = vadd.f32 %v10114_v35, %v10113_v27  ;;  %v10226_v37 = vpop.f32.mrb[45].mxu1  ;;  %v10116_v39 = vpop.f32.mrb[46].mxu0 }
 0x156   : > { %v10227_v42 = vadd.f32 %v10226_v37, %v10225_v30  ;;  %v10228_v44 = vpop.f32.mrb[46].mxu1  ;;  %v10117_v45 = vpop.f32.mrb[47].mxu0 }
 0x157   : > { %v10118_v47 = vadd.f32 %v10117_v45, %v10116_v39  ;;  %v10229_v48 = vpop.f32.mrb[47].mxu1 }
 0x158   : > { %v13889_v50 = vadd.f32 %v10227_v42, %v10115_v36  ;;  %v10230_v52 = vadd.f32 %v10229_v48, %v10228_v44  ;;  %6702 = vmatmul.mubr.bf16.gmra.mrb[152].mxu0 %v12412_v26  ;;  %v12436_v36 = vld [vmem:[%s13385_s8 + $0xa4c] ss:$144 sps:$4 sm:$0xff]   ;;  %v12439_v48 = vld [vmem:[%s13385_s8 + $0xa48] ss:$144 sps:$4 sm:$0xff]  }
 0x159   : > { %6863 = vmatmul.mubr.bf16.gmra.mrb[152].mxu1 %v12413_v28  ;;  %6709 = vmatprep.mubr.bf16.mxu0 %v12418_v29 }
 0x15a   : > { %v13891_v53 = vadd.f32 %v10230_v52, %v10118_v47  ;;  %6870 = vmatprep.mubr.bf16.mxu1 %v12420_v46  ;;  %v12438_v47 = vld [vmem:[%s13385_s8 + $0xa40] ss:$144 sps:$4 sm:$0xff]  }
 0x15b   : > { %v10119_v54 = vpop.f32.mrb[48].mxu0 }
 0x15c   : > { %v10231_v57 = vpop.f32.mrb[48].mxu1  ;;  %v10120_v58 = vpop.f32.mrb[49].mxu0 }
 0x15d   : > { %v10121_v60 = vadd.f32 %v10120_v58, %v10119_v54  ;;  %v10232_v62 = vpop.f32.mrb[49].mxu1  ;;  %v10122_v1 = vpop.f32.mrb[50].mxu0 }
 0x15e   : > { %v10233_v6 = vadd.f32 %v10232_v62, %v10231_v57  ;;  %v10234_v7 = vpop.f32.mrb[50].mxu1  ;;  %v10123_v9 = vpop.f32.mrb[51].mxu0 }
 0x15f   : > { %v10124_v11 = vadd.f32 %v10123_v9, %v10122_v1  ;;  %v10235_v12 = vpop.f32.mrb[51].mxu1  ;;  %v12442_v1 = vld [vmem:[%s13385_s8 + $0xb6c] ss:$144 sps:$4 sm:$0xff]  }
 0x160   : > { %v13897_v13 = vadd.f32 %v10233_v6, %v10121_v60  ;;  %v10236_v14 = vadd.f32 %v10235_v12, %v10234_v7  ;;  %6710 = vmatmul.mubr.bf16.gmra.mrb[156].mxu0 %v12422_v55  ;;  %v12440_v55 = vld [vmem:[%s13385_s8 + $0xb64] ss:$144 sps:$4 sm:$0xff]   ;;  %v12444_v12 = vld [vmem:[%s13385_s8 + $0xb60] ss:$144 sps:$4 sm:$0xff]  }
 0x161   : > { %6871 = vmatmul.mubr.bf16.gmra.mrb[156].mxu1 %v12423_v56  ;;  %6717 = vmatprep.mubr.bf16.mxu0 %v12424_v59 }
 0x162   : > { %v13899_v15 = vadd.f32 %v10236_v14, %v10124_v11  ;;  %6878 = vmatprep.mubr.bf16.mxu1 %v12426_v10 }
 0x163   : > { %v10125_v17 = vpop.f32.mrb[52].mxu0 }
 0x164   : > { %v10237_v20 = vpop.f32.mrb[52].mxu1  ;;  %v10126_v24 = vpop.f32.mrb[53].mxu0 }
 0x165   : > { %v10127_v26 = vadd.f32 %v10126_v24, %v10125_v17  ;;  %v10238_v27 = vpop.f32.mrb[53].mxu1  ;;  %v10128_v28 = vpop.f32.mrb[54].mxu0  ;;  %v12450_v17 = vld [vmem:[%s13385_s8 + $0xc84] ss:$144 sps:$4 sm:$0xff]  }
 0x166   : > { %v10239_v29 = vadd.f32 %v10238_v27, %v10237_v20  ;;  %v10240_v30 = vpop.f32.mrb[54].mxu1  ;;  %v10129_v35 = vpop.f32.mrb[55].mxu0 }
 0x167   : > { %v10130_v37 = vadd.f32 %v10129_v35, %v10128_v28  ;;  %v10241_v39 = vpop.f32.mrb[55].mxu1 }
 0x168   : > { %v13905_v42 = vadd.f32 %v10239_v29, %v10127_v26  ;;  %v10242_v44 = vadd.f32 %v10241_v39, %v10240_v30  ;;  %6718 = vmatmul.mubr.bf16.gmra.mrb[160].mxu0 %v12428_v16  ;;  %v12445_v16 = vld [vmem:[%s13385_s8 + $0xb68] ss:$144 sps:$4 sm:$0xff]   ;;  %v12452_v30 = vld [vmem:[%s13385_s8 + $0xc8c] ss:$144 sps:$4 sm:$0xff]  }
 0x169   : > { %6879 = vmatmul.mubr.bf16.gmra.mrb[160].mxu1 %v12429_v18  ;;  %6725 = vmatprep.mubr.bf16.mxu0 %v12434_v19 }
 0x16a   : > { %v13907_v45 = vadd.f32 %v10242_v44, %v10130_v37  ;;  %6886 = vmatprep.mubr.bf16.mxu1 %v12436_v36 }
 0x16b   : > { %v10131_v46 = vpop.f32.mrb[56].mxu0 }
 0x16c   : > { %v10243_v52 = vpop.f32.mrb[56].mxu1  ;;  %v10132_v54 = vpop.f32.mrb[57].mxu0 }
 0x16d   : > { %v10133_v56 = vadd.f32 %v10132_v54, %v10131_v46  ;;  %v10244_v57 = vpop.f32.mrb[57].mxu1  ;;  %v10134_v58 = vpop.f32.mrb[58].mxu0 }
 0x16e   : > { %v10245_v59 = vadd.f32 %v10244_v57, %v10243_v52  ;;  %v10246_v60 = vpop.f32.mrb[58].mxu1  ;;  %v10135_v62 = vpop.f32.mrb[59].mxu0 }
 0x16f   : > { %v10136_v6 = vadd.f32 %v10135_v62, %v10134_v58  ;;  %v10247_v7 = vpop.f32.mrb[59].mxu1 }
 0x170   : > { %v13913_v9 = vadd.f32 %v10245_v59, %v10133_v56  ;;  %v10248_v10 = vadd.f32 %v10247_v7, %v10246_v60  ;;  %6726 = vmatmul.mubr.bf16.gmra.mrb[164].mxu0 %v12438_v47  ;;  %v12454_v47 = vld [vmem:[%s13385_s8 + $0xc80] ss:$144 sps:$4 sm:$0xff]  }
 0x171   : > { %6887 = vmatmul.mubr.bf16.gmra.mrb[164].mxu1 %v12439_v48  ;;  %6733 = vmatprep.mubr.bf16.mxu0 %v12440_v55  ;;  %v12455_v48 = vld [vmem:[%s13385_s8 + $0xc88] ss:$144 sps:$4 sm:$0xff]   ;;  %v12456_v55 = vld [vmem:[%s13385_s8 + $0xda4] ss:$144 sps:$4 sm:$0xff]  }
 0x172   : > { %v13915_v11 = vadd.f32 %v10248_v10, %v10136_v6  ;;  %6894 = vmatprep.mubr.bf16.mxu1 %v12442_v1  ;;  %v12458_v1 = vld [vmem:[%s13385_s8 + $0xdac] ss:$144 sps:$4 sm:$0xff]  }
 0x173   : > { %v10137_v14 = vpop.f32.mrb[60].mxu0 }
 0x174   : > { %v10249_v18 = vpop.f32.mrb[60].mxu1  ;;  %v10138_v19 = vpop.f32.mrb[61].mxu0 }
 0x175   : > { %v10139_v20 = vadd.f32 %v10138_v19, %v10137_v14  ;;  %v10250_v24 = vpop.f32.mrb[61].mxu1  ;;  %v10140_v26 = vpop.f32.mrb[62].mxu0 }
 0x176   : > { %v10251_v27 = vadd.f32 %v10250_v24, %v10249_v18  ;;  %v10252_v28 = vpop.f32.mrb[62].mxu1  ;;  %v10141_v29 = vpop.f32.mrb[63].mxu0  ;;  %v12466_v24 = vld [vmem:[%s13385_s8 + $0xec4] ss:$144 sps:$4 sm:$0xff]  }
 0x177   : > { %v10142_v35 = vadd.f32 %v10141_v29, %v10140_v26  ;;  %v10253_v36 = vpop.f32.mrb[63].mxu1 }
 0x178   : > { %v13921_v37 = vadd.f32 %v10251_v27, %v10139_v20  ;;  %v10254_v39 = vadd.f32 %v10253_v36, %v10252_v28  ;;  %6734 = vmatmul.mubr.bf16.gmra.mrb[168].mxu0 %v12444_v12  ;;  %v12461_v20 = vld [vmem:[%s13385_s8 + $0xda8] ss:$144 sps:$4 sm:$0xff]   ;;  %v12468_v36 = vld [vmem:[%s13385_s8 + $0xecc] ss:$144 sps:$4 sm:$0xff]  }
 0x179   : > { %6895 = vmatmul.mubr.bf16.gmra.mrb[168].mxu1 %v12445_v16  ;;  %6741 = vmatprep.mubr.bf16.mxu0 %v12450_v17  ;;  %v12460_v17 = vld [vmem:[%s13385_s8 + $0xda0] ss:$144 sps:$4 sm:$0xff]  }
 0x17a   : > { %v13923_v44 = vadd.f32 %v10254_v39, %v10142_v35  ;;  %6902 = vmatprep.mubr.bf16.mxu1 %v12452_v30 }
 0x17b   : > { %v10271_v46 = vpop.f32.mrb[64].mxu0 }
 0x17c   : > { %v10383_v52 = vpop.f32.mrb[64].mxu1  ;;  %v10272_v54 = vpop.f32.mrb[65].mxu0 }
 0x17d   : > { %v10273_v56 = vadd.f32 %v10272_v54, %v10271_v46  ;;  %v10384_v57 = vpop.f32.mrb[65].mxu1  ;;  %v10274_v58 = vpop.f32.mrb[66].mxu0 }
 0x17e   : > { %v10385_v59 = vadd.f32 %v10384_v57, %v10383_v52  ;;  %v10386_v60 = vpop.f32.mrb[66].mxu1  ;;  %v10275_v62 = vpop.f32.mrb[67].mxu0  ;;  %v12470_v57 = vld [vmem:[%s13385_s8 + $0xec0] ss:$144 sps:$4 sm:$0xff]  }
 0x17f   : > { %v6334_v6 = vadd.f32 %v10273_v56, %v13705_v31  ;;  %v10276_v7 = vadd.f32 %v10275_v62, %v10274_v58  ;;  %v10387_v10 = vpop.f32.mrb[67].mxu1  ;;  %v12471_v58 = vld [vmem:[%s13385_s8 + $0xec8] ss:$144 sps:$4 sm:$0xff]  }
 0x180   : > { %v10388_v12 = vadd.f32 %v10387_v10, %v10386_v60  ;;  %6742 = vmatmul.mubr.bf16.gmra.mrb[172].mxu0 %v12454_v47  ;;  %v12472_v60 = vld [vmem:[%s13385_s8 + $0xfe4] ss:$144 sps:$4 sm:$0xff]  }
 0x181   : > { %v13930_v14 = vadd.f32 %v10385_v59, %v6334_v6  ;;  %v6337_v16 = vadd.f32 %v10276_v7, %v13707_v33  ;;  %6903 = vmatmul.mubr.bf16.gmra.mrb[172].mxu1 %v12455_v48  ;;  %6749 = vmatprep.mubr.bf16.mxu0 %v12456_v55 }
 0x182   : > { %6910 = vmatprep.mubr.bf16.mxu1 %v12458_v1 }
 0x183   : > { %v13934_v18 = vadd.f32 %v10388_v12, %v6337_v16  ;;  %v10277_v19 = vpop.f32.mrb[68].mxu0  ;;  %v12474_v12 = vld [vmem:[%s13385_s8 + $0xfec] ss:$144 sps:$4 sm:$0xff]  }
 0x184   : > { %v10389_v26 = vpop.f32.mrb[68].mxu1  ;;  %v10278_v31 = vpop.f32.mrb[69].mxu0 }
 0x185   : > { %v10279_v27 = vadd.f32 %v10278_v31, %v10277_v19  ;;  %v10390_v28 = vpop.f32.mrb[69].mxu1  ;;  %v10280_v29 = vpop.f32.mrb[70].mxu0  ;;  %v12476_v31 = vld [vmem:[%s13385_s8 + $0xfe0] ss:$144 sps:$4 sm:$0xff]  }
 0x186   : > { %v10391_v30 = vadd.f32 %v10390_v28, %v10389_v26  ;;  %v10392_v35 = vpop.f32.mrb[70].mxu1  ;;  %v10281_v33 = vpop.f32.mrb[71].mxu0 }
 0x187   : > { %v6342_v39 = vadd.f32 %v10279_v27, %v13713_v49  ;;  %v10282_v46 = vadd.f32 %v10281_v33, %v10280_v29  ;;  %v10393_v47 = vpop.f32.mrb[71].mxu1  ;;  %v12477_v29 = vld [vmem:[%s13385_s8 + $0xfe8] ss:$144 sps:$4 sm:$0xff]  }
 0x188   : > { %v10394_v48 = vadd.f32 %v10393_v47, %v10392_v35  ;;  %6750 = vmatmul.mubr.bf16.gmra.mrb[176].mxu0 %v12460_v17 }
 0x189   : > { %v13940_v52 = vadd.f32 %v10391_v30, %v6342_v39  ;;  %v6345_v54 = vadd.f32 %v10282_v46, %v13715_v51  ;;  %6911 = vmatmul.mubr.bf16.gmra.mrb[176].mxu1 %v12461_v20  ;;  %6757 = vmatprep.mubr.bf16.mxu0 %v12466_v24  ;;  %v12482_v30 = vld [vmem:[%s13385_s8 + $0x1104] ss:$144 sps:$4 sm:$0xff]  }
 0x18a   : > { %6918 = vmatprep.mubr.bf16.mxu1 %v12468_v36 }
 0x18b   : > { %v13943_v55 = vadd.f32 %v10394_v48, %v6345_v54  ;;  %v10283_v56 = vpop.f32.mrb[72].mxu0  ;;  %v12484_v48 = vld [vmem:[%s13385_s8 + $0x110c] ss:$144 sps:$4 sm:$0xff]  }
 0x18c   : > { %v10395_v59 = vpop.f32.mrb[72].mxu1  ;;  %v10284_v49 = vpop.f32.mrb[73].mxu0 }
 0x18d   : > { %v10285_v62 = vadd.f32 %v10284_v49, %v10283_v56  ;;  %v10396_v1 = vpop.f32.mrb[73].mxu1  ;;  %v10286_v6 = vpop.f32.mrb[74].mxu0 }
 0x18e   : > { %v10397_v7 = vadd.f32 %v10396_v1, %v10395_v59  ;;  %v10398_v10 = vpop.f32.mrb[74].mxu1  ;;  %v10287_v51 = vpop.f32.mrb[75].mxu0  ;;  %v12486_v1 = vld [vmem:[%s13385_s8 + $0x1100] ss:$144 sps:$4 sm:$0xff]  }
 0x18f   : > { %v6350_v16 = vadd.f32 %v10285_v62, %v13721_v3  ;;  %v10288_v17 = vadd.f32 %v10287_v51, %v10286_v6  ;;  %v10399_v19 = vpop.f32.mrb[75].mxu1  ;;  %v12487_v6 = vld [vmem:[%s13385_s8 + $0x1108] ss:$144 sps:$4 sm:$0xff]  }
 0x190   : > { %v10400_v20 = vadd.f32 %v10399_v19, %v10398_v10  ;;  %6758 = vmatmul.mubr.bf16.gmra.mrb[180].mxu0 %v12470_v57  ;;  %v12490_v10 = vld [vmem:[%s13385_s8 + $0x34] ss:$144 sps:$4 sm:$0xff]  }
 0x191   : > { %v13950_v24 = vadd.f32 %v10397_v7, %v6350_v16  ;;  %v6353_v26 = vadd.f32 %v10288_v17, %v13723_v5  ;;  %6919 = vmatmul.mubr.bf16.gmra.mrb[180].mxu1 %v12471_v58  ;;  %6765 = vmatprep.mubr.bf16.mxu0 %v12472_v60 }
 0x192   : > { %6926 = vmatprep.mubr.bf16.mxu1 %v12474_v12 }
 0x193   : > { %v13954_v27 = vadd.f32 %v10400_v20, %v6353_v26  ;;  %v10289_v28 = vpop.f32.mrb[76].mxu0  ;;  %v12493_v20 = vld [vmem:[%s13385_s8 + $0x3c] ss:$144 sps:$4 sm:$0xff]  }
 0x194   : > { %v10401_v35 = vpop.f32.mrb[76].mxu1  ;;  %v10290_v3 = vpop.f32.mrb[77].mxu0 }
 0x195   : > { %v10291_v33 = vadd.f32 %v10290_v3, %v10289_v28  ;;  %v10402_v36 = vpop.f32.mrb[77].mxu1  ;;  %v10292_v39 = vpop.f32.mrb[78].mxu0  ;;  %v12488_v3 = vld [vmem:[%s13385_s8 + $0x30] ss:$144 sps:$4 sm:$0xff]  }
 0x196   : > { %v10403_v46 = vadd.f32 %v10402_v36, %v10401_v35  ;;  %v10404_v47 = vpop.f32.mrb[78].mxu1  ;;  %v10293_v5 = vpop.f32.mrb[79].mxu0 }
 0x197   : > { %v6358_v54 = vadd.f32 %v10291_v33, %v13729_v21  ;;  %v10294_v56 = vadd.f32 %v10293_v5, %v10292_v39  ;;  %v10405_v57 = vpop.f32.mrb[79].mxu1  ;;  %v12491_v39 = vld [vmem:[%s13385_s8 + $0x38] ss:$144 sps:$4 sm:$0xff]   ;;  %v12498_v5 = vld [vmem:[%s13385_s8 + $0x154] ss:$144 sps:$4 sm:$0xff]  }
 0x198   : > { %v10406_v58 = vadd.f32 %v10405_v57, %v10404_v47  ;;  %6766 = vmatmul.mubr.bf16.gmra.mrb[184].mxu0 %v12476_v31 }
 0x199   : > { %v13960_v59 = vadd.f32 %v10403_v46, %v6358_v54  ;;  %v6361_v49 = vadd.f32 %v10294_v56, %v13731_v23  ;;  %6927 = vmatmul.mubr.bf16.gmra.mrb[184].mxu1 %v12477_v29  ;;  %6773 = vmatprep.mubr.bf16.mxu0 %v12482_v30 }
 0x19a   : > { %6934 = vmatprep.mubr.bf16.mxu1 %v12484_v48 }
 0x19b   : > { %v13963_v60 = vadd.f32 %v10406_v58, %v6361_v49  ;;  %v10295_v62 = vpop.f32.mrb[80].mxu0  ;;  %v12497_v49 = vld [vmem:[%s15558_s1 + $0x480] sm:$0xff]  }
 0x19c   : > { %v10407_v7 = vpop.f32.mrb[80].mxu1  ;;  %v10296_v21 = vpop.f32.mrb[81].mxu0 }
 0x19d   : > { %v10297_v51 = vadd.f32 %v10296_v21, %v10295_v62  ;;  %v10408_v12 = vpop.f32.mrb[81].mxu1  ;;  %v10298_v16 = vpop.f32.mrb[82].mxu0  ;;  %v12500_v62 = vld [vmem:[%s13385_s8 + $0x15c] ss:$144 sps:$4 sm:$0xff]  }
 0x19e   : > { %v10409_v17 = vadd.f32 %v10408_v12, %v10407_v7  ;;  %v10410_v19 = vpop.f32.mrb[82].mxu1  ;;  %v10299_v23 = vpop.f32.mrb[83].mxu0 }
 0x19f   : > { %v6366_v26 = vadd.f32 %v10297_v51, %v13737_v41  ;;  %v10300_v31 = vadd.f32 %v10299_v23, %v10298_v16  ;;  %v10411_v28 = vpop.f32.mrb[83].mxu1  ;;  %v12495_v41 = vld [vmem:[%s15558_s1 + $0x400] sm:$0xff]   ;;  %v12512_v51 = vld [vmem:[%s15558_s1 + $0x4c8] sm:$0xff]  }
 0x1a0   : > { %v10412_v29 = vadd.f32 %v10411_v28, %v10410_v19  ;;  %6774 = vmatmul.mubr.bf16.gmra.mrb[188].mxu0 %v12486_v1  ;;  %v12510_v1 = vld [vmem:[%s15558_s1 + $0x448] sm:$0xff]   ;;  %v12528_v28 = vld [vmem:[%s15558_s1 + $0x4d0] sm:$0xff]  }
 0x1a1   : > { %v13970_v30 = vadd.f32 %v10409_v17, %v6366_v26  ;;  %v6369_v35 = vadd.f32 %v10300_v31, %v13739_v43  ;;  %6935 = vmatmul.mubr.bf16.gmra.mrb[188].mxu1 %v12487_v6  ;;  %6975 = vmatprep.mubr.bf16.mxu0 %v12490_v10  ;;  %v12511_v10 = vld [vmem:[%s15558_s1 + $0x408] sm:$0xff]   ;;  %v12502_v26 = vld [vmem:[%s13385_s8 + $0x150] ss:$144 sps:$4 sm:$0xff]  }
 0x1a2   : > { %7136 = vmatprep.mubr.bf16.mxu1 %v12493_v20  ;;  %v12513_v16 = vld [vmem:[%s15558_s1 + $0x488] sm:$0xff]  }
 0x1a3   : > { %v13974_v33 = vadd.f32 %v10412_v29, %v6369_v35  ;;  %v10301_v36 = vpop.f32.mrb[84].mxu0  ;;  %v12503_v31 = vld [vmem:[%s13385_s8 + $0x158] ss:$144 sps:$4 sm:$0xff]  }
 0x1a4   : > { %v10413_v46 = vpop.f32.mrb[84].mxu1  ;;  %v10302_v47 = vpop.f32.mrb[85].mxu0 }
 0x1a5   : > { %v10303_v48 = vadd.f32 %v10302_v47, %v10301_v36  ;;  %v10414_v54 = vpop.f32.mrb[85].mxu1  ;;  %v10304_v56 = vpop.f32.mrb[86].mxu0 }
 0x1a6   : > { %v10415_v43 = vadd.f32 %v10414_v54, %v10413_v46  ;;  %v10416_v57 = vpop.f32.mrb[86].mxu1  ;;  %v10305_v58 = vpop.f32.mrb[87].mxu0  ;;  %v12529_v54 = vld [vmem:[%s15558_s1 + $0x490] sm:$0xff]  }
 0x1a7   : > { %v6374_v6 = vadd.f32 %v10303_v48, %v13760_v2  ;;  %v10306_v7 = vadd.f32 %v10305_v58, %v10304_v56  ;;  %v10417_v21 = vpop.f32.mrb[87].mxu1  ;;  %v12526_v2 = vld [vmem:[%s15558_s1 + $0x450] sm:$0xff]   ;;  %v12542_v58 = vld [vmem:[%s15558_s1 + $0x458] sm:$0xff]  }
 0x1a8   : > { %v10418_v12 = vadd.f32 %v10417_v21, %v10416_v57  ;;  %6976 = vmatmul.mubr.bf16.vlgmr.msra.gmra.mrb[192].mxu0 %v12488_v3  ;;  %v12504_v3 = vld [vmem:[%s13385_s8 + $0x274] ss:$144 sps:$4 sm:$0xff]  }
 0x1a9   : > { %v14001_v17 = vadd.f32 %v10415_v43, %v6374_v6  ;;  %v6377_v19 = vadd.f32 %v10306_v7, %v13768_v8  ;;  %7137 = vmatmul.mubr.bf16.vlgmr.msra.gmra.mrb[192].mxu1 %v12491_v39  ;;  %10928 = vmatpush3.bf16.msra.mxu0 %v12495_v41  ;;  %v12527_v48 = vld [vmem:[%s15558_s1 + $0x410] sm:$0xff]   ;;  %v12545_v7 = vld [vmem:[%s15558_s1 + $0x498] sm:$0xff]   ;;  %v12558_v21 = vld [vmem:[%s15558_s1 + $0x460] sm:$0xff]  }
 0x1aa   : > { %11040 = vmatpush3.bf16.msra.mxu1 %v12497_v49  ;;  %6983 = vmatprep.mubr.bf16.mxu0 %v12498_v5  ;;  %v12506_v5 = vld [vmem:[%s13385_s8 + $0x27c] ss:$144 sps:$4 sm:$0xff]  }
 0x1ab   : > { %v14004_v23 = vadd.f32 %v10418_v12, %v6377_v19  ;;  %v10307_v20 = vpop.f32.mrb[88].mxu0  ;;  %7144 = vmatprep.mubr.bf16.mxu1 %v12500_v62  ;;  %10929 = vmatprep.subr.bf16.mxu0 %v12510_v1  ;;  %v12544_v49 = vld [vmem:[%s15558_s1 + $0x4d8] sm:$0xff]  }
 0x1ac   : > { %v10419_v29 = vpop.f32.mrb[88].mxu1  ;;  %v10308_v35 = vpop.f32.mrb[89].mxu0  ;;  %11041 = vmatprep.subr.bf16.mxu1 %v12512_v51  ;;  %v12560_v51 = vld [vmem:[%s15558_s1 + $0x4e0] sm:$0xff]  }
 0x1ad   : > { %v10309_v8 = vadd.f32 %v10308_v35, %v10307_v20  ;;  %v10420_v36 = vpop.f32.mrb[89].mxu1  ;;  %v10310_v39 = vpop.f32.mrb[90].mxu0  ;;  %10930 = vmatpush3.bf16.msra.mxu0 %v12511_v10  ;;  %v12508_v10 = vld [vmem:[%s13385_s8 + $0x270] ss:$144 sps:$4 sm:$0xff]  }
 0x1ae   : > { %v10421_v41 = vadd.f32 %v10420_v36, %v10419_v29  ;;  %v10422_v46 = vpop.f32.mrb[90].mxu1  ;;  %v10311_v47 = vpop.f32.mrb[91].mxu0  ;;  %11042 = vmatpush3.bf16.msra.mxu1 %v12513_v16  ;;  %10931 = vmatprep.subr.bf16.mxu0 %v12526_v2  ;;  %v12509_v16 = vld [vmem:[%s13385_s8 + $0x278] ss:$144 sps:$4 sm:$0xff]   ;;  %v12514_v2 = vld [vmem:[%s13385_s8 + $0x394] ss:$144 sps:$4 sm:$0xff]  }
 0x1af   : > { %v6382_v56 = vadd.f32 %v10309_v8, %v13789_v32  ;;  %v10312_v43 = vadd.f32 %v10311_v47, %v10310_v39  ;;  %v10423_v57 = vpop.f32.mrb[91].mxu1  ;;  %11043 = vmatprep.subr.bf16.mxu1 %v12528_v28  ;;  %v12543_v32 = vld [vmem:[%s15558_s1 + $0x418] sm:$0xff]   ;;  %v12559_v36 = vld [vmem:[%s15558_s1 + $0x420] sm:$0xff]  }
 0x1b0   : > { %v10424_v62 = vadd.f32 %v10423_v57, %v10422_v46  ;;  %6984 = vmatmul.mubr.bf16.gmra.mrb[196].mxu0 %v12502_v26  ;;  %v12516_v8 = vld [vmem:[%s13385_s8 + $0x39c] ss:$144 sps:$4 sm:$0xff]   ;;  %v12561_v39 = vld [vmem:[%s15558_s1 + $0x4a0] sm:$0xff]  }
 0x1b1   : > { %v14029_v1 = vadd.f32 %v10421_v41, %v6382_v56  ;;  %v6385_v6 = vadd.f32 %v10312_v43, %v13800_v38  ;;  %7145 = vmatmul.mubr.bf16.gmra.mrb[196].mxu1 %v12503_v31  ;;  %6991 = vmatprep.mubr.bf16.mxu0 %v12504_v3  ;;  %v12518_v57 = vld [vmem:[%s13385_s8 + $0x390] ss:$144 sps:$4 sm:$0xff]  }
 0x1b2   : > { %7152 = vmatprep.mubr.bf16.mxu1 %v12506_v5  ;;  %10932 = vmatpush3.bf16.msra.mxu0 %v12527_v48  ;;  %v12574_v5 = vld [vmem:[%s15558_s1 + $0x468] sm:$0xff]  }
 0x1b3   : > { %v14042_v12 = vadd.f32 %v10424_v62, %v6385_v6  ;;  %v10313_v38 = vpop.f32.mrb[92].mxu0  ;;  %11044 = vmatpush3.bf16.msra.mxu1 %v12529_v54  ;;  %10933 = vmatprep.subr.bf16.mxu0 %v12542_v58  ;;  %v12576_v48 = vld [vmem:[%s15558_s1 + $0x4e8] sm:$0xff]  }
 0x1b4   : > { %v10425_v19 = vpop.f32.mrb[92].mxu1  ;;  %v10314_v20 = vpop.f32.mrb[93].mxu0  ;;  %11045 = vmatprep.subr.bf16.mxu1 %v12544_v49  ;;  %v12519_v62 = vld [vmem:[%s13385_s8 + $0x398] ss:$144 sps:$4 sm:$0xff]  }
 0x1b5   : > { %v10315_v26 = vadd.f32 %v10314_v20, %v10313_v38  ;;  %v10426_v31 = vpop.f32.mrb[93].mxu1  ;;  %v10316_v28 = vpop.f32.mrb[94].mxu0  ;;  %v12577_v6 = vld [vmem:[%s15558_s1 + $0x4a8] sm:$0xff]  }
 0x1b6   : > { %v10427_v29 = vadd.f32 %v10426_v31, %v10425_v19  ;;  %v10428_v35 = vpop.f32.mrb[94].mxu1  ;;  %v10317_v3 = vpop.f32.mrb[95].mxu0  ;;  %10934 = vmatpush3.bf16.msra.mxu0 %v12543_v32  ;;  %v12520_v32 = vld [vmem:[%s13385_s8 + $0x4b4] ss:$144 sps:$4 sm:$0xff]  }
 0x1b7   : > { %v6390_v41 = vadd.f32 %v10315_v26, %v13821_v63  ;;  %v10318_v46 = vadd.f32 %v10317_v3, %v10316_v28  ;;  %v10429_v47 = vpop.f32.mrb[95].mxu1  ;;  %11046 = vmatpush3.bf16.msra.mxu1 %v12545_v7  ;;  %10935 = vmatprep.subr.bf16.mxu0 %v12558_v21  ;;  %v12575_v63 = vld [vmem:[%s15558_s1 + $0x428] sm:$0xff]   ;;  %v12591_v31 = vld [vmem:[%s15558_s1 + $0x430] sm:$0xff]  }
 0x1b8   : > { %v10430_v54 = vadd.f32 %v10429_v47, %v10428_v35  ;;  %6992 = vmatmul.mubr.bf16.gmra.mrb[200].mxu0 %v12508_v10  ;;  %11047 = vmatprep.subr.bf16.mxu1 %v12560_v51  ;;  %v12592_v10 = vld [vmem:[%s15558_s1 + $0x4f0] sm:$0xff]   ;;  %v12522_v26 = vld [vmem:[%s13385_s8 + $0x4bc] ss:$144 sps:$4 sm:$0xff]  }
 0x1b9   : > { %v14063_v56 = vadd.f32 %v10427_v29, %v6390_v41  ;;  %v6393_v43 = vadd.f32 %v10318_v46, %v13826_v4  ;;  %7153 = vmatmul.mubr.bf16.gmra.mrb[200].mxu1 %v12509_v16  ;;  %6999 = vmatprep.mubr.bf16.mxu0 %v12514_v2  ;;  %v12590_v4 = vld [vmem:[%s15558_s1 + $0x470] sm:$0xff]   ;;  %v12609_v47 = vld [vmem:[%s15558_s1 + $0x4b8] sm:$0xff]  }
 0x1ba   : > { %7160 = vmatprep.mubr.bf16.mxu1 %v12516_v8  ;;  %10936 = vmatpush3.bf16.msra.mxu0 %v12559_v36  ;;  %v12593_v28 = vld [vmem:[%s15558_s1 + $0x4b0] sm:$0xff]   ;;  %v12606_v8 = vld [vmem:[%s15558_s1 + $0x478] sm:$0xff]  }
 0x1bb   : > { %v14067_v58 = vadd.f32 %v10430_v54, %v6393_v43  ;;  %v10319_v49 = vpop.f32.mrb[96].mxu0  ;;  %11048 = vmatpush3.bf16.msra.mxu1 %v12561_v39  ;;  %10937 = vmatprep.subr.bf16.mxu0 %v12574_v5  ;;  %v12608_v36 = vld [vmem:[%s15558_s1 + $0x4f8] sm:$0xff]   ;;  %v12622_v5 = vld [vmem:[%s15558_s1 + $0x540] sm:$0xff]  }
 0x1bc   : > { %v10431_v7 = vpop.f32.mrb[96].mxu1  ;;  %v10320_v21 = vpop.f32.mrb[97].mxu0  ;;  %11049 = vmatprep.subr.bf16.mxu1 %v12576_v48  ;;  %v12524_v48 = vld [vmem:[%s13385_s8 + $0x4b0] ss:$144 sps:$4 sm:$0xff]   ;;  %v12525_v43 = vld [vmem:[%s13385_s8 + $0x4b8] ss:$144 sps:$4 sm:$0xff]  }
 0x1bd   : > { %v10321_v51 = vadd.f32 %v10320_v21, %v10319_v49  ;;  %v10432_v38 = vpop.f32.mrb[97].mxu1  ;;  %v10322_v16 = vpop.f32.mrb[98].mxu0  ;;  %v12624_v54 = vld [vmem:[%s15558_s1 + $0x5c0] sm:$0xff]  }
 0x1be   : > { %v10433_v2 = vadd.f32 %v10432_v38, %v10431_v7  ;;  %v10434_v19 = vpop.f32.mrb[98].mxu1  ;;  %v10323_v20 = vpop.f32.mrb[99].mxu0  ;;  %10938 = vmatpush3.bf16.msra.mxu0 %v12575_v63 }
 0x1bf   : > { %v6398_v29 = vadd.f32 %v10321_v51, %v13853_v34  ;;  %v10324_v35 = vadd.f32 %v10323_v20, %v10322_v16  ;;  %v10435_v3 = vpop.f32.mrb[99].mxu1  ;;  %11050 = vmatpush3.bf16.msra.mxu1 %v12577_v6  ;;  %10939 = vmatprep.subr.bf16.mxu0 %v12590_v4  ;;  %v12607_v34 = vld [vmem:[%s15558_s1 + $0x438] sm:$0xff]  }
 0x1c0   : > { %v10436_v39 = vadd.f32 %v10435_v3, %v10434_v19  ;;  %7000 = vmatmul.mubr.bf16.gmra.mrb[204].mxu0 %v12518_v57  ;;  %11051 = vmatprep.subr.bf16.mxu1 %v12592_v10  ;;  %v12530_v57 = vld [vmem:[%s13385_s8 + $0x5d4] ss:$144 sps:$4 sm:$0xff]   ;;  %v12532_v51 = vld [vmem:[%s13385_s8 + $0x5dc] ss:$144 sps:$4 sm:$0xff]  }
 0x1c1   : > { %v14097_v41 = vadd.f32 %v10433_v2, %v6398_v29  ;;  %v6401_v46 = vadd.f32 %v10324_v35, %v13864_v40  ;;  %7161 = vmatmul.mubr.bf16.gmra.mrb[204].mxu1 %v12519_v62  ;;  %7007 = vmatprep.mubr.bf16.mxu0 %v12520_v32  ;;  %v12535_v29 = vld [vmem:[%s13385_s8 + $0x5d8] ss:$144 sps:$4 sm:$0xff]  }
 0x1c2   : > { %7168 = vmatprep.mubr.bf16.mxu1 %v12522_v26  ;;  %10940 = vmatpush3.bf16.msra.mxu0 %v12591_v31 }
 0x1c3   : > { %v14110_v63 = vadd.f32 %v10436_v39, %v6401_v46  ;;  %v10325_v40 = vpop.f32.mrb[100].mxu0  ;;  %11052 = vmatpush3.bf16.msra.mxu1 %v12593_v28  ;;  %10941 = vmatprep.subr.bf16.mxu0 %v12606_v8  ;;  %v12534_v28 = vld [vmem:[%s13385_s8 + $0x5d0] ss:$144 sps:$4 sm:$0xff]   ;;  %v12536_v8 = vld [vmem:[%s13385_s8 + $0x6f4] ss:$144 sps:$4 sm:$0xff]  }
 0x1c4   : > { %v10437_v49 = vpop.f32.mrb[100].mxu1  ;;  %v10326_v62 = vpop.f32.mrb[101].mxu0  ;;  %11053 = vmatprep.subr.bf16.mxu1 %v12608_v36 }
 0x1c5   : > { %v10327_v32 = vadd.f32 %v10326_v62, %v10325_v40  ;;  %v10438_v6 = vpop.f32.mrb[101].mxu1  ;;  %v10328_v4 = vpop.f32.mrb[102].mxu0  ;;  %v12540_v62 = vld [vmem:[%s13385_s8 + $0x6f0] ss:$144 sps:$4 sm:$0xff]  }
 0x1c6   : > { %v10439_v7 = vadd.f32 %v10438_v6, %v10437_v49  ;;  %v10440_v21 = vpop.f32.mrb[102].mxu1  ;;  %v10329_v10 = vpop.f32.mrb[103].mxu0  ;;  %10942 = vmatpush3.bf16.msra.mxu0 %v12607_v34 }
 0x1c7   : > { %v6406_v38 = vadd.f32 %v10327_v32, %v13873_v61  ;;  %v10330_v16 = vadd.f32 %v10329_v10, %v10328_v4  ;;  %v10441_v2 = vpop.f32.mrb[103].mxu1  ;;  %11054 = vmatpush3.bf16.msra.mxu1 %v12609_v47  ;;  %11151 = vmatprep.subr.bf16.mxu0 %v12622_v5  ;;  %v12538_v5 = vld [vmem:[%s13385_s8 + $0x6fc] ss:$144 sps:$4 sm:$0xff]   ;;  %v12541_v4 = vld [vmem:[%s13385_s8 + $0x6f8] ss:$144 sps:$4 sm:$0xff]  }
 0x1c8   : > { %v10442_v19 = vadd.f32 %v10441_v2, %v10440_v21  ;;  %7008 = vmatmul.mubr.bf16.gmra.mrb[208].mxu0 %v12524_v48  ;;  %11263 = vmatprep.subr.bf16.mxu1 %v12624_v54 }
 0x1c9   : > { %v14116_v20 = vadd.f32 %v10439_v7, %v6406_v38  ;;  %v6409_v26 = vadd.f32 %v10330_v16, %v13875_v0  ;;  %7169 = vmatmul.mubr.bf16.gmra.mrb[208].mxu1 %v12525_v43  ;;  %7015 = vmatprep.mubr.bf16.mxu0 %v12530_v57  ;;  %v12546_v7 = vld [vmem:[%s13385_s8 + $0x814] ss:$144 sps:$4 sm:$0xff]  }
 0x1ca   : > { %7176 = vmatprep.mubr.bf16.mxu1 %v12532_v51 }
 0x1cb   : > { %v14119_v31 = vadd.f32 %v10442_v19, %v6409_v26  ;;  %v10331_v61 = vpop.f32.mrb[104].mxu0  ;;  %v12548_v19 = vld [vmem:[%s13385_s8 + $0x81c] ss:$144 sps:$4 sm:$0xff]  }
 0x1cc   : > { %v10443_v35 = vpop.f32.mrb[104].mxu1  ;;  %v10332_v3 = vpop.f32.mrb[105].mxu0 }
 0x1cd   : > { %v10333_v36 = vadd.f32 %v10332_v3, %v10331_v61  ;;  %v10444_v39 = vpop.f32.mrb[105].mxu1  ;;  %v10334_v34 = vpop.f32.mrb[106].mxu0 }
 0x1ce   : > { %v10445_v46 = vadd.f32 %v10444_v39, %v10443_v35  ;;  %v10446_v47 = vpop.f32.mrb[106].mxu1  ;;  %v10335_v0 = vpop.f32.mrb[107].mxu0  ;;  %v12550_v39 = vld [vmem:[%s13385_s8 + $0x810] ss:$144 sps:$4 sm:$0xff]  }
 0x1cf   : > { %v6414_v48 = vadd.f32 %v10333_v36, %v13881_v22  ;;  %v10336_v54 = vadd.f32 %v10335_v0, %v10334_v34  ;;  %v10447_v40 = vpop.f32.mrb[107].mxu1  ;;  %v12551_v34 = vld [vmem:[%s13385_s8 + $0x818] ss:$144 sps:$4 sm:$0xff]  }
 0x1d0   : > { %v10448_v43 = vadd.f32 %v10447_v40, %v10446_v47  ;;  %7016 = vmatmul.mubr.bf16.gmra.mrb[212].mxu0 %v12534_v28  ;;  %v12552_v47 = vld [vmem:[%s13385_s8 + $0x934] ss:$144 sps:$4 sm:$0xff]  }
 0x1d1   : > { %v14126_v57 = vadd.f32 %v10445_v46, %v6414_v48  ;;  %v6417_v49 = vadd.f32 %v10336_v54, %v13883_v25  ;;  %7177 = vmatmul.mubr.bf16.gmra.mrb[212].mxu1 %v12535_v29  ;;  %7023 = vmatprep.mubr.bf16.mxu0 %v12536_v8 }
 0x1d2   : > { %7184 = vmatprep.mubr.bf16.mxu1 %v12538_v5 }
 0x1d3   : > { %v14130_v32 = vadd.f32 %v10448_v43, %v6417_v49  ;;  %v10337_v6 = vpop.f32.mrb[108].mxu0  ;;  %v12554_v43 = vld [vmem:[%s13385_s8 + $0x93c] ss:$144 sps:$4 sm:$0xff]  }
 0x1d4   : > { %v10449_v21 = vpop.f32.mrb[108].mxu1  ;;  %v10338_v22 = vpop.f32.mrb[109].mxu0 }
 0x1d5   : > { %v10339_v10 = vadd.f32 %v10338_v22, %v10337_v6  ;;  %v10450_v51 = vpop.f32.mrb[109].mxu1  ;;  %v10340_v38 = vpop.f32.mrb[110].mxu0  ;;  %v12556_v22 = vld [vmem:[%s13385_s8 + $0x930] ss:$144 sps:$4 sm:$0xff]  }
 0x1d6   : > { %v10451_v16 = vadd.f32 %v10450_v51, %v10449_v21  ;;  %v10452_v2 = vpop.f32.mrb[110].mxu1  ;;  %v10341_v25 = vpop.f32.mrb[111].mxu0 }
 0x1d7   : > { %v6422_v26 = vadd.f32 %v10339_v10, %v13889_v50  ;;  %v10342_v61 = vadd.f32 %v10341_v25, %v10340_v38  ;;  %v10453_v28 = vpop.f32.mrb[111].mxu1  ;;  %v12557_v38 = vld [vmem:[%s13385_s8 + $0x938] ss:$144 sps:$4 sm:$0xff]  }
 0x1d8   : > { %v10454_v29 = vadd.f32 %v10453_v28, %v10452_v2  ;;  %7024 = vmatmul.mubr.bf16.gmra.mrb[216].mxu0 %v12540_v62 }
 0x1d9   : > { %v14136_v35 = vadd.f32 %v10451_v16, %v6422_v26  ;;  %v6425_v3 = vadd.f32 %v10342_v61, %v13891_v53  ;;  %7185 = vmatmul.mubr.bf16.gmra.mrb[216].mxu1 %v12541_v4  ;;  %7031 = vmatprep.mubr.bf16.mxu0 %v12546_v7  ;;  %v12562_v16 = vld [vmem:[%s13385_s8 + $0xa54] ss:$144 sps:$4 sm:$0xff]  }
 0x1da   : > { %7192 = vmatprep.mubr.bf16.mxu1 %v12548_v19 }
 0x1db   : > { %v14139_v8 = vadd.f32 %v10454_v29, %v6425_v3  ;;  %v10343_v36 = vpop.f32.mrb[112].mxu0  ;;  %v12564_v29 = vld [vmem:[%s13385_s8 + $0xa5c] ss:$144 sps:$4 sm:$0xff]  }
 0x1dc   : > { %v10455_v46 = vpop.f32.mrb[112].mxu1  ;;  %v10344_v50 = vpop.f32.mrb[113].mxu0 }
 0x1dd   : > { %v10345_v0 = vadd.f32 %v10344_v50, %v10343_v36  ;;  %v10456_v5 = vpop.f32.mrb[113].mxu1  ;;  %v10346_v48 = vpop.f32.mrb[114].mxu0 }
 0x1de   : > { %v10457_v54 = vadd.f32 %v10456_v5, %v10455_v46  ;;  %v10458_v40 = vpop.f32.mrb[114].mxu1  ;;  %v10347_v53 = vpop.f32.mrb[115].mxu0  ;;  %v12566_v5 = vld [vmem:[%s13385_s8 + $0xa50] ss:$144 sps:$4 sm:$0xff]  }
 0x1df   : > { %v6430_v49 = vadd.f32 %v10345_v0, %v13897_v13  ;;  %v10348_v62 = vadd.f32 %v10347_v53, %v10346_v48  ;;  %v10459_v6 = vpop.f32.mrb[115].mxu1  ;;  %v12567_v48 = vld [vmem:[%s13385_s8 + $0xa58] ss:$144 sps:$4 sm:$0xff]  }
 0x1e0   : > { %v10460_v4 = vadd.f32 %v10459_v6, %v10458_v40  ;;  %7032 = vmatmul.mubr.bf16.gmra.mrb[220].mxu0 %v12550_v39  ;;  %v12568_v40 = vld [vmem:[%s13385_s8 + $0xb74] ss:$144 sps:$4 sm:$0xff]  }
 0x1e1   : > { %v14146_v7 = vadd.f32 %v10457_v54, %v6430_v49  ;;  %v6433_v21 = vadd.f32 %v10348_v62, %v13899_v15  ;;  %7193 = vmatmul.mubr.bf16.gmra.mrb[220].mxu1 %v12551_v34  ;;  %7039 = vmatprep.mubr.bf16.mxu0 %v12552_v47 }
 0x1e2   : > { %7200 = vmatprep.mubr.bf16.mxu1 %v12554_v43 }
 0x1e3   : > { %v14150_v10 = vadd.f32 %v10460_v4, %v6433_v21  ;;  %v10349_v51 = vpop.f32.mrb[116].mxu0  ;;  %v12570_v4 = vld [vmem:[%s13385_s8 + $0xb7c] ss:$144 sps:$4 sm:$0xff]  }
 0x1e4   : > { %v10461_v2 = vpop.f32.mrb[116].mxu1  ;;  %v10350_v13 = vpop.f32.mrb[117].mxu0 }
 0x1e5   : > { %v10351_v25 = vadd.f32 %v10350_v13, %v10349_v51  ;;  %v10462_v19 = vpop.f32.mrb[117].mxu1  ;;  %v10352_v26 = vpop.f32.mrb[118].mxu0  ;;  %v12572_v13 = vld [vmem:[%s13385_s8 + $0xb70] ss:$144 sps:$4 sm:$0xff]  }
 0x1e6   : > { %v10463_v61 = vadd.f32 %v10462_v19, %v10461_v2  ;;  %v10464_v28 = vpop.f32.mrb[118].mxu1  ;;  %v10353_v15 = vpop.f32.mrb[119].mxu0 }
 0x1e7   : > { %v6438_v3 = vadd.f32 %v10351_v25, %v13905_v42  ;;  %v10354_v36 = vadd.f32 %v10353_v15, %v10352_v26  ;;  %v10465_v39 = vpop.f32.mrb[119].mxu1  ;;  %v12573_v26 = vld [vmem:[%s13385_s8 + $0xb78] ss:$144 sps:$4 sm:$0xff]  }
 0x1e8   : > { %v10466_v34 = vadd.f32 %v10465_v39, %v10464_v28  ;;  %7040 = vmatmul.mubr.bf16.gmra.mrb[224].mxu0 %v12556_v22 }
 0x1e9   : > { %v14156_v46 = vadd.f32 %v10463_v61, %v6438_v3  ;;  %v6441_v50 = vadd.f32 %v10354_v36, %v13907_v45  ;;  %7201 = vmatmul.mubr.bf16.gmra.mrb[224].mxu1 %v12557_v38  ;;  %7047 = vmatprep.mubr.bf16.mxu0 %v12562_v16  ;;  %v12578_v61 = vld [vmem:[%s13385_s8 + $0xc94] ss:$144 sps:$4 sm:$0xff]  }
 0x1ea   : > { %7208 = vmatprep.mubr.bf16.mxu1 %v12564_v29 }
 0x1eb   : > { %v14159_v47 = vadd.f32 %v10466_v34, %v6441_v50  ;;  %v10355_v0 = vpop.f32.mrb[120].mxu0  ;;  %v12580_v34 = vld [vmem:[%s13385_s8 + $0xc9c] ss:$144 sps:$4 sm:$0xff]  }
 0x1ec   : > { %v10467_v54 = vpop.f32.mrb[120].mxu1  ;;  %v10356_v42 = vpop.f32.mrb[121].mxu0 }
 0x1ed   : > { %v10357_v53 = vadd.f32 %v10356_v42, %v10355_v0  ;;  %v10468_v43 = vpop.f32.mrb[121].mxu1  ;;  %v10358_v49 = vpop.f32.mrb[122].mxu0 }
 0x1ee   : > { %v10469_v62 = vadd.f32 %v10468_v43, %v10467_v54  ;;  %v10470_v6 = vpop.f32.mrb[122].mxu1  ;;  %v10359_v45 = vpop.f32.mrb[123].mxu0  ;;  %v12582_v43 = vld [vmem:[%s13385_s8 + $0xc90] ss:$144 sps:$4 sm:$0xff]  }
 0x1ef   : > { %v6446_v21 = vadd.f32 %v10357_v53, %v13913_v9  ;;  %v10360_v22 = vadd.f32 %v10359_v45, %v10358_v49  ;;  %v10471_v51 = vpop.f32.mrb[123].mxu1  ;;  %v12583_v49 = vld [vmem:[%s13385_s8 + $0xc98] ss:$144 sps:$4 sm:$0xff]  }
 0x1f0   : > { %v10472_v38 = vadd.f32 %v10471_v51, %v10470_v6  ;;  %7048 = vmatmul.mubr.bf16.gmra.mrb[228].mxu0 %v12566_v5  ;;  %v12584_v6 = vld [vmem:[%s13385_s8 + $0xdb4] ss:$144 sps:$4 sm:$0xff]  }
 0x1f1   : > { %v14166_v16 = vadd.f32 %v10469_v62, %v6446_v21  ;;  %v6449_v2 = vadd.f32 %v10360_v22, %v13915_v11  ;;  %7209 = vmatmul.mubr.bf16.gmra.mrb[228].mxu1 %v12567_v48  ;;  %7055 = vmatprep.mubr.bf16.mxu0 %v12568_v40 }
 0x1f2   : > { %7216 = vmatprep.mubr.bf16.mxu1 %v12570_v4 }
 0x1f3   : > { %v14170_v25 = vadd.f32 %v10472_v38, %v6449_v2  ;;  %v10361_v19 = vpop.f32.mrb[124].mxu0  ;;  %v12586_v38 = vld [vmem:[%s13385_s8 + $0xdbc] ss:$144 sps:$4 sm:$0xff]  }
 0x1f4   : > { %v10473_v28 = vpop.f32.mrb[124].mxu1  ;;  %v10362_v9 = vpop.f32.mrb[125].mxu0 }
 0x1f5   : > { %v10363_v15 = vadd.f32 %v10362_v9, %v10361_v19  ;;  %v10474_v29 = vpop.f32.mrb[125].mxu1  ;;  %v10364_v3 = vpop.f32.mrb[126].mxu0  ;;  %v12588_v9 = vld [vmem:[%s13385_s8 + $0xdb0] ss:$144 sps:$4 sm:$0xff]  }
 0x1f6   : > { %v10475_v36 = vadd.f32 %v10474_v29, %v10473_v28  ;;  %v10476_v39 = vpop.f32.mrb[126].mxu1  ;;  %v10365_v11 = vpop.f32.mrb[127].mxu0 }
 0x1f7   : > { %v6454_v50 = vadd.f32 %v10363_v15, %v13921_v37  ;;  %v10366_v0 = vadd.f32 %v10365_v11, %v10364_v3  ;;  %v10477_v5 = vpop.f32.mrb[127].mxu1  ;;  %v12589_v3 = vld [vmem:[%s13385_s8 + $0xdb8] ss:$144 sps:$4 sm:$0xff]  }
 0x1f8   : > { %v10478_v48 = vadd.f32 %v10477_v5, %v10476_v39  ;;  %7056 = vmatmul.mubr.bf16.gmra.mrb[232].mxu0 %v12572_v13 }
 0x1f9   : > { %v14176_v54 = vadd.f32 %v10475_v36, %v6454_v50  ;;  %v6457_v42 = vadd.f32 %v10366_v0, %v13923_v44  ;;  %7217 = vmatmul.mubr.bf16.gmra.mrb[232].mxu1 %v12573_v26  ;;  %7063 = vmatprep.mubr.bf16.mxu0 %v12578_v61  ;;  %v12594_v36 = vld [vmem:[%s13385_s8 + $0xed4] ss:$144 sps:$4 sm:$0xff]  }
 0x1fa   : > { %7224 = vmatprep.mubr.bf16.mxu1 %v12580_v34 }
 0x1fb   : > { %v14179_v40 = vadd.f32 %v10478_v48, %v6457_v42  ;;  %v10495_v53 = vpop.f32.mrb[128].mxu0  ;;  %v12596_v48 = vld [vmem:[%s13385_s8 + $0xedc] ss:$144 sps:$4 sm:$0xff]  }
 0x1fc   : > { %v10607_v62 = vpop.f32.mrb[128].mxu1  ;;  %v10496_v37 = vpop.f32.mrb[129].mxu0 }
 0x1fd   : > { %v10497_v45 = vadd.f32 %v10496_v37, %v10495_v53  ;;  %v10608_v4 = vpop.f32.mrb[129].mxu1  ;;  %v10498_v21 = vpop.f32.mrb[130].mxu0 }
 0x1fe   : > { %v10609_v22 = vadd.f32 %v10608_v4, %v10607_v62  ;;  %v10610_v51 = vpop.f32.mrb[130].mxu1  ;;  %v10499_v44 = vpop.f32.mrb[131].mxu0  ;;  %v12598_v4 = vld [vmem:[%s13385_s8 + $0xed0] ss:$144 sps:$4 sm:$0xff]  }
 0x1ff   : > { %v6656_v2 = vadd.f32 %v10497_v45, %v13930_v14  ;;  %v10500_v13 = vadd.f32 %v10499_v44, %v10498_v21  ;;  %v10611_v19 = vpop.f32.mrb[131].mxu1  ;;  %v12599_v21 = vld [vmem:[%s13385_s8 + $0xed8] ss:$144 sps:$4 sm:$0xff]  }
 0x200   : > { %v10612_v26 = vadd.f32 %v10611_v19, %v10610_v51  ;;  %7064 = vmatmul.mubr.bf16.gmra.mrb[236].mxu0 %v12582_v43  ;;  %v12600_v51 = vld [vmem:[%s13385_s8 + $0xff4] ss:$144 sps:$4 sm:$0xff]  }
 0x201   : > { %v14186_v61 = vadd.f32 %v10609_v22, %v6656_v2  ;;  %v6659_v28 = vadd.f32 %v10500_v13, %v13934_v18  ;;  %7225 = vmatmul.mubr.bf16.gmra.mrb[236].mxu1 %v12583_v49  ;;  %7071 = vmatprep.mubr.bf16.mxu0 %v12584_v6 }
 0x202   : > { %7232 = vmatprep.mubr.bf16.mxu1 %v12586_v38 }
 0x203   : > { %v14190_v15 = vadd.f32 %v10612_v26, %v6659_v28  ;;  %v10501_v29 = vpop.f32.mrb[132].mxu0  ;;  %v12602_v26 = vld [vmem:[%s13385_s8 + $0xffc] ss:$144 sps:$4 sm:$0xff]  }
 0x204   : > { %v10613_v39 = vpop.f32.mrb[132].mxu1  ;;  %v10502_v14 = vpop.f32.mrb[133].mxu0 }
 0x205   : > { %v10503_v11 = vadd.f32 %v10502_v14, %v10501_v29  ;;  %v10614_v34 = vpop.f32.mrb[133].mxu1  ;;  %v10504_v50 = vpop.f32.mrb[134].mxu0  ;;  %v12604_v14 = vld [vmem:[%s13385_s8 + $0xff0] ss:$144 sps:$4 sm:$0xff]  }
 0x206   : > { %v10615_v0 = vadd.f32 %v10614_v34, %v10613_v39  ;;  %v10616_v5 = vpop.f32.mrb[134].mxu1  ;;  %v10505_v18 = vpop.f32.mrb[135].mxu0 }
 0x207   : > { %v6664_v42 = vadd.f32 %v10503_v11, %v13940_v52  ;;  %v10506_v53 = vadd.f32 %v10505_v18, %v10504_v50  ;;  %v10617_v43 = vpop.f32.mrb[135].mxu1  ;;  %v12605_v50 = vld [vmem:[%s13385_s8 + $0xff8] ss:$144 sps:$4 sm:$0xff]  }
 0x208   : > { %v10618_v49 = vadd.f32 %v10617_v43, %v10616_v5  ;;  %7072 = vmatmul.mubr.bf16.gmra.mrb[240].mxu0 %v12588_v9 }
 0x209   : > { %v14196_v62 = vadd.f32 %v10615_v0, %v6664_v42  ;;  %v6667_v37 = vadd.f32 %v10506_v53, %v13943_v55  ;;  %7233 = vmatmul.mubr.bf16.gmra.mrb[240].mxu1 %v12589_v3  ;;  %7079 = vmatprep.mubr.bf16.mxu0 %v12594_v36  ;;  %v12610_v0 = vld [vmem:[%s13385_s8 + $0x1114] ss:$144 sps:$4 sm:$0xff]  }
 0x20a   : > { %7240 = vmatprep.mubr.bf16.mxu1 %v12596_v48 }
 0x20b   : > { %v14199_v6 = vadd.f32 %v10618_v49, %v6667_v37  ;;  %v10507_v45 = vpop.f32.mrb[136].mxu0  ;;  %v12612_v49 = vld [vmem:[%s13385_s8 + $0x111c] ss:$144 sps:$4 sm:$0xff]  }
 0x20c   : > { %v10619_v22 = vpop.f32.mrb[136].mxu1  ;;  %v10508_v52 = vpop.f32.mrb[137].mxu0 }
 0x20d   : > { %v10509_v44 = vadd.f32 %v10508_v52, %v10507_v45  ;;  %v10620_v38 = vpop.f32.mrb[137].mxu1  ;;  %v10510_v2 = vpop.f32.mrb[138].mxu0 }
 0x20e   : > { %v10621_v13 = vadd.f32 %v10620_v38, %v10619_v22  ;;  %v10622_v19 = vpop.f32.mrb[138].mxu1  ;;  %v10511_v55 = vpop.f32.mrb[139].mxu0  ;;  %v12614_v38 = vld [vmem:[%s13385_s8 + $0x1110] ss:$144 sps:$4 sm:$0xff]  }
 0x20f   : > { %v6672_v28 = vadd.f32 %v10509_v44, %v13950_v24  ;;  %v10512_v9 = vadd.f32 %v10511_v55, %v10510_v2  ;;  %v10623_v29 = vpop.f32.mrb[139].mxu1  ;;  %v12615_v2 = vld [vmem:[%s13385_s8 + $0x1118] ss:$144 sps:$4 sm:$0xff]  }
 0x210   : > { %v10624_v3 = vadd.f32 %v10623_v29, %v10622_v19  ;;  %7080 = vmatmul.mubr.bf16.gmra.mrb[244].mxu0 %v12598_v4  ;;  %v12618_v19 = vld [vmem:[%s13385_s8 + $0x44] ss:$144 sps:$4 sm:$0xff]  }
 0x211   : > { %v14206_v36 = vadd.f32 %v10621_v13, %v6672_v28  ;;  %v6675_v39 = vadd.f32 %v10512_v9, %v13954_v27  ;;  %7241 = vmatmul.mubr.bf16.gmra.mrb[244].mxu1 %v12599_v21  ;;  %7087 = vmatprep.mubr.bf16.mxu0 %v12600_v51 }
 0x212   : > { %7248 = vmatprep.mubr.bf16.mxu1 %v12602_v26 }
 0x213   : > { %v14210_v11 = vadd.f32 %v10624_v3, %v6675_v39  ;;  %v10513_v34 = vpop.f32.mrb[140].mxu0  ;;  %v12621_v3 = vld [vmem:[%s13385_s8 + $0x4c] ss:$144 sps:$4 sm:$0xff]  }
 0x214   : > { %v10625_v5 = vpop.f32.mrb[140].mxu1  ;;  %v10514_v24 = vpop.f32.mrb[141].mxu0 }
 0x215   : > { %v10515_v18 = vadd.f32 %v10514_v24, %v10513_v34  ;;  %v10626_v48 = vpop.f32.mrb[141].mxu1  ;;  %v10516_v42 = vpop.f32.mrb[142].mxu0  ;;  %v12616_v24 = vld [vmem:[%s13385_s8 + $0x40] ss:$144 sps:$4 sm:$0xff]  }
 0x216   : > { %v10627_v53 = vadd.f32 %v10626_v48, %v10625_v5  ;;  %v10628_v43 = vpop.f32.mrb[142].mxu1  ;;  %v10517_v27 = vpop.f32.mrb[143].mxu0 }
 0x217   : > { %v6680_v37 = vadd.f32 %v10515_v18, %v13960_v59  ;;  %v10518_v45 = vadd.f32 %v10517_v27, %v10516_v42  ;;  %v10629_v4 = vpop.f32.mrb[143].mxu1  ;;  %v12619_v42 = vld [vmem:[%s13385_s8 + $0x48] ss:$144 sps:$4 sm:$0xff]   ;;  %v12628_v27 = vld [vmem:[%s13385_s8 + $0x164] ss:$144 sps:$4 sm:$0xff]  }
 0x218   : > { %v10630_v21 = vadd.f32 %v10629_v4, %v10628_v43  ;;  %7088 = vmatmul.mubr.bf16.gmra.mrb[248].mxu0 %v12604_v14 }
 0x219   : > { %v14216_v22 = vadd.f32 %v10627_v53, %v6680_v37  ;;  %v6683_v52 = vadd.f32 %v10518_v45, %v13963_v60  ;;  %7249 = vmatmul.mubr.bf16.gmra.mrb[248].mxu1 %v12605_v50  ;;  %7095 = vmatprep.mubr.bf16.mxu0 %v12610_v0 }
 0x21a   : > { %7256 = vmatprep.mubr.bf16.mxu1 %v12612_v49 }
 0x21b   : > { %v14219_v51 = vadd.f32 %v10630_v21, %v6683_v52  ;;  %v10519_v44 = vpop.f32.mrb[144].mxu0  ;;  %v12625_v52 = vld [vmem:[%s15558_s1 + $0x580] sm:$0xff]  }
 0x21c   : > { %v10631_v13 = vpop.f32.mrb[144].mxu1  ;;  %v10520_v59 = vpop.f32.mrb[145].mxu0 }
 0x21d   : > { %v10521_v55 = vadd.f32 %v10520_v59, %v10519_v44  ;;  %v10632_v26 = vpop.f32.mrb[145].mxu1  ;;  %v10522_v28 = vpop.f32.mrb[146].mxu0  ;;  %v12631_v44 = vld [vmem:[%s13385_s8 + $0x16c] ss:$144 sps:$4 sm:$0xff]  }
 0x21e   : > { %v10633_v9 = vadd.f32 %v10632_v26, %v10631_v13  ;;  %v10634_v29 = vpop.f32.mrb[146].mxu1  ;;  %v10523_v60 = vpop.f32.mrb[147].mxu0 }
 0x21f   : > { %v6688_v39 = vadd.f32 %v10521_v55, %v13970_v30  ;;  %v10524_v14 = vadd.f32 %v10523_v60, %v10522_v28  ;;  %v10635_v34 = vpop.f32.mrb[147].mxu1  ;;  %v12623_v30 = vld [vmem:[%s15558_s1 + $0x500] sm:$0xff]   ;;  %v12640_v55 = vld [vmem:[%s15558_s1 + $0x5c8] sm:$0xff]  }
 0x220   : > { %v10636_v50 = vadd.f32 %v10635_v34, %v10634_v29  ;;  %7096 = vmatmul.mubr.bf16.gmra.mrb[252].mxu0 %v12614_v38  ;;  %v12638_v38 = vld [vmem:[%s15558_s1 + $0x548] sm:$0xff]   ;;  %v12656_v34 = vld [vmem:[%s15558_s1 + $0x5d0] sm:$0xff]  }
 0x221   : > { %v14226_v0 = vadd.f32 %v10633_v9, %v6688_v39  ;;  %v6691_v5 = vadd.f32 %v10524_v14, %v13974_v33  ;;  %7257 = vmatmul.mubr.bf16.gmra.mrb[252].mxu1 %v12615_v2  ;;  %7297 = vmatprep.mubr.bf16.mxu0 %v12618_v19  ;;  %v12639_v19 = vld [vmem:[%s15558_s1 + $0x508] sm:$0xff]   ;;  %v12626_v39 = vld [vmem:[%s13385_s8 + $0x160] ss:$144 sps:$4 sm:$0xff]  }
 0x222   : > { %7458 = vmatprep.mubr.bf16.mxu1 %v12621_v3  ;;  %v12641_v28 = vld [vmem:[%s15558_s1 + $0x588] sm:$0xff]  }
 0x223   : > { %v14230_v18 = vadd.f32 %v10636_v50, %v6691_v5  ;;  %v10525_v48 = vpop.f32.mrb[148].mxu0  ;;  %v12629_v14 = vld [vmem:[%s13385_s8 + $0x168] ss:$144 sps:$4 sm:$0xff]  }
 0x224   : > { %v10637_v53 = vpop.f32.mrb[148].mxu1  ;;  %v10526_v43 = vpop.f32.mrb[149].mxu0 }
 0x225   : > { %v10527_v49 = vadd.f32 %v10526_v43, %v10525_v48  ;;  %v10638_v37 = vpop.f32.mrb[149].mxu1  ;;  %v10528_v45 = vpop.f32.mrb[150].mxu0 }
 0x226   : > { %v10639_v33 = vadd.f32 %v10638_v37, %v10637_v53  ;;  %v10640_v4 = vpop.f32.mrb[150].mxu1  ;;  %v10529_v21 = vpop.f32.mrb[151].mxu0  ;;  %v12657_v37 = vld [vmem:[%s15558_s1 + $0x590] sm:$0xff]  }
 0x227   : > { %v6696_v2 = vadd.f32 %v10527_v49, %v14001_v17  ;;  %v10530_v13 = vadd.f32 %v10529_v21, %v10528_v45  ;;  %v10641_v59 = vpop.f32.mrb[151].mxu1  ;;  %v12654_v17 = vld [vmem:[%s15558_s1 + $0x550] sm:$0xff]   ;;  %v12670_v21 = vld [vmem:[%s15558_s1 + $0x558] sm:$0xff]  }
 0x228   : > { %v10642_v26 = vadd.f32 %v10641_v59, %v10640_v4  ;;  %7298 = vmatmul.mubr.bf16.vlgmr.msra.gmra.mrb[0].mxu0 %v12616_v24  ;;  %v12634_v24 = vld [vmem:[%s13385_s8 + $0x284] ss:$144 sps:$4 sm:$0xff]  }
 0x229   : > { %v14257_v9 = vadd.f32 %v10639_v33, %v6696_v2  ;;  %v6699_v29 = vadd.f32 %v10530_v13, %v14004_v23  ;;  %7459 = vmatmul.mubr.bf16.vlgmr.msra.gmra.mrb[0].mxu1 %v12619_v42  ;;  %11152 = vmatpush3.bf16.msra.mxu0 %v12623_v30  ;;  %v12655_v49 = vld [vmem:[%s15558_s1 + $0x510] sm:$0xff]   ;;  %v12673_v13 = vld [vmem:[%s15558_s1 + $0x598] sm:$0xff]   ;;  %v12686_v59 = vld [vmem:[%s15558_s1 + $0x560] sm:$0xff]  }
 0x22a   : > { %11264 = vmatpush3.bf16.msra.mxu1 %v12625_v52  ;;  %7305 = vmatprep.mubr.bf16.mxu0 %v12628_v27  ;;  %v12637_v27 = vld [vmem:[%s13385_s8 + $0x28c] ss:$144 sps:$4 sm:$0xff]  }
 0x22b   : > { %v14260_v60 = vadd.f32 %v10642_v26, %v6699_v29  ;;  %v10531_v3 = vpop.f32.mrb[152].mxu0  ;;  %7466 = vmatprep.mubr.bf16.mxu1 %v12631_v44  ;;  %11153 = vmatprep.subr.bf16.mxu0 %v12638_v38  ;;  %v12672_v52 = vld [vmem:[%s15558_s1 + $0x5d8] sm:$0xff]  }
 0x22c   : > { %v10643_v50 = vpop.f32.mrb[152].mxu1  ;;  %v10532_v5 = vpop.f32.mrb[153].mxu0  ;;  %11265 = vmatprep.subr.bf16.mxu1 %v12640_v55  ;;  %v12671_v38 = vld [vmem:[%s15558_s1 + $0x518] sm:$0xff]   ;;  %v12688_v55 = vld [vmem:[%s15558_s1 + $0x5e0] sm:$0xff]  }
 0x22d   : > { %v10533_v23 = vadd.f32 %v10532_v5, %v10531_v3  ;;  %v10644_v48 = vpop.f32.mrb[153].mxu1  ;;  %v10534_v42 = vpop.f32.mrb[154].mxu0  ;;  %11154 = vmatpush3.bf16.msra.mxu0 %v12639_v19  ;;  %v12632_v19 = vld [vmem:[%s13385_s8 + $0x280] ss:$144 sps:$4 sm:$0xff]  }
 0x22e   : > { %v10645_v30 = vadd.f32 %v10644_v48, %v10643_v50  ;;  %v10646_v53 = vpop.f32.mrb[154].mxu1  ;;  %v10535_v43 = vpop.f32.mrb[155].mxu0  ;;  %11266 = vmatpush3.bf16.msra.mxu1 %v12641_v28  ;;  %11155 = vmatprep.subr.bf16.mxu0 %v12654_v17  ;;  %v12635_v28 = vld [vmem:[%s13385_s8 + $0x288] ss:$144 sps:$4 sm:$0xff]   ;;  %v12644_v17 = vld [vmem:[%s13385_s8 + $0x3a4] ss:$144 sps:$4 sm:$0xff]  }
 0x22f   : > { %v6704_v45 = vadd.f32 %v10533_v23, %v14029_v1  ;;  %v10536_v33 = vadd.f32 %v10535_v43, %v10534_v42  ;;  %v10647_v4 = vpop.f32.mrb[155].mxu1  ;;  %11267 = vmatprep.subr.bf16.mxu1 %v12656_v34  ;;  %v12647_v23 = vld [vmem:[%s13385_s8 + $0x3ac] ss:$144 sps:$4 sm:$0xff]   ;;  %v12687_v48 = vld [vmem:[%s15558_s1 + $0x520] sm:$0xff]  }
 0x230   : > { %v10648_v44 = vadd.f32 %v10647_v4, %v10646_v53  ;;  %7306 = vmatmul.mubr.bf16.gmra.mrb[4].mxu0 %v12626_v39  ;;  %v12689_v42 = vld [vmem:[%s15558_s1 + $0x5a0] sm:$0xff]  }
 0x231   : > { %v14285_v1 = vadd.f32 %v10645_v30, %v6704_v45  ;;  %v6707_v2 = vadd.f32 %v10536_v33, %v14042_v12  ;;  %7467 = vmatmul.mubr.bf16.gmra.mrb[4].mxu1 %v12629_v14  ;;  %7313 = vmatprep.mubr.bf16.mxu0 %v12634_v24  ;;  %v12642_v4 = vld [vmem:[%s13385_s8 + $0x3a0] ss:$144 sps:$4 sm:$0xff]  }
 0x232   : > { %7474 = vmatprep.mubr.bf16.mxu1 %v12637_v27  ;;  %11156 = vmatpush3.bf16.msra.mxu0 %v12655_v49  ;;  %v12702_v27 = vld [vmem:[%s15558_s1 + $0x568] sm:$0xff]  }
 0x233   : > { %v14298_v26 = vadd.f32 %v10648_v44, %v6707_v2  ;;  %v10537_v12 = vpop.f32.mrb[156].mxu0  ;;  %11268 = vmatpush3.bf16.msra.mxu1 %v12657_v37  ;;  %11157 = vmatprep.subr.bf16.mxu0 %v12670_v21  ;;  %v12704_v49 = vld [vmem:[%s15558_s1 + $0x5e8] sm:$0xff]  }
 0x234   : > { %v10649_v29 = vpop.f32.mrb[156].mxu1  ;;  %v10538_v3 = vpop.f32.mrb[157].mxu0  ;;  %11269 = vmatprep.subr.bf16.mxu1 %v12672_v52  ;;  %v12645_v44 = vld [vmem:[%s13385_s8 + $0x3a8] ss:$144 sps:$4 sm:$0xff]  }
 0x235   : > { %v10539_v39 = vadd.f32 %v10538_v3, %v10537_v12  ;;  %v10650_v14 = vpop.f32.mrb[157].mxu1  ;;  %v10540_v34 = vpop.f32.mrb[158].mxu0  ;;  %v12705_v2 = vld [vmem:[%s15558_s1 + $0x5a8] sm:$0xff]  }
 0x236   : > { %v10651_v50 = vadd.f32 %v10650_v14, %v10649_v29  ;;  %v10652_v5 = vpop.f32.mrb[158].mxu1  ;;  %v10541_v24 = vpop.f32.mrb[159].mxu0  ;;  %11158 = vmatpush3.bf16.msra.mxu0 %v12671_v38  ;;  %v12650_v38 = vld [vmem:[%s13385_s8 + $0x4c4] ss:$144 sps:$4 sm:$0xff]  }
 0x237   : > { %v6712_v30 = vadd.f32 %v10539_v39, %v14063_v56  ;;  %v10542_v53 = vadd.f32 %v10541_v24, %v10540_v34  ;;  %v10653_v43 = vpop.f32.mrb[159].mxu1  ;;  %11270 = vmatpush3.bf16.msra.mxu1 %v12673_v13  ;;  %11159 = vmatprep.subr.bf16.mxu0 %v12686_v59  ;;  %v12703_v56 = vld [vmem:[%s15558_s1 + $0x528] sm:$0xff]   ;;  %v12719_v14 = vld [vmem:[%s15558_s1 + $0x530] sm:$0xff]  }
 0x238   : > { %v10654_v37 = vadd.f32 %v10653_v43, %v10652_v5  ;;  %7314 = vmatmul.mubr.bf16.gmra.mrb[8].mxu0 %v12632_v19  ;;  %11271 = vmatprep.subr.bf16.mxu1 %v12688_v55  ;;  %v12720_v19 = vld [vmem:[%s15558_s1 + $0x5f0] sm:$0xff]   ;;  %v12653_v39 = vld [vmem:[%s13385_s8 + $0x4cc] ss:$144 sps:$4 sm:$0xff]  }
 0x239   : > { %v14319_v45 = vadd.f32 %v10651_v50, %v6712_v30  ;;  %v6715_v33 = vadd.f32 %v10542_v53, %v14067_v58  ;;  %7475 = vmatmul.mubr.bf16.gmra.mrb[8].mxu1 %v12635_v28  ;;  %7321 = vmatprep.mubr.bf16.mxu0 %v12644_v17  ;;  %v12718_v58 = vld [vmem:[%s15558_s1 + $0x570] sm:$0xff]   ;;  %v12737_v43 = vld [vmem:[%s15558_s1 + $0x5b8] sm:$0xff]  }
 0x23a   : > { %7482 = vmatprep.mubr.bf16.mxu1 %v12647_v23  ;;  %11160 = vmatpush3.bf16.msra.mxu0 %v12687_v48  ;;  %v12721_v34 = vld [vmem:[%s15558_s1 + $0x5b0] sm:$0xff]   ;;  %v12734_v23 = vld [vmem:[%s15558_s1 + $0x578] sm:$0xff]  }
 0x23b   : > { %v14323_v21 = vadd.f32 %v10654_v37, %v6715_v33  ;;  %v10543_v52 = vpop.f32.mrb[160].mxu0  ;;  %11272 = vmatpush3.bf16.msra.mxu1 %v12689_v42  ;;  %11161 = vmatprep.subr.bf16.mxu0 %v12702_v27  ;;  %v12736_v48 = vld [vmem:[%s15558_s1 + $0x5f8] sm:$0xff]   ;;  %v12750_v27 = vld [vmem:[%s15558_s1 + $0x640] sm:$0xff]  }
 0x23c   : > { %v10655_v13 = vpop.f32.mrb[160].mxu1  ;;  %v10544_v59 = vpop.f32.mrb[161].mxu0  ;;  %11273 = vmatprep.subr.bf16.mxu1 %v12704_v49  ;;  %v12648_v49 = vld [vmem:[%s13385_s8 + $0x4c0] ss:$144 sps:$4 sm:$0xff]   ;;  %v12651_v33 = vld [vmem:[%s13385_s8 + $0x4c8] ss:$144 sps:$4 sm:$0xff]  }
 0x23d   : > { %v10545_v55 = vadd.f32 %v10544_v59, %v10543_v52  ;;  %v10656_v12 = vpop.f32.mrb[161].mxu1  ;;  %v10546_v28 = vpop.f32.mrb[162].mxu0  ;;  %v12752_v37 = vld [vmem:[%s15558_s1 + $0x6c0] sm:$0xff]  }
 0x23e   : > { %v10657_v17 = vadd.f32 %v10656_v12, %v10655_v13  ;;  %v10658_v29 = vpop.f32.mrb[162].mxu1  ;;  %v10547_v3 = vpop.f32.mrb[163].mxu0  ;;  %11162 = vmatpush3.bf16.msra.mxu0 %v12703_v56 }
 0x23f   : > { %v6720_v50 = vadd.f32 %v10545_v55, %v14097_v41  ;;  %v10548_v5 = vadd.f32 %v10547_v3, %v10546_v28  ;;  %v10659_v24 = vpop.f32.mrb[163].mxu1  ;;  %11274 = vmatpush3.bf16.msra.mxu1 %v12705_v2  ;;  %11163 = vmatprep.subr.bf16.mxu0 %v12718_v58  ;;  %v12735_v41 = vld [vmem:[%s15558_s1 + $0x538] sm:$0xff]  }
 0x240   : > { %v10660_v42 = vadd.f32 %v10659_v24, %v10658_v29  ;;  %7322 = vmatmul.mubr.bf16.gmra.mrb[12].mxu0 %v12642_v4  ;;  %11275 = vmatprep.subr.bf16.mxu1 %v12720_v19  ;;  %v12660_v4 = vld [vmem:[%s13385_s8 + $0x5e4] ss:$144 sps:$4 sm:$0xff]   ;;  %v12663_v55 = vld [vmem:[%s13385_s8 + $0x5ec] ss:$144 sps:$4 sm:$0xff]  }
 0x241   : > { %v14353_v30 = vadd.f32 %v10657_v17, %v6720_v50  ;;  %v6723_v53 = vadd.f32 %v10548_v5, %v14110_v63  ;;  %7483 = vmatmul.mubr.bf16.gmra.mrb[12].mxu1 %v12645_v44  ;;  %7329 = vmatprep.mubr.bf16.mxu0 %v12650_v38  ;;  %v12661_v50 = vld [vmem:[%s13385_s8 + $0x5e8] ss:$144 sps:$4 sm:$0xff]  }
 0x242   : > { %7490 = vmatprep.mubr.bf16.mxu1 %v12653_v39  ;;  %11164 = vmatpush3.bf16.msra.mxu0 %v12719_v14 }
 0x243   : > { %v14366_v56 = vadd.f32 %v10660_v42, %v6723_v53  ;;  %v10549_v63 = vpop.f32.mrb[164].mxu0  ;;  %11276 = vmatpush3.bf16.msra.mxu1 %v12721_v34  ;;  %11165 = vmatprep.subr.bf16.mxu0 %v12734_v23  ;;  %v12658_v34 = vld [vmem:[%s13385_s8 + $0x5e0] ss:$144 sps:$4 sm:$0xff]   ;;  %v12666_v23 = vld [vmem:[%s13385_s8 + $0x704] ss:$144 sps:$4 sm:$0xff]  }
 0x244   : > { %v10661_v52 = vpop.f32.mrb[164].mxu1  ;;  %v10550_v44 = vpop.f32.mrb[165].mxu0  ;;  %11277 = vmatprep.subr.bf16.mxu1 %v12736_v48 }
 0x245   : > { %v10551_v38 = vadd.f32 %v10550_v44, %v10549_v63  ;;  %v10662_v2 = vpop.f32.mrb[165].mxu1  ;;  %v10552_v58 = vpop.f32.mrb[166].mxu0  ;;  %v12664_v44 = vld [vmem:[%s13385_s8 + $0x700] ss:$144 sps:$4 sm:$0xff]  }
 0x246   : > { %v10663_v13 = vadd.f32 %v10662_v2, %v10661_v52  ;;  %v10664_v59 = vpop.f32.mrb[166].mxu1  ;;  %v10553_v19 = vpop.f32.mrb[167].mxu0  ;;  %11166 = vmatpush3.bf16.msra.mxu0 %v12735_v41 }
 0x247   : > { %v6728_v12 = vadd.f32 %v10551_v38, %v14116_v20  ;;  %v10554_v28 = vadd.f32 %v10553_v19, %v10552_v58  ;;  %v10665_v17 = vpop.f32.mrb[167].mxu1  ;;  %11278 = vmatpush3.bf16.msra.mxu1 %v12737_v43  ;;  %11375 = vmatprep.subr.bf16.mxu0 %v12750_v27  ;;  %v12669_v27 = vld [vmem:[%s13385_s8 + $0x70c] ss:$144 sps:$4 sm:$0xff]   ;;  %v12667_v58 = vld [vmem:[%s13385_s8 + $0x708] ss:$144 sps:$4 sm:$0xff]  }
 0x248   : > { %v10666_v29 = vadd.f32 %v10665_v17, %v10664_v59  ;;  %7330 = vmatmul.mubr.bf16.gmra.mrb[16].mxu0 %v12648_v49  ;;  %11487 = vmatprep.subr.bf16.mxu1 %v12752_v37 }
 0x249   : > { %v14372_v3 = vadd.f32 %v10663_v13, %v6728_v12  ;;  %v6731_v39 = vadd.f32 %v10554_v28, %v14119_v31  ;;  %7491 = vmatmul.mubr.bf16.gmra.mrb[16].mxu1 %v12651_v33  ;;  %7337 = vmatprep.mubr.bf16.mxu0 %v12660_v4  ;;  %v12676_v13 = vld [vmem:[%s13385_s8 + $0x824] ss:$144 sps:$4 sm:$0xff]  }
 0x24a   : > { %7498 = vmatprep.mubr.bf16.mxu1 %v12663_v55 }
 0x24b   : > { %v14375_v14 = vadd.f32 %v10666_v29, %v6731_v39  ;;  %v10555_v20 = vpop.f32.mrb[168].mxu0 }
 0x24c   : > { %v10667_v5 = vpop.f32.mrb[168].mxu1  ;;  %v10556_v24 = vpop.f32.mrb[169].mxu0 }
 0x24d   : > { %v10557_v48 = vadd.f32 %v10556_v24, %v10555_v20  ;;  %v10668_v42 = vpop.f32.mrb[169].mxu1  ;;  %v10558_v41 = vpop.f32.mrb[170].mxu0 }
 0x24e   : > { %v10669_v53 = vadd.f32 %v10668_v42, %v10667_v5  ;;  %v10670_v43 = vpop.f32.mrb[170].mxu1  ;;  %v10559_v31 = vpop.f32.mrb[171].mxu0 }
 0x24f   : > { %v6736_v49 = vadd.f32 %v10557_v48, %v14126_v57  ;;  %v10560_v37 = vadd.f32 %v10559_v31, %v10558_v41  ;;  %v10671_v63 = vpop.f32.mrb[171].mxu1 }
 0x250   : > { %v10672_v33 = vadd.f32 %v10671_v63, %v10670_v43  ;;  %7338 = vmatmul.mubr.bf16.gmra.mrb[20].mxu0 %v12658_v34 }
 0x251   : > { %v14382_v4 = vadd.f32 %v10669_v53, %v6736_v49  ;;  %v6739_v52 = vadd.f32 %v10560_v37, %v14130_v32  ;;  %7499 = vmatmul.mubr.bf16.gmra.mrb[20].mxu1 %v12661_v50  ;;  %7345 = vmatprep.mubr.bf16.mxu0 %v12666_v23  ;;  %v12679_v32 = vld [vmem:[%s13385_s8 + $0x82c] ss:$144 sps:$4 sm:$0xff]   ;;  %v12682_v49 = vld [vmem:[%s13385_s8 + $0x944] ss:$144 sps:$4 sm:$0xff]  }
 0x252   : > { %7506 = vmatprep.mubr.bf16.mxu1 %v12669_v27  ;;  %v12677_v27 = vld [vmem:[%s13385_s8 + $0x828] ss:$144 sps:$4 sm:$0xff]  }
 0x253   : > { %v14386_v38 = vadd.f32 %v10672_v33, %v6739_v52  ;;  %v10561_v2 = vpop.f32.mrb[172].mxu0 }
 0x254   : > { %v10673_v59 = vpop.f32.mrb[172].mxu1  ;;  %v10562_v57 = vpop.f32.mrb[173].mxu0 }
 0x255   : > { %v10563_v19 = vadd.f32 %v10562_v57, %v10561_v2  ;;  %v10674_v55 = vpop.f32.mrb[173].mxu1  ;;  %v10564_v12 = vpop.f32.mrb[174].mxu0 }
 0x256   : > { %v10675_v28 = vadd.f32 %v10674_v55, %v10673_v59  ;;  %v10676_v17 = vpop.f32.mrb[174].mxu1  ;;  %v10565_v29 = vpop.f32.mrb[175].mxu0 }
 0x257   : > { %v6744_v39 = vadd.f32 %v10563_v19, %v14136_v35  ;;  %v10566_v20 = vadd.f32 %v10565_v29, %v10564_v12  ;;  %v10677_v34 = vpop.f32.mrb[175].mxu1  ;;  %v12674_v35 = vld [vmem:[%s13385_s8 + $0x820] ss:$144 sps:$4 sm:$0xff]  }
 0x258   : > { %v10678_v50 = vadd.f32 %v10677_v34, %v10676_v17  ;;  %7346 = vmatmul.mubr.bf16.gmra.mrb[24].mxu0 %v12664_v44 }
 0x259   : > { %v14392_v5 = vadd.f32 %v10675_v28, %v6744_v39  ;;  %v6747_v24 = vadd.f32 %v10566_v20, %v14139_v8  ;;  %7507 = vmatmul.mubr.bf16.gmra.mrb[24].mxu1 %v12667_v58  ;;  %7353 = vmatprep.mubr.bf16.mxu0 %v12676_v13  ;;  %v12685_v8 = vld [vmem:[%s13385_s8 + $0x94c] ss:$144 sps:$4 sm:$0xff]   ;;  %v12692_v39 = vld [vmem:[%s13385_s8 + $0xa64] ss:$144 sps:$4 sm:$0xff]  }
 0x25a   : > { %7514 = vmatprep.mubr.bf16.mxu1 %v12679_v32  ;;  %v12683_v32 = vld [vmem:[%s13385_s8 + $0x948] ss:$144 sps:$4 sm:$0xff]  }
 0x25b   : > { %v14395_v23 = vadd.f32 %v10678_v50, %v6747_v24  ;;  %v10567_v48 = vpop.f32.mrb[176].mxu0 }
 0x25c   : > { %v10679_v42 = vpop.f32.mrb[176].mxu1  ;;  %v10568_v41 = vpop.f32.mrb[177].mxu0 }
 0x25d   : > { %v10569_v53 = vadd.f32 %v10568_v41, %v10567_v48  ;;  %v10680_v43 = vpop.f32.mrb[177].mxu1  ;;  %v10570_v31 = vpop.f32.mrb[178].mxu0 }
 0x25e   : > { %v10681_v37 = vadd.f32 %v10680_v43, %v10679_v42  ;;  %v10682_v63 = vpop.f32.mrb[178].mxu1  ;;  %v10571_v33 = vpop.f32.mrb[179].mxu0 }
 0x25f   : > { %v6752_v52 = vadd.f32 %v10569_v53, %v14146_v7  ;;  %v10572_v44 = vadd.f32 %v10571_v33, %v10570_v31  ;;  %v10683_v2 = vpop.f32.mrb[179].mxu1  ;;  %v12680_v7 = vld [vmem:[%s13385_s8 + $0x940] ss:$144 sps:$4 sm:$0xff]  }
 0x260   : > { %v10684_v58 = vadd.f32 %v10683_v2, %v10682_v63  ;;  %7354 = vmatmul.mubr.bf16.gmra.mrb[28].mxu0 %v12674_v35 }
 0x261   : > { %v14402_v13 = vadd.f32 %v10681_v37, %v6752_v52  ;;  %v6755_v59 = vadd.f32 %v10572_v44, %v14150_v10  ;;  %7515 = vmatmul.mubr.bf16.gmra.mrb[28].mxu1 %v12677_v27  ;;  %7361 = vmatprep.mubr.bf16.mxu0 %v12682_v49  ;;  %v12695_v10 = vld [vmem:[%s13385_s8 + $0xa6c] ss:$144 sps:$4 sm:$0xff]   ;;  %v12698_v52 = vld [vmem:[%s13385_s8 + $0xb84] ss:$144 sps:$4 sm:$0xff]  }
 0x262   : > { %7522 = vmatprep.mubr.bf16.mxu1 %v12685_v8  ;;  %v12693_v8 = vld [vmem:[%s13385_s8 + $0xa68] ss:$144 sps:$4 sm:$0xff]  }
 0x263   : > { %v14405_v57 = vadd.f32 %v10684_v58, %v6755_v59  ;;  %v10573_v19 = vpop.f32.mrb[180].mxu0 }
 0x264   : > { %v10685_v55 = vpop.f32.mrb[180].mxu1  ;;  %v10574_v12 = vpop.f32.mrb[181].mxu0 }
 0x265   : > { %v10575_v28 = vadd.f32 %v10574_v12, %v10573_v19  ;;  %v10686_v17 = vpop.f32.mrb[181].mxu1  ;;  %v10576_v29 = vpop.f32.mrb[182].mxu0 }
 0x266   : > { %v10687_v20 = vadd.f32 %v10686_v17, %v10685_v55  ;;  %v10688_v34 = vpop.f32.mrb[182].mxu1  ;;  %v10577_v50 = vpop.f32.mrb[183].mxu0 }
 0x267   : > { %v6760_v24 = vadd.f32 %v10575_v28, %v14156_v46  ;;  %v10578_v48 = vadd.f32 %v10577_v50, %v10576_v29  ;;  %v10689_v42 = vpop.f32.mrb[183].mxu1  ;;  %v12690_v46 = vld [vmem:[%s13385_s8 + $0xa60] ss:$144 sps:$4 sm:$0xff]  }
 0x268   : > { %v10690_v41 = vadd.f32 %v10689_v42, %v10688_v34  ;;  %7362 = vmatmul.mubr.bf16.gmra.mrb[32].mxu0 %v12680_v7 }
 0x269   : > { %v14412_v35 = vadd.f32 %v10687_v20, %v6760_v24  ;;  %v6763_v53 = vadd.f32 %v10578_v48, %v14159_v47  ;;  %7523 = vmatmul.mubr.bf16.gmra.mrb[32].mxu1 %v12683_v32  ;;  %7369 = vmatprep.mubr.bf16.mxu0 %v12692_v39  ;;  %v12701_v47 = vld [vmem:[%s13385_s8 + $0xb8c] ss:$144 sps:$4 sm:$0xff]   ;;  %v12708_v24 = vld [vmem:[%s13385_s8 + $0xca4] ss:$144 sps:$4 sm:$0xff]  }
 0x26a   : > { %7530 = vmatprep.mubr.bf16.mxu1 %v12695_v10  ;;  %v12699_v10 = vld [vmem:[%s13385_s8 + $0xb88] ss:$144 sps:$4 sm:$0xff]  }
 0x26b   : > { %v14415_v43 = vadd.f32 %v10690_v41, %v6763_v53  ;;  %v10579_v31 = vpop.f32.mrb[184].mxu0 }
 0x26c   : > { %v10691_v27 = vpop.f32.mrb[184].mxu1  ;;  %v10580_v49 = vpop.f32.mrb[185].mxu0 }
 0x26d   : > { %v10581_v37 = vadd.f32 %v10580_v49, %v10579_v31  ;;  %v10692_v63 = vpop.f32.mrb[185].mxu1  ;;  %v10582_v33 = vpop.f32.mrb[186].mxu0 }
 0x26e   : > { %v10693_v44 = vadd.f32 %v10692_v63, %v10691_v27  ;;  %v10694_v2 = vpop.f32.mrb[186].mxu1  ;;  %v10583_v58 = vpop.f32.mrb[187].mxu0 }
 0x26f   : > { %v6768_v59 = vadd.f32 %v10581_v37, %v14166_v16  ;;  %v10584_v19 = vadd.f32 %v10583_v58, %v10582_v33  ;;  %v10695_v55 = vpop.f32.mrb[187].mxu1  ;;  %v12696_v16 = vld [vmem:[%s13385_s8 + $0xb80] ss:$144 sps:$4 sm:$0xff]  }
 0x270   : > { %v10696_v12 = vadd.f32 %v10695_v55, %v10694_v2  ;;  %7370 = vmatmul.mubr.bf16.gmra.mrb[36].mxu0 %v12690_v46 }
 0x271   : > { %v14422_v7 = vadd.f32 %v10693_v44, %v6768_v59  ;;  %v6771_v28 = vadd.f32 %v10584_v19, %v14170_v25  ;;  %7531 = vmatmul.mubr.bf16.gmra.mrb[36].mxu1 %v12693_v8  ;;  %7377 = vmatprep.mubr.bf16.mxu0 %v12698_v52  ;;  %v12711_v25 = vld [vmem:[%s13385_s8 + $0xcac] ss:$144 sps:$4 sm:$0xff]   ;;  %v12714_v59 = vld [vmem:[%s13385_s8 + $0xdc4] ss:$144 sps:$4 sm:$0xff]  }
 0x272   : > { %7538 = vmatprep.mubr.bf16.mxu1 %v12701_v47  ;;  %v12709_v47 = vld [vmem:[%s13385_s8 + $0xca8] ss:$144 sps:$4 sm:$0xff]  }
 0x273   : > { %v14425_v17 = vadd.f32 %v10696_v12, %v6771_v28  ;;  %v10585_v29 = vpop.f32.mrb[188].mxu0 }
 0x274   : > { %v10697_v32 = vpop.f32.mrb[188].mxu1  ;;  %v10586_v39 = vpop.f32.mrb[189].mxu0 }
 0x275   : > { %v10587_v20 = vadd.f32 %v10586_v39, %v10585_v29  ;;  %v10698_v34 = vpop.f32.mrb[189].mxu1  ;;  %v10588_v50 = vpop.f32.mrb[190].mxu0 }
 0x276   : > { %v10699_v48 = vadd.f32 %v10698_v34, %v10697_v32  ;;  %v10700_v42 = vpop.f32.mrb[190].mxu1  ;;  %v10589_v41 = vpop.f32.mrb[191].mxu0 }
 0x277   : > { %v6776_v53 = vadd.f32 %v10587_v20, %v14176_v54  ;;  %v10590_v31 = vadd.f32 %v10589_v41, %v10588_v50  ;;  %v10701_v27 = vpop.f32.mrb[191].mxu1  ;;  %v12706_v54 = vld [vmem:[%s13385_s8 + $0xca0] ss:$144 sps:$4 sm:$0xff]  }
 0x278   : > { %v10702_v49 = vadd.f32 %v10701_v27, %v10700_v42  ;;  %7378 = vmatmul.mubr.bf16.gmra.mrb[40].mxu0 %v12696_v16 }
 0x279   : > { %v14432_v46 = vadd.f32 %v10699_v48, %v6776_v53  ;;  %v6779_v37 = vadd.f32 %v10590_v31, %v14179_v40  ;;  %7539 = vmatmul.mubr.bf16.gmra.mrb[40].mxu1 %v12699_v10  ;;  %7385 = vmatprep.mubr.bf16.mxu0 %v12708_v24  ;;  %v12717_v40 = vld [vmem:[%s13385_s8 + $0xdcc] ss:$144 sps:$4 sm:$0xff]   ;;  %v12724_v53 = vld [vmem:[%s13385_s8 + $0xee4] ss:$144 sps:$4 sm:$0xff]  }
 0x27a   : > { %7546 = vmatprep.mubr.bf16.mxu1 %v12711_v25  ;;  %v12715_v25 = vld [vmem:[%s13385_s8 + $0xdc8] ss:$144 sps:$4 sm:$0xff]  }
 0x27b   : > { %v14435_v63 = vadd.f32 %v10702_v49, %v6779_v37  ;;  %v10719_v33 = vpop.f32.mrb[192].mxu0 }
 0x27c   : > { %v10831_v8 = vpop.f32.mrb[192].mxu1  ;;  %v10720_v52 = vpop.f32.mrb[193].mxu0 }
 0x27d   : > { %v10721_v44 = vadd.f32 %v10720_v52, %v10719_v33  ;;  %v10832_v2 = vpop.f32.mrb[193].mxu1  ;;  %v10722_v58 = vpop.f32.mrb[194].mxu0 }
 0x27e   : > { %v10833_v19 = vadd.f32 %v10832_v2, %v10831_v8  ;;  %v10834_v55 = vpop.f32.mrb[194].mxu1  ;;  %v10723_v12 = vpop.f32.mrb[195].mxu0 }
 0x27f   : > { %v6978_v28 = vadd.f32 %v10721_v44, %v14186_v61  ;;  %v10724_v29 = vadd.f32 %v10723_v12, %v10722_v58  ;;  %v10835_v32 = vpop.f32.mrb[195].mxu1  ;;  %v12712_v61 = vld [vmem:[%s13385_s8 + $0xdc0] ss:$144 sps:$4 sm:$0xff]  }
 0x280   : > { %v10836_v39 = vadd.f32 %v10835_v32, %v10834_v55  ;;  %7386 = vmatmul.mubr.bf16.gmra.mrb[44].mxu0 %v12706_v54 }
 0x281   : > { %v14442_v16 = vadd.f32 %v10833_v19, %v6978_v28  ;;  %v6981_v20 = vadd.f32 %v10724_v29, %v14190_v15  ;;  %7547 = vmatmul.mubr.bf16.gmra.mrb[44].mxu1 %v12709_v47  ;;  %7393 = vmatprep.mubr.bf16.mxu0 %v12714_v59  ;;  %v12727_v15 = vld [vmem:[%s13385_s8 + $0xeec] ss:$144 sps:$4 sm:$0xff]   ;;  %v12730_v28 = vld [vmem:[%s13385_s8 + $0x1004] ss:$144 sps:$4 sm:$0xff]  }
 0x282   : > { %7554 = vmatprep.mubr.bf16.mxu1 %v12717_v40  ;;  %v12725_v40 = vld [vmem:[%s13385_s8 + $0xee8] ss:$144 sps:$4 sm:$0xff]  }
 0x283   : > { %v14445_v34 = vadd.f32 %v10836_v39, %v6981_v20  ;;  %v10725_v50 = vpop.f32.mrb[196].mxu0 }
 0x284   : > { %v10837_v10 = vpop.f32.mrb[196].mxu1  ;;  %v10726_v24 = vpop.f32.mrb[197].mxu0 }
 0x285   : > { %v10727_v48 = vadd.f32 %v10726_v24, %v10725_v50  ;;  %v10838_v42 = vpop.f32.mrb[197].mxu1  ;;  %v10728_v41 = vpop.f32.mrb[198].mxu0 }
 0x286   : > { %v10839_v31 = vadd.f32 %v10838_v42, %v10837_v10  ;;  %v10840_v27 = vpop.f32.mrb[198].mxu1  ;;  %v10729_v49 = vpop.f32.mrb[199].mxu0 }
 0x287   : > { %v6986_v37 = vadd.f32 %v10727_v48, %v14196_v62  ;;  %v10730_v33 = vadd.f32 %v10729_v49, %v10728_v41  ;;  %v10841_v8 = vpop.f32.mrb[199].mxu1  ;;  %v12722_v62 = vld [vmem:[%s13385_s8 + $0xee0] ss:$144 sps:$4 sm:$0xff]  }
 0x288   : > { %v10842_v52 = vadd.f32 %v10841_v8, %v10840_v27  ;;  %7394 = vmatmul.mubr.bf16.gmra.mrb[48].mxu0 %v12712_v61 }
 0x289   : > { %v14452_v54 = vadd.f32 %v10839_v31, %v6986_v37  ;;  %v6989_v44 = vadd.f32 %v10730_v33, %v14199_v6  ;;  %7555 = vmatmul.mubr.bf16.gmra.mrb[48].mxu1 %v12715_v25  ;;  %7401 = vmatprep.mubr.bf16.mxu0 %v12724_v53  ;;  %v12733_v6 = vld [vmem:[%s13385_s8 + $0x100c] ss:$144 sps:$4 sm:$0xff]   ;;  %v12740_v37 = vld [vmem:[%s13385_s8 + $0x1124] ss:$144 sps:$4 sm:$0xff]  }
 0x28a   : > { %7562 = vmatprep.mubr.bf16.mxu1 %v12727_v15  ;;  %v12731_v15 = vld [vmem:[%s13385_s8 + $0x1008] ss:$144 sps:$4 sm:$0xff]  }
 0x28b   : > { %v14455_v2 = vadd.f32 %v10842_v52, %v6989_v44  ;;  %v10731_v58 = vpop.f32.mrb[200].mxu0 }
 0x28c   : > { %v10843_v47 = vpop.f32.mrb[200].mxu1  ;;  %v10732_v59 = vpop.f32.mrb[201].mxu0 }
 0x28d   : > { %v10733_v19 = vadd.f32 %v10732_v59, %v10731_v58  ;;  %v10844_v55 = vpop.f32.mrb[201].mxu1  ;;  %v10734_v12 = vpop.f32.mrb[202].mxu0 }
 0x28e   : > { %v10845_v29 = vadd.f32 %v10844_v55, %v10843_v47  ;;  %v10846_v32 = vpop.f32.mrb[202].mxu1  ;;  %v10735_v39 = vpop.f32.mrb[203].mxu0 }
 0x28f   : > { %v6994_v20 = vadd.f32 %v10733_v19, %v14206_v36  ;;  %v10736_v50 = vadd.f32 %v10735_v39, %v10734_v12  ;;  %v10847_v10 = vpop.f32.mrb[203].mxu1  ;;  %v12728_v36 = vld [vmem:[%s13385_s8 + $0x1000] ss:$144 sps:$4 sm:$0xff]  }
 0x290   : > { %v10848_v24 = vadd.f32 %v10847_v10, %v10846_v32  ;;  %7402 = vmatmul.mubr.bf16.gmra.mrb[52].mxu0 %v12722_v62 }
 0x291   : > { %v14462_v61 = vadd.f32 %v10845_v29, %v6994_v20  ;;  %v6997_v48 = vadd.f32 %v10736_v50, %v14210_v11  ;;  %7563 = vmatmul.mubr.bf16.gmra.mrb[52].mxu1 %v12725_v40  ;;  %7409 = vmatprep.mubr.bf16.mxu0 %v12730_v28  ;;  %v12743_v11 = vld [vmem:[%s13385_s8 + $0x112c] ss:$144 sps:$4 sm:$0xff]   ;;  %v12746_v20 = vld [vmem:[%s13385_s8 + $0x54] ss:$144 sps:$4 sm:$0xff]  }
 0x292   : > { %7570 = vmatprep.mubr.bf16.mxu1 %v12733_v6  ;;  %v12741_v6 = vld [vmem:[%s13385_s8 + $0x1128] ss:$144 sps:$4 sm:$0xff]  }
 0x293   : > { %v14465_v42 = vadd.f32 %v10848_v24, %v6997_v48  ;;  %v10737_v41 = vpop.f32.mrb[204].mxu0 }
 0x294   : > { %v10849_v25 = vpop.f32.mrb[204].mxu1  ;;  %v10738_v53 = vpop.f32.mrb[205].mxu0 }
 0x295   : > { %v10739_v31 = vadd.f32 %v10738_v53, %v10737_v41  ;;  %v10850_v27 = vpop.f32.mrb[205].mxu1  ;;  %v10740_v49 = vpop.f32.mrb[206].mxu0 }
 0x296   : > { %v10851_v33 = vadd.f32 %v10850_v27, %v10849_v25  ;;  %v10852_v8 = vpop.f32.mrb[206].mxu1  ;;  %v10741_v52 = vpop.f32.mrb[207].mxu0 }
 0x297   : > { %v7002_v44 = vadd.f32 %v10739_v31, %v14216_v22  ;;  %v10742_v58 = vadd.f32 %v10741_v52, %v10740_v49  ;;  %v10853_v47 = vpop.f32.mrb[207].mxu1  ;;  %v12738_v22 = vld [vmem:[%s13385_s8 + $0x1120] ss:$144 sps:$4 sm:$0xff]  }
 0x298   : > { %v10854_v59 = vadd.f32 %v10853_v47, %v10852_v8  ;;  %7410 = vmatmul.mubr.bf16.gmra.mrb[56].mxu0 %v12728_v36 }
 0x299   : > { %v14472_v62 = vadd.f32 %v10851_v33, %v7002_v44  ;;  %v7005_v19 = vadd.f32 %v10742_v58, %v14219_v51  ;;  %7571 = vmatmul.mubr.bf16.gmra.mrb[56].mxu1 %v12731_v15  ;;  %7417 = vmatprep.mubr.bf16.mxu0 %v12740_v37  ;;  %v12749_v51 = vld [vmem:[%s13385_s8 + $0x5c] ss:$144 sps:$4 sm:$0xff]   ;;  %v12751_v44 = vld [vmem:[%s15558_s1 + $0x600] sm:$0xff]  }
 0x29a   : > { %7578 = vmatprep.mubr.bf16.mxu1 %v12743_v11  ;;  %v12747_v11 = vld [vmem:[%s13385_s8 + $0x58] ss:$144 sps:$4 sm:$0xff]  }
 0x29b   : > { %v14475_v55 = vadd.f32 %v10854_v59, %v7005_v19  ;;  %v10743_v12 = vpop.f32.mrb[208].mxu0  ;;  %v12753_v59 = vld [vmem:[%s15558_s1 + $0x680] sm:$0xff]  }
 0x29c   : > { %v10855_v40 = vpop.f32.mrb[208].mxu1  ;;  %v10744_v28 = vpop.f32.mrb[209].mxu0  ;;  %v12756_v19 = vld [vmem:[%s13385_s8 + $0x174] ss:$144 sps:$4 sm:$0xff]  }
 0x29d   : > { %v10745_v29 = vadd.f32 %v10744_v28, %v10743_v12  ;;  %v10856_v32 = vpop.f32.mrb[209].mxu1  ;;  %v10746_v39 = vpop.f32.mrb[210].mxu0 }
 0x29e   : > { %v10857_v50 = vadd.f32 %v10856_v32, %v10855_v40  ;;  %v10858_v10 = vpop.f32.mrb[210].mxu1  ;;  %v10747_v24 = vpop.f32.mrb[211].mxu0 }
 0x29f   : > { %v7010_v48 = vadd.f32 %v10745_v29, %v14226_v0  ;;  %v10748_v41 = vadd.f32 %v10747_v24, %v10746_v39  ;;  %v10859_v25 = vpop.f32.mrb[211].mxu1  ;;  %v12744_v0 = vld [vmem:[%s13385_s8 + $0x50] ss:$144 sps:$4 sm:$0xff]   ;;  %v12766_v29 = vld [vmem:[%s15558_s1 + $0x648] sm:$0xff]  }
 0x2a0   : > { %v10860_v53 = vadd.f32 %v10859_v25, %v10858_v10  ;;  %7418 = vmatmul.mubr.bf16.gmra.mrb[60].mxu0 %v12738_v22  ;;  %v12759_v22 = vld [vmem:[%s13385_s8 + $0x17c] ss:$144 sps:$4 sm:$0xff]   ;;  %v12782_v10 = vld [vmem:[%s15558_s1 + $0x650] sm:$0xff]  }
 0x2a1   : > { %v14482_v36 = vadd.f32 %v10857_v50, %v7010_v48  ;;  %v7013_v31 = vadd.f32 %v10748_v41, %v14230_v18  ;;  %7579 = vmatmul.mubr.bf16.gmra.mrb[60].mxu1 %v12741_v6  ;;  %7619 = vmatprep.mubr.bf16.mxu0 %v12746_v20  ;;  %v12768_v39 = vld [vmem:[%s15558_s1 + $0x6c8] sm:$0xff]   ;;  %v12754_v25 = vld [vmem:[%s13385_s8 + $0x170] ss:$144 sps:$4 sm:$0xff]  }
 0x2a2   : > { %7780 = vmatprep.mubr.bf16.mxu1 %v12749_v51  ;;  %v12769_v50 = vld [vmem:[%s15558_s1 + $0x688] sm:$0xff]   ;;  %v12784_v51 = vld [vmem:[%s15558_s1 + $0x6d0] sm:$0xff]  }
 0x2a3   : > { %v14485_v27 = vadd.f32 %v10860_v53, %v7013_v31  ;;  %v10749_v49 = vpop.f32.mrb[212].mxu0 }
 0x2a4   : > { %v10861_v15 = vpop.f32.mrb[212].mxu1  ;;  %v10750_v37 = vpop.f32.mrb[213].mxu0 }
 0x2a5   : > { %v10751_v33 = vadd.f32 %v10750_v37, %v10749_v49  ;;  %v10862_v8 = vpop.f32.mrb[213].mxu1  ;;  %v10752_v52 = vpop.f32.mrb[214].mxu0  ;;  %v12762_v37 = vld [vmem:[%s13385_s8 + $0x294] ss:$144 sps:$4 sm:$0xff]  }
 0x2a6   : > { %v10863_v18 = vadd.f32 %v10862_v8, %v10861_v15  ;;  %v10864_v58 = vpop.f32.mrb[214].mxu1  ;;  %v10753_v47 = vpop.f32.mrb[215].mxu0  ;;  %v12757_v15 = vld [vmem:[%s13385_s8 + $0x178] ss:$144 sps:$4 sm:$0xff]  }
 0x2a7   : > { %v7018_v12 = vadd.f32 %v10751_v33, %v14257_v9  ;;  %v10754_v40 = vadd.f32 %v10753_v47, %v10752_v52  ;;  %v10865_v28 = vpop.f32.mrb[215].mxu1  ;;  %v12767_v9 = vld [vmem:[%s15558_s1 + $0x608] sm:$0xff]   ;;  %v12785_v47 = vld [vmem:[%s15558_s1 + $0x690] sm:$0xff]  }
 0x2a8   : > { %v10866_v32 = vadd.f32 %v10865_v28, %v10864_v58  ;;  %7620 = vmatmul.mubr.bf16.vlgmr.msra.gmra.mrb[64].mxu0 %v12744_v0  ;;  %v12765_v52 = vld [vmem:[%s13385_s8 + $0x29c] ss:$144 sps:$4 sm:$0xff]  }
 0x2a9   : > { %v14504_v6 = vadd.f32 %v10863_v18, %v7018_v12  ;;  %v7021_v20 = vadd.f32 %v10754_v40, %v14260_v60  ;;  %7781 = vmatmul.mubr.bf16.vlgmr.msra.gmra.mrb[64].mxu1 %v12747_v11  ;;  %11376 = vmatpush3.bf16.msra.mxu0 %v12751_v44  ;;  %v12783_v11 = vld [vmem:[%s15558_s1 + $0x610] sm:$0xff]   ;;  %v12800_v12 = vld [vmem:[%s15558_s1 + $0x6d8] sm:$0xff]  }
 0x2aa   : > { %11488 = vmatpush3.bf16.msra.mxu1 %v12753_v59  ;;  %7627 = vmatprep.mubr.bf16.mxu0 %v12756_v19  ;;  %v12798_v59 = vld [vmem:[%s15558_s1 + $0x658] sm:$0xff]  }
 0x2ab   : > { %v14516_v24 = vadd.f32 %v10866_v32, %v7021_v20  ;;  %v10755_v60 = vpop.f32.mrb[216].mxu0  ;;  %7788 = vmatprep.mubr.bf16.mxu1 %v12759_v22  ;;  %11377 = vmatprep.subr.bf16.mxu0 %v12766_v29  ;;  %v12799_v28 = vld [vmem:[%s15558_s1 + $0x618] sm:$0xff]   ;;  %v12814_v32 = vld [vmem:[%s15558_s1 + $0x660] sm:$0xff]  }
 0x2ac   : > { %v10867_v48 = vpop.f32.mrb[216].mxu1  ;;  %v10756_v41 = vpop.f32.mrb[217].mxu0  ;;  %11489 = vmatprep.subr.bf16.mxu1 %v12768_v39 }
 0x2ad   : > { %v10757_v53 = vadd.f32 %v10756_v41, %v10755_v60  ;;  %v10868_v31 = vpop.f32.mrb[217].mxu1  ;;  %v10758_v49 = vpop.f32.mrb[218].mxu0  ;;  %11378 = vmatpush3.bf16.msra.mxu0 %v12767_v9  ;;  %v12760_v9 = vld [vmem:[%s13385_s8 + $0x290] ss:$144 sps:$4 sm:$0xff]   ;;  %v12772_v41 = vld [vmem:[%s13385_s8 + $0x3b4] ss:$144 sps:$4 sm:$0xff]  }
 0x2ae   : > { %v10869_v0 = vadd.f32 %v10868_v31, %v10867_v48  ;;  %v10870_v33 = vpop.f32.mrb[218].mxu1  ;;  %v10759_v8 = vpop.f32.mrb[219].mxu0  ;;  %11490 = vmatpush3.bf16.msra.mxu1 %v12769_v50  ;;  %11379 = vmatprep.subr.bf16.mxu0 %v12782_v10  ;;  %v12816_v50 = vld [vmem:[%s15558_s1 + $0x6e0] sm:$0xff]   ;;  %v12763_v48 = vld [vmem:[%s13385_s8 + $0x298] ss:$144 sps:$4 sm:$0xff]  }
 0x2af   : > { %v7026_v44 = vadd.f32 %v10757_v53, %v14285_v1  ;;  %v10760_v18 = vadd.f32 %v10759_v8, %v10758_v49  ;;  %v10871_v58 = vpop.f32.mrb[219].mxu1  ;;  %11491 = vmatprep.subr.bf16.mxu1 %v12784_v51  ;;  %v12775_v49 = vld [vmem:[%s13385_s8 + $0x3bc] ss:$144 sps:$4 sm:$0xff]   ;;  %v12817_v8 = vld [vmem:[%s15558_s1 + $0x6a0] sm:$0xff]  }
 0x2b0   : > { %v10872_v19 = vadd.f32 %v10871_v58, %v10870_v33  ;;  %7628 = vmatmul.mubr.bf16.gmra.mrb[68].mxu0 %v12754_v25  ;;  %v12831_v58 = vld [vmem:[%s15558_s1 + $0x628] sm:$0xff]  }
 0x2b1   : > { %v14538_v40 = vadd.f32 %v10869_v0, %v7026_v44  ;;  %v7029_v1 = vadd.f32 %v10760_v18, %v14298_v26  ;;  %7789 = vmatmul.mubr.bf16.gmra.mrb[68].mxu1 %v12757_v15  ;;  %7635 = vmatprep.mubr.bf16.mxu0 %v12762_v37  ;;  %v12801_v26 = vld [vmem:[%s15558_s1 + $0x698] sm:$0xff]   ;;  %v12815_v15 = vld [vmem:[%s15558_s1 + $0x620] sm:$0xff]   ;;  %v12832_v44 = vld [vmem:[%s15558_s1 + $0x6e8] sm:$0xff]  }
 0x2b2   : > { %7796 = vmatprep.mubr.bf16.mxu1 %v12765_v52  ;;  %11380 = vmatpush3.bf16.msra.mxu0 %v12783_v11  ;;  %v12830_v52 = vld [vmem:[%s15558_s1 + $0x668] sm:$0xff]  }
 0x2b3   : > { %v14544_v22 = vadd.f32 %v10872_v19, %v7029_v1  ;;  %v10761_v29 = vpop.f32.mrb[220].mxu0  ;;  %11492 = vmatpush3.bf16.msra.mxu1 %v12785_v47  ;;  %11381 = vmatprep.subr.bf16.mxu0 %v12798_v59  ;;  %v12846_v19 = vld [vmem:[%s15558_s1 + $0x670] sm:$0xff]  }
 0x2b4   : > { %v10873_v39 = vpop.f32.mrb[220].mxu1  ;;  %v10762_v20 = vpop.f32.mrb[221].mxu0  ;;  %11493 = vmatprep.subr.bf16.mxu1 %v12800_v12 }
 0x2b5   : > { %v10763_v10 = vadd.f32 %v10762_v20, %v10761_v29  ;;  %v10874_v60 = vpop.f32.mrb[221].mxu1  ;;  %v10764_v51 = vpop.f32.mrb[222].mxu0  ;;  %v12848_v29 = vld [vmem:[%s15558_s1 + $0x6f0] sm:$0xff]   ;;  %v12773_v20 = vld [vmem:[%s13385_s8 + $0x3b8] ss:$144 sps:$4 sm:$0xff]  }
 0x2b6   : > { %v10875_v25 = vadd.f32 %v10874_v60, %v10873_v39  ;;  %v10876_v53 = vpop.f32.mrb[222].mxu1  ;;  %v10765_v31 = vpop.f32.mrb[223].mxu0  ;;  %11382 = vmatpush3.bf16.msra.mxu0 %v12799_v28  ;;  %v12770_v28 = vld [vmem:[%s13385_s8 + $0x3b0] ss:$144 sps:$4 sm:$0xff]  }
 0x2b7   : > { %v7034_v37 = vadd.f32 %v10763_v10, %v14319_v45  ;;  %v10766_v0 = vadd.f32 %v10765_v31, %v10764_v51  ;;  %v10877_v33 = vpop.f32.mrb[223].mxu1  ;;  %11494 = vmatpush3.bf16.msra.mxu1 %v12801_v26  ;;  %11383 = vmatprep.subr.bf16.mxu0 %v12814_v32  ;;  %v12781_v51 = vld [vmem:[%s13385_s8 + $0x4dc] ss:$144 sps:$4 sm:$0xff]   ;;  %v12849_v31 = vld [vmem:[%s15558_s1 + $0x6b0] sm:$0xff]  }
 0x2b8   : > { %v10878_v11 = vadd.f32 %v10877_v33, %v10876_v53  ;;  %7636 = vmatmul.mubr.bf16.gmra.mrb[72].mxu0 %v12760_v9  ;;  %11495 = vmatprep.subr.bf16.mxu1 %v12816_v50  ;;  %v12778_v9 = vld [vmem:[%s13385_s8 + $0x4d4] ss:$144 sps:$4 sm:$0xff]   ;;  %v12863_v33 = vld [vmem:[%s15558_s1 + $0x638] sm:$0xff]  }
 0x2b9   : > { %v14572_v45 = vadd.f32 %v10875_v25, %v7034_v37  ;;  %v7037_v18 = vadd.f32 %v10766_v0, %v14323_v21  ;;  %7797 = vmatmul.mubr.bf16.gmra.mrb[72].mxu1 %v12763_v48  ;;  %7643 = vmatprep.mubr.bf16.mxu0 %v12772_v41  ;;  %v12833_v21 = vld [vmem:[%s15558_s1 + $0x6a8] sm:$0xff]   ;;  %v12847_v48 = vld [vmem:[%s15558_s1 + $0x630] sm:$0xff]   ;;  %v12864_v37 = vld [vmem:[%s15558_s1 + $0x6f8] sm:$0xff]  }
 0x2ba   : > { %7804 = vmatprep.mubr.bf16.mxu1 %v12775_v49  ;;  %11384 = vmatpush3.bf16.msra.mxu0 %v12815_v15  ;;  %v12862_v49 = vld [vmem:[%s15558_s1 + $0x678] sm:$0xff]  }
 0x2bb   : > { %v14578_v47 = vadd.f32 %v10878_v11, %v7037_v18  ;;  %v10767_v59 = vpop.f32.mrb[224].mxu0  ;;  %11496 = vmatpush3.bf16.msra.mxu1 %v12817_v8  ;;  %11385 = vmatprep.subr.bf16.mxu0 %v12830_v52  ;;  %v12878_v11 = vld [vmem:[%s15558_s1 + $0x740] sm:$0xff]  }
 0x2bc   : > { %v10879_v12 = vpop.f32.mrb[224].mxu1  ;;  %v10768_v1 = vpop.f32.mrb[225].mxu0  ;;  %11497 = vmatprep.subr.bf16.mxu1 %v12832_v44 }
 0x2bd   : > { %v10769_v26 = vadd.f32 %v10768_v1, %v10767_v59  ;;  %v10880_v32 = vpop.f32.mrb[225].mxu1  ;;  %v10770_v39 = vpop.f32.mrb[226].mxu0  ;;  %v12880_v59 = vld [vmem:[%s15558_s1 + $0x7c0] sm:$0xff]   ;;  %v12779_v1 = vld [vmem:[%s13385_s8 + $0x4d8] ss:$144 sps:$4 sm:$0xff]  }
 0x2be   : > { %v10881_v50 = vadd.f32 %v10880_v32, %v10879_v12  ;;  %v10882_v10 = vpop.f32.mrb[226].mxu1  ;;  %v10771_v60 = vpop.f32.mrb[227].mxu0  ;;  %11386 = vmatpush3.bf16.msra.mxu0 %v12831_v58  ;;  %v12776_v58 = vld [vmem:[%s13385_s8 + $0x4d0] ss:$144 sps:$4 sm:$0xff]  }
 0x2bf   : > { %v7042_v41 = vadd.f32 %v10769_v26, %v14353_v30  ;;  %v10772_v25 = vadd.f32 %v10771_v60, %v10770_v39  ;;  %v10883_v53 = vpop.f32.mrb[227].mxu1  ;;  %11498 = vmatpush3.bf16.msra.mxu1 %v12833_v21  ;;  %11387 = vmatprep.subr.bf16.mxu0 %v12846_v19  ;;  %v12791_v39 = vld [vmem:[%s13385_s8 + $0x5fc] ss:$144 sps:$4 sm:$0xff]  }
 0x2c0   : > { %v10884_v15 = vadd.f32 %v10883_v53, %v10882_v10  ;;  %7644 = vmatmul.mubr.bf16.gmra.mrb[76].mxu0 %v12770_v28  ;;  %11499 = vmatprep.subr.bf16.mxu1 %v12848_v29  ;;  %v12788_v28 = vld [vmem:[%s13385_s8 + $0x5f4] ss:$144 sps:$4 sm:$0xff]   ;;  %v12786_v53 = vld [vmem:[%s13385_s8 + $0x5f0] ss:$144 sps:$4 sm:$0xff]  }
 0x2c1   : > { %v14606_v30 = vadd.f32 %v10881_v50, %v7042_v41  ;;  %v7045_v0 = vadd.f32 %v10772_v25, %v14366_v56  ;;  %7805 = vmatmul.mubr.bf16.gmra.mrb[76].mxu1 %v12773_v20  ;;  %7651 = vmatprep.mubr.bf16.mxu0 %v12778_v9  ;;  %v12865_v56 = vld [vmem:[%s15558_s1 + $0x6b8] sm:$0xff]  }
 0x2c2   : > { %7812 = vmatprep.mubr.bf16.mxu1 %v12781_v51  ;;  %11388 = vmatpush3.bf16.msra.mxu0 %v12847_v48 }
 0x2c3   : > { %v14612_v8 = vadd.f32 %v10884_v15, %v7045_v0  ;;  %v10773_v52 = vpop.f32.mrb[228].mxu0  ;;  %11500 = vmatpush3.bf16.msra.mxu1 %v12849_v31  ;;  %11389 = vmatprep.subr.bf16.mxu0 %v12862_v49  ;;  %v12794_v0 = vld [vmem:[%s13385_s8 + $0x714] ss:$144 sps:$4 sm:$0xff]  }
 0x2c4   : > { %v10885_v44 = vpop.f32.mrb[228].mxu1  ;;  %v10774_v18 = vpop.f32.mrb[229].mxu0  ;;  %11501 = vmatprep.subr.bf16.mxu1 %v12864_v37  ;;  %v12789_v37 = vld [vmem:[%s13385_s8 + $0x5f8] ss:$144 sps:$4 sm:$0xff]  }
 0x2c5   : > { %v10775_v21 = vadd.f32 %v10774_v18, %v10773_v52  ;;  %v10886_v19 = vpop.f32.mrb[229].mxu1  ;;  %v10776_v12 = vpop.f32.mrb[230].mxu0 }
 0x2c6   : > { %v10887_v29 = vadd.f32 %v10886_v19, %v10885_v44  ;;  %v10888_v26 = vpop.f32.mrb[230].mxu1  ;;  %v10777_v32 = vpop.f32.mrb[231].mxu0  ;;  %11390 = vmatpush3.bf16.msra.mxu0 %v12863_v33 }
 0x2c7   : > { %v7050_v20 = vadd.f32 %v10775_v21, %v14372_v3  ;;  %v10778_v9 = vadd.f32 %v10777_v32, %v10776_v12  ;;  %v10889_v50 = vpop.f32.mrb[231].mxu1  ;;  %11502 = vmatpush3.bf16.msra.mxu1 %v12865_v56  ;;  %11599 = vmatprep.subr.bf16.mxu0 %v12878_v11 }
 0x2c8   : > { %v10890_v10 = vadd.f32 %v10889_v50, %v10888_v26  ;;  %7652 = vmatmul.mubr.bf16.gmra.mrb[80].mxu0 %v12776_v58  ;;  %11711 = vmatprep.subr.bf16.mxu1 %v12880_v59 }
 0x2c9   : > { %v14628_v60 = vadd.f32 %v10887_v29, %v7050_v20  ;;  %v7053_v51 = vadd.f32 %v10778_v9, %v14375_v14  ;;  %7813 = vmatmul.mubr.bf16.gmra.mrb[80].mxu1 %v12779_v1  ;;  %7659 = vmatprep.mubr.bf16.mxu0 %v12788_v28  ;;  %v12797_v14 = vld [vmem:[%s13385_s8 + $0x71c] ss:$144 sps:$4 sm:$0xff]   ;;  %v12804_v20 = vld [vmem:[%s13385_s8 + $0x834] ss:$144 sps:$4 sm:$0xff]  }
 0x2ca   : > { %7820 = vmatprep.mubr.bf16.mxu1 %v12791_v39  ;;  %v12795_v39 = vld [vmem:[%s13385_s8 + $0x718] ss:$144 sps:$4 sm:$0xff]  }
 0x2cb   : > { %v14631_v48 = vadd.f32 %v10890_v10, %v7053_v51  ;;  %v10779_v3 = vpop.f32.mrb[232].mxu0 }
 0x2cc   : > { %v10891_v41 = vpop.f32.mrb[232].mxu1  ;;  %v10780_v25 = vpop.f32.mrb[233].mxu0 }
 0x2cd   : > { %v10781_v31 = vadd.f32 %v10780_v25, %v10779_v3  ;;  %v10892_v49 = vpop.f32.mrb[233].mxu1  ;;  %v10782_v15 = vpop.f32.mrb[234].mxu0 }
 0x2ce   : > { %v10893_v33 = vadd.f32 %v10892_v49, %v10891_v41  ;;  %v10894_v52 = vpop.f32.mrb[234].mxu1  ;;  %v10783_v56 = vpop.f32.mrb[235].mxu0 }
 0x2cf   : > { %v7058_v11 = vadd.f32 %v10781_v31, %v14382_v4  ;;  %v10784_v44 = vadd.f32 %v10783_v56, %v10782_v15  ;;  %v10895_v18 = vpop.f32.mrb[235].mxu1  ;;  %v12792_v4 = vld [vmem:[%s13385_s8 + $0x710] ss:$144 sps:$4 sm:$0xff]  }
 0x2d0   : > { %v10896_v58 = vadd.f32 %v10895_v18, %v10894_v52  ;;  %7660 = vmatmul.mubr.bf16.gmra.mrb[84].mxu0 %v12786_v53 }
 0x2d1   : > { %v14638_v59 = vadd.f32 %v10893_v33, %v7058_v11  ;;  %v7061_v21 = vadd.f32 %v10784_v44, %v14386_v38  ;;  %7821 = vmatmul.mubr.bf16.gmra.mrb[84].mxu1 %v12789_v37  ;;  %7667 = vmatprep.mubr.bf16.mxu0 %v12794_v0  ;;  %v12807_v38 = vld [vmem:[%s13385_s8 + $0x83c] ss:$144 sps:$4 sm:$0xff]   ;;  %v12810_v11 = vld [vmem:[%s13385_s8 + $0x954] ss:$144 sps:$4 sm:$0xff]  }
 0x2d2   : > { %7828 = vmatprep.mubr.bf16.mxu1 %v12797_v14  ;;  %v12805_v14 = vld [vmem:[%s13385_s8 + $0x838] ss:$144 sps:$4 sm:$0xff]  }
 0x2d3   : > { %v14641_v19 = vadd.f32 %v10896_v58, %v7061_v21  ;;  %v10785_v12 = vpop.f32.mrb[236].mxu0 }
 0x2d4   : > { %v10897_v1 = vpop.f32.mrb[236].mxu1  ;;  %v10786_v28 = vpop.f32.mrb[237].mxu0 }
 0x2d5   : > { %v10787_v29 = vadd.f32 %v10786_v28, %v10785_v12  ;;  %v10898_v26 = vpop.f32.mrb[237].mxu1  ;;  %v10788_v32 = vpop.f32.mrb[238].mxu0 }
 0x2d6   : > { %v10899_v9 = vadd.f32 %v10898_v26, %v10897_v1  ;;  %v10900_v50 = vpop.f32.mrb[238].mxu1  ;;  %v10789_v10 = vpop.f32.mrb[239].mxu0 }
 0x2d7   : > { %v7066_v51 = vadd.f32 %v10787_v29, %v14392_v5  ;;  %v10790_v3 = vadd.f32 %v10789_v10, %v10788_v32  ;;  %v10901_v41 = vpop.f32.mrb[239].mxu1  ;;  %v12802_v5 = vld [vmem:[%s13385_s8 + $0x830] ss:$144 sps:$4 sm:$0xff]  }
 0x2d8   : > { %v10902_v25 = vadd.f32 %v10901_v41, %v10900_v50  ;;  %7668 = vmatmul.mubr.bf16.gmra.mrb[88].mxu0 %v12792_v4 }
 0x2d9   : > { %v14648_v53 = vadd.f32 %v10899_v9, %v7066_v51  ;;  %v7069_v31 = vadd.f32 %v10790_v3, %v14395_v23  ;;  %7829 = vmatmul.mubr.bf16.gmra.mrb[88].mxu1 %v12795_v39  ;;  %7675 = vmatprep.mubr.bf16.mxu0 %v12804_v20  ;;  %v12813_v23 = vld [vmem:[%s13385_s8 + $0x95c] ss:$144 sps:$4 sm:$0xff]   ;;  %v12820_v51 = vld [vmem:[%s13385_s8 + $0xa74] ss:$144 sps:$4 sm:$0xff]  }
 0x2da   : > { %7836 = vmatprep.mubr.bf16.mxu1 %v12807_v38  ;;  %v12811_v38 = vld [vmem:[%s13385_s8 + $0x958] ss:$144 sps:$4 sm:$0xff]  }
 0x2db   : > { %v14651_v49 = vadd.f32 %v10902_v25, %v7069_v31  ;;  %v10791_v15 = vpop.f32.mrb[240].mxu0 }
 0x2dc   : > { %v10903_v37 = vpop.f32.mrb[240].mxu1  ;;  %v10792_v0 = vpop.f32.mrb[241].mxu0 }
 0x2dd   : > { %v10793_v33 = vadd.f32 %v10792_v0, %v10791_v15  ;;  %v10904_v52 = vpop.f32.mrb[241].mxu1  ;;  %v10794_v56 = vpop.f32.mrb[242].mxu0 }
 0x2de   : > { %v10905_v44 = vadd.f32 %v10904_v52, %v10903_v37  ;;  %v10906_v18 = vpop.f32.mrb[242].mxu1  ;;  %v10795_v58 = vpop.f32.mrb[243].mxu0 }
 0x2df   : > { %v7074_v21 = vadd.f32 %v10793_v33, %v14402_v13  ;;  %v10796_v12 = vadd.f32 %v10795_v58, %v10794_v56  ;;  %v10907_v1 = vpop.f32.mrb[243].mxu1  ;;  %v12808_v13 = vld [vmem:[%s13385_s8 + $0x950] ss:$144 sps:$4 sm:$0xff]  }
 0x2e0   : > { %v10908_v28 = vadd.f32 %v10907_v1, %v10906_v18  ;;  %7676 = vmatmul.mubr.bf16.gmra.mrb[92].mxu0 %v12802_v5 }
 0x2e1   : > { %v14658_v4 = vadd.f32 %v10905_v44, %v7074_v21  ;;  %v7077_v29 = vadd.f32 %v10796_v12, %v14405_v57  ;;  %7837 = vmatmul.mubr.bf16.gmra.mrb[92].mxu1 %v12805_v14  ;;  %7683 = vmatprep.mubr.bf16.mxu0 %v12810_v11  ;;  %v12823_v57 = vld [vmem:[%s13385_s8 + $0xa7c] ss:$144 sps:$4 sm:$0xff]   ;;  %v12826_v21 = vld [vmem:[%s13385_s8 + $0xb94] ss:$144 sps:$4 sm:$0xff]  }
 0x2e2   : > { %7844 = vmatprep.mubr.bf16.mxu1 %v12813_v23  ;;  %v12821_v23 = vld [vmem:[%s13385_s8 + $0xa78] ss:$144 sps:$4 sm:$0xff]  }
 0x2e3   : > { %v14661_v26 = vadd.f32 %v10908_v28, %v7077_v29  ;;  %v10797_v32 = vpop.f32.mrb[244].mxu0 }
 0x2e4   : > { %v10909_v39 = vpop.f32.mrb[244].mxu1  ;;  %v10798_v20 = vpop.f32.mrb[245].mxu0 }
 0x2e5   : > { %v10799_v9 = vadd.f32 %v10798_v20, %v10797_v32  ;;  %v10910_v50 = vpop.f32.mrb[245].mxu1  ;;  %v10800_v10 = vpop.f32.mrb[246].mxu0 }
 0x2e6   : > { %v10911_v3 = vadd.f32 %v10910_v50, %v10909_v39  ;;  %v10912_v41 = vpop.f32.mrb[246].mxu1  ;;  %v10801_v25 = vpop.f32.mrb[247].mxu0 }
 0x2e7   : > { %v7082_v31 = vadd.f32 %v10799_v9, %v14412_v35  ;;  %v10802_v15 = vadd.f32 %v10801_v25, %v10800_v10  ;;  %v10913_v37 = vpop.f32.mrb[247].mxu1  ;;  %v12818_v35 = vld [vmem:[%s13385_s8 + $0xa70] ss:$144 sps:$4 sm:$0xff]  }
 0x2e8   : > { %v10914_v0 = vadd.f32 %v10913_v37, %v10912_v41  ;;  %7684 = vmatmul.mubr.bf16.gmra.mrb[96].mxu0 %v12808_v13 }
 0x2e9   : > { %v14668_v5 = vadd.f32 %v10911_v3, %v7082_v31  ;;  %v7085_v33 = vadd.f32 %v10802_v15, %v14415_v43  ;;  %7845 = vmatmul.mubr.bf16.gmra.mrb[96].mxu1 %v12811_v38  ;;  %7691 = vmatprep.mubr.bf16.mxu0 %v12820_v51  ;;  %v12829_v43 = vld [vmem:[%s13385_s8 + $0xb9c] ss:$144 sps:$4 sm:$0xff]   ;;  %v12836_v31 = vld [vmem:[%s13385_s8 + $0xcb4] ss:$144 sps:$4 sm:$0xff]  }
 0x2ea   : > { %7852 = vmatprep.mubr.bf16.mxu1 %v12823_v57  ;;  %v12827_v57 = vld [vmem:[%s13385_s8 + $0xb98] ss:$144 sps:$4 sm:$0xff]  }
 0x2eb   : > { %v14671_v52 = vadd.f32 %v10914_v0, %v7085_v33  ;;  %v10803_v56 = vpop.f32.mrb[248].mxu0 }
 0x2ec   : > { %v10915_v14 = vpop.f32.mrb[248].mxu1  ;;  %v10804_v11 = vpop.f32.mrb[249].mxu0 }
 0x2ed   : > { %v10805_v44 = vadd.f32 %v10804_v11, %v10803_v56  ;;  %v10916_v18 = vpop.f32.mrb[249].mxu1  ;;  %v10806_v58 = vpop.f32.mrb[250].mxu0 }
 0x2ee   : > { %v10917_v12 = vadd.f32 %v10916_v18, %v10915_v14  ;;  %v10918_v1 = vpop.f32.mrb[250].mxu1  ;;  %v10807_v28 = vpop.f32.mrb[251].mxu0 }
 0x2ef   : > { %v7090_v29 = vadd.f32 %v10805_v44, %v14422_v7  ;;  %v10808_v32 = vadd.f32 %v10807_v28, %v10806_v58  ;;  %v10919_v39 = vpop.f32.mrb[251].mxu1  ;;  %v12824_v7 = vld [vmem:[%s13385_s8 + $0xb90] ss:$144 sps:$4 sm:$0xff]  }
 0x2f0   : > { %v10920_v20 = vadd.f32 %v10919_v39, %v10918_v1  ;;  %7692 = vmatmul.mubr.bf16.gmra.mrb[100].mxu0 %v12818_v35 }
 0x2f1   : > { %v14678_v13 = vadd.f32 %v10917_v12, %v7090_v29  ;;  %v7093_v9 = vadd.f32 %v10808_v32, %v14425_v17  ;;  %7853 = vmatmul.mubr.bf16.gmra.mrb[100].mxu1 %v12821_v23  ;;  %7699 = vmatprep.mubr.bf16.mxu0 %v12826_v21  ;;  %v12839_v17 = vld [vmem:[%s13385_s8 + $0xcbc] ss:$144 sps:$4 sm:$0xff]   ;;  %v12842_v29 = vld [vmem:[%s13385_s8 + $0xdd4] ss:$144 sps:$4 sm:$0xff]  }
 0x2f2   : > { %7860 = vmatprep.mubr.bf16.mxu1 %v12829_v43  ;;  %v12837_v43 = vld [vmem:[%s13385_s8 + $0xcb8] ss:$144 sps:$4 sm:$0xff]  }
 0x2f3   : > { %v14681_v50 = vadd.f32 %v10920_v20, %v7093_v9  ;;  %v10809_v10 = vpop.f32.mrb[252].mxu0 }
 0x2f4   : > { %v10921_v38 = vpop.f32.mrb[252].mxu1  ;;  %v10810_v51 = vpop.f32.mrb[253].mxu0 }
 0x2f5   : > { %v10811_v3 = vadd.f32 %v10810_v51, %v10809_v10  ;;  %v10922_v41 = vpop.f32.mrb[253].mxu1  ;;  %v10812_v25 = vpop.f32.mrb[254].mxu0 }
 0x2f6   : > { %v10923_v15 = vadd.f32 %v10922_v41, %v10921_v38  ;;  %v10924_v37 = vpop.f32.mrb[254].mxu1  ;;  %v10813_v0 = vpop.f32.mrb[255].mxu0 }
 0x2f7   : > { %v7098_v33 = vadd.f32 %v10811_v3, %v14432_v46  ;;  %v10814_v56 = vadd.f32 %v10813_v0, %v10812_v25  ;;  %v10925_v14 = vpop.f32.mrb[255].mxu1  ;;  %v12834_v46 = vld [vmem:[%s13385_s8 + $0xcb0] ss:$144 sps:$4 sm:$0xff]  }
 0x2f8   : > { %v10926_v11 = vadd.f32 %v10925_v14, %v10924_v37  ;;  %7700 = vmatmul.mubr.bf16.gmra.mrb[104].mxu0 %v12824_v7 }
 0x2f9   : > { %v14688_v35 = vadd.f32 %v10923_v15, %v7098_v33  ;;  %v7101_v44 = vadd.f32 %v10814_v56, %v14435_v63  ;;  %7861 = vmatmul.mubr.bf16.gmra.mrb[104].mxu1 %v12827_v57  ;;  %7707 = vmatprep.mubr.bf16.mxu0 %v12836_v31  ;;  %v12845_v63 = vld [vmem:[%s13385_s8 + $0xddc] ss:$144 sps:$4 sm:$0xff]   ;;  %v12852_v33 = vld [vmem:[%s13385_s8 + $0xef4] ss:$144 sps:$4 sm:$0xff]  }
 0x2fa   : > { %7868 = vmatprep.mubr.bf16.mxu1 %v12839_v17  ;;  %v12843_v17 = vld [vmem:[%s13385_s8 + $0xdd8] ss:$144 sps:$4 sm:$0xff]  }
 0x2fb   : > { %v14691_v18 = vadd.f32 %v10926_v11, %v7101_v44  ;;  %v10943_v58 = vpop.f32.mrb[0].mxu0  ;;  %v12855_v11 = vld [vmem:[%s13385_s8 + $0xefc] ss:$144 sps:$4 sm:$0xff]  }
 0x2fc   : > { %v11055_v23 = vpop.f32.mrb[0].mxu1  ;;  %v10944_v21 = vpop.f32.mrb[1].mxu0 }
 0x2fd   : > { %v10945_v12 = vadd.f32 %v10944_v21, %v10943_v58  ;;  %v11056_v1 = vpop.f32.mrb[1].mxu1  ;;  %v10946_v28 = vpop.f32.mrb[2].mxu0 }
 0x2fe   : > { %v11057_v32 = vadd.f32 %v11056_v1, %v11055_v23  ;;  %v11058_v39 = vpop.f32.mrb[2].mxu1  ;;  %v10947_v20 = vpop.f32.mrb[3].mxu0 }
 0x2ff   : > { %v7300_v9 = vadd.f32 %v10945_v12, %v14442_v16  ;;  %v10948_v10 = vadd.f32 %v10947_v20, %v10946_v28  ;;  %v11059_v38 = vpop.f32.mrb[3].mxu1  ;;  %v12840_v16 = vld [vmem:[%s13385_s8 + $0xdd0] ss:$144 sps:$4 sm:$0xff]  }
 0x300   : > { %v11060_v51 = vadd.f32 %v11059_v38, %v11058_v39  ;;  %7708 = vmatmul.mubr.bf16.gmra.mrb[108].mxu0 %v12834_v46 }
 0x301   : > { %v7303_v7 = vadd.f32 %v10948_v10, %v14445_v34  ;;  %7869 = vmatmul.mubr.bf16.gmra.mrb[108].mxu1 %v12837_v43  ;;  %7715 = vmatprep.mubr.bf16.mxu0 %v12842_v29  ;;  %v14699_v3 = vadd.f32 %v11057_v32, %v7300_v9  ;;  %v12858_v9 = vld [vmem:[%s13385_s8 + $0x1014] ss:$144 sps:$4 sm:$0xff]  }
 0x302   : > { %7876 = vmatprep.mubr.bf16.mxu1 %v12845_v63  ;;  %v12853_v63 = vld [vmem:[%s13385_s8 + $0xef8] ss:$144 sps:$4 sm:$0xff]  }
 0x303   : > { %v10949_v41 = vpop.f32.mrb[4].mxu0  ;;  %v14701_v25 = vadd.f32 %v11060_v51, %v7303_v7  ;;  %v12861_v51 = vld [vmem:[%s13385_s8 + $0x101c] ss:$144 sps:$4 sm:$0xff]  }
 0x304   : > { %v11061_v57 = vpop.f32.mrb[4].mxu1  ;;  %v10950_v31 = vpop.f32.mrb[5].mxu0 }
 0x305   : > { %v10951_v15 = vadd.f32 %v10950_v31, %v10949_v41  ;;  %v11062_v37 = vpop.f32.mrb[5].mxu1  ;;  %v10952_v0 = vpop.f32.mrb[6].mxu0 }
 0x306   : > { %v11063_v56 = vadd.f32 %v11062_v37, %v11061_v57  ;;  %v11064_v14 = vpop.f32.mrb[6].mxu1  ;;  %v10953_v34 = vpop.f32.mrb[7].mxu0 }
 0x307   : > { %v7308_v44 = vadd.f32 %v10951_v15, %v14452_v54  ;;  %v10954_v58 = vadd.f32 %v10953_v34, %v10952_v0  ;;  %v11065_v23 = vpop.f32.mrb[7].mxu1  ;;  %v12850_v54 = vld [vmem:[%s13385_s8 + $0xef0] ss:$144 sps:$4 sm:$0xff]  }
 0x308   : > { %v11066_v21 = vadd.f32 %v11065_v23, %v11064_v14  ;;  %7716 = vmatmul.mubr.bf16.gmra.mrb[112].mxu0 %v12840_v16 }
 0x309   : > { %v7311_v46 = vadd.f32 %v10954_v58, %v14455_v2  ;;  %7877 = vmatmul.mubr.bf16.gmra.mrb[112].mxu1 %v12843_v17  ;;  %7723 = vmatprep.mubr.bf16.mxu0 %v12852_v33  ;;  %v14709_v12 = vadd.f32 %v11063_v56, %v7308_v44  ;;  %v12868_v44 = vld [vmem:[%s13385_s8 + $0x1134] ss:$144 sps:$4 sm:$0xff]  }
 0x30a   : > { %7884 = vmatprep.mubr.bf16.mxu1 %v12855_v11  ;;  %v12859_v11 = vld [vmem:[%s13385_s8 + $0x1018] ss:$144 sps:$4 sm:$0xff]  }
 0x30b   : > { %v10955_v1 = vpop.f32.mrb[8].mxu0  ;;  %v14711_v28 = vadd.f32 %v11066_v21, %v7311_v46  ;;  %v12871_v21 = vld [vmem:[%s13385_s8 + $0x113c] ss:$144 sps:$4 sm:$0xff]  }
 0x30c   : > { %v11067_v43 = vpop.f32.mrb[8].mxu1  ;;  %v10956_v29 = vpop.f32.mrb[9].mxu0 }
 0x30d   : > { %v10957_v32 = vadd.f32 %v10956_v29, %v10955_v1  ;;  %v11068_v39 = vpop.f32.mrb[9].mxu1  ;;  %v10958_v20 = vpop.f32.mrb[10].mxu0 }
 0x30e   : > { %v11069_v10 = vadd.f32 %v11068_v39, %v11067_v43  ;;  %v11070_v38 = vpop.f32.mrb[10].mxu1  ;;  %v10959_v2 = vpop.f32.mrb[11].mxu0 }
 0x30f   : > { %v7316_v7 = vadd.f32 %v10957_v32, %v14462_v61  ;;  %v10960_v41 = vadd.f32 %v10959_v2, %v10958_v20  ;;  %v11071_v57 = vpop.f32.mrb[11].mxu1  ;;  %v12856_v61 = vld [vmem:[%s13385_s8 + $0x1010] ss:$144 sps:$4 sm:$0xff]  }
 0x310   : > { %v11072_v31 = vadd.f32 %v11071_v57, %v11070_v38  ;;  %7724 = vmatmul.mubr.bf16.gmra.mrb[116].mxu0 %v12850_v54 }
 0x311   : > { %v7319_v16 = vadd.f32 %v10960_v41, %v14465_v42  ;;  %7885 = vmatmul.mubr.bf16.gmra.mrb[116].mxu1 %v12853_v63  ;;  %7731 = vmatprep.mubr.bf16.mxu0 %v12858_v9  ;;  %v14719_v15 = vadd.f32 %v11069_v10, %v7316_v7  ;;  %v12874_v7 = vld [vmem:[%s13385_s8 + $0x64] ss:$144 sps:$4 sm:$0xff]  }
 0x312   : > { %7892 = vmatprep.mubr.bf16.mxu1 %v12861_v51  ;;  %v12869_v51 = vld [vmem:[%s13385_s8 + $0x1138] ss:$144 sps:$4 sm:$0xff]  }
 0x313   : > { %v10961_v37 = vpop.f32.mrb[12].mxu0  ;;  %v14721_v0 = vadd.f32 %v11072_v31, %v7319_v16  ;;  %v12877_v31 = vld [vmem:[%s13385_s8 + $0x6c] ss:$144 sps:$4 sm:$0xff]  }
 0x314   : > { %v11073_v17 = vpop.f32.mrb[12].mxu1  ;;  %v10962_v33 = vpop.f32.mrb[13].mxu0 }
 0x315   : > { %v10963_v56 = vadd.f32 %v10962_v33, %v10961_v37  ;;  %v11074_v14 = vpop.f32.mrb[13].mxu1  ;;  %v10964_v34 = vpop.f32.mrb[14].mxu0 }
 0x316   : > { %v11075_v58 = vadd.f32 %v11074_v14, %v11073_v17  ;;  %v11076_v23 = vpop.f32.mrb[14].mxu1  ;;  %v10965_v42 = vpop.f32.mrb[15].mxu0 }
 0x317   : > { %v7324_v46 = vadd.f32 %v10963_v56, %v14472_v62  ;;  %v10966_v1 = vadd.f32 %v10965_v42, %v10964_v34  ;;  %v11077_v43 = vpop.f32.mrb[15].mxu1  ;;  %v12866_v62 = vld [vmem:[%s13385_s8 + $0x1130] ss:$144 sps:$4 sm:$0xff]  }
 0x318   : > { %v11078_v29 = vadd.f32 %v11077_v43, %v11076_v23  ;;  %7732 = vmatmul.mubr.bf16.gmra.mrb[120].mxu0 %v12856_v61 }
 0x319   : > { %v7327_v54 = vadd.f32 %v10966_v1, %v14475_v55  ;;  %7893 = vmatmul.mubr.bf16.gmra.mrb[120].mxu1 %v12859_v11  ;;  %7739 = vmatprep.mubr.bf16.mxu0 %v12868_v44  ;;  %v14729_v32 = vadd.f32 %v11075_v58, %v7324_v46 }
 0x31a   : > { %7900 = vmatprep.mubr.bf16.mxu1 %v12871_v21  ;;  %v12875_v21 = vld [vmem:[%s13385_s8 + $0x68] ss:$144 sps:$4 sm:$0xff]  }
 0x31b   : > { %v10967_v39 = vpop.f32.mrb[16].mxu0  ;;  %v14731_v20 = vadd.f32 %v11078_v29, %v7327_v54  ;;  %v12881_v29 = vld [vmem:[%s15558_s1 + $0x780] sm:$0xff]  }
 0x31c   : > { %v11079_v63 = vpop.f32.mrb[16].mxu1  ;;  %v10968_v9 = vpop.f32.mrb[17].mxu0  ;;  %v12884_v54 = vld [vmem:[%s13385_s8 + $0x184] ss:$144 sps:$4 sm:$0xff]  }
 0x31d   : > { %v10969_v10 = vadd.f32 %v10968_v9, %v10967_v39  ;;  %v11080_v38 = vpop.f32.mrb[17].mxu1  ;;  %v10970_v2 = vpop.f32.mrb[18].mxu0 }
 0x31e   : > { %v11081_v41 = vadd.f32 %v11080_v38, %v11079_v63  ;;  %v11082_v57 = vpop.f32.mrb[18].mxu1  ;;  %v10971_v55 = vpop.f32.mrb[19].mxu0 }
 0x31f   : > { %v7332_v16 = vadd.f32 %v10969_v10, %v14482_v36  ;;  %v10972_v37 = vadd.f32 %v10971_v55, %v10970_v2  ;;  %v11083_v17 = vpop.f32.mrb[19].mxu1  ;;  %v12872_v36 = vld [vmem:[%s13385_s8 + $0x60] ss:$144 sps:$4 sm:$0xff]   ;;  %v12894_v10 = vld [vmem:[%s15558_s1 + $0x748] sm:$0xff]  }
 0x320   : > { %v11084_v33 = vadd.f32 %v11083_v17, %v11082_v57  ;;  %7740 = vmatmul.mubr.bf16.gmra.mrb[124].mxu0 %v12866_v62  ;;  %v12887_v62 = vld [vmem:[%s13385_s8 + $0x18c] ss:$144 sps:$4 sm:$0xff]   ;;  %v12912_v55 = vld [vmem:[%s15558_s1 + $0x7d0] sm:$0xff]  }
 0x321   : > { %v7335_v61 = vadd.f32 %v10972_v37, %v14485_v27  ;;  %7901 = vmatmul.mubr.bf16.gmra.mrb[124].mxu1 %v12869_v51  ;;  %7941 = vmatprep.mubr.bf16.mxu0 %v12874_v7  ;;  %v14739_v56 = vadd.f32 %v11081_v41, %v7332_v16  ;;  %v12879_v27 = vld [vmem:[%s15558_s1 + $0x700] sm:$0xff]   ;;  %v12896_v2 = vld [vmem:[%s15558_s1 + $0x7c8] sm:$0xff]  }
 0x322   : > { %8102 = vmatprep.mubr.bf16.mxu1 %v12877_v31  ;;  %v12897_v41 = vld [vmem:[%s15558_s1 + $0x788] sm:$0xff]   ;;  %v12882_v17 = vld [vmem:[%s13385_s8 + $0x180] ss:$144 sps:$4 sm:$0xff]  }
 0x323   : > { %v10973_v14 = vpop.f32.mrb[20].mxu0  ;;  %v14741_v34 = vadd.f32 %v11084_v33, %v7335_v61 }
 0x324   : > { %v11085_v11 = vpop.f32.mrb[20].mxu1  ;;  %v10974_v44 = vpop.f32.mrb[21].mxu0 }
 0x325   : > { %v10975_v58 = vadd.f32 %v10974_v44, %v10973_v14  ;;  %v11086_v23 = vpop.f32.mrb[21].mxu1  ;;  %v10976_v42 = vpop.f32.mrb[22].mxu0  ;;  %v12890_v44 = vld [vmem:[%s13385_s8 + $0x2a4] ss:$144 sps:$4 sm:$0xff]  }
 0x326   : > { %v11087_v46 = vadd.f32 %v11086_v23, %v11085_v11  ;;  %v11088_v1 = vpop.f32.mrb[22].mxu1  ;;  %v10977_v43 = vpop.f32.mrb[23].mxu0  ;;  %v12885_v11 = vld [vmem:[%s13385_s8 + $0x188] ss:$144 sps:$4 sm:$0xff]  }
 0x327   : > { %v7340_v39 = vadd.f32 %v10975_v58, %v14504_v6  ;;  %v10978_v63 = vadd.f32 %v10977_v43, %v10976_v42  ;;  %v11089_v9 = vpop.f32.mrb[23].mxu1  ;;  %v12895_v6 = vld [vmem:[%s15558_s1 + $0x708] sm:$0xff]   ;;  %v12913_v43 = vld [vmem:[%s15558_s1 + $0x790] sm:$0xff]  }
 0x328   : > { %v11090_v38 = vadd.f32 %v11089_v9, %v11088_v1  ;;  %7942 = vmatmul.mubr.bf16.vlgmr.msra.gmra.mrb[128].mxu0 %v12872_v36  ;;  %v12893_v42 = vld [vmem:[%s13385_s8 + $0x2ac] ss:$144 sps:$4 sm:$0xff]  }
 0x329   : > { %v7343_v51 = vadd.f32 %v10978_v63, %v14516_v24  ;;  %8103 = vmatmul.mubr.bf16.vlgmr.msra.gmra.mrb[128].mxu1 %v12875_v21  ;;  %11600 = vmatpush3.bf16.msra.mxu0 %v12879_v27  ;;  %v14764_v7 = vadd.f32 %v11087_v46, %v7340_v39  ;;  %v12910_v24 = vld [vmem:[%s15558_s1 + $0x750] sm:$0xff]   ;;  %v12928_v39 = vld [vmem:[%s15558_s1 + $0x7d8] sm:$0xff]  }
 0x32a   : > { %11712 = vmatpush3.bf16.msra.mxu1 %v12881_v29  ;;  %7949 = vmatprep.mubr.bf16.mxu0 %v12884_v54  ;;  %v12911_v21 = vld [vmem:[%s15558_s1 + $0x710] sm:$0xff]   ;;  %v12926_v29 = vld [vmem:[%s15558_s1 + $0x758] sm:$0xff]  }
 0x32b   : > { %v10979_v57 = vpop.f32.mrb[24].mxu0  ;;  %8110 = vmatprep.mubr.bf16.mxu1 %v12887_v62  ;;  %11601 = vmatprep.subr.bf16.mxu0 %v12894_v10  ;;  %v14775_v31 = vadd.f32 %v11090_v38, %v7343_v51  ;;  %v12927_v9 = vld [vmem:[%s15558_s1 + $0x718] sm:$0xff]  }
 0x32c   : > { %v11091_v16 = vpop.f32.mrb[24].mxu1  ;;  %v10980_v37 = vpop.f32.mrb[25].mxu0  ;;  %11713 = vmatprep.subr.bf16.mxu1 %v12896_v2  ;;  %v12929_v10 = vld [vmem:[%s15558_s1 + $0x798] sm:$0xff]  }
 0x32d   : > { %v10981_v33 = vadd.f32 %v10980_v37, %v10979_v57  ;;  %v11092_v61 = vpop.f32.mrb[25].mxu1  ;;  %v10982_v14 = vpop.f32.mrb[26].mxu0  ;;  %11602 = vmatpush3.bf16.msra.mxu0 %v12895_v6  ;;  %v12888_v6 = vld [vmem:[%s13385_s8 + $0x2a0] ss:$144 sps:$4 sm:$0xff]   ;;  %v12900_v37 = vld [vmem:[%s13385_s8 + $0x3c4] ss:$144 sps:$4 sm:$0xff]  }
 0x32e   : > { %v11093_v36 = vadd.f32 %v11092_v61, %v11091_v16  ;;  %v11094_v58 = vpop.f32.mrb[26].mxu1  ;;  %v10983_v23 = vpop.f32.mrb[27].mxu0  ;;  %11714 = vmatpush3.bf16.msra.mxu1 %v12897_v41  ;;  %11603 = vmatprep.subr.bf16.mxu0 %v12910_v24  ;;  %v12944_v41 = vld [vmem:[%s15558_s1 + $0x7e0] sm:$0xff]   ;;  %v12891_v16 = vld [vmem:[%s13385_s8 + $0x2a8] ss:$144 sps:$4 sm:$0xff]  }
 0x32f   : > { %v7348_v27 = vadd.f32 %v10981_v33, %v14538_v40  ;;  %v10984_v46 = vadd.f32 %v10983_v23, %v10982_v14  ;;  %v11095_v1 = vpop.f32.mrb[27].mxu1  ;;  %11715 = vmatprep.subr.bf16.mxu1 %v12912_v55  ;;  %v12903_v14 = vld [vmem:[%s13385_s8 + $0x3cc] ss:$144 sps:$4 sm:$0xff]   ;;  %v12945_v23 = vld [vmem:[%s15558_s1 + $0x7a0] sm:$0xff]  }
 0x330   : > { %v11096_v54 = vadd.f32 %v11095_v1, %v11094_v58  ;;  %7950 = vmatmul.mubr.bf16.gmra.mrb[132].mxu0 %v12882_v17  ;;  %v12959_v1 = vld [vmem:[%s15558_s1 + $0x728] sm:$0xff]  }
 0x331   : > { %v7351_v40 = vadd.f32 %v10984_v46, %v14544_v22  ;;  %8111 = vmatmul.mubr.bf16.gmra.mrb[132].mxu1 %v12885_v11  ;;  %7957 = vmatprep.mubr.bf16.mxu0 %v12890_v44  ;;  %v14795_v63 = vadd.f32 %v11093_v36, %v7348_v27  ;;  %v12942_v22 = vld [vmem:[%s15558_s1 + $0x760] sm:$0xff]   ;;  %v12960_v27 = vld [vmem:[%s15558_s1 + $0x7e8] sm:$0xff]  }
 0x332   : > { %8118 = vmatprep.mubr.bf16.mxu1 %v12893_v42  ;;  %11604 = vmatpush3.bf16.msra.mxu0 %v12911_v21  ;;  %v12943_v11 = vld [vmem:[%s15558_s1 + $0x720] sm:$0xff]   ;;  %v12958_v42 = vld [vmem:[%s15558_s1 + $0x768] sm:$0xff]  }
 0x333   : > { %v10985_v62 = vpop.f32.mrb[28].mxu0  ;;  %11716 = vmatpush3.bf16.msra.mxu1 %v12913_v43  ;;  %11605 = vmatprep.subr.bf16.mxu0 %v12926_v29  ;;  %v14806_v38 = vadd.f32 %v11096_v54, %v7351_v40  ;;  %v12961_v29 = vld [vmem:[%s15558_s1 + $0x7a8] sm:$0xff]  }
 0x334   : > { %v11097_v2 = vpop.f32.mrb[28].mxu1  ;;  %v10986_v51 = vpop.f32.mrb[29].mxu0  ;;  %11717 = vmatprep.subr.bf16.mxu1 %v12928_v39 }
 0x335   : > { %v10987_v24 = vadd.f32 %v10986_v51, %v10985_v62  ;;  %v11098_v57 = vpop.f32.mrb[29].mxu1  ;;  %v10988_v55 = vpop.f32.mrb[30].mxu0  ;;  %v12976_v62 = vld [vmem:[%s15558_s1 + $0x7f0] sm:$0xff]   ;;  %v12901_v51 = vld [vmem:[%s13385_s8 + $0x3c8] ss:$144 sps:$4 sm:$0xff]  }
 0x336   : > { %v11099_v17 = vadd.f32 %v11098_v57, %v11097_v2  ;;  %v11100_v33 = vpop.f32.mrb[30].mxu1  ;;  %v10989_v61 = vpop.f32.mrb[31].mxu0  ;;  %11606 = vmatpush3.bf16.msra.mxu0 %v12927_v9  ;;  %v12898_v9 = vld [vmem:[%s13385_s8 + $0x3c0] ss:$144 sps:$4 sm:$0xff]  }
 0x337   : > { %v7356_v44 = vadd.f32 %v10987_v24, %v14572_v45  ;;  %v10990_v36 = vadd.f32 %v10989_v61, %v10988_v55  ;;  %v11101_v58 = vpop.f32.mrb[31].mxu1  ;;  %11718 = vmatpush3.bf16.msra.mxu1 %v12929_v10  ;;  %11607 = vmatprep.subr.bf16.mxu0 %v12942_v22  ;;  %v12909_v55 = vld [vmem:[%s13385_s8 + $0x4ec] ss:$144 sps:$4 sm:$0xff]   ;;  %v12977_v61 = vld [vmem:[%s15558_s1 + $0x7b0] sm:$0xff]  }
 0x338   : > { %v11102_v21 = vadd.f32 %v11101_v58, %v11100_v33  ;;  %7958 = vmatmul.mubr.bf16.gmra.mrb[136].mxu0 %v12888_v6  ;;  %11719 = vmatprep.subr.bf16.mxu1 %v12944_v41  ;;  %v12906_v6 = vld [vmem:[%s13385_s8 + $0x4e4] ss:$144 sps:$4 sm:$0xff]   ;;  %v12991_v58 = vld [vmem:[%s15558_s1 + $0x738] sm:$0xff]  }
 0x339   : > { %v7359_v45 = vadd.f32 %v10990_v36, %v14578_v47  ;;  %8119 = vmatmul.mubr.bf16.gmra.mrb[136].mxu1 %v12891_v16  ;;  %7965 = vmatprep.mubr.bf16.mxu0 %v12900_v37  ;;  %v14829_v46 = vadd.f32 %v11099_v17, %v7356_v44  ;;  %v12974_v47 = vld [vmem:[%s15558_s1 + $0x770] sm:$0xff]   ;;  %v12992_v44 = vld [vmem:[%s15558_s1 + $0x7f8] sm:$0xff]  }
 0x33a   : > { %8126 = vmatprep.mubr.bf16.mxu1 %v12903_v14  ;;  %11608 = vmatpush3.bf16.msra.mxu0 %v12943_v11  ;;  %v12975_v16 = vld [vmem:[%s15558_s1 + $0x730] sm:$0xff]   ;;  %v12990_v14 = vld [vmem:[%s15558_s1 + $0x778] sm:$0xff]  }
 0x33b   : > { %v10991_v43 = vpop.f32.mrb[32].mxu0  ;;  %11720 = vmatpush3.bf16.msra.mxu1 %v12945_v23  ;;  %11609 = vmatprep.subr.bf16.mxu0 %v12958_v42  ;;  %v14840_v54 = vadd.f32 %v11102_v21, %v7359_v45  ;;  %v12993_v42 = vld [vmem:[%s15558_s1 + $0x7b8] sm:$0xff]  }
 0x33c   : > { %v11103_v39 = vpop.f32.mrb[32].mxu1  ;;  %v10992_v40 = vpop.f32.mrb[33].mxu0  ;;  %11721 = vmatprep.subr.bf16.mxu1 %v12960_v27 }
 0x33d   : > { %v10993_v10 = vadd.f32 %v10992_v40, %v10991_v43  ;;  %v11104_v22 = vpop.f32.mrb[33].mxu1  ;;  %v10994_v2 = vpop.f32.mrb[34].mxu0  ;;  %v13008_v43 = vld [vmem:[%s15558_s1 + $0x8c0] sm:$0xff]   ;;  %v12907_v40 = vld [vmem:[%s13385_s8 + $0x4e8] ss:$144 sps:$4 sm:$0xff]  }
 0x33e   : > { %v11105_v41 = vadd.f32 %v11104_v22, %v11103_v39  ;;  %v11106_v24 = vpop.f32.mrb[34].mxu1  ;;  %v10995_v57 = vpop.f32.mrb[35].mxu0  ;;  %11610 = vmatpush3.bf16.msra.mxu0 %v12959_v1  ;;  %v12904_v1 = vld [vmem:[%s13385_s8 + $0x4e0] ss:$144 sps:$4 sm:$0xff]  }
 0x33f   : > { %v7364_v37 = vadd.f32 %v10993_v10, %v14606_v30  ;;  %v10996_v17 = vadd.f32 %v10995_v57, %v10994_v2  ;;  %v11107_v33 = vpop.f32.mrb[35].mxu1  ;;  %11722 = vmatpush3.bf16.msra.mxu1 %v12961_v29  ;;  %11611 = vmatprep.subr.bf16.mxu0 %v12974_v47  ;;  %v12919_v2 = vld [vmem:[%s13385_s8 + $0x60c] ss:$144 sps:$4 sm:$0xff]  }
 0x340   : > { %v11108_v11 = vadd.f32 %v11107_v33, %v11106_v24  ;;  %7966 = vmatmul.mubr.bf16.gmra.mrb[140].mxu0 %v12898_v9  ;;  %11723 = vmatprep.subr.bf16.mxu1 %v12976_v62  ;;  %v12916_v9 = vld [vmem:[%s13385_s8 + $0x604] ss:$144 sps:$4 sm:$0xff]   ;;  %v12914_v33 = vld [vmem:[%s13385_s8 + $0x600] ss:$144 sps:$4 sm:$0xff]  }
 0x341   : > { %v7367_v30 = vadd.f32 %v10996_v17, %v14612_v8  ;;  %8127 = vmatmul.mubr.bf16.gmra.mrb[140].mxu1 %v12901_v51  ;;  %7973 = vmatprep.mubr.bf16.mxu0 %v12906_v6  ;;  %v14863_v36 = vadd.f32 %v11105_v41, %v7364_v37  ;;  %v13006_v8 = vld [vmem:[%s15558_s1 + $0x840] sm:$0xff]  }
 0x342   : > { %8134 = vmatprep.mubr.bf16.mxu1 %v12909_v55  ;;  %11612 = vmatpush3.bf16.msra.mxu0 %v12975_v16 }
 0x343   : > { %v10997_v23 = vpop.f32.mrb[36].mxu0  ;;  %11724 = vmatpush3.bf16.msra.mxu1 %v12977_v61  ;;  %11613 = vmatprep.subr.bf16.mxu0 %v12990_v14  ;;  %v14874_v21 = vadd.f32 %v11108_v11, %v7367_v30  ;;  %v12922_v30 = vld [vmem:[%s13385_s8 + $0x724] ss:$144 sps:$4 sm:$0xff]  }
 0x344   : > { %v11109_v27 = vpop.f32.mrb[36].mxu1  ;;  %v10998_v45 = vpop.f32.mrb[37].mxu0  ;;  %11725 = vmatprep.subr.bf16.mxu1 %v12992_v44  ;;  %v12917_v44 = vld [vmem:[%s13385_s8 + $0x608] ss:$144 sps:$4 sm:$0xff]  }
 0x345   : > { %v10999_v29 = vadd.f32 %v10998_v45, %v10997_v23  ;;  %v11110_v47 = vpop.f32.mrb[37].mxu1  ;;  %v11000_v39 = vpop.f32.mrb[38].mxu0 }
 0x346   : > { %v11111_v62 = vadd.f32 %v11110_v47, %v11109_v27  ;;  %v11112_v10 = vpop.f32.mrb[38].mxu1  ;;  %v11001_v22 = vpop.f32.mrb[39].mxu0  ;;  %11614 = vmatpush3.bf16.msra.mxu0 %v12991_v58 }
 0x347   : > { %v7372_v51 = vadd.f32 %v10999_v29, %v14628_v60  ;;  %v11002_v6 = vadd.f32 %v11001_v22, %v11000_v39  ;;  %v11113_v41 = vpop.f32.mrb[39].mxu1  ;;  %11726 = vmatpush3.bf16.msra.mxu1 %v12993_v42  ;;  %11823 = vmatprep.subr.bf16.mxu0 %v13006_v8  ;;  %v12925_v42 = vld [vmem:[%s13385_s8 + $0x72c] ss:$144 sps:$4 sm:$0xff]  }
 0x348   : > { %v11114_v24 = vadd.f32 %v11113_v41, %v11112_v10  ;;  %7974 = vmatmul.mubr.bf16.gmra.mrb[144].mxu0 %v12904_v1  ;;  %11935 = vmatprep.subr.bf16.mxu1 %v13008_v43 }
 0x349   : > { %v7375_v57 = vadd.f32 %v11002_v6, %v14631_v48  ;;  %8135 = vmatmul.mubr.bf16.gmra.mrb[144].mxu1 %v12907_v40  ;;  %7981 = vmatprep.mubr.bf16.mxu0 %v12916_v9  ;;  %v14885_v55 = vadd.f32 %v11111_v62, %v7372_v51  ;;  %v12932_v51 = vld [vmem:[%s13385_s8 + $0x844] ss:$144 sps:$4 sm:$0xff]  }
 0x34a   : > { %8142 = vmatprep.mubr.bf16.mxu1 %v12919_v2  ;;  %v12923_v2 = vld [vmem:[%s13385_s8 + $0x728] ss:$144 sps:$4 sm:$0xff]  }
 0x34b   : > { %v11003_v16 = vpop.f32.mrb[40].mxu0  ;;  %v14887_v60 = vadd.f32 %v11114_v24, %v7375_v57  ;;  %v12935_v24 = vld [vmem:[%s13385_s8 + $0x84c] ss:$144 sps:$4 sm:$0xff]  }
 0x34c   : > { %v11115_v37 = vpop.f32.mrb[40].mxu1  ;;  %v11004_v17 = vpop.f32.mrb[41].mxu0 }
 0x34d   : > { %v11005_v61 = vadd.f32 %v11004_v17, %v11003_v16  ;;  %v11116_v14 = vpop.f32.mrb[41].mxu1  ;;  %v11006_v11 = vpop.f32.mrb[42].mxu0 }
 0x34e   : > { %v11117_v58 = vadd.f32 %v11116_v14, %v11115_v37  ;;  %v11118_v23 = vpop.f32.mrb[42].mxu1  ;;  %v11007_v48 = vpop.f32.mrb[43].mxu0 }
 0x34f   : > { %v7380_v8 = vadd.f32 %v11005_v61, %v14638_v59  ;;  %v11008_v27 = vadd.f32 %v11007_v48, %v11006_v11  ;;  %v11119_v45 = vpop.f32.mrb[43].mxu1  ;;  %v12920_v59 = vld [vmem:[%s13385_s8 + $0x720] ss:$144 sps:$4 sm:$0xff]  }
 0x350   : > { %v11120_v1 = vadd.f32 %v11119_v45, %v11118_v23  ;;  %7982 = vmatmul.mubr.bf16.gmra.mrb[148].mxu0 %v12914_v33 }
 0x351   : > { %v7383_v43 = vadd.f32 %v11008_v27, %v14641_v19  ;;  %8143 = vmatmul.mubr.bf16.gmra.mrb[148].mxu1 %v12917_v44  ;;  %7989 = vmatprep.mubr.bf16.mxu0 %v12922_v30  ;;  %v14895_v29 = vadd.f32 %v11117_v58, %v7380_v8  ;;  %v12938_v8 = vld [vmem:[%s13385_s8 + $0x964] ss:$144 sps:$4 sm:$0xff]  }
 0x352   : > { %8150 = vmatprep.mubr.bf16.mxu1 %v12925_v42  ;;  %v12933_v42 = vld [vmem:[%s13385_s8 + $0x848] ss:$144 sps:$4 sm:$0xff]  }
 0x353   : > { %v11009_v47 = vpop.f32.mrb[44].mxu0  ;;  %v14897_v39 = vadd.f32 %v11120_v1, %v7383_v43  ;;  %v12941_v1 = vld [vmem:[%s13385_s8 + $0x96c] ss:$144 sps:$4 sm:$0xff]  }
 0x354   : > { %v11121_v40 = vpop.f32.mrb[44].mxu1  ;;  %v11010_v9 = vpop.f32.mrb[45].mxu0 }
 0x355   : > { %v11011_v62 = vadd.f32 %v11010_v9, %v11009_v47  ;;  %v11122_v10 = vpop.f32.mrb[45].mxu1  ;;  %v11012_v22 = vpop.f32.mrb[46].mxu0 }
 0x356   : > { %v11123_v6 = vadd.f32 %v11122_v10, %v11121_v40  ;;  %v11124_v41 = vpop.f32.mrb[46].mxu1  ;;  %v11013_v19 = vpop.f32.mrb[47].mxu0 }
 0x357   : > { %v7388_v57 = vadd.f32 %v11011_v62, %v14648_v53  ;;  %v11014_v16 = vadd.f32 %v11013_v19, %v11012_v22  ;;  %v11125_v37 = vpop.f32.mrb[47].mxu1  ;;  %v12930_v53 = vld [vmem:[%s13385_s8 + $0x840] ss:$144 sps:$4 sm:$0xff]  }
 0x358   : > { %v11126_v17 = vadd.f32 %v11125_v37, %v11124_v41  ;;  %7990 = vmatmul.mubr.bf16.gmra.mrb[152].mxu0 %v12920_v59 }
 0x359   : > { %v7391_v33 = vadd.f32 %v11014_v16, %v14651_v49  ;;  %8151 = vmatmul.mubr.bf16.gmra.mrb[152].mxu1 %v12923_v2  ;;  %7997 = vmatprep.mubr.bf16.mxu0 %v12932_v51  ;;  %v14905_v61 = vadd.f32 %v11123_v6, %v7388_v57  ;;  %v12948_v57 = vld [vmem:[%s13385_s8 + $0xa84] ss:$144 sps:$4 sm:$0xff]  }
 0x35a   : > { %8158 = vmatprep.mubr.bf16.mxu1 %v12935_v24  ;;  %v12939_v24 = vld [vmem:[%s13385_s8 + $0x968] ss:$144 sps:$4 sm:$0xff]  }
 0x35b   : > { %v11015_v14 = vpop.f32.mrb[48].mxu0  ;;  %v14907_v11 = vadd.f32 %v11126_v17, %v7391_v33  ;;  %v12951_v17 = vld [vmem:[%s13385_s8 + $0xa8c] ss:$144 sps:$4 sm:$0xff]  }
 0x35c   : > { %v11127_v44 = vpop.f32.mrb[48].mxu1  ;;  %v11016_v30 = vpop.f32.mrb[49].mxu0 }
 0x35d   : > { %v11017_v58 = vadd.f32 %v11016_v30, %v11015_v14  ;;  %v11128_v23 = vpop.f32.mrb[49].mxu1  ;;  %v11018_v48 = vpop.f32.mrb[50].mxu0 }
 0x35e   : > { %v11129_v27 = vadd.f32 %v11128_v23, %v11127_v44  ;;  %v11130_v45 = vpop.f32.mrb[50].mxu1  ;;  %v11019_v49 = vpop.f32.mrb[51].mxu0 }
 0x35f   : > { %v7396_v43 = vadd.f32 %v11017_v58, %v14658_v4  ;;  %v11020_v47 = vadd.f32 %v11019_v49, %v11018_v48  ;;  %v11131_v40 = vpop.f32.mrb[51].mxu1  ;;  %v12936_v4 = vld [vmem:[%s13385_s8 + $0x960] ss:$144 sps:$4 sm:$0xff]  }
 0x360   : > { %v11132_v9 = vadd.f32 %v11131_v40, %v11130_v45  ;;  %7998 = vmatmul.mubr.bf16.gmra.mrb[156].mxu0 %v12930_v53 }
 0x361   : > { %v7399_v59 = vadd.f32 %v11020_v47, %v14661_v26  ;;  %8159 = vmatmul.mubr.bf16.gmra.mrb[156].mxu1 %v12933_v42  ;;  %8005 = vmatprep.mubr.bf16.mxu0 %v12938_v8  ;;  %v14915_v62 = vadd.f32 %v11129_v27, %v7396_v43  ;;  %v12954_v43 = vld [vmem:[%s13385_s8 + $0xba4] ss:$144 sps:$4 sm:$0xff]  }
 0x362   : > { %8166 = vmatprep.mubr.bf16.mxu1 %v12941_v1  ;;  %v12949_v1 = vld [vmem:[%s13385_s8 + $0xa88] ss:$144 sps:$4 sm:$0xff]  }
 0x363   : > { %v11021_v10 = vpop.f32.mrb[52].mxu0  ;;  %v14917_v22 = vadd.f32 %v11132_v9, %v7399_v59  ;;  %v12957_v9 = vld [vmem:[%s13385_s8 + $0xbac] ss:$144 sps:$4 sm:$0xff]  }
 0x364   : > { %v11133_v2 = vpop.f32.mrb[52].mxu1  ;;  %v11022_v51 = vpop.f32.mrb[53].mxu0 }
 0x365   : > { %v11023_v6 = vadd.f32 %v11022_v51, %v11021_v10  ;;  %v11134_v41 = vpop.f32.mrb[53].mxu1  ;;  %v11024_v19 = vpop.f32.mrb[54].mxu0 }
 0x366   : > { %v11135_v16 = vadd.f32 %v11134_v41, %v11133_v2  ;;  %v11136_v37 = vpop.f32.mrb[54].mxu1  ;;  %v11025_v26 = vpop.f32.mrb[55].mxu0 }
 0x367   : > { %v7404_v33 = vadd.f32 %v11023_v6, %v14668_v5  ;;  %v11026_v14 = vadd.f32 %v11025_v26, %v11024_v19  ;;  %v11137_v44 = vpop.f32.mrb[55].mxu1  ;;  %v12946_v5 = vld [vmem:[%s13385_s8 + $0xa80] ss:$144 sps:$4 sm:$0xff]  }
 0x368   : > { %v11138_v30 = vadd.f32 %v11137_v44, %v11136_v37  ;;  %8006 = vmatmul.mubr.bf16.gmra.mrb[160].mxu0 %v12936_v4 }
 0x369   : > { %v7407_v53 = vadd.f32 %v11026_v14, %v14671_v52  ;;  %8167 = vmatmul.mubr.bf16.gmra.mrb[160].mxu1 %v12939_v24  ;;  %8013 = vmatprep.mubr.bf16.mxu0 %v12948_v57  ;;  %v14925_v58 = vadd.f32 %v11135_v16, %v7404_v33  ;;  %v12964_v33 = vld [vmem:[%s13385_s8 + $0xcc4] ss:$144 sps:$4 sm:$0xff]  }
 0x36a   : > { %8174 = vmatprep.mubr.bf16.mxu1 %v12951_v17  ;;  %v12955_v17 = vld [vmem:[%s13385_s8 + $0xba8] ss:$144 sps:$4 sm:$0xff]  }
 0x36b   : > { %v11027_v23 = vpop.f32.mrb[56].mxu0  ;;  %v14927_v48 = vadd.f32 %v11138_v30, %v7407_v53  ;;  %v12967_v30 = vld [vmem:[%s13385_s8 + $0xccc] ss:$144 sps:$4 sm:$0xff]  }
 0x36c   : > { %v11139_v42 = vpop.f32.mrb[56].mxu1  ;;  %v11028_v8 = vpop.f32.mrb[57].mxu0 }
 0x36d   : > { %v11029_v27 = vadd.f32 %v11028_v8, %v11027_v23  ;;  %v11140_v45 = vpop.f32.mrb[57].mxu1  ;;  %v11030_v49 = vpop.f32.mrb[58].mxu0 }
 0x36e   : > { %v11141_v47 = vadd.f32 %v11140_v45, %v11139_v42  ;;  %v11142_v40 = vpop.f32.mrb[58].mxu1  ;;  %v11031_v52 = vpop.f32.mrb[59].mxu0 }
 0x36f   : > { %v7412_v59 = vadd.f32 %v11029_v27, %v14678_v13  ;;  %v11032_v10 = vadd.f32 %v11031_v52, %v11030_v49  ;;  %v11143_v2 = vpop.f32.mrb[59].mxu1  ;;  %v12952_v13 = vld [vmem:[%s13385_s8 + $0xba0] ss:$144 sps:$4 sm:$0xff]  }
 0x370   : > { %v11144_v51 = vadd.f32 %v11143_v2, %v11142_v40  ;;  %8014 = vmatmul.mubr.bf16.gmra.mrb[164].mxu0 %v12946_v5 }
 0x371   : > { %v7415_v4 = vadd.f32 %v11032_v10, %v14681_v50  ;;  %8175 = vmatmul.mubr.bf16.gmra.mrb[164].mxu1 %v12949_v1  ;;  %8021 = vmatprep.mubr.bf16.mxu0 %v12954_v43  ;;  %v14935_v6 = vadd.f32 %v11141_v47, %v7412_v59  ;;  %v12970_v59 = vld [vmem:[%s13385_s8 + $0xde4] ss:$144 sps:$4 sm:$0xff]  }
 0x372   : > { %8182 = vmatprep.mubr.bf16.mxu1 %v12957_v9  ;;  %v12965_v9 = vld [vmem:[%s13385_s8 + $0xcc8] ss:$144 sps:$4 sm:$0xff]  }
 0x373   : > { %v11033_v41 = vpop.f32.mrb[60].mxu0  ;;  %v14937_v19 = vadd.f32 %v11144_v51, %v7415_v4  ;;  %v12973_v51 = vld [vmem:[%s13385_s8 + $0xdec] ss:$144 sps:$4 sm:$0xff]  }
 0x374   : > { %v11145_v24 = vpop.f32.mrb[60].mxu1  ;;  %v11034_v57 = vpop.f32.mrb[61].mxu0 }
 0x375   : > { %v11035_v16 = vadd.f32 %v11034_v57, %v11033_v41  ;;  %v11146_v37 = vpop.f32.mrb[61].mxu1  ;;  %v11036_v26 = vpop.f32.mrb[62].mxu0 }
 0x376   : > { %v11147_v14 = vadd.f32 %v11146_v37, %v11145_v24  ;;  %v11148_v44 = vpop.f32.mrb[62].mxu1  ;;  %v11037_v50 = vpop.f32.mrb[63].mxu0 }
 0x377   : > { %v7420_v53 = vadd.f32 %v11035_v16, %v14688_v35  ;;  %v11038_v23 = vadd.f32 %v11037_v50, %v11036_v26  ;;  %v11149_v42 = vpop.f32.mrb[63].mxu1  ;;  %v12962_v35 = vld [vmem:[%s13385_s8 + $0xcc0] ss:$144 sps:$4 sm:$0xff]  }
 0x378   : > { %v11150_v8 = vadd.f32 %v11149_v42, %v11148_v44  ;;  %8022 = vmatmul.mubr.bf16.gmra.mrb[168].mxu0 %v12952_v13 }
 0x379   : > { %v7423_v5 = vadd.f32 %v11038_v23, %v14691_v18  ;;  %8183 = vmatmul.mubr.bf16.gmra.mrb[168].mxu1 %v12955_v17  ;;  %8029 = vmatprep.mubr.bf16.mxu0 %v12964_v33  ;;  %v14945_v27 = vadd.f32 %v11147_v14, %v7420_v53  ;;  %v12980_v53 = vld [vmem:[%s13385_s8 + $0xf04] ss:$144 sps:$4 sm:$0xff]  }
 0x37a   : > { %8190 = vmatprep.mubr.bf16.mxu1 %v12967_v30  ;;  %v12971_v30 = vld [vmem:[%s13385_s8 + $0xde8] ss:$144 sps:$4 sm:$0xff]  }
 0x37b   : > { %v11167_v45 = vpop.f32.mrb[64].mxu0  ;;  %v14947_v49 = vadd.f32 %v11150_v8, %v7423_v5 }
 0x37c   : > { %v11279_v1 = vpop.f32.mrb[64].mxu1  ;;  %v11168_v43 = vpop.f32.mrb[65].mxu0 }
 0x37d   : > { %v11169_v47 = vadd.f32 %v11168_v43, %v11167_v45  ;;  %v11280_v40 = vpop.f32.mrb[65].mxu1  ;;  %v11170_v52 = vpop.f32.mrb[66].mxu0 }
 0x37e   : > { %v11281_v10 = vadd.f32 %v11280_v40, %v11279_v1  ;;  %v11282_v2 = vpop.f32.mrb[66].mxu1  ;;  %v11171_v18 = vpop.f32.mrb[67].mxu0 }
 0x37f   : > { %v7622_v4 = vadd.f32 %v11169_v47, %v14699_v3  ;;  %v11172_v41 = vadd.f32 %v11171_v18, %v11170_v52  ;;  %v11283_v24 = vpop.f32.mrb[67].mxu1  ;;  %v12968_v3 = vld [vmem:[%s13385_s8 + $0xde0] ss:$144 sps:$4 sm:$0xff]  }
 0x380   : > { %v11284_v57 = vadd.f32 %v11283_v24, %v11282_v2  ;;  %8030 = vmatmul.mubr.bf16.gmra.mrb[172].mxu0 %v12962_v35 }
 0x381   : > { %v14954_v13 = vadd.f32 %v11281_v10, %v7622_v4  ;;  %v7625_v16 = vadd.f32 %v11172_v41, %v14701_v25  ;;  %8191 = vmatmul.mubr.bf16.gmra.mrb[172].mxu1 %v12965_v9  ;;  %8037 = vmatprep.mubr.bf16.mxu0 %v12970_v59  ;;  %v12983_v25 = vld [vmem:[%s13385_s8 + $0xf0c] ss:$144 sps:$4 sm:$0xff]   ;;  %v12986_v4 = vld [vmem:[%s13385_s8 + $0x1024] ss:$144 sps:$4 sm:$0xff]  }
 0x382   : > { %8198 = vmatprep.mubr.bf16.mxu1 %v12973_v51  ;;  %v12981_v51 = vld [vmem:[%s13385_s8 + $0xf08] ss:$144 sps:$4 sm:$0xff]  }
 0x383   : > { %v14957_v37 = vadd.f32 %v11284_v57, %v7625_v16  ;;  %v11173_v26 = vpop.f32.mrb[68].mxu0 }
 0x384   : > { %v11285_v17 = vpop.f32.mrb[68].mxu1  ;;  %v11174_v33 = vpop.f32.mrb[69].mxu0 }
 0x385   : > { %v11175_v14 = vadd.f32 %v11174_v33, %v11173_v26  ;;  %v11286_v44 = vpop.f32.mrb[69].mxu1  ;;  %v11176_v50 = vpop.f32.mrb[70].mxu0 }
 0x386   : > { %v11287_v23 = vadd.f32 %v11286_v44, %v11285_v17  ;;  %v11288_v42 = vpop.f32.mrb[70].mxu1  ;;  %v11177_v8 = vpop.f32.mrb[71].mxu0 }
 0x387   : > { %v7630_v5 = vadd.f32 %v11175_v14, %v14709_v12  ;;  %v11178_v45 = vadd.f32 %v11177_v8, %v11176_v50  ;;  %v11289_v1 = vpop.f32.mrb[71].mxu1  ;;  %v12978_v12 = vld [vmem:[%s13385_s8 + $0xf00] ss:$144 sps:$4 sm:$0xff]  }
 0x388   : > { %v11290_v43 = vadd.f32 %v11289_v1, %v11288_v42  ;;  %8038 = vmatmul.mubr.bf16.gmra.mrb[176].mxu0 %v12968_v3 }
 0x389   : > { %v14964_v35 = vadd.f32 %v11287_v23, %v7630_v5  ;;  %v7633_v47 = vadd.f32 %v11178_v45, %v14711_v28  ;;  %8199 = vmatmul.mubr.bf16.gmra.mrb[176].mxu1 %v12971_v30  ;;  %8045 = vmatprep.mubr.bf16.mxu0 %v12980_v53  ;;  %v12989_v28 = vld [vmem:[%s13385_s8 + $0x102c] ss:$144 sps:$4 sm:$0xff]   ;;  %v12996_v5 = vld [vmem:[%s13385_s8 + $0x1144] ss:$144 sps:$4 sm:$0xff]  }
 0x38a   : > { %8206 = vmatprep.mubr.bf16.mxu1 %v12983_v25  ;;  %v12987_v25 = vld [vmem:[%s13385_s8 + $0x1028] ss:$144 sps:$4 sm:$0xff]  }
 0x38b   : > { %v14967_v40 = vadd.f32 %v11290_v43, %v7633_v47  ;;  %v11179_v52 = vpop.f32.mrb[72].mxu0 }
 0x38c   : > { %v11291_v9 = vpop.f32.mrb[72].mxu1  ;;  %v11180_v59 = vpop.f32.mrb[73].mxu0 }
 0x38d   : > { %v11181_v10 = vadd.f32 %v11180_v59, %v11179_v52  ;;  %v11292_v2 = vpop.f32.mrb[73].mxu1  ;;  %v11182_v18 = vpop.f32.mrb[74].mxu0 }
 0x38e   : > { %v11293_v41 = vadd.f32 %v11292_v2, %v11291_v9  ;;  %v11294_v24 = vpop.f32.mrb[74].mxu1  ;;  %v11183_v57 = vpop.f32.mrb[75].mxu0 }
 0x38f   : > { %v7638_v16 = vadd.f32 %v11181_v10, %v14719_v15  ;;  %v11184_v26 = vadd.f32 %v11183_v57, %v11182_v18  ;;  %v11295_v17 = vpop.f32.mrb[75].mxu1  ;;  %v12984_v15 = vld [vmem:[%s13385_s8 + $0x1020] ss:$144 sps:$4 sm:$0xff]  }
 0x390   : > { %v11296_v33 = vadd.f32 %v11295_v17, %v11294_v24  ;;  %8046 = vmatmul.mubr.bf16.gmra.mrb[180].mxu0 %v12978_v12 }
 0x391   : > { %v14974_v3 = vadd.f32 %v11293_v41, %v7638_v16  ;;  %v7641_v14 = vadd.f32 %v11184_v26, %v14721_v0  ;;  %8207 = vmatmul.mubr.bf16.gmra.mrb[180].mxu1 %v12981_v51  ;;  %8053 = vmatprep.mubr.bf16.mxu0 %v12986_v4  ;;  %v12999_v0 = vld [vmem:[%s13385_s8 + $0x114c] ss:$144 sps:$4 sm:$0xff]   ;;  %v13002_v16 = vld [vmem:[%s13385_s8 + $0x74] ss:$144 sps:$4 sm:$0xff]  }
 0x392   : > { %8214 = vmatprep.mubr.bf16.mxu1 %v12989_v28  ;;  %v12997_v28 = vld [vmem:[%s13385_s8 + $0x1148] ss:$144 sps:$4 sm:$0xff]  }
 0x393   : > { %v14977_v44 = vadd.f32 %v11296_v33, %v7641_v14  ;;  %v11185_v50 = vpop.f32.mrb[76].mxu0 }
 0x394   : > { %v11297_v30 = vpop.f32.mrb[76].mxu1  ;;  %v11186_v53 = vpop.f32.mrb[77].mxu0 }
 0x395   : > { %v11187_v23 = vadd.f32 %v11186_v53, %v11185_v50  ;;  %v11298_v42 = vpop.f32.mrb[77].mxu1  ;;  %v11188_v8 = vpop.f32.mrb[78].mxu0 }
 0x396   : > { %v11299_v45 = vadd.f32 %v11298_v42, %v11297_v30  ;;  %v11300_v1 = vpop.f32.mrb[78].mxu1  ;;  %v11189_v43 = vpop.f32.mrb[79].mxu0 }
 0x397   : > { %v7646_v47 = vadd.f32 %v11187_v23, %v14729_v32  ;;  %v11190_v52 = vadd.f32 %v11189_v43, %v11188_v8  ;;  %v11301_v9 = vpop.f32.mrb[79].mxu1  ;;  %v12994_v32 = vld [vmem:[%s13385_s8 + $0x1140] ss:$144 sps:$4 sm:$0xff]  }
 0x398   : > { %v11302_v59 = vadd.f32 %v11301_v9, %v11300_v1  ;;  %8054 = vmatmul.mubr.bf16.gmra.mrb[184].mxu0 %v12984_v15 }
 0x399   : > { %v14984_v12 = vadd.f32 %v11299_v45, %v7646_v47  ;;  %v7649_v10 = vadd.f32 %v11190_v52, %v14731_v20  ;;  %8215 = vmatmul.mubr.bf16.gmra.mrb[184].mxu1 %v12987_v25  ;;  %8061 = vmatprep.mubr.bf16.mxu0 %v12996_v5  ;;  %v13005_v20 = vld [vmem:[%s13385_s8 + $0x7c] ss:$144 sps:$4 sm:$0xff]   ;;  %v13007_v47 = vld [vmem:[%s15558_s1 + $0x800] sm:$0xff]  }
 0x39a   : > { %8222 = vmatprep.mubr.bf16.mxu1 %v12999_v0  ;;  %v13003_v0 = vld [vmem:[%s13385_s8 + $0x78] ss:$144 sps:$4 sm:$0xff]  }
 0x39b   : > { %v14987_v2 = vadd.f32 %v11302_v59, %v7649_v10  ;;  %v11191_v18 = vpop.f32.mrb[80].mxu0  ;;  %v13009_v59 = vld [vmem:[%s15558_s1 + $0x880] sm:$0xff]  }
 0x39c   : > { %v11303_v51 = vpop.f32.mrb[80].mxu1  ;;  %v11192_v4 = vpop.f32.mrb[81].mxu0  ;;  %v13012_v10 = vld [vmem:[%s13385_s8 + $0x194] ss:$144 sps:$4 sm:$0xff]  }
 0x39d   : > { %v11193_v41 = vadd.f32 %v11192_v4, %v11191_v18  ;;  %v11304_v24 = vpop.f32.mrb[81].mxu1  ;;  %v11194_v57 = vpop.f32.mrb[82].mxu0 }
 0x39e   : > { %v11305_v26 = vadd.f32 %v11304_v24, %v11303_v51  ;;  %v11306_v17 = vpop.f32.mrb[82].mxu1  ;;  %v11195_v33 = vpop.f32.mrb[83].mxu0 }
 0x39f   : > { %v7654_v14 = vadd.f32 %v11193_v41, %v14739_v56  ;;  %v11196_v50 = vadd.f32 %v11195_v33, %v11194_v57  ;;  %v11307_v30 = vpop.f32.mrb[83].mxu1  ;;  %v13000_v56 = vld [vmem:[%s13385_s8 + $0x70] ss:$144 sps:$4 sm:$0xff]   ;;  %v13022_v41 = vld [vmem:[%s15558_s1 + $0x848] sm:$0xff]  }
 0x3a0   : > { %v11308_v53 = vadd.f32 %v11307_v30, %v11306_v17  ;;  %8062 = vmatmul.mubr.bf16.gmra.mrb[188].mxu0 %v12994_v32  ;;  %v13015_v32 = vld [vmem:[%s13385_s8 + $0x19c] ss:$144 sps:$4 sm:$0xff]   ;;  %v13038_v17 = vld [vmem:[%s15558_s1 + $0x850] sm:$0xff]  }
 0x3a1   : > { %v14994_v15 = vadd.f32 %v11305_v26, %v7654_v14  ;;  %v7657_v23 = vadd.f32 %v11196_v50, %v14741_v34  ;;  %8223 = vmatmul.mubr.bf16.gmra.mrb[188].mxu1 %v12997_v28  ;;  %8263 = vmatprep.mubr.bf16.mxu0 %v13002_v16  ;;  %v13024_v57 = vld [vmem:[%s15558_s1 + $0x8c8] sm:$0xff]   ;;  %v13010_v30 = vld [vmem:[%s13385_s8 + $0x190] ss:$144 sps:$4 sm:$0xff]  }
 0x3a2   : > { %8424 = vmatprep.mubr.bf16.mxu1 %v13005_v20  ;;  %v13025_v26 = vld [vmem:[%s15558_s1 + $0x888] sm:$0xff]   ;;  %v13040_v20 = vld [vmem:[%s15558_s1 + $0x8d0] sm:$0xff]  }
 0x3a3   : > { %v14997_v42 = vadd.f32 %v11308_v53, %v7657_v23  ;;  %v11197_v8 = vpop.f32.mrb[84].mxu0 }
 0x3a4   : > { %v11309_v25 = vpop.f32.mrb[84].mxu1  ;;  %v11198_v5 = vpop.f32.mrb[85].mxu0 }
 0x3a5   : > { %v11199_v45 = vadd.f32 %v11198_v5, %v11197_v8  ;;  %v11310_v1 = vpop.f32.mrb[85].mxu1  ;;  %v11200_v43 = vpop.f32.mrb[86].mxu0  ;;  %v13018_v5 = vld [vmem:[%s13385_s8 + $0x2b4] ss:$144 sps:$4 sm:$0xff]  }
 0x3a6   : > { %v11311_v34 = vadd.f32 %v11310_v1, %v11309_v25  ;;  %v11312_v52 = vpop.f32.mrb[86].mxu1  ;;  %v11201_v9 = vpop.f32.mrb[87].mxu0  ;;  %v13013_v25 = vld [vmem:[%s13385_s8 + $0x198] ss:$144 sps:$4 sm:$0xff]  }
 0x3a7   : > { %v7662_v18 = vadd.f32 %v11199_v45, %v14764_v7  ;;  %v11202_v51 = vadd.f32 %v11201_v9, %v11200_v43  ;;  %v11313_v4 = vpop.f32.mrb[87].mxu1  ;;  %v13023_v7 = vld [vmem:[%s15558_s1 + $0x808] sm:$0xff]   ;;  %v13041_v9 = vld [vmem:[%s15558_s1 + $0x890] sm:$0xff]  }
 0x3a8   : > { %v11314_v24 = vadd.f32 %v11313_v4, %v11312_v52  ;;  %8264 = vmatmul.mubr.bf16.vlgmr.msra.gmra.mrb[192].mxu0 %v13000_v56  ;;  %v13021_v43 = vld [vmem:[%s13385_s8 + $0x2bc] ss:$144 sps:$4 sm:$0xff]  }
 0x3a9   : > { %v15016_v28 = vadd.f32 %v11311_v34, %v7662_v18  ;;  %v7665_v16 = vadd.f32 %v11202_v51, %v14775_v31  ;;  %8425 = vmatmul.mubr.bf16.vlgmr.msra.gmra.mrb[192].mxu1 %v13003_v0  ;;  %11824 = vmatpush3.bf16.msra.mxu0 %v13007_v47  ;;  %v13039_v0 = vld [vmem:[%s15558_s1 + $0x810] sm:$0xff]   ;;  %v13056_v18 = vld [vmem:[%s15558_s1 + $0x8d8] sm:$0xff]  }
 0x3aa   : > { %11936 = vmatpush3.bf16.msra.mxu1 %v13009_v59  ;;  %8271 = vmatprep.mubr.bf16.mxu0 %v13012_v10  ;;  %v13054_v59 = vld [vmem:[%s15558_s1 + $0x858] sm:$0xff]  }
 0x3ab   : > { %v15028_v33 = vadd.f32 %v11314_v24, %v7665_v16  ;;  %v11203_v31 = vpop.f32.mrb[88].mxu0  ;;  %8432 = vmatprep.mubr.bf16.mxu1 %v13015_v32  ;;  %11825 = vmatprep.subr.bf16.mxu0 %v13022_v41  ;;  %v13055_v4 = vld [vmem:[%s15558_s1 + $0x818] sm:$0xff]   ;;  %v13070_v24 = vld [vmem:[%s15558_s1 + $0x860] sm:$0xff]  }
 0x3ac   : > { %v11315_v14 = vpop.f32.mrb[88].mxu1  ;;  %v11204_v50 = vpop.f32.mrb[89].mxu0  ;;  %11937 = vmatprep.subr.bf16.mxu1 %v13024_v57 }
 0x3ad   : > { %v11205_v53 = vadd.f32 %v11204_v50, %v11203_v31  ;;  %v11316_v23 = vpop.f32.mrb[89].mxu1  ;;  %v11206_v8 = vpop.f32.mrb[90].mxu0  ;;  %11826 = vmatpush3.bf16.msra.mxu0 %v13023_v7  ;;  %v13016_v7 = vld [vmem:[%s13385_s8 + $0x2b0] ss:$144 sps:$4 sm:$0xff]   ;;  %v13028_v50 = vld [vmem:[%s13385_s8 + $0x3d4] ss:$144 sps:$4 sm:$0xff]  }
 0x3ae   : > { %v11317_v56 = vadd.f32 %v11316_v23, %v11315_v14  ;;  %v11318_v45 = vpop.f32.mrb[90].mxu1  ;;  %v11207_v1 = vpop.f32.mrb[91].mxu0  ;;  %11938 = vmatpush3.bf16.msra.mxu1 %v13025_v26  ;;  %11827 = vmatprep.subr.bf16.mxu0 %v13038_v17  ;;  %v13072_v26 = vld [vmem:[%s15558_s1 + $0x8e0] sm:$0xff]   ;;  %v13019_v14 = vld [vmem:[%s13385_s8 + $0x2b8] ss:$144 sps:$4 sm:$0xff]  }
 0x3af   : > { %v7670_v47 = vadd.f32 %v11205_v53, %v14795_v63  ;;  %v11208_v34 = vadd.f32 %v11207_v1, %v11206_v8  ;;  %v11319_v52 = vpop.f32.mrb[91].mxu1  ;;  %11939 = vmatprep.subr.bf16.mxu1 %v13040_v20  ;;  %v13031_v8 = vld [vmem:[%s13385_s8 + $0x3dc] ss:$144 sps:$4 sm:$0xff]   ;;  %v13073_v1 = vld [vmem:[%s15558_s1 + $0x8a0] sm:$0xff]  }
 0x3b0   : > { %v11320_v10 = vadd.f32 %v11319_v52, %v11318_v45  ;;  %8272 = vmatmul.mubr.bf16.gmra.mrb[196].mxu0 %v13010_v30  ;;  %v13087_v52 = vld [vmem:[%s15558_s1 + $0x828] sm:$0xff]  }
 0x3b1   : > { %v15050_v51 = vadd.f32 %v11317_v56, %v7670_v47  ;;  %v7673_v63 = vadd.f32 %v11208_v34, %v14806_v38  ;;  %8433 = vmatmul.mubr.bf16.gmra.mrb[196].mxu1 %v13013_v25  ;;  %8279 = vmatprep.mubr.bf16.mxu0 %v13018_v5  ;;  %v13057_v38 = vld [vmem:[%s15558_s1 + $0x898] sm:$0xff]   ;;  %v13071_v25 = vld [vmem:[%s15558_s1 + $0x820] sm:$0xff]   ;;  %v13088_v47 = vld [vmem:[%s15558_s1 + $0x8e8] sm:$0xff]  }
 0x3b2   : > { %8440 = vmatprep.mubr.bf16.mxu1 %v13021_v43  ;;  %11828 = vmatpush3.bf16.msra.mxu0 %v13039_v0  ;;  %v13086_v43 = vld [vmem:[%s15558_s1 + $0x868] sm:$0xff]  }
 0x3b3   : > { %v15056_v32 = vadd.f32 %v11320_v10, %v7673_v63  ;;  %v11209_v41 = vpop.f32.mrb[92].mxu0  ;;  %11940 = vmatpush3.bf16.msra.mxu1 %v13041_v9  ;;  %11829 = vmatprep.subr.bf16.mxu0 %v13054_v59  ;;  %v13102_v10 = vld [vmem:[%s15558_s1 + $0x870] sm:$0xff]  }
 0x3b4   : > { %v11321_v57 = vpop.f32.mrb[92].mxu1  ;;  %v11210_v16 = vpop.f32.mrb[93].mxu0  ;;  %11941 = vmatprep.subr.bf16.mxu1 %v13056_v18 }
 0x3b5   : > { %v11211_v17 = vadd.f32 %v11210_v16, %v11209_v41  ;;  %v11322_v31 = vpop.f32.mrb[93].mxu1  ;;  %v11212_v20 = vpop.f32.mrb[94].mxu0  ;;  %v13104_v41 = vld [vmem:[%s15558_s1 + $0x8f0] sm:$0xff]   ;;  %v13029_v16 = vld [vmem:[%s13385_s8 + $0x3d8] ss:$144 sps:$4 sm:$0xff]  }
 0x3b6   : > { %v11323_v30 = vadd.f32 %v11322_v31, %v11321_v57  ;;  %v11324_v53 = vpop.f32.mrb[94].mxu1  ;;  %v11213_v23 = vpop.f32.mrb[95].mxu0  ;;  %11830 = vmatpush3.bf16.msra.mxu0 %v13055_v4  ;;  %v13026_v4 = vld [vmem:[%s13385_s8 + $0x3d0] ss:$144 sps:$4 sm:$0xff]  }
 0x3b7   : > { %v7678_v5 = vadd.f32 %v11211_v17, %v14829_v46  ;;  %v11214_v56 = vadd.f32 %v11213_v23, %v11212_v20  ;;  %v11325_v45 = vpop.f32.mrb[95].mxu1  ;;  %11942 = vmatpush3.bf16.msra.mxu1 %v13057_v38  ;;  %11831 = vmatprep.subr.bf16.mxu0 %v13070_v24  ;;  %v13037_v20 = vld [vmem:[%s13385_s8 + $0x4fc] ss:$144 sps:$4 sm:$0xff]   ;;  %v13105_v23 = vld [vmem:[%s15558_s1 + $0x8b0] sm:$0xff]  }
 0x3b8   : > { %v11326_v0 = vadd.f32 %v11325_v45, %v11324_v53  ;;  %8280 = vmatmul.mubr.bf16.gmra.mrb[200].mxu0 %v13016_v7  ;;  %11943 = vmatprep.subr.bf16.mxu1 %v13072_v26  ;;  %v13034_v7 = vld [vmem:[%s13385_s8 + $0x4f4] ss:$144 sps:$4 sm:$0xff]   ;;  %v13119_v45 = vld [vmem:[%s15558_s1 + $0x838] sm:$0xff]  }
 0x3b9   : > { %v15084_v46 = vadd.f32 %v11323_v30, %v7678_v5  ;;  %v7681_v34 = vadd.f32 %v11214_v56, %v14840_v54  ;;  %8441 = vmatmul.mubr.bf16.gmra.mrb[200].mxu1 %v13019_v14  ;;  %8287 = vmatprep.mubr.bf16.mxu0 %v13028_v50  ;;  %v13089_v54 = vld [vmem:[%s15558_s1 + $0x8a8] sm:$0xff]   ;;  %v13103_v14 = vld [vmem:[%s15558_s1 + $0x830] sm:$0xff]  }
 0x3ba   : > { %8448 = vmatprep.mubr.bf16.mxu1 %v13031_v8  ;;  %11832 = vmatpush3.bf16.msra.mxu0 %v13071_v25  ;;  %v13118_v8 = vld [vmem:[%s15558_s1 + $0x878] sm:$0xff]  }
 0x3bb   : > { %v15090_v9 = vadd.f32 %v11326_v0, %v7681_v34  ;;  %v11215_v59 = vpop.f32.mrb[96].mxu0  ;;  %11944 = vmatpush3.bf16.msra.mxu1 %v13073_v1  ;;  %11833 = vmatprep.subr.bf16.mxu0 %v13086_v43  ;;  %v13032_v34 = vld [vmem:[%s13385_s8 + $0x4f0] ss:$144 sps:$4 sm:$0xff]  }
 0x3bc   : > { %v11327_v18 = vpop.f32.mrb[96].mxu1  ;;  %v11216_v63 = vpop.f32.mrb[97].mxu0  ;;  %11945 = vmatprep.subr.bf16.mxu1 %v13088_v47 }
 0x3bd   : > { %v11217_v38 = vadd.f32 %v11216_v63, %v11215_v59  ;;  %v11328_v24 = vpop.f32.mrb[97].mxu1  ;;  %v11218_v57 = vpop.f32.mrb[98].mxu0 }
 0x3be   : > { %v11329_v26 = vadd.f32 %v11328_v24, %v11327_v18  ;;  %v11330_v17 = vpop.f32.mrb[98].mxu1  ;;  %v11219_v31 = vpop.f32.mrb[99].mxu0  ;;  %11834 = vmatpush3.bf16.msra.mxu0 %v13087_v52  ;;  %v13044_v18 = vld [vmem:[%s13385_s8 + $0x614] ss:$144 sps:$4 sm:$0xff]  }
 0x3bf   : > { %v7686_v50 = vadd.f32 %v11217_v38, %v14863_v36  ;;  %v11220_v30 = vadd.f32 %v11219_v31, %v11218_v57  ;;  %v11331_v53 = vpop.f32.mrb[99].mxu1  ;;  %11946 = vmatpush3.bf16.msra.mxu1 %v13089_v54  ;;  %11835 = vmatprep.subr.bf16.mxu0 %v13102_v10  ;;  %v13120_v36 = vld [vmem:[%s15558_s1 + $0x8f8] sm:$0xff]  }
 0x3c0   : > { %v11332_v25 = vadd.f32 %v11331_v53, %v11330_v17  ;;  %8288 = vmatmul.mubr.bf16.gmra.mrb[204].mxu0 %v13026_v4  ;;  %11947 = vmatprep.subr.bf16.mxu1 %v13104_v41  ;;  %v13035_v10 = vld [vmem:[%s13385_s8 + $0x4f8] ss:$144 sps:$4 sm:$0xff]   ;;  %v13047_v38 = vld [vmem:[%s13385_s8 + $0x61c] ss:$144 sps:$4 sm:$0xff]  }
 0x3c1   : > { %v15118_v5 = vadd.f32 %v11329_v26, %v7686_v50  ;;  %v7689_v56 = vadd.f32 %v11220_v30, %v14874_v21  ;;  %8449 = vmatmul.mubr.bf16.gmra.mrb[204].mxu1 %v13029_v16  ;;  %8295 = vmatprep.mubr.bf16.mxu0 %v13034_v7  ;;  %v13121_v21 = vld [vmem:[%s15558_s1 + $0x8b8] sm:$0xff]   ;;  %v13042_v50 = vld [vmem:[%s13385_s8 + $0x610] ss:$144 sps:$4 sm:$0xff]  }
 0x3c2   : > { %8456 = vmatprep.mubr.bf16.mxu1 %v13037_v20  ;;  %11836 = vmatpush3.bf16.msra.mxu0 %v13103_v14 }
 0x3c3   : > { %v15124_v1 = vadd.f32 %v11332_v25, %v7689_v56  ;;  %v11221_v43 = vpop.f32.mrb[100].mxu0  ;;  %11948 = vmatpush3.bf16.msra.mxu1 %v13105_v23  ;;  %11837 = vmatprep.subr.bf16.mxu0 %v13118_v8  ;;  %v13045_v8 = vld [vmem:[%s13385_s8 + $0x618] ss:$144 sps:$4 sm:$0xff]   ;;  %v13050_v25 = vld [vmem:[%s13385_s8 + $0x734] ss:$144 sps:$4 sm:$0xff]  }
 0x3c4   : > { %v11333_v0 = vpop.f32.mrb[100].mxu1  ;;  %v11222_v47 = vpop.f32.mrb[101].mxu0  ;;  %11949 = vmatprep.subr.bf16.mxu1 %v13120_v36 }
 0x3c5   : > { %v11223_v52 = vadd.f32 %v11222_v47, %v11221_v43  ;;  %v11334_v59 = vpop.f32.mrb[101].mxu1  ;;  %v11224_v54 = vpop.f32.mrb[102].mxu0 }
 0x3c6   : > { %v11335_v63 = vadd.f32 %v11334_v59, %v11333_v0  ;;  %v11336_v4 = vpop.f32.mrb[102].mxu1  ;;  %v11225_v41 = vpop.f32.mrb[103].mxu0  ;;  %11838 = vmatpush3.bf16.msra.mxu0 %v13119_v45 }
 0x3c7   : > { %v7694_v24 = vadd.f32 %v11223_v52, %v14885_v55  ;;  %v11226_v57 = vadd.f32 %v11225_v41, %v11224_v54  ;;  %v11337_v16 = vpop.f32.mrb[103].mxu1  ;;  %11950 = vmatpush3.bf16.msra.mxu1 %v13121_v21 }
 0x3c8   : > { %v11338_v7 = vadd.f32 %v11337_v16, %v11336_v4  ;;  %8296 = vmatmul.mubr.bf16.gmra.mrb[208].mxu0 %v13032_v34 }
 0x3c9   : > { %v15134_v26 = vadd.f32 %v11335_v63, %v7694_v24  ;;  %v7697_v17 = vadd.f32 %v11226_v57, %v14887_v60  ;;  %8457 = vmatmul.mubr.bf16.gmra.mrb[208].mxu1 %v13035_v10  ;;  %8303 = vmatprep.mubr.bf16.mxu0 %v13044_v18  ;;  %v13053_v60 = vld [vmem:[%s13385_s8 + $0x73c] ss:$144 sps:$4 sm:$0xff]   ;;  %v13060_v24 = vld [vmem:[%s13385_s8 + $0x854] ss:$144 sps:$4 sm:$0xff]  }
 0x3ca   : > { %8464 = vmatprep.mubr.bf16.mxu1 %v13047_v38  ;;  %v13051_v38 = vld [vmem:[%s13385_s8 + $0x738] ss:$144 sps:$4 sm:$0xff]  }
 0x3cb   : > { %v15137_v31 = vadd.f32 %v11338_v7, %v7697_v17  ;;  %v11227_v20 = vpop.f32.mrb[104].mxu0 }
 0x3cc   : > { %v11339_v14 = vpop.f32.mrb[104].mxu1  ;;  %v11228_v55 = vpop.f32.mrb[105].mxu0 }
 0x3cd   : > { %v11229_v30 = vadd.f32 %v11228_v55, %v11227_v20  ;;  %v11340_v53 = vpop.f32.mrb[105].mxu1  ;;  %v11230_v23 = vpop.f32.mrb[106].mxu0 }
 0x3ce   : > { %v11341_v36 = vadd.f32 %v11340_v53, %v11339_v14  ;;  %v11342_v56 = vpop.f32.mrb[106].mxu1  ;;  %v11231_v45 = vpop.f32.mrb[107].mxu0 }
 0x3cf   : > { %v7702_v43 = vadd.f32 %v11229_v30, %v14895_v29  ;;  %v11232_v21 = vadd.f32 %v11231_v45, %v11230_v23  ;;  %v11343_v0 = vpop.f32.mrb[107].mxu1  ;;  %v13048_v29 = vld [vmem:[%s13385_s8 + $0x730] ss:$144 sps:$4 sm:$0xff]  }
 0x3d0   : > { %v11344_v47 = vadd.f32 %v11343_v0, %v11342_v56  ;;  %8304 = vmatmul.mubr.bf16.gmra.mrb[212].mxu0 %v13042_v50 }
 0x3d1   : > { %v15144_v34 = vadd.f32 %v11341_v36, %v7702_v43  ;;  %v7705_v52 = vadd.f32 %v11232_v21, %v14897_v39  ;;  %8465 = vmatmul.mubr.bf16.gmra.mrb[212].mxu1 %v13045_v8  ;;  %8311 = vmatprep.mubr.bf16.mxu0 %v13050_v25  ;;  %v13063_v39 = vld [vmem:[%s13385_s8 + $0x85c] ss:$144 sps:$4 sm:$0xff]   ;;  %v13066_v43 = vld [vmem:[%s13385_s8 + $0x974] ss:$144 sps:$4 sm:$0xff]  }
 0x3d2   : > { %8472 = vmatprep.mubr.bf16.mxu1 %v13053_v60  ;;  %v13061_v60 = vld [vmem:[%s13385_s8 + $0x858] ss:$144 sps:$4 sm:$0xff]  }
 0x3d3   : > { %v15147_v59 = vadd.f32 %v11344_v47, %v7705_v52  ;;  %v11233_v54 = vpop.f32.mrb[108].mxu0 }
 0x3d4   : > { %v11345_v10 = vpop.f32.mrb[108].mxu1  ;;  %v11234_v18 = vpop.f32.mrb[109].mxu0 }
 0x3d5   : > { %v11235_v63 = vadd.f32 %v11234_v18, %v11233_v54  ;;  %v11346_v4 = vpop.f32.mrb[109].mxu1  ;;  %v11236_v41 = vpop.f32.mrb[110].mxu0 }
 0x3d6   : > { %v11347_v57 = vadd.f32 %v11346_v4, %v11345_v10  ;;  %v11348_v16 = vpop.f32.mrb[110].mxu1  ;;  %v11237_v7 = vpop.f32.mrb[111].mxu0 }
 0x3d7   : > { %v7710_v17 = vadd.f32 %v11235_v63, %v14905_v61  ;;  %v11238_v20 = vadd.f32 %v11237_v7, %v11236_v41  ;;  %v11349_v14 = vpop.f32.mrb[111].mxu1  ;;  %v13058_v61 = vld [vmem:[%s13385_s8 + $0x850] ss:$144 sps:$4 sm:$0xff]  }
 0x3d8   : > { %v11350_v55 = vadd.f32 %v11349_v14, %v11348_v16  ;;  %8312 = vmatmul.mubr.bf16.gmra.mrb[216].mxu0 %v13048_v29 }
 0x3d9   : > { %v15154_v50 = vadd.f32 %v11347_v57, %v7710_v17  ;;  %v7713_v30 = vadd.f32 %v11238_v20, %v14907_v11  ;;  %8473 = vmatmul.mubr.bf16.gmra.mrb[216].mxu1 %v13051_v38  ;;  %8319 = vmatprep.mubr.bf16.mxu0 %v13060_v24  ;;  %v13069_v11 = vld [vmem:[%s13385_s8 + $0x97c] ss:$144 sps:$4 sm:$0xff]   ;;  %v13076_v17 = vld [vmem:[%s13385_s8 + $0xa94] ss:$144 sps:$4 sm:$0xff]  }
 0x3da   : > { %8480 = vmatprep.mubr.bf16.mxu1 %v13063_v39  ;;  %v13067_v39 = vld [vmem:[%s13385_s8 + $0x978] ss:$144 sps:$4 sm:$0xff]  }
 0x3db   : > { %v15157_v53 = vadd.f32 %v11350_v55, %v7713_v30  ;;  %v11239_v23 = vpop.f32.mrb[112].mxu0 }
 0x3dc   : > { %v11351_v8 = vpop.f32.mrb[112].mxu1  ;;  %v11240_v25 = vpop.f32.mrb[113].mxu0 }
 0x3dd   : > { %v11241_v36 = vadd.f32 %v11240_v25, %v11239_v23  ;;  %v11352_v56 = vpop.f32.mrb[113].mxu1  ;;  %v11242_v45 = vpop.f32.mrb[114].mxu0 }
 0x3de   : > { %v11353_v21 = vadd.f32 %v11352_v56, %v11351_v8  ;;  %v11354_v0 = vpop.f32.mrb[114].mxu1  ;;  %v11243_v47 = vpop.f32.mrb[115].mxu0 }
 0x3df   : > { %v7718_v52 = vadd.f32 %v11241_v36, %v14915_v62  ;;  %v11244_v54 = vadd.f32 %v11243_v47, %v11242_v45  ;;  %v11355_v10 = vpop.f32.mrb[115].mxu1  ;;  %v13064_v62 = vld [vmem:[%s13385_s8 + $0x970] ss:$144 sps:$4 sm:$0xff]  }
 0x3e0   : > { %v11356_v18 = vadd.f32 %v11355_v10, %v11354_v0  ;;  %8320 = vmatmul.mubr.bf16.gmra.mrb[220].mxu0 %v13058_v61 }
 0x3e1   : > { %v15164_v29 = vadd.f32 %v11353_v21, %v7718_v52  ;;  %v7721_v63 = vadd.f32 %v11244_v54, %v14917_v22  ;;  %8481 = vmatmul.mubr.bf16.gmra.mrb[220].mxu1 %v13061_v60  ;;  %8327 = vmatprep.mubr.bf16.mxu0 %v13066_v43  ;;  %v13079_v22 = vld [vmem:[%s13385_s8 + $0xa9c] ss:$144 sps:$4 sm:$0xff]   ;;  %v13082_v52 = vld [vmem:[%s13385_s8 + $0xbb4] ss:$144 sps:$4 sm:$0xff]  }
 0x3e2   : > { %8488 = vmatprep.mubr.bf16.mxu1 %v13069_v11  ;;  %v13077_v11 = vld [vmem:[%s13385_s8 + $0xa98] ss:$144 sps:$4 sm:$0xff]  }
 0x3e3   : > { %v15167_v4 = vadd.f32 %v11356_v18, %v7721_v63  ;;  %v11245_v41 = vpop.f32.mrb[116].mxu0 }
 0x3e4   : > { %v11357_v38 = vpop.f32.mrb[116].mxu1  ;;  %v11246_v24 = vpop.f32.mrb[117].mxu0 }
 0x3e5   : > { %v11247_v57 = vadd.f32 %v11246_v24, %v11245_v41  ;;  %v11358_v16 = vpop.f32.mrb[117].mxu1  ;;  %v11248_v7 = vpop.f32.mrb[118].mxu0 }
 0x3e6   : > { %v11359_v20 = vadd.f32 %v11358_v16, %v11357_v38  ;;  %v11360_v14 = vpop.f32.mrb[118].mxu1  ;;  %v11249_v55 = vpop.f32.mrb[119].mxu0 }
 0x3e7   : > { %v7726_v30 = vadd.f32 %v11247_v57, %v14925_v58  ;;  %v11250_v23 = vadd.f32 %v11249_v55, %v11248_v7  ;;  %v11361_v8 = vpop.f32.mrb[119].mxu1  ;;  %v13074_v58 = vld [vmem:[%s13385_s8 + $0xa90] ss:$144 sps:$4 sm:$0xff]  }
 0x3e8   : > { %v11362_v25 = vadd.f32 %v11361_v8, %v11360_v14  ;;  %8328 = vmatmul.mubr.bf16.gmra.mrb[224].mxu0 %v13064_v62 }
 0x3e9   : > { %v15174_v61 = vadd.f32 %v11359_v20, %v7726_v30  ;;  %v7729_v36 = vadd.f32 %v11250_v23, %v14927_v48  ;;  %8489 = vmatmul.mubr.bf16.gmra.mrb[224].mxu1 %v13067_v39  ;;  %8335 = vmatprep.mubr.bf16.mxu0 %v13076_v17  ;;  %v13085_v48 = vld [vmem:[%s13385_s8 + $0xbbc] ss:$144 sps:$4 sm:$0xff]   ;;  %v13092_v30 = vld [vmem:[%s13385_s8 + $0xcd4] ss:$144 sps:$4 sm:$0xff]  }
 0x3ea   : > { %8496 = vmatprep.mubr.bf16.mxu1 %v13079_v22  ;;  %v13083_v22 = vld [vmem:[%s13385_s8 + $0xbb8] ss:$144 sps:$4 sm:$0xff]  }
 0x3eb   : > { %v15177_v56 = vadd.f32 %v11362_v25, %v7729_v36  ;;  %v11251_v45 = vpop.f32.mrb[120].mxu0 }
 0x3ec   : > { %v11363_v60 = vpop.f32.mrb[120].mxu1  ;;  %v11252_v43 = vpop.f32.mrb[121].mxu0 }
 0x3ed   : > { %v11253_v21 = vadd.f32 %v11252_v43, %v11251_v45  ;;  %v11364_v0 = vpop.f32.mrb[121].mxu1  ;;  %v11254_v47 = vpop.f32.mrb[122].mxu0 }
 0x3ee   : > { %v11365_v54 = vadd.f32 %v11364_v0, %v11363_v60  ;;  %v11366_v10 = vpop.f32.mrb[122].mxu1  ;;  %v11255_v18 = vpop.f32.mrb[123].mxu0 }
 0x3ef   : > { %v7734_v63 = vadd.f32 %v11253_v21, %v14935_v6  ;;  %v11256_v41 = vadd.f32 %v11255_v18, %v11254_v47  ;;  %v11367_v38 = vpop.f32.mrb[123].mxu1  ;;  %v13080_v6 = vld [vmem:[%s13385_s8 + $0xbb0] ss:$144 sps:$4 sm:$0xff]  }
 0x3f0   : > { %v11368_v24 = vadd.f32 %v11367_v38, %v11366_v10  ;;  %8336 = vmatmul.mubr.bf16.gmra.mrb[228].mxu0 %v13074_v58 }
 0x3f1   : > { %v15184_v62 = vadd.f32 %v11365_v54, %v7734_v63  ;;  %v7737_v57 = vadd.f32 %v11256_v41, %v14937_v19  ;;  %8497 = vmatmul.mubr.bf16.gmra.mrb[228].mxu1 %v13077_v11  ;;  %8343 = vmatprep.mubr.bf16.mxu0 %v13082_v52  ;;  %v13095_v19 = vld [vmem:[%s13385_s8 + $0xcdc] ss:$144 sps:$4 sm:$0xff]   ;;  %v13098_v63 = vld [vmem:[%s13385_s8 + $0xdf4] ss:$144 sps:$4 sm:$0xff]  }
 0x3f2   : > { %8504 = vmatprep.mubr.bf16.mxu1 %v13085_v48  ;;  %v13093_v48 = vld [vmem:[%s13385_s8 + $0xcd8] ss:$144 sps:$4 sm:$0xff]  }
 0x3f3   : > { %v15187_v16 = vadd.f32 %v11368_v24, %v7737_v57  ;;  %v11257_v7 = vpop.f32.mrb[124].mxu0 }
 0x3f4   : > { %v11369_v39 = vpop.f32.mrb[124].mxu1  ;;  %v11258_v17 = vpop.f32.mrb[125].mxu0 }
 0x3f5   : > { %v11259_v20 = vadd.f32 %v11258_v17, %v11257_v7  ;;  %v11370_v14 = vpop.f32.mrb[125].mxu1  ;;  %v11260_v55 = vpop.f32.mrb[126].mxu0 }
 0x3f6   : > { %v11371_v23 = vadd.f32 %v11370_v14, %v11369_v39  ;;  %v11372_v8 = vpop.f32.mrb[126].mxu1  ;;  %v11261_v25 = vpop.f32.mrb[127].mxu0 }
 0x3f7   : > { %v7742_v36 = vadd.f32 %v11259_v20, %v14945_v27  ;;  %v11262_v45 = vadd.f32 %v11261_v25, %v11260_v55  ;;  %v11373_v60 = vpop.f32.mrb[127].mxu1  ;;  %v13090_v27 = vld [vmem:[%s13385_s8 + $0xcd0] ss:$144 sps:$4 sm:$0xff]  }
 0x3f8   : > { %v11374_v43 = vadd.f32 %v11373_v60, %v11372_v8  ;;  %8344 = vmatmul.mubr.bf16.gmra.mrb[232].mxu0 %v13080_v6 }
 0x3f9   : > { %v15194_v58 = vadd.f32 %v11371_v23, %v7742_v36  ;;  %v7745_v21 = vadd.f32 %v11262_v45, %v14947_v49  ;;  %8505 = vmatmul.mubr.bf16.gmra.mrb[232].mxu1 %v13083_v22  ;;  %8351 = vmatprep.mubr.bf16.mxu0 %v13092_v30  ;;  %v13101_v49 = vld [vmem:[%s13385_s8 + $0xdfc] ss:$144 sps:$4 sm:$0xff]   ;;  %v13108_v36 = vld [vmem:[%s13385_s8 + $0xf14] ss:$144 sps:$4 sm:$0xff]  }
 0x3fa   : > { %8512 = vmatprep.mubr.bf16.mxu1 %v13095_v19  ;;  %v13099_v19 = vld [vmem:[%s13385_s8 + $0xdf8] ss:$144 sps:$4 sm:$0xff]  }
 0x3fb   : > { %v15197_v0 = vadd.f32 %v11374_v43, %v7745_v21  ;;  %v11391_v47 = vpop.f32.mrb[128].mxu0 }
 0x3fc   : > { %v11503_v11 = vpop.f32.mrb[128].mxu1  ;;  %v11392_v52 = vpop.f32.mrb[129].mxu0 }
 0x3fd   : > { %v11393_v54 = vadd.f32 %v11392_v52, %v11391_v47  ;;  %v11504_v10 = vpop.f32.mrb[129].mxu1  ;;  %v11394_v18 = vpop.f32.mrb[130].mxu0 }
 0x3fe   : > { %v11505_v41 = vadd.f32 %v11504_v10, %v11503_v11  ;;  %v11506_v38 = vpop.f32.mrb[130].mxu1  ;;  %v11395_v24 = vpop.f32.mrb[131].mxu0 }
 0x3ff   : > { %v7944_v57 = vadd.f32 %v11393_v54, %v14954_v13  ;;  %v11396_v7 = vadd.f32 %v11395_v24, %v11394_v18  ;;  %v11507_v39 = vpop.f32.mrb[131].mxu1  ;;  %v13096_v13 = vld [vmem:[%s13385_s8 + $0xdf0] ss:$144 sps:$4 sm:$0xff]  }
 0x400   : > { %v11508_v17 = vadd.f32 %v11507_v39, %v11506_v38  ;;  %8352 = vmatmul.mubr.bf16.gmra.mrb[236].mxu0 %v13090_v27 }
 0x401   : > { %v15204_v6 = vadd.f32 %v11505_v41, %v7944_v57  ;;  %v7947_v20 = vadd.f32 %v11396_v7, %v14957_v37  ;;  %8513 = vmatmul.mubr.bf16.gmra.mrb[236].mxu1 %v13093_v48  ;;  %8359 = vmatprep.mubr.bf16.mxu0 %v13098_v63  ;;  %v13111_v37 = vld [vmem:[%s13385_s8 + $0xf1c] ss:$144 sps:$4 sm:$0xff]   ;;  %v13114_v57 = vld [vmem:[%s13385_s8 + $0x1034] ss:$144 sps:$4 sm:$0xff]  }
 0x402   : > { %8520 = vmatprep.mubr.bf16.mxu1 %v13101_v49  ;;  %v13109_v49 = vld [vmem:[%s13385_s8 + $0xf18] ss:$144 sps:$4 sm:$0xff]  }
 0x403   : > { %v15207_v14 = vadd.f32 %v11508_v17, %v7947_v20  ;;  %v11397_v55 = vpop.f32.mrb[132].mxu0 }
 0x404   : > { %v11509_v22 = vpop.f32.mrb[132].mxu1  ;;  %v11398_v30 = vpop.f32.mrb[133].mxu0 }
 0x405   : > { %v11399_v23 = vadd.f32 %v11398_v30, %v11397_v55  ;;  %v11510_v8 = vpop.f32.mrb[133].mxu1  ;;  %v11400_v25 = vpop.f32.mrb[134].mxu0 }
 0x406   : > { %v11511_v45 = vadd.f32 %v11510_v8, %v11509_v22  ;;  %v11512_v60 = vpop.f32.mrb[134].mxu1  ;;  %v11401_v43 = vpop.f32.mrb[135].mxu0 }
 0x407   : > { %v7952_v21 = vadd.f32 %v11399_v23, %v14964_v35  ;;  %v11402_v47 = vadd.f32 %v11401_v43, %v11400_v25  ;;  %v11513_v11 = vpop.f32.mrb[135].mxu1  ;;  %v13106_v35 = vld [vmem:[%s13385_s8 + $0xf10] ss:$144 sps:$4 sm:$0xff]  }
 0x408   : > { %v11514_v52 = vadd.f32 %v11513_v11, %v11512_v60  ;;  %8360 = vmatmul.mubr.bf16.gmra.mrb[240].mxu0 %v13096_v13 }
 0x409   : > { %v15214_v27 = vadd.f32 %v11511_v45, %v7952_v21  ;;  %v7955_v54 = vadd.f32 %v11402_v47, %v14967_v40  ;;  %8521 = vmatmul.mubr.bf16.gmra.mrb[240].mxu1 %v13099_v19  ;;  %8367 = vmatprep.mubr.bf16.mxu0 %v13108_v36  ;;  %v13117_v40 = vld [vmem:[%s13385_s8 + $0x103c] ss:$144 sps:$4 sm:$0xff]   ;;  %v13124_v21 = vld [vmem:[%s13385_s8 + $0x1154] ss:$144 sps:$4 sm:$0xff]  }
 0x40a   : > { %8528 = vmatprep.mubr.bf16.mxu1 %v13111_v37  ;;  %v13115_v37 = vld [vmem:[%s13385_s8 + $0x1038] ss:$144 sps:$4 sm:$0xff]  }
 0x40b   : > { %v15217_v10 = vadd.f32 %v11514_v52, %v7955_v54  ;;  %v11403_v18 = vpop.f32.mrb[136].mxu0 }
 0x40c   : > { %v11515_v48 = vpop.f32.mrb[136].mxu1  ;;  %v11404_v63 = vpop.f32.mrb[137].mxu0 }
 0x40d   : > { %v11405_v41 = vadd.f32 %v11404_v63, %v11403_v18  ;;  %v11516_v38 = vpop.f32.mrb[137].mxu1  ;;  %v11406_v24 = vpop.f32.mrb[138].mxu0 }
 0x40e   : > { %v11517_v7 = vadd.f32 %v11516_v38, %v11515_v48  ;;  %v11518_v39 = vpop.f32.mrb[138].mxu1  ;;  %v11407_v17 = vpop.f32.mrb[139].mxu0 }
 0x40f   : > { %v7960_v20 = vadd.f32 %v11405_v41, %v14974_v3  ;;  %v11408_v55 = vadd.f32 %v11407_v17, %v11406_v24  ;;  %v11519_v22 = vpop.f32.mrb[139].mxu1  ;;  %v13112_v3 = vld [vmem:[%s13385_s8 + $0x1030] ss:$144 sps:$4 sm:$0xff]  }
 0x410   : > { %v11520_v30 = vadd.f32 %v11519_v22, %v11518_v39  ;;  %8368 = vmatmul.mubr.bf16.gmra.mrb[244].mxu0 %v13106_v35 }
 0x411   : > { %v15224_v13 = vadd.f32 %v11517_v7, %v7960_v20  ;;  %v7963_v23 = vadd.f32 %v11408_v55, %v14977_v44  ;;  %8529 = vmatmul.mubr.bf16.gmra.mrb[244].mxu1 %v13109_v49  ;;  %8375 = vmatprep.mubr.bf16.mxu0 %v13114_v57  ;;  %v13127_v44 = vld [vmem:[%s13385_s8 + $0x115c] ss:$144 sps:$4 sm:$0xff]   ;;  %v13130_v20 = vld [vmem:[%s13385_s8 + $0x84] ss:$144 sps:$4 sm:$0xff]  }
 0x412   : > { %8536 = vmatprep.mubr.bf16.mxu1 %v13117_v40  ;;  %v13125_v40 = vld [vmem:[%s13385_s8 + $0x1158] ss:$144 sps:$4 sm:$0xff]  }
 0x413   : > { %v15227_v8 = vadd.f32 %v11520_v30, %v7963_v23  ;;  %v11409_v25 = vpop.f32.mrb[140].mxu0 }
 0x414   : > { %v11521_v19 = vpop.f32.mrb[140].mxu1  ;;  %v11410_v36 = vpop.f32.mrb[141].mxu0 }
 0x415   : > { %v11411_v45 = vadd.f32 %v11410_v36, %v11409_v25  ;;  %v11522_v60 = vpop.f32.mrb[141].mxu1  ;;  %v11412_v43 = vpop.f32.mrb[142].mxu0 }
 0x416   : > { %v11523_v47 = vadd.f32 %v11522_v60, %v11521_v19  ;;  %v11524_v11 = vpop.f32.mrb[142].mxu1  ;;  %v11413_v52 = vpop.f32.mrb[143].mxu0 }
 0x417   : > { %v7968_v54 = vadd.f32 %v11411_v45, %v14984_v12  ;;  %v11414_v18 = vadd.f32 %v11413_v52, %v11412_v43  ;;  %v11525_v48 = vpop.f32.mrb[143].mxu1  ;;  %v13122_v12 = vld [vmem:[%s13385_s8 + $0x1150] ss:$144 sps:$4 sm:$0xff]  }
 0x418   : > { %v11526_v63 = vadd.f32 %v11525_v48, %v11524_v11  ;;  %8376 = vmatmul.mubr.bf16.gmra.mrb[248].mxu0 %v13112_v3 }
 0x419   : > { %v15234_v35 = vadd.f32 %v11523_v47, %v7968_v54  ;;  %v7971_v41 = vadd.f32 %v11414_v18, %v14987_v2  ;;  %8537 = vmatmul.mubr.bf16.gmra.mrb[248].mxu1 %v13115_v37  ;;  %8383 = vmatprep.mubr.bf16.mxu0 %v13124_v21  ;;  %v13133_v2 = vld [vmem:[%s13385_s8 + $0x8c] ss:$144 sps:$4 sm:$0xff]   ;;  %v13136_v54 = vld [vmem:[%s13385_s8 + $0x1a4] ss:$144 sps:$4 sm:$0xff]  }
 0x41a   : > { %8544 = vmatprep.mubr.bf16.mxu1 %v13127_v44  ;;  %v13131_v44 = vld [vmem:[%s13385_s8 + $0x88] ss:$144 sps:$4 sm:$0xff]  }
 0x41b   : > { %v15237_v38 = vadd.f32 %v11526_v63, %v7971_v41  ;;  %v11415_v24 = vpop.f32.mrb[144].mxu0 }
 0x41c   : > { %v11527_v49 = vpop.f32.mrb[144].mxu1  ;;  %v11416_v57 = vpop.f32.mrb[145].mxu0 }
 0x41d   : > { %v11417_v7 = vadd.f32 %v11416_v57, %v11415_v24  ;;  %v11528_v39 = vpop.f32.mrb[145].mxu1  ;;  %v11418_v17 = vpop.f32.mrb[146].mxu0 }
 0x41e   : > { %v11529_v55 = vadd.f32 %v11528_v39, %v11527_v49  ;;  %v11530_v22 = vpop.f32.mrb[146].mxu1  ;;  %v11419_v30 = vpop.f32.mrb[147].mxu0 }
 0x41f   : > { %v7976_v23 = vadd.f32 %v11417_v7, %v14994_v15  ;;  %v11420_v25 = vadd.f32 %v11419_v30, %v11418_v17  ;;  %v11531_v19 = vpop.f32.mrb[147].mxu1  ;;  %v13128_v15 = vld [vmem:[%s13385_s8 + $0x80] ss:$144 sps:$4 sm:$0xff]  }
 0x420   : > { %v11532_v36 = vadd.f32 %v11531_v19, %v11530_v22  ;;  %8384 = vmatmul.mubr.bf16.gmra.mrb[252].mxu0 %v13122_v12 }
 0x421   : > { %v15244_v3 = vadd.f32 %v11529_v55, %v7976_v23  ;;  %v7979_v45 = vadd.f32 %v11420_v25, %v14997_v42  ;;  %8545 = vmatmul.mubr.bf16.gmra.mrb[252].mxu1 %v13125_v40  ;;  %8585 = vmatprep.mubr.bf16.mxu0 %v13130_v20  ;;  %v13139_v42 = vld [vmem:[%s13385_s8 + $0x1ac] ss:$144 sps:$4 sm:$0xff]   ;;  %v13142_v23 = vld [vmem:[%s13385_s8 + $0x2c4] ss:$144 sps:$4 sm:$0xff]  }
 0x422   : > { %8746 = vmatprep.mubr.bf16.mxu1 %v13133_v2  ;;  %v13137_v2 = vld [vmem:[%s13385_s8 + $0x1a8] ss:$144 sps:$4 sm:$0xff]  }
 0x423   : > { %v15247_v60 = vadd.f32 %v11532_v36, %v7979_v45  ;;  %v11421_v43 = vpop.f32.mrb[148].mxu0 }
 0x424   : > { %v11533_v37 = vpop.f32.mrb[148].mxu1  ;;  %v11422_v21 = vpop.f32.mrb[149].mxu0 }
 0x425   : > { %v11423_v47 = vadd.f32 %v11422_v21, %v11421_v43  ;;  %v11534_v11 = vpop.f32.mrb[149].mxu1  ;;  %v11424_v52 = vpop.f32.mrb[150].mxu0 }
 0x426   : > { %v11535_v18 = vadd.f32 %v11534_v11, %v11533_v37  ;;  %v11536_v48 = vpop.f32.mrb[150].mxu1  ;;  %v11425_v63 = vpop.f32.mrb[151].mxu0 }
 0x427   : > { %v7984_v41 = vadd.f32 %v11423_v47, %v15016_v28  ;;  %v11426_v24 = vadd.f32 %v11425_v63, %v11424_v52  ;;  %v11537_v49 = vpop.f32.mrb[151].mxu1  ;;  %v13134_v28 = vld [vmem:[%s13385_s8 + $0x1a0] ss:$144 sps:$4 sm:$0xff]  }
 0x428   : > { %v11538_v57 = vadd.f32 %v11537_v49, %v11536_v48  ;;  %8586 = vmatmul.mubr.bf16.vlgmr.msra.gmra.mrb[0].mxu0 %v13128_v15 }
 0x429   : > { %v15254_v12 = vadd.f32 %v11535_v18, %v7984_v41  ;;  %v7987_v7 = vadd.f32 %v11426_v24, %v15028_v33  ;;  %8747 = vmatmul.mubr.bf16.vlgmr.msra.gmra.mrb[0].mxu1 %v13131_v44  ;;  %8593 = vmatprep.mubr.bf16.mxu0 %v13136_v54  ;;  %v13145_v33 = vld [vmem:[%s13385_s8 + $0x2cc] ss:$144 sps:$4 sm:$0xff]   ;;  %v13148_v41 = vld [vmem:[%s13385_s8 + $0x3e4] ss:$144 sps:$4 sm:$0xff]  }
 0x42a   : > { %8754 = vmatprep.mubr.bf16.mxu1 %v13139_v42  ;;  %v13143_v42 = vld [vmem:[%s13385_s8 + $0x2c8] ss:$144 sps:$4 sm:$0xff]  }
 0x42b   : > { %v15257_v39 = vadd.f32 %v11538_v57, %v7987_v7  ;;  %v11427_v17 = vpop.f32.mrb[152].mxu0 }
 0x42c   : > { %v11539_v40 = vpop.f32.mrb[152].mxu1  ;;  %v11428_v20 = vpop.f32.mrb[153].mxu0 }
 0x42d   : > { %v11429_v55 = vadd.f32 %v11428_v20, %v11427_v17  ;;  %v11540_v22 = vpop.f32.mrb[153].mxu1  ;;  %v11430_v30 = vpop.f32.mrb[154].mxu0 }
 0x42e   : > { %v11541_v25 = vadd.f32 %v11540_v22, %v11539_v40  ;;  %v11542_v19 = vpop.f32.mrb[154].mxu1  ;;  %v11431_v36 = vpop.f32.mrb[155].mxu0 }
 0x42f   : > { %v7992_v45 = vadd.f32 %v11429_v55, %v15050_v51  ;;  %v11432_v43 = vadd.f32 %v11431_v36, %v11430_v30  ;;  %v11543_v37 = vpop.f32.mrb[155].mxu1  ;;  %v13140_v51 = vld [vmem:[%s13385_s8 + $0x2c0] ss:$144 sps:$4 sm:$0xff]  }
 0x430   : > { %v11544_v21 = vadd.f32 %v11543_v37, %v11542_v19  ;;  %8594 = vmatmul.mubr.bf16.gmra.mrb[4].mxu0 %v13134_v28 }
 0x431   : > { %v15264_v15 = vadd.f32 %v11541_v25, %v7992_v45  ;;  %v7995_v47 = vadd.f32 %v11432_v43, %v15056_v32  ;;  %8755 = vmatmul.mubr.bf16.gmra.mrb[4].mxu1 %v13137_v2  ;;  %8601 = vmatprep.mubr.bf16.mxu0 %v13142_v23  ;;  %v13151_v32 = vld [vmem:[%s13385_s8 + $0x3ec] ss:$144 sps:$4 sm:$0xff]   ;;  %v13154_v45 = vld [vmem:[%s13385_s8 + $0x504] ss:$144 sps:$4 sm:$0xff]  }
 0x432   : > { %8762 = vmatprep.mubr.bf16.mxu1 %v13145_v33  ;;  %v13149_v33 = vld [vmem:[%s13385_s8 + $0x3e8] ss:$144 sps:$4 sm:$0xff]  }
 0x433   : > { %v15267_v11 = vadd.f32 %v11544_v21, %v7995_v47  ;;  %v11433_v52 = vpop.f32.mrb[156].mxu0 }
 0x434   : > { %v11545_v44 = vpop.f32.mrb[156].mxu1  ;;  %v11434_v54 = vpop.f32.mrb[157].mxu0 }
 0x435   : > { %v11435_v18 = vadd.f32 %v11434_v54, %v11433_v52  ;;  %v11546_v48 = vpop.f32.mrb[157].mxu1  ;;  %v11436_v63 = vpop.f32.mrb[158].mxu0 }
 0x436   : > { %v11547_v24 = vadd.f32 %v11546_v48, %v11545_v44  ;;  %v11548_v49 = vpop.f32.mrb[158].mxu1  ;;  %v11437_v57 = vpop.f32.mrb[159].mxu0 }
 0x437   : > { %v8000_v7 = vadd.f32 %v11435_v18, %v15084_v46  ;;  %v11438_v17 = vadd.f32 %v11437_v57, %v11436_v63  ;;  %v11549_v40 = vpop.f32.mrb[159].mxu1  ;;  %v13146_v46 = vld [vmem:[%s13385_s8 + $0x3e0] ss:$144 sps:$4 sm:$0xff]  }
 0x438   : > { %v11550_v20 = vadd.f32 %v11549_v40, %v11548_v49  ;;  %8602 = vmatmul.mubr.bf16.gmra.mrb[8].mxu0 %v13140_v51 }
 0x439   : > { %v15274_v28 = vadd.f32 %v11547_v24, %v8000_v7  ;;  %v8003_v55 = vadd.f32 %v11438_v17, %v15090_v9  ;;  %8763 = vmatmul.mubr.bf16.gmra.mrb[8].mxu1 %v13143_v42  ;;  %8609 = vmatprep.mubr.bf16.mxu0 %v13148_v41  ;;  %v13157_v9 = vld [vmem:[%s13385_s8 + $0x50c] ss:$144 sps:$4 sm:$0xff]   ;;  %v13160_v7 = vld [vmem:[%s13385_s8 + $0x624] ss:$144 sps:$4 sm:$0xff]  }
 0x43a   : > { %8770 = vmatprep.mubr.bf16.mxu1 %v13151_v32  ;;  %v13155_v32 = vld [vmem:[%s13385_s8 + $0x508] ss:$144 sps:$4 sm:$0xff]  }
 0x43b   : > { %v15277_v22 = vadd.f32 %v11550_v20, %v8003_v55  ;;  %v11439_v30 = vpop.f32.mrb[160].mxu0 }
 0x43c   : > { %v11551_v2 = vpop.f32.mrb[160].mxu1  ;;  %v11440_v23 = vpop.f32.mrb[161].mxu0 }
 0x43d   : > { %v11441_v25 = vadd.f32 %v11440_v23, %v11439_v30  ;;  %v11552_v19 = vpop.f32.mrb[161].mxu1  ;;  %v11442_v36 = vpop.f32.mrb[162].mxu0 }
 0x43e   : > { %v11553_v43 = vadd.f32 %v11552_v19, %v11551_v2  ;;  %v11554_v37 = vpop.f32.mrb[162].mxu1  ;;  %v11443_v21 = vpop.f32.mrb[163].mxu0 }
 0x43f   : > { %v8008_v47 = vadd.f32 %v11441_v25, %v15118_v5  ;;  %v11444_v52 = vadd.f32 %v11443_v21, %v11442_v36  ;;  %v11555_v44 = vpop.f32.mrb[163].mxu1  ;;  %v13152_v5 = vld [vmem:[%s13385_s8 + $0x500] ss:$144 sps:$4 sm:$0xff]  }
 0x440   : > { %v11556_v54 = vadd.f32 %v11555_v44, %v11554_v37  ;;  %8610 = vmatmul.mubr.bf16.gmra.mrb[12].mxu0 %v13146_v46 }
 0x441   : > { %v15284_v51 = vadd.f32 %v11553_v43, %v8008_v47  ;;  %v8011_v18 = vadd.f32 %v11444_v52, %v15124_v1  ;;  %8771 = vmatmul.mubr.bf16.gmra.mrb[12].mxu1 %v13149_v33  ;;  %8617 = vmatprep.mubr.bf16.mxu0 %v13154_v45  ;;  %v13163_v1 = vld [vmem:[%s13385_s8 + $0x62c] ss:$144 sps:$4 sm:$0xff]   ;;  %v13166_v47 = vld [vmem:[%s13385_s8 + $0x744] ss:$144 sps:$4 sm:$0xff]  }
 0x442   : > { %8778 = vmatprep.mubr.bf16.mxu1 %v13157_v9  ;;  %v13161_v9 = vld [vmem:[%s13385_s8 + $0x628] ss:$144 sps:$4 sm:$0xff]  }
 0x443   : > { %v15287_v48 = vadd.f32 %v11556_v54, %v8011_v18  ;;  %v11445_v63 = vpop.f32.mrb[164].mxu0 }
 0x444   : > { %v11557_v42 = vpop.f32.mrb[164].mxu1  ;;  %v11446_v41 = vpop.f32.mrb[165].mxu0 }
 0x445   : > { %v11447_v24 = vadd.f32 %v11446_v41, %v11445_v63  ;;  %v11558_v49 = vpop.f32.mrb[165].mxu1  ;;  %v11448_v57 = vpop.f32.mrb[166].mxu0 }
 0x446   : > { %v11559_v17 = vadd.f32 %v11558_v49, %v11557_v42  ;;  %v11560_v40 = vpop.f32.mrb[166].mxu1  ;;  %v11449_v20 = vpop.f32.mrb[167].mxu0 }
 0x447   : > { %v8016_v55 = vadd.f32 %v11447_v24, %v15134_v26  ;;  %v11450_v30 = vadd.f32 %v11449_v20, %v11448_v57  ;;  %v11561_v2 = vpop.f32.mrb[167].mxu1  ;;  %v13158_v26 = vld [vmem:[%s13385_s8 + $0x620] ss:$144 sps:$4 sm:$0xff]  }
 0x448   : > { %v11562_v23 = vadd.f32 %v11561_v2, %v11560_v40  ;;  %8618 = vmatmul.mubr.bf16.gmra.mrb[16].mxu0 %v13152_v5 }
 0x449   : > { %v15294_v46 = vadd.f32 %v11559_v17, %v8016_v55  ;;  %v8019_v25 = vadd.f32 %v11450_v30, %v15137_v31  ;;  %8779 = vmatmul.mubr.bf16.gmra.mrb[16].mxu1 %v13155_v32  ;;  %8625 = vmatprep.mubr.bf16.mxu0 %v13160_v7  ;;  %v13169_v31 = vld [vmem:[%s13385_s8 + $0x74c] ss:$144 sps:$4 sm:$0xff]   ;;  %v13172_v55 = vld [vmem:[%s13385_s8 + $0x864] ss:$144 sps:$4 sm:$0xff]  }
 0x44a   : > { %8786 = vmatprep.mubr.bf16.mxu1 %v13163_v1  ;;  %v13167_v1 = vld [vmem:[%s13385_s8 + $0x748] ss:$144 sps:$4 sm:$0xff]  }
 0x44b   : > { %v15297_v19 = vadd.f32 %v11562_v23, %v8019_v25  ;;  %v11451_v36 = vpop.f32.mrb[168].mxu0 }
 0x44c   : > { %v11563_v33 = vpop.f32.mrb[168].mxu1  ;;  %v11452_v45 = vpop.f32.mrb[169].mxu0 }
 0x44d   : > { %v11453_v43 = vadd.f32 %v11452_v45, %v11451_v36  ;;  %v11564_v37 = vpop.f32.mrb[169].mxu1  ;;  %v11454_v21 = vpop.f32.mrb[170].mxu0 }
 0x44e   : > { %v11565_v52 = vadd.f32 %v11564_v37, %v11563_v33  ;;  %v11566_v44 = vpop.f32.mrb[170].mxu1  ;;  %v11455_v54 = vpop.f32.mrb[171].mxu0 }
 0x44f   : > { %v8024_v18 = vadd.f32 %v11453_v43, %v15144_v34  ;;  %v11456_v63 = vadd.f32 %v11455_v54, %v11454_v21  ;;  %v11567_v42 = vpop.f32.mrb[171].mxu1  ;;  %v13164_v34 = vld [vmem:[%s13385_s8 + $0x740] ss:$144 sps:$4 sm:$0xff]  }
 0x450   : > { %v11568_v41 = vadd.f32 %v11567_v42, %v11566_v44  ;;  %8626 = vmatmul.mubr.bf16.gmra.mrb[20].mxu0 %v13158_v26 }
 0x451   : > { %v15304_v5 = vadd.f32 %v11565_v52, %v8024_v18  ;;  %v8027_v24 = vadd.f32 %v11456_v63, %v15147_v59  ;;  %8787 = vmatmul.mubr.bf16.gmra.mrb[20].mxu1 %v13161_v9  ;;  %8633 = vmatprep.mubr.bf16.mxu0 %v13166_v47  ;;  %v13175_v59 = vld [vmem:[%s13385_s8 + $0x86c] ss:$144 sps:$4 sm:$0xff]   ;;  %v13178_v18 = vld [vmem:[%s13385_s8 + $0x984] ss:$144 sps:$4 sm:$0xff]  }
 0x452   : > { %8794 = vmatprep.mubr.bf16.mxu1 %v13169_v31  ;;  %v13173_v31 = vld [vmem:[%s13385_s8 + $0x868] ss:$144 sps:$4 sm:$0xff]  }
 0x453   : > { %v15307_v49 = vadd.f32 %v11568_v41, %v8027_v24  ;;  %v11457_v57 = vpop.f32.mrb[172].mxu0 }
 0x454   : > { %v11569_v32 = vpop.f32.mrb[172].mxu1  ;;  %v11458_v7 = vpop.f32.mrb[173].mxu0 }
 0x455   : > { %v11459_v17 = vadd.f32 %v11458_v7, %v11457_v57  ;;  %v11570_v40 = vpop.f32.mrb[173].mxu1  ;;  %v11460_v20 = vpop.f32.mrb[174].mxu0 }
 0x456   : > { %v11571_v30 = vadd.f32 %v11570_v40, %v11569_v32  ;;  %v11572_v2 = vpop.f32.mrb[174].mxu1  ;;  %v11461_v23 = vpop.f32.mrb[175].mxu0 }
 0x457   : > { %v8032_v25 = vadd.f32 %v11459_v17, %v15154_v50  ;;  %v11462_v36 = vadd.f32 %v11461_v23, %v11460_v20  ;;  %v11573_v33 = vpop.f32.mrb[175].mxu1  ;;  %v13170_v50 = vld [vmem:[%s13385_s8 + $0x860] ss:$144 sps:$4 sm:$0xff]  }
 0x458   : > { %v11574_v45 = vadd.f32 %v11573_v33, %v11572_v2  ;;  %8634 = vmatmul.mubr.bf16.gmra.mrb[24].mxu0 %v13164_v34 }
 0x459   : > { %v15314_v26 = vadd.f32 %v11571_v30, %v8032_v25  ;;  %v8035_v43 = vadd.f32 %v11462_v36, %v15157_v53  ;;  %8795 = vmatmul.mubr.bf16.gmra.mrb[24].mxu1 %v13167_v1  ;;  %8641 = vmatprep.mubr.bf16.mxu0 %v13172_v55  ;;  %v13181_v53 = vld [vmem:[%s13385_s8 + $0x98c] ss:$144 sps:$4 sm:$0xff]   ;;  %v13184_v25 = vld [vmem:[%s13385_s8 + $0xaa4] ss:$144 sps:$4 sm:$0xff]  }
 0x45a   : > { %8802 = vmatprep.mubr.bf16.mxu1 %v13175_v59  ;;  %v13179_v59 = vld [vmem:[%s13385_s8 + $0x988] ss:$144 sps:$4 sm:$0xff]  }
 0x45b   : > { %v15317_v37 = vadd.f32 %v11574_v45, %v8035_v43  ;;  %v11463_v21 = vpop.f32.mrb[176].mxu0 }
 0x45c   : > { %v11575_v9 = vpop.f32.mrb[176].mxu1  ;;  %v11464_v47 = vpop.f32.mrb[177].mxu0 }
 0x45d   : > { %v11465_v52 = vadd.f32 %v11464_v47, %v11463_v21  ;;  %v11576_v44 = vpop.f32.mrb[177].mxu1  ;;  %v11466_v54 = vpop.f32.mrb[178].mxu0 }
 0x45e   : > { %v11577_v63 = vadd.f32 %v11576_v44, %v11575_v9  ;;  %v11578_v42 = vpop.f32.mrb[178].mxu1  ;;  %v11467_v41 = vpop.f32.mrb[179].mxu0 }
 0x45f   : > { %v8040_v24 = vadd.f32 %v11465_v52, %v15164_v29  ;;  %v11468_v57 = vadd.f32 %v11467_v41, %v11466_v54  ;;  %v11579_v32 = vpop.f32.mrb[179].mxu1  ;;  %v13176_v29 = vld [vmem:[%s13385_s8 + $0x980] ss:$144 sps:$4 sm:$0xff]  }
 0x460   : > { %v11580_v7 = vadd.f32 %v11579_v32, %v11578_v42  ;;  %8642 = vmatmul.mubr.bf16.gmra.mrb[28].mxu0 %v13170_v50 }
 0x461   : > { %v15324_v34 = vadd.f32 %v11577_v63, %v8040_v24  ;;  %v8043_v17 = vadd.f32 %v11468_v57, %v15167_v4  ;;  %8803 = vmatmul.mubr.bf16.gmra.mrb[28].mxu1 %v13173_v31  ;;  %8649 = vmatprep.mubr.bf16.mxu0 %v13178_v18  ;;  %v13187_v4 = vld [vmem:[%s13385_s8 + $0xaac] ss:$144 sps:$4 sm:$0xff]   ;;  %v13190_v24 = vld [vmem:[%s13385_s8 + $0xbc4] ss:$144 sps:$4 sm:$0xff]  }
 0x462   : > { %8810 = vmatprep.mubr.bf16.mxu1 %v13181_v53  ;;  %v13185_v53 = vld [vmem:[%s13385_s8 + $0xaa8] ss:$144 sps:$4 sm:$0xff]  }
 0x463   : > { %v15327_v40 = vadd.f32 %v11580_v7, %v8043_v17  ;;  %v11469_v20 = vpop.f32.mrb[180].mxu0 }
 0x464   : > { %v11581_v1 = vpop.f32.mrb[180].mxu1  ;;  %v11470_v55 = vpop.f32.mrb[181].mxu0 }
 0x465   : > { %v11471_v30 = vadd.f32 %v11470_v55, %v11469_v20  ;;  %v11582_v2 = vpop.f32.mrb[181].mxu1  ;;  %v11472_v23 = vpop.f32.mrb[182].mxu0 }
 0x466   : > { %v11583_v36 = vadd.f32 %v11582_v2, %v11581_v1  ;;  %v11584_v33 = vpop.f32.mrb[182].mxu1  ;;  %v11473_v45 = vpop.f32.mrb[183].mxu0 }
 0x467   : > { %v8048_v43 = vadd.f32 %v11471_v30, %v15174_v61  ;;  %v11474_v21 = vadd.f32 %v11473_v45, %v11472_v23  ;;  %v11585_v9 = vpop.f32.mrb[183].mxu1  ;;  %v13182_v61 = vld [vmem:[%s13385_s8 + $0xaa0] ss:$144 sps:$4 sm:$0xff]  }
 0x468   : > { %v11586_v47 = vadd.f32 %v11585_v9, %v11584_v33  ;;  %8650 = vmatmul.mubr.bf16.gmra.mrb[32].mxu0 %v13176_v29 }
 0x469   : > { %v15334_v50 = vadd.f32 %v11583_v36, %v8048_v43  ;;  %v8051_v52 = vadd.f32 %v11474_v21, %v15177_v56  ;;  %8811 = vmatmul.mubr.bf16.gmra.mrb[32].mxu1 %v13179_v59  ;;  %8657 = vmatprep.mubr.bf16.mxu0 %v13184_v25  ;;  %v13193_v56 = vld [vmem:[%s13385_s8 + $0xbcc] ss:$144 sps:$4 sm:$0xff]   ;;  %v13196_v43 = vld [vmem:[%s13385_s8 + $0xce4] ss:$144 sps:$4 sm:$0xff]  }
 0x46a   : > { %8818 = vmatprep.mubr.bf16.mxu1 %v13187_v4  ;;  %v13191_v4 = vld [vmem:[%s13385_s8 + $0xbc8] ss:$144 sps:$4 sm:$0xff]  }
 0x46b   : > { %v15337_v44 = vadd.f32 %v11586_v47, %v8051_v52  ;;  %v11475_v54 = vpop.f32.mrb[184].mxu0 }
 0x46c   : > { %v11587_v31 = vpop.f32.mrb[184].mxu1  ;;  %v11476_v18 = vpop.f32.mrb[185].mxu0 }
 0x46d   : > { %v11477_v63 = vadd.f32 %v11476_v18, %v11475_v54  ;;  %v11588_v42 = vpop.f32.mrb[185].mxu1  ;;  %v11478_v41 = vpop.f32.mrb[186].mxu0 }
 0x46e   : > { %v11589_v57 = vadd.f32 %v11588_v42, %v11587_v31  ;;  %v11590_v32 = vpop.f32.mrb[186].mxu1  ;;  %v11479_v7 = vpop.f32.mrb[187].mxu0 }
 0x46f   : > { %v8056_v17 = vadd.f32 %v11477_v63, %v15184_v62  ;;  %v11480_v20 = vadd.f32 %v11479_v7, %v11478_v41  ;;  %v11591_v1 = vpop.f32.mrb[187].mxu1  ;;  %v13188_v62 = vld [vmem:[%s13385_s8 + $0xbc0] ss:$144 sps:$4 sm:$0xff]  }
 0x470   : > { %v11592_v55 = vadd.f32 %v11591_v1, %v11590_v32  ;;  %8658 = vmatmul.mubr.bf16.gmra.mrb[36].mxu0 %v13182_v61 }
 0x471   : > { %v15344_v29 = vadd.f32 %v11589_v57, %v8056_v17  ;;  %v8059_v30 = vadd.f32 %v11480_v20, %v15187_v16  ;;  %8819 = vmatmul.mubr.bf16.gmra.mrb[36].mxu1 %v13185_v53  ;;  %8665 = vmatprep.mubr.bf16.mxu0 %v13190_v24  ;;  %v13199_v16 = vld [vmem:[%s13385_s8 + $0xcec] ss:$144 sps:$4 sm:$0xff]   ;;  %v13202_v17 = vld [vmem:[%s13385_s8 + $0xe04] ss:$144 sps:$4 sm:$0xff]  }
 0x472   : > { %8826 = vmatprep.mubr.bf16.mxu1 %v13193_v56  ;;  %v13197_v56 = vld [vmem:[%s13385_s8 + $0xce8] ss:$144 sps:$4 sm:$0xff]  }
 0x473   : > { %v15347_v2 = vadd.f32 %v11592_v55, %v8059_v30  ;;  %v11481_v23 = vpop.f32.mrb[188].mxu0 }
 0x474   : > { %v11593_v59 = vpop.f32.mrb[188].mxu1  ;;  %v11482_v25 = vpop.f32.mrb[189].mxu0 }
 0x475   : > { %v11483_v36 = vadd.f32 %v11482_v25, %v11481_v23  ;;  %v11594_v33 = vpop.f32.mrb[189].mxu1  ;;  %v11484_v45 = vpop.f32.mrb[190].mxu0 }
 0x476   : > { %v11595_v21 = vadd.f32 %v11594_v33, %v11593_v59  ;;  %v11596_v9 = vpop.f32.mrb[190].mxu1  ;;  %v11485_v47 = vpop.f32.mrb[191].mxu0 }
 0x477   : > { %v8064_v52 = vadd.f32 %v11483_v36, %v15194_v58  ;;  %v11486_v54 = vadd.f32 %v11485_v47, %v11484_v45  ;;  %v11597_v31 = vpop.f32.mrb[191].mxu1  ;;  %v13194_v58 = vld [vmem:[%s13385_s8 + $0xce0] ss:$144 sps:$4 sm:$0xff]  }
 0x478   : > { %v11598_v18 = vadd.f32 %v11597_v31, %v11596_v9  ;;  %8666 = vmatmul.mubr.bf16.gmra.mrb[40].mxu0 %v13188_v62 }
 0x479   : > { %v15354_v61 = vadd.f32 %v11595_v21, %v8064_v52  ;;  %v8067_v63 = vadd.f32 %v11486_v54, %v15197_v0  ;;  %8827 = vmatmul.mubr.bf16.gmra.mrb[40].mxu1 %v13191_v4  ;;  %8673 = vmatprep.mubr.bf16.mxu0 %v13196_v43  ;;  %v13205_v0 = vld [vmem:[%s13385_s8 + $0xe0c] ss:$144 sps:$4 sm:$0xff]   ;;  %v13208_v52 = vld [vmem:[%s13385_s8 + $0xf24] ss:$144 sps:$4 sm:$0xff]  }
 0x47a   : > { %8834 = vmatprep.mubr.bf16.mxu1 %v13199_v16  ;;  %v13203_v16 = vld [vmem:[%s13385_s8 + $0xe08] ss:$144 sps:$4 sm:$0xff]  }
 0x47b   : > { %v15357_v42 = vadd.f32 %v11598_v18, %v8067_v63  ;;  %v11615_v41 = vpop.f32.mrb[192].mxu0 }
 0x47c   : > { %v11727_v53 = vpop.f32.mrb[192].mxu1  ;;  %v11616_v24 = vpop.f32.mrb[193].mxu0 }
 0x47d   : > { %v11617_v57 = vadd.f32 %v11616_v24, %v11615_v41  ;;  %v11728_v32 = vpop.f32.mrb[193].mxu1  ;;  %v11618_v7 = vpop.f32.mrb[194].mxu0 }
 0x47e   : > { %v11729_v20 = vadd.f32 %v11728_v32, %v11727_v53  ;;  %v11730_v1 = vpop.f32.mrb[194].mxu1  ;;  %v11619_v55 = vpop.f32.mrb[195].mxu0 }
 0x47f   : > { %v8266_v30 = vadd.f32 %v11617_v57, %v15204_v6  ;;  %v11620_v23 = vadd.f32 %v11619_v55, %v11618_v7  ;;  %v11731_v59 = vpop.f32.mrb[195].mxu1  ;;  %v13200_v6 = vld [vmem:[%s13385_s8 + $0xe00] ss:$144 sps:$4 sm:$0xff]  }
 0x480   : > { %v11732_v25 = vadd.f32 %v11731_v59, %v11730_v1  ;;  %8674 = vmatmul.mubr.bf16.gmra.mrb[44].mxu0 %v13194_v58 }
 0x481   : > { %v15364_v62 = vadd.f32 %v11729_v20, %v8266_v30  ;;  %v8269_v36 = vadd.f32 %v11620_v23, %v15207_v14  ;;  %8835 = vmatmul.mubr.bf16.gmra.mrb[44].mxu1 %v13197_v56  ;;  %8681 = vmatprep.mubr.bf16.mxu0 %v13202_v17  ;;  %v13211_v14 = vld [vmem:[%s13385_s8 + $0xf2c] ss:$144 sps:$4 sm:$0xff]   ;;  %v13214_v30 = vld [vmem:[%s13385_s8 + $0x1044] ss:$144 sps:$4 sm:$0xff]  }
 0x482   : > { %8842 = vmatprep.mubr.bf16.mxu1 %v13205_v0  ;;  %v13209_v0 = vld [vmem:[%s13385_s8 + $0xf28] ss:$144 sps:$4 sm:$0xff]  }
 0x483   : > { %v15367_v33 = vadd.f32 %v11732_v25, %v8269_v36  ;;  %v11621_v45 = vpop.f32.mrb[196].mxu0 }
 0x484   : > { %v11733_v4 = vpop.f32.mrb[196].mxu1  ;;  %v11622_v43 = vpop.f32.mrb[197].mxu0 }
 0x485   : > { %v11623_v21 = vadd.f32 %v11622_v43, %v11621_v45  ;;  %v11734_v9 = vpop.f32.mrb[197].mxu1  ;;  %v11624_v47 = vpop.f32.mrb[198].mxu0 }
 0x486   : > { %v11735_v54 = vadd.f32 %v11734_v9, %v11733_v4  ;;  %v11736_v31 = vpop.f32.mrb[198].mxu1  ;;  %v11625_v18 = vpop.f32.mrb[199].mxu0 }
 0x487   : > { %v8274_v63 = vadd.f32 %v11623_v21, %v15214_v27  ;;  %v11626_v41 = vadd.f32 %v11625_v18, %v11624_v47  ;;  %v11737_v53 = vpop.f32.mrb[199].mxu1  ;;  %v13206_v27 = vld [vmem:[%s13385_s8 + $0xf20] ss:$144 sps:$4 sm:$0xff]  }
 0x488   : > { %v11738_v24 = vadd.f32 %v11737_v53, %v11736_v31  ;;  %8682 = vmatmul.mubr.bf16.gmra.mrb[48].mxu0 %v13200_v6 }
 0x489   : > { %v15374_v58 = vadd.f32 %v11735_v54, %v8274_v63  ;;  %v8277_v57 = vadd.f32 %v11626_v41, %v15217_v10  ;;  %8843 = vmatmul.mubr.bf16.gmra.mrb[48].mxu1 %v13203_v16  ;;  %8689 = vmatprep.mubr.bf16.mxu0 %v13208_v52  ;;  %v13217_v10 = vld [vmem:[%s13385_s8 + $0x104c] ss:$144 sps:$4 sm:$0xff]   ;;  %v13220_v63 = vld [vmem:[%s13385_s8 + $0x1164] ss:$144 sps:$4 sm:$0xff]  }
 0x48a   : > { %8850 = vmatprep.mubr.bf16.mxu1 %v13211_v14  ;;  %v13215_v14 = vld [vmem:[%s13385_s8 + $0x1048] ss:$144 sps:$4 sm:$0xff]  }
 0x48b   : > { %v15377_v32 = vadd.f32 %v11738_v24, %v8277_v57  ;;  %v11627_v7 = vpop.f32.mrb[200].mxu0 }
 0x48c   : > { %v11739_v56 = vpop.f32.mrb[200].mxu1  ;;  %v11628_v17 = vpop.f32.mrb[201].mxu0 }
 0x48d   : > { %v11629_v20 = vadd.f32 %v11628_v17, %v11627_v7  ;;  %v11740_v1 = vpop.f32.mrb[201].mxu1  ;;  %v11630_v55 = vpop.f32.mrb[202].mxu0 }
 0x48e   : > { %v11741_v23 = vadd.f32 %v11740_v1, %v11739_v56  ;;  %v11742_v59 = vpop.f32.mrb[202].mxu1  ;;  %v11631_v25 = vpop.f32.mrb[203].mxu0 }
 0x48f   : > { %v8282_v36 = vadd.f32 %v11629_v20, %v15224_v13  ;;  %v11632_v45 = vadd.f32 %v11631_v25, %v11630_v55  ;;  %v11743_v4 = vpop.f32.mrb[203].mxu1  ;;  %v13212_v13 = vld [vmem:[%s13385_s8 + $0x1040] ss:$144 sps:$4 sm:$0xff]  }
 0x490   : > { %v11744_v43 = vadd.f32 %v11743_v4, %v11742_v59  ;;  %8690 = vmatmul.mubr.bf16.gmra.mrb[52].mxu0 %v13206_v27 }
 0x491   : > { %v15384_v6 = vadd.f32 %v11741_v23, %v8282_v36  ;;  %v8285_v21 = vadd.f32 %v11632_v45, %v15227_v8  ;;  %8851 = vmatmul.mubr.bf16.gmra.mrb[52].mxu1 %v13209_v0  ;;  %8697 = vmatprep.mubr.bf16.mxu0 %v13214_v30  ;;  %v13223_v8 = vld [vmem:[%s13385_s8 + $0x116c] ss:$144 sps:$4 sm:$0xff]   ;;  %v13218_v23 = vld [vmem:[%s13385_s8 + $0x1160] ss:$144 sps:$4 sm:$0xff]  }
 0x492   : > { %8858 = vmatprep.mubr.bf16.mxu1 %v13217_v10  ;;  %v13221_v10 = vld [vmem:[%s13385_s8 + $0x1168] ss:$144 sps:$4 sm:$0xff]   ;;  %s9163_s8 = sshll.u32 %s15566_s23, 3  ;;  %s9164_s23 = sshll.u32 %s15568_s12, 3 }
 0x493   : > { %v15387_v9 = vadd.f32 %v11744_v43, %v8285_v21  ;;  %v11633_v47 = vpop.f32.mrb[204].mxu0  ;;  %s15478_s28 = scalar_lea.vmem %s15559_s2, %s9163_s8  ;;  %s215_s4 = scalar_lea.vmem %s15560_s3, %s9164_s23 }
 0x494   : > { %v11745_v16 = vpop.f32.mrb[204].mxu1  ;;  %v11634_v52 = vpop.f32.mrb[205].mxu0 }
 0x495   : > { %v11635_v54 = vadd.f32 %v11634_v52, %v11633_v47  ;;  %v11746_v31 = vpop.f32.mrb[205].mxu1  ;;  %v11636_v18 = vpop.f32.mrb[206].mxu0 }
 0x496   : > { %v11747_v41 = vadd.f32 %v11746_v31, %v11745_v16  ;;  %v11748_v53 = vpop.f32.mrb[206].mxu1  ;;  %v11637_v24 = vpop.f32.mrb[207].mxu0 }
 0x497   : > { %v8290_v57 = vadd.f32 %v11635_v54, %v15234_v35  ;;  %v11638_v7 = vadd.f32 %v11637_v24, %v11636_v18  ;;  %v11749_v56 = vpop.f32.mrb[207].mxu1 }
 0x498   : > { %v11750_v17 = vadd.f32 %v11749_v56, %v11748_v53  ;;  %8698 = vmatmul.mubr.bf16.gmra.mrb[56].mxu0 %v13212_v13 }
 0x499   : > { %v15394_v27 = vadd.f32 %v11747_v41, %v8290_v57  ;;  %v8293_v20 = vadd.f32 %v11638_v7, %v15237_v38  ;;  %8859 = vmatmul.mubr.bf16.gmra.mrb[56].mxu1 %v13215_v14  ;;  %8705 = vmatprep.mubr.bf16.mxu0 %v13220_v63 }
 0x49a   : > { %8866 = vmatprep.mubr.bf16.mxu1 %v13223_v8 }
 0x49b   : > { %v15397_v1 = vadd.f32 %v11750_v17, %v8293_v20  ;;  %v11639_v55 = vpop.f32.mrb[208].mxu0 }
 0x49c   : > { %v11751_v0 = vpop.f32.mrb[208].mxu1  ;;  %v11640_v30 = vpop.f32.mrb[209].mxu0 }
 0x49d   : > { %v11641_v59 = vadd.f32 %v11640_v30, %v11639_v55  ;;  %v11752_v35 = vpop.f32.mrb[209].mxu1  ;;  %v11642_v25 = vpop.f32.mrb[210].mxu0 }
 0x49e   : > { %v11753_v36 = vadd.f32 %v11752_v35, %v11751_v0  ;;  %v11754_v45 = vpop.f32.mrb[210].mxu1  ;;  %v11643_v4 = vpop.f32.mrb[211].mxu0 }
 0x49f   : > { %v8298_v43 = vadd.f32 %v11641_v59, %v15244_v3  ;;  %v11644_v21 = vadd.f32 %v11643_v4, %v11642_v25  ;;  %v11755_v38 = vpop.f32.mrb[211].mxu1 }
 0x4a0   : > { %v11756_v47 = vadd.f32 %v11755_v38, %v11754_v45  ;;  %8706 = vmatmul.mubr.bf16.gmra.mrb[60].mxu0 %v13218_v23 }
 0x4a1   : > { %v15402_v16 = vadd.f32 %v11753_v36, %v8298_v43  ;;  %v8301_v52 = vadd.f32 %v11644_v21, %v15247_v60  ;;  %8867 = vmatmul.mubr.bf16.gmra.mrb[60].mxu1 %v13221_v10 }
 0x4a3   : > { %v15405_v13 = vadd.f32 %v11756_v47, %v8301_v52  ;;  %v11645_v54 = vpop.f32.mrb[212].mxu0 }
 0x4a4   : > { %v11757_v31 = vpop.f32.mrb[212].mxu1  ;;  %v11646_v18 = vpop.f32.mrb[213].mxu0 }
 0x4a5   : > { %v11647_v14 = vadd.f32 %v11646_v18, %v11645_v54  ;;  %v11758_v63 = vpop.f32.mrb[213].mxu1  ;;  %v11648_v41 = vpop.f32.mrb[214].mxu0 }
 0x4a6   : > { %v11759_v53 = vadd.f32 %v11758_v63, %v11757_v31  ;;  %v11760_v24 = vpop.f32.mrb[214].mxu1  ;;  %v11649_v3 = vpop.f32.mrb[215].mxu0 }
 0x4a7   : > { %v8306_v8 = vadd.f32 %v11647_v14, %v15254_v12  ;;  %v11650_v57 = vadd.f32 %v11649_v3, %v11648_v41  ;;  %v11761_v7 = vpop.f32.mrb[215].mxu1 }
 0x4a8   : > { %v11762_v56 = vadd.f32 %v11761_v7, %v11760_v24 }
 0x4a9   : > { %v15408_v17 = vadd.f32 %v11759_v53, %v8306_v8  ;;  %v8309_v60 = vadd.f32 %v11650_v57, %v15257_v39 }
 0x4ab   : > { %v15411_v20 = vadd.f32 %v11762_v56, %v8309_v60  ;;  %v11651_v55 = vpop.f32.mrb[216].mxu0 }
 0x4ac   : > { %v11763_v0 = vpop.f32.mrb[216].mxu1  ;;  %v11652_v30 = vpop.f32.mrb[217].mxu0 }
 0x4ad   : > { %v11653_v23 = vadd.f32 %v11652_v30, %v11651_v55  ;;  %v11764_v59 = vpop.f32.mrb[217].mxu1  ;;  %v11654_v35 = vpop.f32.mrb[218].mxu0 }
 0x4ae   : > { %v11765_v25 = vadd.f32 %v11764_v59, %v11763_v0  ;;  %v11766_v10 = vpop.f32.mrb[218].mxu1  ;;  %v11655_v36 = vpop.f32.mrb[219].mxu0 }
 0x4af   : > { %v8314_v12 = vadd.f32 %v11653_v23, %v15264_v15  ;;  %v11656_v45 = vadd.f32 %v11655_v36, %v11654_v35  ;;  %v11767_v4 = vpop.f32.mrb[219].mxu1 }
 0x4b0   : > { %v11768_v43 = vadd.f32 %v11767_v4, %v11766_v10 }
 0x4b1   : > { %v15414_v21 = vadd.f32 %v11765_v25, %v8314_v12  ;;  %v8317_v39 = vadd.f32 %v11656_v45, %v15267_v11 }
 0x4b3   : > { %v15417_v38 = vadd.f32 %v11768_v43, %v8317_v39  ;;  %v11657_v47 = vpop.f32.mrb[220].mxu0 }
 0x4b4   : > { %v11769_v52 = vpop.f32.mrb[220].mxu1  ;;  %v11658_v54 = vpop.f32.mrb[221].mxu0 }
 0x4b5   : > { %v11659_v31 = vadd.f32 %v11658_v54, %v11657_v47  ;;  %v11770_v18 = vpop.f32.mrb[221].mxu1  ;;  %v11660_v14 = vpop.f32.mrb[222].mxu0 }
 0x4b6   : > { %v11771_v63 = vadd.f32 %v11770_v18, %v11769_v52  ;;  %v11772_v41 = vpop.f32.mrb[222].mxu1  ;;  %v11661_v53 = vpop.f32.mrb[223].mxu0 }
 0x4b7   : > { %v8322_v15 = vadd.f32 %v11659_v31, %v15274_v28  ;;  %v11662_v24 = vadd.f32 %v11661_v53, %v11660_v14  ;;  %v11773_v3 = vpop.f32.mrb[223].mxu1 }
 0x4b8   : > { %v11774_v8 = vadd.f32 %v11773_v3, %v11772_v41 }
 0x4b9   : > { %v15420_v57 = vadd.f32 %v11771_v63, %v8322_v15  ;;  %v8325_v11 = vadd.f32 %v11662_v24, %v15277_v22 }
 0x4bb   : > { %v15423_v7 = vadd.f32 %v11774_v8, %v8325_v11  ;;  %v11663_v56 = vpop.f32.mrb[224].mxu0 }
 0x4bc   : > { %v11775_v60 = vpop.f32.mrb[224].mxu1  ;;  %v11664_v55 = vpop.f32.mrb[225].mxu0 }
 0x4bd   : > { %v11665_v0 = vadd.f32 %v11664_v55, %v11663_v56  ;;  %v11776_v30 = vpop.f32.mrb[225].mxu1  ;;  %v11666_v23 = vpop.f32.mrb[226].mxu0 }
 0x4be   : > { %v11777_v59 = vadd.f32 %v11776_v30, %v11775_v60  ;;  %v11778_v35 = vpop.f32.mrb[226].mxu1  ;;  %v11667_v25 = vpop.f32.mrb[227].mxu0 }
 0x4bf   : > { %v8330_v28 = vadd.f32 %v11665_v0, %v15284_v51  ;;  %v11668_v10 = vadd.f32 %v11667_v25, %v11666_v23  ;;  %v11779_v36 = vpop.f32.mrb[227].mxu1 }
 0x4c0   : > { %v11780_v12 = vadd.f32 %v11779_v36, %v11778_v35 }
 0x4c1   : > { %v15426_v45 = vadd.f32 %v11777_v59, %v8330_v28  ;;  %v8333_v22 = vadd.f32 %v11668_v10, %v15287_v48 }
 0x4c3   : > { %v15429_v4 = vadd.f32 %v11780_v12, %v8333_v22  ;;  %v11669_v43 = vpop.f32.mrb[228].mxu0 }
 0x4c4   : > { %v11781_v39 = vpop.f32.mrb[228].mxu1  ;;  %v11670_v47 = vpop.f32.mrb[229].mxu0 }
 0x4c5   : > { %v11671_v52 = vadd.f32 %v11670_v47, %v11669_v43  ;;  %v11782_v54 = vpop.f32.mrb[229].mxu1  ;;  %v11672_v31 = vpop.f32.mrb[230].mxu0 }
 0x4c6   : > { %v11783_v18 = vadd.f32 %v11782_v54, %v11781_v39  ;;  %v11784_v14 = vpop.f32.mrb[230].mxu1  ;;  %v11673_v63 = vpop.f32.mrb[231].mxu0 }
 0x4c7   : > { %v8338_v51 = vadd.f32 %v11671_v52, %v15294_v46  ;;  %v11674_v41 = vadd.f32 %v11673_v63, %v11672_v31  ;;  %v11785_v53 = vpop.f32.mrb[231].mxu1 }
 0x4c8   : > { %v11786_v15 = vadd.f32 %v11785_v53, %v11784_v14 }
 0x4c9   : > { %v15432_v24 = vadd.f32 %v11783_v18, %v8338_v51  ;;  %v8341_v48 = vadd.f32 %v11674_v41, %v15297_v19 }
 0x4cb   : > { %v15435_v3 = vadd.f32 %v11786_v15, %v8341_v48  ;;  %v11675_v8 = vpop.f32.mrb[232].mxu0 }
 0x4cc   : > { %v11787_v11 = vpop.f32.mrb[232].mxu1  ;;  %v11676_v56 = vpop.f32.mrb[233].mxu0 }
 0x4cd   : > { %v11677_v60 = vadd.f32 %v11676_v56, %v11675_v8  ;;  %v11788_v55 = vpop.f32.mrb[233].mxu1  ;;  %v11678_v0 = vpop.f32.mrb[234].mxu0 }
 0x4ce   : > { %v11789_v30 = vadd.f32 %v11788_v55, %v11787_v11  ;;  %v11790_v23 = vpop.f32.mrb[234].mxu1  ;;  %v11679_v59 = vpop.f32.mrb[235].mxu0 }
 0x4cf   : > { %v8346_v46 = vadd.f32 %v11677_v60, %v15304_v5  ;;  %v11680_v35 = vadd.f32 %v11679_v59, %v11678_v0  ;;  %v11791_v25 = vpop.f32.mrb[235].mxu1 }
 0x4d0   : > { %v11792_v28 = vadd.f32 %v11791_v25, %v11790_v23 }
 0x4d1   : > { %v15438_v10 = vadd.f32 %v11789_v30, %v8346_v46  ;;  %v8349_v19 = vadd.f32 %v11680_v35, %v15307_v49 }
 0x4d3   : > { %v15441_v36 = vadd.f32 %v11792_v28, %v8349_v19  ;;  %v11681_v12 = vpop.f32.mrb[236].mxu0 }
 0x4d4   : > { %v11793_v22 = vpop.f32.mrb[236].mxu1  ;;  %v11682_v43 = vpop.f32.mrb[237].mxu0 }
 0x4d5   : > { %v11683_v39 = vadd.f32 %v11682_v43, %v11681_v12  ;;  %v11794_v47 = vpop.f32.mrb[237].mxu1  ;;  %v11684_v52 = vpop.f32.mrb[238].mxu0 }
 0x4d6   : > { %v11795_v54 = vadd.f32 %v11794_v47, %v11793_v22  ;;  %v11796_v31 = vpop.f32.mrb[238].mxu1  ;;  %v11685_v18 = vpop.f32.mrb[239].mxu0 }
 0x4d7   : > { %v8354_v5 = vadd.f32 %v11683_v39, %v15314_v26  ;;  %v11686_v14 = vadd.f32 %v11685_v18, %v11684_v52  ;;  %v11797_v63 = vpop.f32.mrb[239].mxu1 }
 0x4d8   : > { %v11798_v51 = vadd.f32 %v11797_v63, %v11796_v31 }
 0x4d9   : > { %v15444_v41 = vadd.f32 %v11795_v54, %v8354_v5  ;;  %v8357_v49 = vadd.f32 %v11686_v14, %v15317_v37 }
 0x4db   : > { %v15447_v53 = vadd.f32 %v11798_v51, %v8357_v49  ;;  %v11687_v15 = vpop.f32.mrb[240].mxu0 }
 0x4dc   : > { %v11799_v48 = vpop.f32.mrb[240].mxu1  ;;  %v11688_v8 = vpop.f32.mrb[241].mxu0 }
 0x4dd   : > { %v11689_v11 = vadd.f32 %v11688_v8, %v11687_v15  ;;  %v11800_v56 = vpop.f32.mrb[241].mxu1  ;;  %v11690_v60 = vpop.f32.mrb[242].mxu0 }
 0x4de   : > { %v11801_v55 = vadd.f32 %v11800_v56, %v11799_v48  ;;  %v11802_v0 = vpop.f32.mrb[242].mxu1  ;;  %v11691_v30 = vpop.f32.mrb[243].mxu0 }
 0x4df   : > { %v8362_v26 = vadd.f32 %v11689_v11, %v15324_v34  ;;  %v11692_v23 = vadd.f32 %v11691_v30, %v11690_v60  ;;  %v11803_v59 = vpop.f32.mrb[243].mxu1 }
 0x4e0   : > { %v11804_v46 = vadd.f32 %v11803_v59, %v11802_v0 }
 0x4e1   : > { %v15450_v35 = vadd.f32 %v11801_v55, %v8362_v26  ;;  %v8365_v37 = vadd.f32 %v11692_v23, %v15327_v40 }
 0x4e3   : > { %v15453_v25 = vadd.f32 %v11804_v46, %v8365_v37  ;;  %v11693_v28 = vpop.f32.mrb[244].mxu0 }
 0x4e4   : > { %v11805_v19 = vpop.f32.mrb[244].mxu1  ;;  %v11694_v12 = vpop.f32.mrb[245].mxu0 }
 0x4e5   : > { %v11695_v22 = vadd.f32 %v11694_v12, %v11693_v28  ;;  %v11806_v43 = vpop.f32.mrb[245].mxu1  ;;  %v11696_v39 = vpop.f32.mrb[246].mxu0 }
 0x4e6   : > { %v11807_v47 = vadd.f32 %v11806_v43, %v11805_v19  ;;  %v11808_v52 = vpop.f32.mrb[246].mxu1  ;;  %v11697_v54 = vpop.f32.mrb[247].mxu0 }
 0x4e7   : > { %v8370_v34 = vadd.f32 %v11695_v22, %v15334_v50  ;;  %v11698_v31 = vadd.f32 %v11697_v54, %v11696_v39  ;;  %v11809_v18 = vpop.f32.mrb[247].mxu1 }
 0x4e8   : > { %v11810_v5 = vadd.f32 %v11809_v18, %v11808_v52 }
 0x4e9   : > { %v15456_v14 = vadd.f32 %v11807_v47, %v8370_v34  ;;  %v8373_v40 = vadd.f32 %v11698_v31, %v15337_v44 }
 0x4eb   : > { %v15459_v63 = vadd.f32 %v11810_v5, %v8373_v40  ;;  %v11699_v51 = vpop.f32.mrb[248].mxu0 }
 0x4ec   : > { %v11811_v49 = vpop.f32.mrb[248].mxu1  ;;  %v11700_v15 = vpop.f32.mrb[249].mxu0 }
 0x4ed   : > { %v11701_v48 = vadd.f32 %v11700_v15, %v11699_v51  ;;  %v11812_v8 = vpop.f32.mrb[249].mxu1  ;;  %v11702_v11 = vpop.f32.mrb[250].mxu0 }
 0x4ee   : > { %v11813_v56 = vadd.f32 %v11812_v8, %v11811_v49  ;;  %v11814_v60 = vpop.f32.mrb[250].mxu1  ;;  %v11703_v55 = vpop.f32.mrb[251].mxu0 }
 0x4ef   : > { %v8378_v50 = vadd.f32 %v11701_v48, %v15344_v29  ;;  %v11704_v0 = vadd.f32 %v11703_v55, %v11702_v11  ;;  %v11815_v30 = vpop.f32.mrb[251].mxu1 }
 0x4f0   : > { %v11816_v26 = vadd.f32 %v11815_v30, %v11814_v60 }
 0x4f1   : > { %v15462_v23 = vadd.f32 %v11813_v56, %v8378_v50  ;;  %v8381_v44 = vadd.f32 %v11704_v0, %v15347_v2 }
 0x4f3   : > { %v15465_v59 = vadd.f32 %v11816_v26, %v8381_v44  ;;  %v11705_v46 = vpop.f32.mrb[252].mxu0 }
 0x4f4   : > { %v11817_v37 = vpop.f32.mrb[252].mxu1  ;;  %v11706_v28 = vpop.f32.mrb[253].mxu0 }
 0x4f5   : > { %v11707_v19 = vadd.f32 %v11706_v28, %v11705_v46  ;;  %v11818_v12 = vpop.f32.mrb[253].mxu1  ;;  %v11708_v22 = vpop.f32.mrb[254].mxu0 }
 0x4f6   : > { %v11819_v43 = vadd.f32 %v11818_v12, %v11817_v37  ;;  %v11820_v39 = vpop.f32.mrb[254].mxu1  ;;  %v11709_v47 = vpop.f32.mrb[255].mxu0 }
 0x4f7   : > { %v8386_v29 = vadd.f32 %v11707_v19, %v15354_v61  ;;  %v11710_v52 = vadd.f32 %v11709_v47, %v11708_v22  ;;  %v11821_v54 = vpop.f32.mrb[255].mxu1 }
 0x4f8   : > { %v11822_v34 = vadd.f32 %v11821_v54, %v11820_v39 }
 0x4f9   : > { %v15468_v31 = vadd.f32 %v11819_v43, %v8386_v29  ;;  %v8389_v2 = vadd.f32 %v11710_v52, %v15357_v42 }
 0x4fb   : > { %v15471_v18 = vadd.f32 %v11822_v34, %v8389_v2  ;;  %v11839_v5 = vpop.f32.mrb[0].mxu0 }
 0x4fc   : > { %v11951_v40 = vpop.f32.mrb[0].mxu1  ;;  %v11840_v51 = vpop.f32.mrb[1].mxu0 }
 0x4fd   : > { %v11841_v49 = vadd.f32 %v11840_v51, %v11839_v5  ;;  %v11952_v15 = vpop.f32.mrb[1].mxu1  ;;  %v11842_v48 = vpop.f32.mrb[2].mxu0 }
 0x4fe   : > { %v11953_v8 = vadd.f32 %v11952_v15, %v11951_v40  ;;  %v11954_v11 = vpop.f32.mrb[2].mxu1  ;;  %v11843_v56 = vpop.f32.mrb[3].mxu0 }
 0x4ff   : > { %v8588_v61 = vadd.f32 %v11841_v49, %v15364_v62  ;;  %v11844_v60 = vadd.f32 %v11843_v56, %v11842_v48  ;;  %v11955_v55 = vpop.f32.mrb[3].mxu1 }
 0x500   : > { %v11956_v42 = vadd.f32 %v11955_v55, %v11954_v11 }
 0x501   : > { %v8749_v50 = vadd.f32 %v11953_v8, %v8588_v61  ;;  %v8591_v0 = vadd.f32 %v11844_v60, %v15367_v33 }
 0x503   : > { %8875 = vst [vmem:[%s15478_s28] sm:$0xff] %v8749_v50  ;;  %v8752_v30 = vadd.f32 %v11956_v42, %v8591_v0  ;;  %v11845_v26 = vpop.f32.mrb[4].mxu0  ;;  %v8976_v37 = vmul.f32 %v8749_v50, %v8749_v50 }
 0x504   : > { %v11957_v44 = vpop.f32.mrb[4].mxu1  ;;  %v11846_v46 = vpop.f32.mrb[5].mxu0 }
 0x505   : > { %8876 = vst [vmem:[%s15478_s28 + $0x8] sm:$0xff] %v8752_v30  ;;  %v8939_v62 = vadd.f32 %v8752_v30, %v8749_v50  ;;  %v8977_v28 = vmul.f32 %v8752_v30, %v8752_v30  ;;  %v11847_v19 = vadd.f32 %v11846_v46, %v11845_v26  ;;  %v11958_v12 = vpop.f32.mrb[5].mxu1  ;;  %v11848_v22 = vpop.f32.mrb[6].mxu0 }
 0x506   : > { %v11959_v43 = vadd.f32 %v11958_v12, %v11957_v44  ;;  %v11960_v39 = vpop.f32.mrb[6].mxu1  ;;  %v11849_v47 = vpop.f32.mrb[7].mxu0 }
 0x507   : > { %v9008_v29 = vadd.f32 %v8977_v28, %v8976_v37  ;;  %v8596_v33 = vadd.f32 %v11847_v19, %v15374_v58  ;;  %v11850_v52 = vadd.f32 %v11849_v47, %v11848_v22  ;;  %v11961_v54 = vpop.f32.mrb[7].mxu1 }
 0x508   : > { %v11962_v34 = vadd.f32 %v11961_v54, %v11960_v39 }
 0x509   : > { %v8757_v2 = vadd.f32 %v11959_v43, %v8596_v33  ;;  %v8599_v5 = vadd.f32 %v11850_v52, %v15377_v32 }
 0x50b   : > { %8877 = vst [vmem:[%s15478_s28 + $0x10] sm:$0xff] %v8757_v2  ;;  %v8940_v40 = vadd.f32 %v8939_v62, %v8757_v2  ;;  %v8978_v51 = vmul.f32 %v8757_v2, %v8757_v2  ;;  %v8760_v49 = vadd.f32 %v11962_v34, %v8599_v5  ;;  %v11851_v15 = vpop.f32.mrb[8].mxu0 }
 0x50c   : > { %v11963_v48 = vpop.f32.mrb[8].mxu1  ;;  %v11852_v8 = vpop.f32.mrb[9].mxu0 }
 0x50d   : > { %v9009_v11 = vadd.f32 %v9008_v29, %v8978_v51  ;;  %8878 = vst [vmem:[%s15478_s28 + $0x18] sm:$0xff] %v8760_v49  ;;  %v8941_v56 = vadd.f32 %v8940_v40, %v8760_v49  ;;  %v8979_v61 = vmul.f32 %v8760_v49, %v8760_v49  ;;  %v11853_v60 = vadd.f32 %v11852_v8, %v11851_v15  ;;  %v11964_v58 = vpop.f32.mrb[9].mxu1  ;;  %v11854_v55 = vpop.f32.mrb[10].mxu0 }
 0x50e   : > { %v11965_v42 = vadd.f32 %v11964_v58, %v11963_v48  ;;  %v11966_v50 = vpop.f32.mrb[10].mxu1  ;;  %v11855_v0 = vpop.f32.mrb[11].mxu0 }
 0x50f   : > { %v9010_v32 = vadd.f32 %v9009_v11, %v8979_v61  ;;  %v8604_v30 = vadd.f32 %v11853_v60, %v15384_v6  ;;  %v11856_v26 = vadd.f32 %v11855_v0, %v11854_v55  ;;  %v11967_v44 = vpop.f32.mrb[11].mxu1 }
 0x510   : > { %v11968_v46 = vadd.f32 %v11967_v44, %v11966_v50 }
 0x511   : > { %v8765_v37 = vadd.f32 %v11965_v42, %v8604_v30  ;;  %v8607_v62 = vadd.f32 %v11856_v26, %v15387_v9 }
 0x513   : > { %8879 = vst [vmem:[%s15478_s28 + $0x20] sm:$0xff] %v8765_v37  ;;  %v8942_v28 = vadd.f32 %v8941_v56, %v8765_v37  ;;  %v8980_v19 = vmul.f32 %v8765_v37, %v8765_v37  ;;  %v8768_v12 = vadd.f32 %v11968_v46, %v8607_v62  ;;  %v11857_v22 = vpop.f32.mrb[12].mxu0 }
 0x514   : > { %v11969_v43 = vpop.f32.mrb[12].mxu1  ;;  %v11858_v39 = vpop.f32.mrb[13].mxu0 }
 0x515   : > { %v9011_v47 = vadd.f32 %v9010_v32, %v8980_v19  ;;  %8880 = vst [vmem:[%s15478_s28 + $0x28] sm:$0xff] %v8768_v12  ;;  %v8943_v29 = vadd.f32 %v8942_v28, %v8768_v12  ;;  %v8981_v33 = vmul.f32 %v8768_v12, %v8768_v12  ;;  %v11859_v52 = vadd.f32 %v11858_v39, %v11857_v22  ;;  %v11970_v6 = vpop.f32.mrb[13].mxu1  ;;  %v11860_v54 = vpop.f32.mrb[14].mxu0 }
 0x516   : > { %v11971_v34 = vadd.f32 %v11970_v6, %v11969_v43  ;;  %v11972_v2 = vpop.f32.mrb[14].mxu1  ;;  %v11861_v5 = vpop.f32.mrb[15].mxu0 }
 0x517   : > { %v9012_v9 = vadd.f32 %v9011_v47, %v8981_v33  ;;  %v8612_v40 = vadd.f32 %v11859_v52, %v15394_v27  ;;  %v11862_v51 = vadd.f32 %v11861_v5, %v11860_v54  ;;  %v11973_v49 = vpop.f32.mrb[15].mxu1 }
 0x518   : > { %v11974_v15 = vadd.f32 %v11973_v49, %v11972_v2 }
 0x519   : > { %v8773_v48 = vadd.f32 %v11971_v34, %v8612_v40  ;;  %v8615_v8 = vadd.f32 %v11862_v51, %v15397_v1 }
 0x51b   : > { %8881 = vst [vmem:[%s15478_s28 + $0x30] sm:$0xff] %v8773_v48  ;;  %v8944_v11 = vadd.f32 %v8943_v29, %v8773_v48  ;;  %v8982_v56 = vmul.f32 %v8773_v48, %v8773_v48  ;;  %v8776_v61 = vadd.f32 %v11974_v15, %v8615_v8  ;;  %v11863_v60 = vpop.f32.mrb[16].mxu0 }
 0x51c   : > { %v11975_v58 = vpop.f32.mrb[16].mxu1  ;;  %v11864_v55 = vpop.f32.mrb[17].mxu0 }
 0x51d   : > { %v9013_v42 = vadd.f32 %v9012_v9, %v8982_v56  ;;  %8882 = vst [vmem:[%s15478_s28 + $0x38] sm:$0xff] %v8776_v61  ;;  %v8945_v50 = vadd.f32 %v8944_v11, %v8776_v61  ;;  %v8983_v0 = vmul.f32 %v8776_v61, %v8776_v61  ;;  %v11865_v32 = vadd.f32 %v11864_v55, %v11863_v60  ;;  %v11976_v27 = vpop.f32.mrb[17].mxu1  ;;  %v11866_v30 = vpop.f32.mrb[18].mxu0 }
 0x51e   : > { %v11977_v26 = vadd.f32 %v11976_v27, %v11975_v58  ;;  %v11978_v44 = vpop.f32.mrb[18].mxu1  ;;  %v11867_v46 = vpop.f32.mrb[19].mxu0 }
 0x51f   : > { %v9014_v1 = vadd.f32 %v9013_v42, %v8983_v0  ;;  %v8620_v37 = vadd.f32 %v11865_v32, %v15402_v16  ;;  %v11868_v62 = vadd.f32 %v11867_v46, %v11866_v30  ;;  %v11979_v28 = vpop.f32.mrb[19].mxu1 }
 0x520   : > { %v11980_v19 = vadd.f32 %v11979_v28, %v11978_v44 }
 0x521   : > { %v8781_v12 = vadd.f32 %v11977_v26, %v8620_v37  ;;  %v8623_v22 = vadd.f32 %v11868_v62, %v15405_v13 }
 0x523   : > { %8883 = vst [vmem:[%s15478_s28 + $0x40] sm:$0xff] %v8781_v12  ;;  %v8946_v43 = vadd.f32 %v8945_v50, %v8781_v12  ;;  %v8984_v39 = vmul.f32 %v8781_v12, %v8781_v12  ;;  %v8784_v47 = vadd.f32 %v11980_v19, %v8623_v22  ;;  %v11869_v29 = vpop.f32.mrb[20].mxu0 }
 0x524   : > { %v11981_v33 = vpop.f32.mrb[20].mxu1  ;;  %v11870_v52 = vpop.f32.mrb[21].mxu0 }
 0x525   : > { %v9015_v6 = vadd.f32 %v9014_v1, %v8984_v39  ;;  %8884 = vst [vmem:[%s15478_s28 + $0x48] sm:$0xff] %v8784_v47  ;;  %v8947_v54 = vadd.f32 %v8946_v43, %v8784_v47  ;;  %v8985_v34 = vmul.f32 %v8784_v47, %v8784_v47  ;;  %v11871_v2 = vadd.f32 %v11870_v52, %v11869_v29  ;;  %v11982_v16 = vpop.f32.mrb[21].mxu1  ;;  %v11872_v5 = vpop.f32.mrb[22].mxu0 }
 0x526   : > { %v11983_v9 = vadd.f32 %v11982_v16, %v11981_v33  ;;  %v11984_v40 = vpop.f32.mrb[22].mxu1  ;;  %v11873_v51 = vpop.f32.mrb[23].mxu0 }
 0x527   : > { %v9016_v13 = vadd.f32 %v9015_v6, %v8985_v34  ;;  %v8628_v49 = vadd.f32 %v11871_v2, %v15408_v17  ;;  %v11874_v15 = vadd.f32 %v11873_v51, %v11872_v5  ;;  %v11985_v48 = vpop.f32.mrb[23].mxu1 }
 0x528   : > { %v11986_v8 = vadd.f32 %v11985_v48, %v11984_v40 }
 0x529   : > { %v8789_v11 = vadd.f32 %v11983_v9, %v8628_v49  ;;  %v8631_v56 = vadd.f32 %v11874_v15, %v15411_v20 }
 0x52b   : > { %8885 = vst [vmem:[%s15478_s28 + $0x50] sm:$0xff] %v8789_v11  ;;  %v8948_v61 = vadd.f32 %v8947_v54, %v8789_v11  ;;  %v8986_v60 = vmul.f32 %v8789_v11, %v8789_v11  ;;  %v8792_v58 = vadd.f32 %v11986_v8, %v8631_v56  ;;  %v11875_v55 = vpop.f32.mrb[24].mxu0 }
 0x52c   : > { %v11987_v42 = vpop.f32.mrb[24].mxu1  ;;  %v11876_v50 = vpop.f32.mrb[25].mxu0 }
 0x52d   : > { %v9017_v0 = vadd.f32 %v9016_v13, %v8986_v60  ;;  %8886 = vst [vmem:[%s15478_s28 + $0x58] sm:$0xff] %v8792_v58  ;;  %v8949_v32 = vadd.f32 %v8948_v61, %v8792_v58  ;;  %v8987_v27 = vmul.f32 %v8792_v58, %v8792_v58  ;;  %v11877_v30 = vadd.f32 %v11876_v50, %v11875_v55  ;;  %v11988_v17 = vpop.f32.mrb[25].mxu1  ;;  %v11878_v26 = vpop.f32.mrb[26].mxu0 }
 0x52e   : > { %v11989_v44 = vadd.f32 %v11988_v17, %v11987_v42  ;;  %v11990_v46 = vpop.f32.mrb[26].mxu1  ;;  %v11879_v1 = vpop.f32.mrb[27].mxu0 }
 0x52f   : > { %v9018_v20 = vadd.f32 %v9017_v0, %v8987_v27  ;;  %v8636_v37 = vadd.f32 %v11877_v30, %v15414_v21  ;;  %v11880_v62 = vadd.f32 %v11879_v1, %v11878_v26  ;;  %v11991_v28 = vpop.f32.mrb[27].mxu1 }
 0x530   : > { %v11992_v19 = vadd.f32 %v11991_v28, %v11990_v46 }
 0x531   : > { %v8797_v12 = vadd.f32 %v11989_v44, %v8636_v37  ;;  %v8639_v22 = vadd.f32 %v11880_v62, %v15417_v38 }
 0x533   : > { %8887 = vst [vmem:[%s15478_s28 + $0x60] sm:$0xff] %v8797_v12  ;;  %v8950_v43 = vadd.f32 %v8949_v32, %v8797_v12  ;;  %v8988_v39 = vmul.f32 %v8797_v12, %v8797_v12  ;;  %v8800_v47 = vadd.f32 %v11992_v19, %v8639_v22  ;;  %v11881_v29 = vpop.f32.mrb[28].mxu0 }
 0x534   : > { %v11993_v33 = vpop.f32.mrb[28].mxu1  ;;  %v11882_v52 = vpop.f32.mrb[29].mxu0 }
 0x535   : > { %v9019_v6 = vadd.f32 %v9018_v20, %v8988_v39  ;;  %8888 = vst [vmem:[%s15478_s28 + $0x68] sm:$0xff] %v8800_v47  ;;  %v8951_v54 = vadd.f32 %v8950_v43, %v8800_v47  ;;  %v8989_v34 = vmul.f32 %v8800_v47, %v8800_v47  ;;  %v11883_v2 = vadd.f32 %v11882_v52, %v11881_v29  ;;  %v11994_v21 = vpop.f32.mrb[29].mxu1  ;;  %v11884_v16 = vpop.f32.mrb[30].mxu0 }
 0x536   : > { %v11995_v5 = vadd.f32 %v11994_v21, %v11993_v33  ;;  %v11996_v9 = vpop.f32.mrb[30].mxu1  ;;  %v11885_v40 = vpop.f32.mrb[31].mxu0 }
 0x537   : > { %v9020_v38 = vadd.f32 %v9019_v6, %v8989_v34  ;;  %v8644_v51 = vadd.f32 %v11883_v2, %v15420_v57  ;;  %v11886_v13 = vadd.f32 %v11885_v40, %v11884_v16  ;;  %v11997_v49 = vpop.f32.mrb[31].mxu1 }
 0x538   : > { %v11998_v15 = vadd.f32 %v11997_v49, %v11996_v9 }
 0x539   : > { %v8805_v48 = vadd.f32 %v11995_v5, %v8644_v51  ;;  %v8647_v8 = vadd.f32 %v11886_v13, %v15423_v7 }
 0x53b   : > { %8889 = vst [vmem:[%s15478_s28 + $0x70] sm:$0xff] %v8805_v48  ;;  %v8952_v11 = vadd.f32 %v8951_v54, %v8805_v48  ;;  %v8990_v56 = vmul.f32 %v8805_v48, %v8805_v48  ;;  %v8808_v61 = vadd.f32 %v11998_v15, %v8647_v8  ;;  %v11887_v60 = vpop.f32.mrb[32].mxu0 }
 0x53c   : > { %v11999_v58 = vpop.f32.mrb[32].mxu1  ;;  %v11888_v55 = vpop.f32.mrb[33].mxu0 }
 0x53d   : > { %v9021_v42 = vadd.f32 %v9020_v38, %v8990_v56  ;;  %8890 = vst [vmem:[%s15478_s28 + $0x78] sm:$0xff] %v8808_v61  ;;  %v8953_v50 = vadd.f32 %v8952_v11, %v8808_v61  ;;  %v8991_v0 = vmul.f32 %v8808_v61, %v8808_v61  ;;  %v11889_v32 = vadd.f32 %v11888_v55, %v11887_v60  ;;  %v12000_v57 = vpop.f32.mrb[33].mxu1  ;;  %v11890_v27 = vpop.f32.mrb[34].mxu0 }
 0x53e   : > { %v12001_v30 = vadd.f32 %v12000_v57, %v11999_v58  ;;  %v12002_v17 = vpop.f32.mrb[34].mxu1  ;;  %v11891_v26 = vpop.f32.mrb[35].mxu0 }
 0x53f   : > { %v9022_v7 = vadd.f32 %v9021_v42, %v8991_v0  ;;  %v8652_v44 = vadd.f32 %v11889_v32, %v15426_v45  ;;  %v11892_v46 = vadd.f32 %v11891_v26, %v11890_v27  ;;  %v12003_v1 = vpop.f32.mrb[35].mxu1 }
 0x540   : > { %v12004_v20 = vadd.f32 %v12003_v1, %v12002_v17 }
 0x541   : > { %v8813_v37 = vadd.f32 %v12001_v30, %v8652_v44  ;;  %v8655_v62 = vadd.f32 %v11892_v46, %v15429_v4 }
 0x543   : > { %8891 = vst [vmem:[%s15478_s28 + $0x80] sm:$0xff] %v8813_v37  ;;  %v8954_v28 = vadd.f32 %v8953_v50, %v8813_v37  ;;  %v8992_v19 = vmul.f32 %v8813_v37, %v8813_v37  ;;  %v8816_v12 = vadd.f32 %v12004_v20, %v8655_v62  ;;  %v11893_v22 = vpop.f32.mrb[36].mxu0 }
 0x544   : > { %v12005_v43 = vpop.f32.mrb[36].mxu1  ;;  %v11894_v39 = vpop.f32.mrb[37].mxu0 }
 0x545   : > { %v9023_v47 = vadd.f32 %v9022_v7, %v8992_v19  ;;  %8892 = vst [vmem:[%s15478_s28 + $0x88] sm:$0xff] %v8816_v12  ;;  %v8955_v29 = vadd.f32 %v8954_v28, %v8816_v12  ;;  %v8993_v33 = vmul.f32 %v8816_v12, %v8816_v12  ;;  %v11895_v52 = vadd.f32 %v11894_v39, %v11893_v22  ;;  %v12006_v45 = vpop.f32.mrb[37].mxu1  ;;  %v11896_v6 = vpop.f32.mrb[38].mxu0 }
 0x546   : > { %v12007_v54 = vadd.f32 %v12006_v45, %v12005_v43  ;;  %v12008_v34 = vpop.f32.mrb[38].mxu1  ;;  %v11897_v2 = vpop.f32.mrb[39].mxu0 }
 0x547   : > { %v9024_v4 = vadd.f32 %v9023_v47, %v8993_v33  ;;  %v8660_v21 = vadd.f32 %v11895_v52, %v15432_v24  ;;  %v11898_v16 = vadd.f32 %v11897_v2, %v11896_v6  ;;  %v12009_v5 = vpop.f32.mrb[39].mxu1 }
 0x548   : > { %v12010_v9 = vadd.f32 %v12009_v5, %v12008_v34 }
 0x549   : > { %v8821_v40 = vadd.f32 %v12007_v54, %v8660_v21  ;;  %v8663_v38 = vadd.f32 %v11898_v16, %v15435_v3 }
 0x54b   : > { %8893 = vst [vmem:[%s15478_s28 + $0x90] sm:$0xff] %v8821_v40  ;;  %v8956_v51 = vadd.f32 %v8955_v29, %v8821_v40  ;;  %v8994_v13 = vmul.f32 %v8821_v40, %v8821_v40  ;;  %v8824_v49 = vadd.f32 %v12010_v9, %v8663_v38  ;;  %v11899_v15 = vpop.f32.mrb[40].mxu0 }
 0x54c   : > { %v12011_v48 = vpop.f32.mrb[40].mxu1  ;;  %v11900_v8 = vpop.f32.mrb[41].mxu0 }
 0x54d   : > { %v9025_v11 = vadd.f32 %v9024_v4, %v8994_v13  ;;  %8894 = vst [vmem:[%s15478_s28 + $0x98] sm:$0xff] %v8824_v49  ;;  %v8957_v56 = vadd.f32 %v8956_v51, %v8824_v49  ;;  %v8995_v61 = vmul.f32 %v8824_v49, %v8824_v49  ;;  %v11901_v60 = vadd.f32 %v11900_v8, %v11899_v15  ;;  %v12012_v24 = vpop.f32.mrb[41].mxu1  ;;  %v11902_v58 = vpop.f32.mrb[42].mxu0 }
 0x54e   : > { %v12013_v55 = vadd.f32 %v12012_v24, %v12011_v48  ;;  %v12014_v42 = vpop.f32.mrb[42].mxu1  ;;  %v11903_v50 = vpop.f32.mrb[43].mxu0 }
 0x54f   : > { %v9026_v3 = vadd.f32 %v9025_v11, %v8995_v61  ;;  %v8668_v0 = vadd.f32 %v11901_v60, %v15438_v10  ;;  %v11904_v32 = vadd.f32 %v11903_v50, %v11902_v58  ;;  %v12015_v57 = vpop.f32.mrb[43].mxu1 }
 0x550   : > { %v12016_v27 = vadd.f32 %v12015_v57, %v12014_v42 }
 0x551   : > { %v8829_v30 = vadd.f32 %v12013_v55, %v8668_v0  ;;  %v8671_v17 = vadd.f32 %v11904_v32, %v15441_v36 }
 0x553   : > { %8895 = vst [vmem:[%s15478_s28 + $0xa0] sm:$0xff] %v8829_v30  ;;  %v8958_v26 = vadd.f32 %v8957_v56, %v8829_v30  ;;  %v8996_v7 = vmul.f32 %v8829_v30, %v8829_v30  ;;  %v8832_v44 = vadd.f32 %v12016_v27, %v8671_v17  ;;  %v11905_v46 = vpop.f32.mrb[44].mxu0 }
 0x554   : > { %v12017_v1 = vpop.f32.mrb[44].mxu1  ;;  %v11906_v20 = vpop.f32.mrb[45].mxu0 }
 0x555   : > { %v9027_v37 = vadd.f32 %v9026_v3, %v8996_v7  ;;  %8896 = vst [vmem:[%s15478_s28 + $0xa8] sm:$0xff] %v8832_v44  ;;  %v8959_v62 = vadd.f32 %v8958_v26, %v8832_v44  ;;  %v8997_v28 = vmul.f32 %v8832_v44, %v8832_v44  ;;  %v11907_v19 = vadd.f32 %v11906_v20, %v11905_v46  ;;  %v12018_v10 = vpop.f32.mrb[45].mxu1  ;;  %v11908_v12 = vpop.f32.mrb[46].mxu0 }
 0x556   : > { %v12019_v22 = vadd.f32 %v12018_v10, %v12017_v1  ;;  %v12020_v43 = vpop.f32.mrb[46].mxu1  ;;  %v11909_v39 = vpop.f32.mrb[47].mxu0 }
 0x557   : > { %v9028_v36 = vadd.f32 %v9027_v37, %v8997_v28  ;;  %v8676_v47 = vadd.f32 %v11907_v19, %v15444_v41  ;;  %v11910_v29 = vadd.f32 %v11909_v39, %v11908_v12  ;;  %v12021_v33 = vpop.f32.mrb[47].mxu1 }
 0x558   : > { %v12022_v52 = vadd.f32 %v12021_v33, %v12020_v43 }
 0x559   : > { %v8837_v45 = vadd.f32 %v12019_v22, %v8676_v47  ;;  %v8679_v6 = vadd.f32 %v11910_v29, %v15447_v53 }
 0x55b   : > { %8897 = vst [vmem:[%s15478_s28 + $0xb0] sm:$0xff] %v8837_v45  ;;  %v8960_v54 = vadd.f32 %v8959_v62, %v8837_v45  ;;  %v8998_v34 = vmul.f32 %v8837_v45, %v8837_v45  ;;  %v8840_v2 = vadd.f32 %v12022_v52, %v8679_v6  ;;  %v11911_v4 = vpop.f32.mrb[48].mxu0 }
 0x55c   : > { %v12023_v21 = vpop.f32.mrb[48].mxu1  ;;  %v11912_v16 = vpop.f32.mrb[49].mxu0 }
 0x55d   : > { %v9029_v5 = vadd.f32 %v9028_v36, %v8998_v34  ;;  %8898 = vst [vmem:[%s15478_s28 + $0xb8] sm:$0xff] %v8840_v2  ;;  %v8961_v9 = vadd.f32 %v8960_v54, %v8840_v2  ;;  %v8999_v40 = vmul.f32 %v8840_v2, %v8840_v2  ;;  %v11913_v38 = vadd.f32 %v11912_v16, %v11911_v4  ;;  %v12024_v41 = vpop.f32.mrb[49].mxu1  ;;  %v11914_v51 = vpop.f32.mrb[50].mxu0 }
 0x55e   : > { %v12025_v13 = vadd.f32 %v12024_v41, %v12023_v21  ;;  %v12026_v49 = vpop.f32.mrb[50].mxu1  ;;  %v11915_v15 = vpop.f32.mrb[51].mxu0 }
 0x55f   : > { %v9030_v53 = vadd.f32 %v9029_v5, %v8999_v40  ;;  %v8684_v48 = vadd.f32 %v11913_v38, %v15450_v35  ;;  %v11916_v8 = vadd.f32 %v11915_v15, %v11914_v51  ;;  %v12027_v11 = vpop.f32.mrb[51].mxu1 }
 0x560   : > { %v12028_v56 = vadd.f32 %v12027_v11, %v12026_v49 }
 0x561   : > { %v8845_v61 = vadd.f32 %v12025_v13, %v8684_v48  ;;  %v8687_v60 = vadd.f32 %v11916_v8, %v15453_v25 }
 0x563   : > { %8899 = vst [vmem:[%s15478_s28 + $0xc0] sm:$0xff] %v8845_v61  ;;  %v8962_v24 = vadd.f32 %v8961_v9, %v8845_v61  ;;  %v9000_v58 = vmul.f32 %v8845_v61, %v8845_v61  ;;  %v8848_v55 = vadd.f32 %v12028_v56, %v8687_v60  ;;  %v11917_v42 = vpop.f32.mrb[52].mxu0 }
 0x564   : > { %v12029_v50 = vpop.f32.mrb[52].mxu1  ;;  %v11918_v3 = vpop.f32.mrb[53].mxu0 }
 0x565   : > { %v9031_v0 = vadd.f32 %v9030_v53, %v9000_v58  ;;  %8900 = vst [vmem:[%s15478_s28 + $0xc8] sm:$0xff] %v8848_v55  ;;  %v8963_v32 = vadd.f32 %v8962_v24, %v8848_v55  ;;  %v9001_v57 = vmul.f32 %v8848_v55, %v8848_v55  ;;  %v11919_v27 = vadd.f32 %v11918_v3, %v11917_v42  ;;  %v12030_v35 = vpop.f32.mrb[53].mxu1  ;;  %v11920_v30 = vpop.f32.mrb[54].mxu0 }
 0x566   : > { %v12031_v17 = vadd.f32 %v12030_v35, %v12029_v50  ;;  %v12032_v26 = vpop.f32.mrb[54].mxu1  ;;  %v11921_v7 = vpop.f32.mrb[55].mxu0 }
 0x567   : > { %v9032_v25 = vadd.f32 %v9031_v0, %v9001_v57  ;;  %v8692_v44 = vadd.f32 %v11919_v27, %v15456_v14  ;;  %v11922_v46 = vadd.f32 %v11921_v7, %v11920_v30  ;;  %v12033_v1 = vpop.f32.mrb[55].mxu1 }
 0x568   : > { %v12034_v20 = vadd.f32 %v12033_v1, %v12032_v26  ;;  %v9045_v26 = vlaneseq }
 0x569   : > { %v8853_v37 = vadd.f32 %v12031_v17, %v8692_v44  ;;  %v8695_v62 = vadd.f32 %v11922_v46, %v15459_v63 }
 0x56b   : > { %8901 = vst [vmem:[%s15478_s28 + $0xd0] sm:$0xff] %v8853_v37  ;;  %v8964_v28 = vadd.f32 %v8963_v32, %v8853_v37  ;;  %v9002_v19 = vmul.f32 %v8853_v37, %v8853_v37  ;;  %v8856_v10 = vadd.f32 %v12034_v20, %v8695_v62  ;;  %v11923_v12 = vpop.f32.mrb[56].mxu0 }
 0x56c   : > { %v12035_v22 = vpop.f32.mrb[56].mxu1  ;;  %v11924_v43 = vpop.f32.mrb[57].mxu0 }
 0x56d   : > { %v9033_v39 = vadd.f32 %v9032_v25, %v9002_v19  ;;  %8902 = vst [vmem:[%s15478_s28 + $0xd8] sm:$0xff] %v8856_v10  ;;  %v8965_v36 = vadd.f32 %v8964_v28, %v8856_v10  ;;  %v9003_v47 = vmul.f32 %v8856_v10, %v8856_v10  ;;  %v11925_v29 = vadd.f32 %v11924_v43, %v11923_v12  ;;  %v12036_v14 = vpop.f32.mrb[57].mxu1  ;;  %v11926_v33 = vpop.f32.mrb[58].mxu0 }
 0x56e   : > { %v12037_v52 = vadd.f32 %v12036_v14, %v12035_v22  ;;  %v12038_v45 = vpop.f32.mrb[58].mxu1  ;;  %v11927_v6 = vpop.f32.mrb[59].mxu0 }
 0x56f   : > { %v9034_v63 = vadd.f32 %v9033_v39, %v9003_v47  ;;  %v8700_v54 = vadd.f32 %v11925_v29, %v15462_v23  ;;  %v11928_v34 = vadd.f32 %v11927_v6, %v11926_v33  ;;  %v12039_v2 = vpop.f32.mrb[59].mxu1 }
 0x570   : > { %v12040_v4 = vadd.f32 %v12039_v2, %v12038_v45 }
 0x571   : > { %v8861_v21 = vadd.f32 %v12037_v52, %v8700_v54  ;;  %v8703_v16 = vadd.f32 %v11928_v34, %v15465_v59 }
 0x573   : > { %8903 = vst [vmem:[%s15478_s28 + $0xe0] sm:$0xff] %v8861_v21  ;;  %v8966_v5 = vadd.f32 %v8965_v36, %v8861_v21  ;;  %v9004_v9 = vmul.f32 %v8861_v21, %v8861_v21  ;;  %v8864_v40 = vadd.f32 %v12040_v4, %v8703_v16  ;;  %v11929_v38 = vpop.f32.mrb[60].mxu0 }
 0x574   : > { %v12041_v41 = vpop.f32.mrb[60].mxu1  ;;  %v11930_v51 = vpop.f32.mrb[61].mxu0 }
 0x575   : > { %v9035_v13 = vadd.f32 %v9034_v63, %v9004_v9  ;;  %8904 = vst [vmem:[%s15478_s28 + $0xe8] sm:$0xff] %v8864_v40  ;;  %v8967_v49 = vadd.f32 %v8966_v5, %v8864_v40  ;;  %v9005_v15 = vmul.f32 %v8864_v40, %v8864_v40  ;;  %v11931_v53 = vadd.f32 %v11930_v51, %v11929_v38  ;;  %v12042_v23 = vpop.f32.mrb[61].mxu1  ;;  %v11932_v48 = vpop.f32.mrb[62].mxu0 }
 0x576   : > { %v12043_v8 = vadd.f32 %v12042_v23, %v12041_v41  ;;  %v12044_v11 = vpop.f32.mrb[62].mxu1  ;;  %v11933_v56 = vpop.f32.mrb[63].mxu0 }
 0x577   : > { %v9036_v59 = vadd.f32 %v9035_v13, %v9005_v15  ;;  %v8708_v61 = vadd.f32 %v11931_v53, %v15468_v31  ;;  %v11934_v60 = vadd.f32 %v11933_v56, %v11932_v48  ;;  %v12045_v24 = vpop.f32.mrb[63].mxu1 }
 0x578   : > { %v12046_v58 = vadd.f32 %v12045_v24, %v12044_v11 }
 0x579   : > { %v8869_v55 = vadd.f32 %v12043_v8, %v8708_v61  ;;  %v8711_v42 = vadd.f32 %v11934_v60, %v15471_v18  ;;  %v9046_v18 = vshrl.u32 %v9045_v26, 7 }
 0x57b   : > { %8905 = vst [vmem:[%s15478_s28 + $0xf0] sm:$0xff] %v8869_v55  ;;  %v8968_v50 = vadd.f32 %v8967_v49, %v8869_v55  ;;  %v9006_v3 = vmul.f32 %v8869_v55, %v8869_v55  ;;  %v8872_v0 = vadd.f32 %v12046_v58, %v8711_v42  ;;  %vm9047_vm0 = vcmp.eq.s32.totalorder %v9046_v18, 0 }
 0x57c   : > { %vm9049_vm1 = vcmp.eq.s32.totalorder %v9046_v18, 1 }
 0x57d   : > { %v9037_v32 = vadd.f32 %v9036_v59, %v9006_v3  ;;  %8906 = vst [vmem:[%s15478_s28 + $0xf8] sm:$0xff] %v8872_v0  ;;  %v8969_v57 = vadd.f32 %v8968_v50, %v8872_v0  ;;  %v9007_v27 = vmul.f32 %v8872_v0, %v8872_v0 }
 0x57f   : > { %v8970_v35 = vrot.slane %v8969_v57, 4  ;;  %v9038_v30 = vadd.f32 %v9037_v32, %v9007_v27 }
 0x581   : > { %v8971_v17 = vadd.f32 %v8970_v35, %v8969_v57  ;;  %v9039_v31 = vrot.slane %v9038_v30, 4 }
 0x583   : > { %v8972_v7 = vrot.slane %v8971_v17, 2  ;;  %v9040_v25 = vadd.f32 %v9039_v31, %v9038_v30 }
 0x585   : > { %v8973_v44 = vadd.f32 %v8972_v7, %v8971_v17  ;;  %v9041_v46 = vrot.slane %v9040_v25, 2 }
 0x587   : > { %v8974_v1 = vrot.slane %v8973_v44, 1  ;;  %v9042_v20 = vadd.f32 %v9041_v46, %v9040_v25 }
 0x589   : > { %v8975_v37 = vadd.f32 %v8974_v1, %v8973_v44  ;;  %v9043_v62 = vrot.slane %v9042_v20, 1 }
 0x58b   : > { %v9044_v28 = vadd.f32 %v9043_v62, %v9042_v20  ;;  %v9048_v19 = vsel %vm9047_vm0, %v8975_v37, 0.0 }
 0x58d   : > { %v9050_v10 = vsel %vm9049_vm1, %v9044_v28, 0.0 }
 0x58e   : > { %v9051_v12 = vadd.f32 %v9050_v10, %v9048_v19 }
 0x590   : > { %9052 = vst [vmem:[%s215_s4] sm:$0xff] %v9051_v12 }
 0x591 PF: > { %s14_s14 = sadd.s32 1, %s13246_s14   ;;  %s15561_s12 = smov %s13242_s13 }
 0x592   : > { %p11_p6 = scmp.ge.s32.totalorder %s14_s14, 4   ;;  %s15562_s13 = smov %s15564_s15 }
 0x594   :  { %13 = sbr.rel (!%p11_p6) target bundleno = 2 (0x2), region = 70 }

</bundles_post_ra>
